<compile_context>
chip_gen: v6e
topology: v6e:2x2x1
jax: 0.10.0
libtpu: 0.0.40
codegen_flags: <defaults>
</compile_context>

<pallas_src>
import functools

import jax
import jax.numpy as jnp
import numpy as np
from jax import lax
from jax.experimental import pallas as pl
from jax.experimental.pallas import tpu as pltpu


def _round_up(v, m):
    return ((v + m - 1) // m) * m


def _pick_c_chunk(C):
    # Largest "nice" channel chunk that divides C (keeps weight tiles lane-dense).
    for ck in (512, 256, 128):
        if C >= ck and C % ck == 0:
            return ck
    return C


def _tail_kernel(x_ref, w_ref, b_ref, o_ref, acc_ref, *, inv_hw):
    # x_ref  : (TB, CK, HW)  activation tile, NCHW layout (HW on lanes), bf16
    # w_ref  : (Np, CK)      fc weight chunk, PyTorch [out, in] layout, bf16
    # b_ref  : (1, Np)       fc bias, f32, lane-padded
    # o_ref  : (TB, Np)      output tile, f32 (lane-dense stores)
    # acc_ref: (TB, Np)      f32 VMEM accumulator across C chunks
    k = pl.program_id(1)

    @pl.when(k == 0)
    def _():
        acc_ref[...] = jnp.zeros_like(acc_ref)

    # AdaptiveAvgPool2d((1,1)) == mean over spatial positions (the lane axis here).
    # f32 accumulation without an explicit full-tile astype of the bf16 input.
    pooled = jnp.sum(x_ref[...], axis=2, dtype=jnp.float32) * inv_hw      # (TB, CK)

    # Dropout(p=0.5) is identity in eval/inference mode.
    # fc partial product: pooled @ W_chunk^T on the MXU (bf16 in, f32 accumulate),
    # contracted directly against the [N, C]-layout weight (trans_b) -- no
    # per-call weight transpose anywhere.
    acc_ref[...] += lax.dot_general(
        pooled.astype(w_ref.dtype), w_ref[...],
        dimension_numbers=(((1,), (1,)), ((), ())),
        preferred_element_type=jnp.float32,
    )

    @pl.when(k == pl.num_programs(1) - 1)
    def _():
        o_ref[...] = acc_ref[...] + b_ref[...]      # bias broadcast over batch tile


def inception_v3_cutted_forward(x_nchw, fc_weight, fc_bias, *, batch_tile=32):
    """x_nchw: [B, C, H, W]; fc_weight: [N, C] (PyTorch layout); fc_bias: [N]."""
    B, C, H, W = x_nchw.shape
    N = fc_weight.shape[0]
    HW = H * W

    # ---- dtypes --------------------------------------------------------------
    # bf16 activations halve the dominant HBM traffic.  In a real deployment the
    # Mixed_7c producer should emit bf16 so this cast fuses away upstream.
    x = x_nchw.reshape(B, C, HW)                    # metadata-only reshape; NCHW kept
    if x.dtype == jnp.float32:
        x = x.astype(jnp.bfloat16)
    w = fc_weight.astype(jnp.bfloat16)              # [N, C]; no transpose, no f32 copy
    b = fc_bias.astype(jnp.float32)

    # ---- tiling --------------------------------------------------------------
    Np = _round_up(N, 128)                          # lane-dense output / MXU tiles
    TB = max(8, min(_round_up(batch_tile, 8), _round_up(B, 8)))

    # Few batch tiles => nothing for the batch axis to pipeline; chunk C instead
    # (restores DMA/compute overlap at small inference batches and shrinks the
    # per-step VMEM footprint).  With many batch tiles, keep the full C so the
    # weight stays a constant resident block (DMA'd once per call).
    CK = _pick_c_chunk(C) if (_round_up(B, TB) // TB) <= 2 else C

    lane_hw = _round_up(HW, 128)                    # lane padding of the HW axis
    x_item = x.dtype.itemsize
    w_item = w.dtype.itemsize

    def _vmem_needed(tb):
        return (2 * tb * CK * lane_hw * x_item      # double-buffered x tiles
                + tb * CK * lane_hw * 4             # f32 convert temp in the reduce
                + 2 * Np * max(CK, 128) * w_item    # weight buffers
                + 2 * 8 * Np * 4                    # bias buffers (sublane-padded)
                + 2 * tb * Np * 4                   # output buffers
                + tb * Np * 4)                      # f32 accumulator scratch

    VMEM_CAP = 48 << 20                             # v7x-safe (64 MiB physical)
    while TB > 8 and _vmem_needed(TB) * 2 > VMEM_CAP:
        TB = max(8, ((TB // 2) + 7) // 8 * 8)
    vmem_limit = int(min(max(_vmem_needed(TB) * 2, 4 << 20), VMEM_CAP))

    # ---- padding -------------------------------------------------------------
    Bp = _round_up(B, TB)
    if Bp != B:
        x = jnp.pad(x, ((0, Bp - B), (0, 0), (0, 0)))
    if Np != N:
        w = jnp.pad(w, ((0, Np - N), (0, 0)))
        b = jnp.pad(b, ((0, Np - N),))
    b = b.reshape(1, Np)

    grid = (Bp // TB, C // CK)

    cost = pl.CostEstimate(
        flops=2 * Bp * C * Np + Bp * C * HW,
        transcendentals=0,
        bytes_accessed=(x.size * x_item + w.size * w_item + b.size * 4
                        + Bp * Np * 4),
    )

    out = pl.pallas_call(
        functools.partial(_tail_kernel, inv_hw=1.0 / HW),
        out_shape=jax.ShapeDtypeStruct((Bp, Np), jnp.float32),
        grid=grid,
        in_specs=[
            pl.BlockSpec((TB, CK, HW), lambda i, k: (i, k, 0)),  # pipelined act tiles
            pl.BlockSpec((Np, CK), lambda i, k: (0, k)),         # weight chunk
            pl.BlockSpec((1, Np), lambda i, k: (0, 0)),          # bias: constant block
        ],
        out_specs=pl.BlockSpec((TB, Np), lambda i, k: (i, 0)),   # resident across k
        scratch_shapes=[pltpu.VMEM((TB, Np), jnp.float32)],
        compiler_params=pltpu.CompilerParams(
            dimension_semantics=("parallel", "arbitrary"),  # batch shards on v7x TCs
            vmem_limit_bytes=vmem_limit,
        ),
        cost_estimate=cost,
    )(x, w, b)

    return out[:B, :N]


if __name__ == "__main__":
    # Small, module-consistent shapes (real inception tail: C=2048, H=W=8, N=1000).
    # C=1024 exercises the C-chunked accumulation path (2 chunks of 512).
    B, C, H, W = 2, 1024, 4, 4
    NUM_CLASSES = 16

    key = jax.random.PRNGKey(0)
    kx, kw, kb = jax.random.split(key, 3)
    x = jax.random.normal(kx, (B, C, H, W), dtype=jnp.float32)
    # PyTorch Linear stores weight as [out_features, in_features].
    fc_w = jax.random.normal(kw, (NUM_CLASSES, C), dtype=jnp.float32) * 0.05
    fc_b = jax.random.normal(kb, (NUM_CLASSES,), dtype=jnp.float32) * 0.05

    out = inception_v3_cutted_forward(x, fc_w, fc_b)
    out = jax.block_until_ready(out)
    assert out.shape == (B, NUM_CLASSES)

    # Pure-JAX f32 reference of the same cut forward pass (avgpool -> flatten -> fc).
    pooled_f32 = jnp.mean(x, axis=(2, 3))
    ref_f32 = pooled_f32 @ fc_w.T + fc_b
    # Kernel runs activations/weight in bf16 (f32 accumulation), so logits differ
    # from the f32 reference at the bf16 level.
    np.testing.assert_allclose(np.asarray(out), np.asarray(ref_f32),
                               rtol=5e-2, atol=5e-2)

    # Quantization-aware reference (same bf16 rounding of x, pooled, W; f32 accum):
    # verifies the kernel math (pool -> flatten -> fc) essentially exactly.
    xq = x.astype(jnp.bfloat16).astype(jnp.float32)
    wq = fc_w.astype(jnp.bfloat16).astype(jnp.float32)
    pooled_q = jnp.mean(xq, axis=(2, 3)).astype(jnp.bfloat16).astype(jnp.float32)
    ref_q = pooled_q @ wq.T + fc_b
    np.testing.assert_allclose(np.asarray(out), np.asarray(ref_q),
                               rtol=5e-3, atol=5e-3)

    print("KERNEL_OK")
</pallas_src>

<mosaic_0001>
module attributes {stable_mosaic.version = 11 : i64} {
  func.func @_tail_kernel(%arg0: i32, %arg1: i32, %arg2: memref<8x512x16xbf16, #tpu.memory_space<vmem>>, %arg3: memref<128x512xbf16, #tpu.memory_space<vmem>>, %arg4: memref<1x128xf32, #tpu.memory_space<vmem>>, %arg5: memref<8x128xf32, #tpu.memory_space<vmem>>, %arg6: memref<8x128xf32, #tpu.memory_space<vmem>>) attributes {dimension_semantics = [#tpu.dimension_semantics<parallel>, #tpu.dimension_semantics<arbitrary>], iteration_bounds = array<i64: 1, 2>, scalar_prefetch = 0 : i64, scratch_operands = 1 : i64, tpu.core_type = #tpu.core_type<tc>, window_params = [{transform_indices = @transform_0, window_bounds = array<i64: 8, 512, 16>}, {transform_indices = @transform_1, window_bounds = array<i64: 128, 512>}, {pipeline_mode = #tpu.pipeline_mode<synchronous>, transform_indices = @transform_2, window_bounds = array<i64: 1, 128>}, {transform_indices = @transform_3, window_bounds = array<i64: 8, 128>}]} {
    %c0_i32 = arith.constant 0 : i32
    %0 = arith.cmpi eq, %arg1, %c0_i32 : i32
    %1 = arith.extui %0 : i1 to i32
    %c0_i32_0 = arith.constant 0 : i32
    %2 = arith.cmpi ne, %1, %c0_i32_0 : i32
    scf.if %2 {
      %cst_12 = arith.constant 0.000000e+00 : f32
      %17 = vector.broadcast %cst_12 : f32 to vector<8x128xf32>
      %c0_13 = arith.constant 0 : index
      %c0_14 = arith.constant 0 : index
      %18 = vector.load %arg6[%c0_13, %c0_14] : memref<8x128xf32, #tpu.memory_space<vmem>>, vector<8x128xf32>
      tpu.vector_store %arg6[%c0_13, %c0_14], %17 {strides = array<i32>} : memref<8x128xf32, #tpu.memory_space<vmem>>, vector<8x128xf32>,
    } else {
    }
    %c0 = arith.constant 0 : index
    %c0_1 = arith.constant 0 : index
    %c0_2 = arith.constant 0 : index
    %3 = vector.load %arg2[%c0, %c0_1, %c0_2] : memref<8x512x16xbf16, #tpu.memory_space<vmem>>, vector<8x512x16xbf16>
    %4 = arith.extf %3 : vector<8x512x16xbf16> to vector<8x512x16xf32>
    %cst = arith.constant dense<0.000000e+00> : vector<8x512xf32>
    %5 = vector.multi_reduction <add>, %4, %cst [2] : vector<8x512x16xf32> to vector<8x512xf32>
    %cst_3 = arith.constant 6.250000e-02 : f32
    %6 = vector.broadcast %cst_3 : f32 to vector<8x512xf32>
    %7 = arith.mulf %5, %6 : vector<8x512xf32>
    %c0_4 = arith.constant 0 : index
    %c0_5 = arith.constant 0 : index
    %8 = vector.load %arg6[%c0_4, %c0_5] : memref<8x128xf32, #tpu.memory_space<vmem>>, vector<8x128xf32>
    %9 = arith.truncf %7 : vector<8x512xf32> to vector<8x512xbf16>
    %c0_6 = arith.constant 0 : index
    %c0_7 = arith.constant 0 : index
    %10 = vector.load %arg3[%c0_6, %c0_7] : memref<128x512xbf16, #tpu.memory_space<vmem>>, vector<128x512xbf16>
    %cst_8 = arith.constant dense<0.000000e+00> : vector<8x128xf32>
    %11 = tpu.matmul %9, %10, %cst_8 {dimension_numbers = #tpu.dot_dimension_numbers<[1], [1], [0], [0], [0, 0, 1, 0], [], []>} : vector<8x512xbf16>, vector<128x512xbf16>, vector<8x128xf32> -> vector<8x128xf32>
    %12 = arith.addf %8, %11 : vector<8x128xf32>
    %c0_9 = arith.constant 0 : index
    %c0_10 = arith.constant 0 : index
    %13 = vector.load %arg6[%c0_9, %c0_10] : memref<8x128xf32, #tpu.memory_space<vmem>>, vector<8x128xf32>
    tpu.vector_store %arg6[%c0_9, %c0_10], %12 {strides = array<i32>} : memref<8x128xf32, #tpu.memory_space<vmem>>, vector<8x128xf32>,
    %c1_i32 = arith.constant 1 : i32
    %14 = arith.cmpi eq, %arg1, %c1_i32 : i32
    %15 = arith.extui %14 : i1 to i32
    %c0_i32_11 = arith.constant 0 : i32
    %16 = arith.cmpi ne, %15, %c0_i32_11 : i32
    scf.if %16 {
      %c0_12 = arith.constant 0 : index
      %c0_13 = arith.constant 0 : index
      %17 = vector.load %arg6[%c0_12, %c0_13] : memref<8x128xf32, #tpu.memory_space<vmem>>, vector<8x128xf32>
      %c0_14 = arith.constant 0 : index
      %c0_15 = arith.constant 0 : index
      %18 = vector.load %arg4[%c0_14, %c0_15] : memref<1x128xf32, #tpu.memory_space<vmem>>, vector<1x128xf32>
      %19 = vector.broadcast %18 : vector<1x128xf32> to vector<8x128xf32>
      %20 = arith.addf %17, %19 : vector<8x128xf32>
      %c0_16 = arith.constant 0 : index
      %c0_17 = arith.constant 0 : index
      %21 = vector.load %arg5[%c0_16, %c0_17] : memref<8x128xf32, #tpu.memory_space<vmem>>, vector<8x128xf32>
      tpu.vector_store %arg5[%c0_16, %c0_17], %20 {strides = array<i32>} : memref<8x128xf32, #tpu.memory_space<vmem>>, vector<8x128xf32>,
    } else {
    }
    return
  }
  func.func @transform_0(%arg0: i32, %arg1: i32) -> (i32, i32, i32) {
    %c0_i32 = arith.constant 0 : i32
    %c0_i32_0 = arith.constant 0 : i32
    return %arg0, %arg1, %c0_i32 : i32, i32, i32
  }
  func.func @transform_1(%arg0: i32, %arg1: i32) -> (i32, i32) {
    %c0_i32 = arith.constant 0 : i32
    %c0_i32_0 = arith.constant 0 : i32
    return %c0_i32, %arg1 : i32, i32
  }
  func.func @transform_2(%arg0: i32, %arg1: i32) -> (i32, i32) {
    %c0_i32 = arith.constant 0 : i32
    %c0_i32_0 = arith.constant 0 : i32
    %c0_i32_1 = arith.constant 0 : i32
    return %c0_i32, %c0_i32_0 : i32, i32
  }
  func.func @transform_3(%arg0: i32, %arg1: i32) -> (i32, i32) {
    %c0_i32 = arith.constant 0 : i32
    %c0_i32_0 = arith.constant 0 : i32
    return %arg0, %c0_i32 : i32, i32
  }
}

</mosaic_0001>

<bundles_post_ra>
// kernel: tpu_custom_call.1
= control target key start
LH: loop header
LB: loop body
LE: loop exit
PB: predicated region body
PF: predicated region fallthrough
CT: control target
= control target key end

     0   :  { %8 = vsyncpa [#allocation6], 0  ;;  %s13057_s12 = smov 0   ;;  %s13059_s13 = smov 0   ;;  %s15901_s0 = inlined_call_operand.vmem [shape: bf16[8,1024,16], index: 0, kind: input, shape index: {}]   ;;  %s15902_s1 = inlined_call_operand.vmem [shape: bf16[128,1024], index: 1, kind: input, shape index: {}]   ;;  %s15903_s2 = inlined_call_operand.vmem [shape: f32[1,128], index: 2, kind: input, shape index: {}]   ;;  %s15904_s3 = inlined_call_operand.hbm [shape: f32[8,128], index: 3, kind: output, shape index: {}]  }
   0x1   :  { %s13061_s14 = smov 0   ;;  %s13063_s15 = smov 0  }
   0x2   :  { %s13065_s16 = smov 0  }
   0x3 LB: > { %s11539_s17 = sadd.s32 4294967295, %s13033_s16   ;;  %s23_s18 = sadd.s32 1, %s13029_s15  ;;  %s13033_s16 = sphi %s13065_s16, %s14_s16   ;;  %s13029_s15 = sphi %s13063_s15, %s15959_s15   ;;  %s13025_s14 = sphi %s13061_s14, %s15958_s14   ;;  %s13021_s13 = sphi %s13059_s13, %s15957_s13   ;;  %s13017_s12 = sphi %s13057_s12, %s15956_s12  }
   0x4   : > { %p24_p0 = scmp.ge.s32.totalorder %s23_s18, 2  ;;  %p42_p1 = scmp.ne.s32.totalorder %s13021_s13, %s13017_s12 }
   0x5   : > { %p43_p2 = scmp.eq.s32.totalorder %s13033_s16, 0  ;;  %s35_s21 = sadd.s32 1, %s13021_s13 }
   0x6   : > { %s15961_s18 = smov (%p24_p0, %s23_s18), 0  ;;  %p11541_p5 = scmp.ge.s32.totalorder %s13033_s16, 2 }
   0x7   : > { %p13089_p3 = por %p43_p2, %p42_p1  ;;  %s31_s20 = ssub.s32 %s13029_s15, %s15961_s18 }
   0x8   : > { %p33_p4 = scmp.eq.s32.totalorder %s31_s20, 0  ;;  %144 = sbr.rel (%p11541_p5) target bundleno = 165 (0xa5), region = 20 }
   0xa   : > { %s13097_s22 = scalar_select %p33_p4, %s13021_s13, %s35_s21  }
   0xd   : > { %147 = sbr.rel (!%p13089_p3) target bundleno = 145 (0x91), region = 24  ;;  %s149_s23 = sand.u32 (%p13089_p3), 1, %s13021_s13  }
   0xe   : > { %s11590_s24 = sshll.u32 (%p13089_p3), %s13029_s15, 8  ;;  %s11542_s25 = sshll.u32 (%p13089_p3), %s149_s23, 11 }
   0xf   : > { %s13107_s28 = scalar_lea.vmem (%p13089_p3), %s15901_s0, %s11590_s24  ;;  %s13112_s29 = scalar_lea.vmem (%p13089_p3), [#allocation3], %s11542_s25 }
  0x10   : > { %v174_v0 = vld [vmem:[%s13107_s28] sm:$0xff] (%p13089_p3)   ;;  %v178_v1 = vld [vmem:[%s13107_s28 + $0x8] sm:$0xff] (%p13089_p3)   ;;  %v182_v2 = vld [vmem:[%s13107_s28 + $0x10] sm:$0xff] (%p13089_p3)  }
  0x11   : > { %175 = vst [vmem:[%s13112_s29] sm:$0xff] (%p13089_p3), %v174_v0   ;;  %179 = vst [vmem:[%s13112_s29 + $0x8] sm:$0xff] (%p13089_p3), %v178_v1   ;;  %v186_v3 = vld [vmem:[%s13107_s28 + $0x18] sm:$0xff] (%p13089_p3)   ;;  %v190_v4 = vld [vmem:[%s13107_s28 + $0x20] sm:$0xff] (%p13089_p3)  }
  0x12   : > { %183 = vst [vmem:[%s13112_s29 + $0x10] sm:$0xff] %v182_v2   ;;  %v194_v5 = vld [vmem:[%s13107_s28 + $0x28] sm:$0xff]   ;;  %187 = vst [vmem:[%s13112_s29 + $0x18] sm:$0xff] %v186_v3   ;;  %v198_v6 = vld [vmem:[%s13107_s28 + $0x30] sm:$0xff]  }
  0x13   : > { %191 = vst [vmem:[%s13112_s29 + $0x20] sm:$0xff] %v190_v4   ;;  %195 = vst [vmem:[%s13112_s29 + $0x28] sm:$0xff] %v194_v5   ;;  %v202_v7 = vld [vmem:[%s13107_s28 + $0x38] sm:$0xff]   ;;  %v206_v8 = vld [vmem:[%s13107_s28 + $0x40] sm:$0xff]  }
  0x14   : > { %199 = vst [vmem:[%s13112_s29 + $0x30] sm:$0xff] %v198_v6   ;;  %203 = vst [vmem:[%s13112_s29 + $0x38] sm:$0xff] %v202_v7   ;;  %v210_v9 = vld [vmem:[%s13107_s28 + $0x48] sm:$0xff]   ;;  %v214_v10 = vld [vmem:[%s13107_s28 + $0x50] sm:$0xff]  }
  0x15   : > { %207 = vst [vmem:[%s13112_s29 + $0x40] sm:$0xff] %v206_v8   ;;  %v218_v11 = vld [vmem:[%s13107_s28 + $0x58] sm:$0xff]   ;;  %211 = vst [vmem:[%s13112_s29 + $0x48] sm:$0xff] %v210_v9   ;;  %v222_v12 = vld [vmem:[%s13107_s28 + $0x60] sm:$0xff]  }
  0x16   : > { %215 = vst [vmem:[%s13112_s29 + $0x50] sm:$0xff] %v214_v10   ;;  %219 = vst [vmem:[%s13112_s29 + $0x58] sm:$0xff] %v218_v11   ;;  %v226_v13 = vld [vmem:[%s13107_s28 + $0x68] sm:$0xff]   ;;  %v230_v14 = vld [vmem:[%s13107_s28 + $0x70] sm:$0xff]  }
  0x17   : > { %223 = vst [vmem:[%s13112_s29 + $0x60] sm:$0xff] %v222_v12   ;;  %227 = vst [vmem:[%s13112_s29 + $0x68] sm:$0xff] %v226_v13   ;;  %v234_v15 = vld [vmem:[%s13107_s28 + $0x78] sm:$0xff]   ;;  %v238_v16 = vld [vmem:[%s13107_s28 + $0x80] sm:$0xff]  }
  0x18   : > { %231 = vst [vmem:[%s13112_s29 + $0x70] sm:$0xff] %v230_v14   ;;  %v242_v17 = vld [vmem:[%s13107_s28 + $0x88] sm:$0xff]   ;;  %235 = vst [vmem:[%s13112_s29 + $0x78] sm:$0xff] %v234_v15   ;;  %v246_v18 = vld [vmem:[%s13107_s28 + $0x90] sm:$0xff]  }
  0x19   : > { %239 = vst [vmem:[%s13112_s29 + $0x80] sm:$0xff] %v238_v16   ;;  %243 = vst [vmem:[%s13112_s29 + $0x88] sm:$0xff] %v242_v17   ;;  %v250_v19 = vld [vmem:[%s13107_s28 + $0x98] sm:$0xff]   ;;  %v254_v20 = vld [vmem:[%s13107_s28 + $0xa0] sm:$0xff]  }
  0x1a   : > { %247 = vst [vmem:[%s13112_s29 + $0x90] sm:$0xff] %v246_v18   ;;  %251 = vst [vmem:[%s13112_s29 + $0x98] sm:$0xff] %v250_v19   ;;  %v258_v21 = vld [vmem:[%s13107_s28 + $0xa8] sm:$0xff]   ;;  %v262_v22 = vld [vmem:[%s13107_s28 + $0xb0] sm:$0xff]  }
  0x1b   : > { %255 = vst [vmem:[%s13112_s29 + $0xa0] sm:$0xff] %v254_v20   ;;  %v266_v23 = vld [vmem:[%s13107_s28 + $0xb8] sm:$0xff]   ;;  %259 = vst [vmem:[%s13112_s29 + $0xa8] sm:$0xff] %v258_v21   ;;  %v270_v24 = vld [vmem:[%s13107_s28 + $0xc0] sm:$0xff]  }
  0x1c   : > { %263 = vst [vmem:[%s13112_s29 + $0xb0] sm:$0xff] %v262_v22   ;;  %267 = vst [vmem:[%s13112_s29 + $0xb8] sm:$0xff] %v266_v23   ;;  %v274_v25 = vld [vmem:[%s13107_s28 + $0xc8] sm:$0xff]   ;;  %v278_v26 = vld [vmem:[%s13107_s28 + $0xd0] sm:$0xff]  }
  0x1d   : > { %271 = vst [vmem:[%s13112_s29 + $0xc0] sm:$0xff] %v270_v24   ;;  %275 = vst [vmem:[%s13112_s29 + $0xc8] sm:$0xff] %v274_v25   ;;  %v282_v27 = vld [vmem:[%s13107_s28 + $0xd8] sm:$0xff]   ;;  %v286_v28 = vld [vmem:[%s13107_s28 + $0xe0] sm:$0xff]  }
  0x1e   : > { %279 = vst [vmem:[%s13112_s29 + $0xd0] sm:$0xff] %v278_v26   ;;  %v290_v29 = vld [vmem:[%s13107_s28 + $0xe8] sm:$0xff]   ;;  %283 = vst [vmem:[%s13112_s29 + $0xd8] sm:$0xff] %v282_v27   ;;  %v294_v30 = vld [vmem:[%s13107_s28 + $0xf0] sm:$0xff]  }
  0x1f   : > { %287 = vst [vmem:[%s13112_s29 + $0xe0] sm:$0xff] %v286_v28   ;;  %291 = vst [vmem:[%s13112_s29 + $0xe8] sm:$0xff] %v290_v29   ;;  %v298_v31 = vld [vmem:[%s13107_s28 + $0xf8] sm:$0xff]   ;;  %v302_v32 = vld [vmem:[%s13107_s28 + $0x200] sm:$0xff]  }
  0x20   : > { %295 = vst [vmem:[%s13112_s29 + $0xf0] sm:$0xff] %v294_v30   ;;  %299 = vst [vmem:[%s13112_s29 + $0xf8] sm:$0xff] %v298_v31   ;;  %v306_v33 = vld [vmem:[%s13107_s28 + $0x208] sm:$0xff]   ;;  %v310_v34 = vld [vmem:[%s13107_s28 + $0x210] sm:$0xff]  }
  0x21   : > { %303 = vst [vmem:[%s13112_s29 + $0x100] sm:$0xff] %v302_v32   ;;  %v314_v35 = vld [vmem:[%s13107_s28 + $0x218] sm:$0xff]   ;;  %307 = vst [vmem:[%s13112_s29 + $0x108] sm:$0xff] %v306_v33   ;;  %v318_v36 = vld [vmem:[%s13107_s28 + $0x220] sm:$0xff]  }
  0x22   : > { %311 = vst [vmem:[%s13112_s29 + $0x110] sm:$0xff] %v310_v34   ;;  %315 = vst [vmem:[%s13112_s29 + $0x118] sm:$0xff] %v314_v35   ;;  %v322_v37 = vld [vmem:[%s13107_s28 + $0x228] sm:$0xff]   ;;  %v326_v38 = vld [vmem:[%s13107_s28 + $0x230] sm:$0xff]  }
  0x23   : > { %319 = vst [vmem:[%s13112_s29 + $0x120] sm:$0xff] %v318_v36   ;;  %323 = vst [vmem:[%s13112_s29 + $0x128] sm:$0xff] %v322_v37   ;;  %v330_v39 = vld [vmem:[%s13107_s28 + $0x238] sm:$0xff]   ;;  %v334_v40 = vld [vmem:[%s13107_s28 + $0x240] sm:$0xff]  }
  0x24   : > { %327 = vst [vmem:[%s13112_s29 + $0x130] sm:$0xff] %v326_v38   ;;  %v338_v41 = vld [vmem:[%s13107_s28 + $0x248] sm:$0xff]   ;;  %331 = vst [vmem:[%s13112_s29 + $0x138] sm:$0xff] %v330_v39   ;;  %v342_v42 = vld [vmem:[%s13107_s28 + $0x250] sm:$0xff]  }
  0x25   : > { %335 = vst [vmem:[%s13112_s29 + $0x140] sm:$0xff] %v334_v40   ;;  %339 = vst [vmem:[%s13112_s29 + $0x148] sm:$0xff] %v338_v41   ;;  %v346_v43 = vld [vmem:[%s13107_s28 + $0x258] sm:$0xff]   ;;  %v350_v44 = vld [vmem:[%s13107_s28 + $0x260] sm:$0xff]  }
  0x26   : > { %343 = vst [vmem:[%s13112_s29 + $0x150] sm:$0xff] %v342_v42   ;;  %347 = vst [vmem:[%s13112_s29 + $0x158] sm:$0xff] %v346_v43   ;;  %v354_v45 = vld [vmem:[%s13107_s28 + $0x268] sm:$0xff]   ;;  %v358_v46 = vld [vmem:[%s13107_s28 + $0x270] sm:$0xff]  }
  0x27   : > { %351 = vst [vmem:[%s13112_s29 + $0x160] sm:$0xff] %v350_v44   ;;  %v362_v47 = vld [vmem:[%s13107_s28 + $0x278] sm:$0xff]   ;;  %355 = vst [vmem:[%s13112_s29 + $0x168] sm:$0xff] %v354_v45   ;;  %v366_v48 = vld [vmem:[%s13107_s28 + $0x280] sm:$0xff]  }
  0x28   : > { %359 = vst [vmem:[%s13112_s29 + $0x170] sm:$0xff] %v358_v46   ;;  %363 = vst [vmem:[%s13112_s29 + $0x178] sm:$0xff] %v362_v47   ;;  %v370_v49 = vld [vmem:[%s13107_s28 + $0x288] sm:$0xff]   ;;  %v374_v50 = vld [vmem:[%s13107_s28 + $0x290] sm:$0xff]  }
  0x29   : > { %367 = vst [vmem:[%s13112_s29 + $0x180] sm:$0xff] %v366_v48   ;;  %371 = vst [vmem:[%s13112_s29 + $0x188] sm:$0xff] %v370_v49   ;;  %v378_v51 = vld [vmem:[%s13107_s28 + $0x298] sm:$0xff]   ;;  %v382_v52 = vld [vmem:[%s13107_s28 + $0x2a0] sm:$0xff]  }
  0x2a   : > { %375 = vst [vmem:[%s13112_s29 + $0x190] sm:$0xff] %v374_v50   ;;  %v386_v53 = vld [vmem:[%s13107_s28 + $0x2a8] sm:$0xff]   ;;  %379 = vst [vmem:[%s13112_s29 + $0x198] sm:$0xff] %v378_v51   ;;  %v390_v54 = vld [vmem:[%s13107_s28 + $0x2b0] sm:$0xff]  }
  0x2b   : > { %383 = vst [vmem:[%s13112_s29 + $0x1a0] sm:$0xff] %v382_v52   ;;  %387 = vst [vmem:[%s13112_s29 + $0x1a8] sm:$0xff] %v386_v53   ;;  %v394_v55 = vld [vmem:[%s13107_s28 + $0x2b8] sm:$0xff]   ;;  %v398_v56 = vld [vmem:[%s13107_s28 + $0x2c0] sm:$0xff]  }
  0x2c   : > { %391 = vst [vmem:[%s13112_s29 + $0x1b0] sm:$0xff] %v390_v54   ;;  %395 = vst [vmem:[%s13112_s29 + $0x1b8] sm:$0xff] %v394_v55   ;;  %v402_v57 = vld [vmem:[%s13107_s28 + $0x2c8] sm:$0xff]   ;;  %v406_v58 = vld [vmem:[%s13107_s28 + $0x2d0] sm:$0xff]  }
  0x2d   : > { %399 = vst [vmem:[%s13112_s29 + $0x1c0] sm:$0xff] %v398_v56   ;;  %v410_v59 = vld [vmem:[%s13107_s28 + $0x2d8] sm:$0xff]   ;;  %403 = vst [vmem:[%s13112_s29 + $0x1c8] sm:$0xff] %v402_v57   ;;  %v414_v60 = vld [vmem:[%s13107_s28 + $0x2e0] sm:$0xff]  }
  0x2e   : > { %407 = vst [vmem:[%s13112_s29 + $0x1d0] sm:$0xff] %v406_v58   ;;  %411 = vst [vmem:[%s13112_s29 + $0x1d8] sm:$0xff] %v410_v59   ;;  %v418_v61 = vld [vmem:[%s13107_s28 + $0x2e8] sm:$0xff]   ;;  %v422_v62 = vld [vmem:[%s13107_s28 + $0x2f0] sm:$0xff]  }
  0x2f   : > { %415 = vst [vmem:[%s13112_s29 + $0x1e0] sm:$0xff] %v414_v60   ;;  %419 = vst [vmem:[%s13112_s29 + $0x1e8] sm:$0xff] %v418_v61   ;;  %v426_v63 = vld [vmem:[%s13107_s28 + $0x2f8] sm:$0xff]   ;;  %v430_v0 = vld [vmem:[%s13107_s28 + $0x400] sm:$0xff]  }
  0x30   : > { %423 = vst [vmem:[%s13112_s29 + $0x1f0] sm:$0xff] %v422_v62   ;;  %v434_v1 = vld [vmem:[%s13107_s28 + $0x408] sm:$0xff]   ;;  %427 = vst [vmem:[%s13112_s29 + $0x1f8] sm:$0xff] %v426_v63   ;;  %v438_v2 = vld [vmem:[%s13107_s28 + $0x410] sm:$0xff]  }
  0x31   : > { %431 = vst [vmem:[%s13112_s29 + $0x200] sm:$0xff] %v430_v0   ;;  %435 = vst [vmem:[%s13112_s29 + $0x208] sm:$0xff] %v434_v1   ;;  %v442_v3 = vld [vmem:[%s13107_s28 + $0x418] sm:$0xff]   ;;  %v446_v4 = vld [vmem:[%s13107_s28 + $0x420] sm:$0xff]  }
  0x32   : > { %439 = vst [vmem:[%s13112_s29 + $0x210] sm:$0xff] %v438_v2   ;;  %443 = vst [vmem:[%s13112_s29 + $0x218] sm:$0xff] %v442_v3   ;;  %v450_v5 = vld [vmem:[%s13107_s28 + $0x428] sm:$0xff]   ;;  %v454_v6 = vld [vmem:[%s13107_s28 + $0x430] sm:$0xff]  }
  0x33   : > { %447 = vst [vmem:[%s13112_s29 + $0x220] sm:$0xff] %v446_v4   ;;  %v458_v7 = vld [vmem:[%s13107_s28 + $0x438] sm:$0xff]   ;;  %451 = vst [vmem:[%s13112_s29 + $0x228] sm:$0xff] %v450_v5   ;;  %v462_v8 = vld [vmem:[%s13107_s28 + $0x440] sm:$0xff]  }
  0x34   : > { %455 = vst [vmem:[%s13112_s29 + $0x230] sm:$0xff] %v454_v6   ;;  %459 = vst [vmem:[%s13112_s29 + $0x238] sm:$0xff] %v458_v7   ;;  %v466_v9 = vld [vmem:[%s13107_s28 + $0x448] sm:$0xff]   ;;  %v470_v10 = vld [vmem:[%s13107_s28 + $0x450] sm:$0xff]  }
  0x35   : > { %463 = vst [vmem:[%s13112_s29 + $0x240] sm:$0xff] %v462_v8   ;;  %467 = vst [vmem:[%s13112_s29 + $0x248] sm:$0xff] %v466_v9   ;;  %v474_v11 = vld [vmem:[%s13107_s28 + $0x458] sm:$0xff]   ;;  %v478_v12 = vld [vmem:[%s13107_s28 + $0x460] sm:$0xff]  }
  0x36   : > { %471 = vst [vmem:[%s13112_s29 + $0x250] sm:$0xff] %v470_v10   ;;  %v482_v13 = vld [vmem:[%s13107_s28 + $0x468] sm:$0xff]   ;;  %475 = vst [vmem:[%s13112_s29 + $0x258] sm:$0xff] %v474_v11   ;;  %v486_v14 = vld [vmem:[%s13107_s28 + $0x470] sm:$0xff]  }
  0x37   : > { %479 = vst [vmem:[%s13112_s29 + $0x260] sm:$0xff] %v478_v12   ;;  %483 = vst [vmem:[%s13112_s29 + $0x268] sm:$0xff] %v482_v13   ;;  %v490_v15 = vld [vmem:[%s13107_s28 + $0x478] sm:$0xff]   ;;  %v494_v16 = vld [vmem:[%s13107_s28 + $0x480] sm:$0xff]  }
  0x38   : > { %487 = vst [vmem:[%s13112_s29 + $0x270] sm:$0xff] %v486_v14   ;;  %491 = vst [vmem:[%s13112_s29 + $0x278] sm:$0xff] %v490_v15   ;;  %v498_v17 = vld [vmem:[%s13107_s28 + $0x488] sm:$0xff]   ;;  %v502_v18 = vld [vmem:[%s13107_s28 + $0x490] sm:$0xff]  }
  0x39   : > { %495 = vst [vmem:[%s13112_s29 + $0x280] sm:$0xff] %v494_v16   ;;  %v506_v19 = vld [vmem:[%s13107_s28 + $0x498] sm:$0xff]   ;;  %499 = vst [vmem:[%s13112_s29 + $0x288] sm:$0xff] %v498_v17   ;;  %v510_v20 = vld [vmem:[%s13107_s28 + $0x4a0] sm:$0xff]  }
  0x3a   : > { %503 = vst [vmem:[%s13112_s29 + $0x290] sm:$0xff] %v502_v18   ;;  %507 = vst [vmem:[%s13112_s29 + $0x298] sm:$0xff] %v506_v19   ;;  %v514_v21 = vld [vmem:[%s13107_s28 + $0x4a8] sm:$0xff]   ;;  %v518_v22 = vld [vmem:[%s13107_s28 + $0x4b0] sm:$0xff]  }
  0x3b   : > { %511 = vst [vmem:[%s13112_s29 + $0x2a0] sm:$0xff] %v510_v20   ;;  %515 = vst [vmem:[%s13112_s29 + $0x2a8] sm:$0xff] %v514_v21   ;;  %v522_v23 = vld [vmem:[%s13107_s28 + $0x4b8] sm:$0xff]   ;;  %v526_v24 = vld [vmem:[%s13107_s28 + $0x4c0] sm:$0xff]  }
  0x3c   : > { %519 = vst [vmem:[%s13112_s29 + $0x2b0] sm:$0xff] %v518_v22   ;;  %v530_v25 = vld [vmem:[%s13107_s28 + $0x4c8] sm:$0xff]   ;;  %523 = vst [vmem:[%s13112_s29 + $0x2b8] sm:$0xff] %v522_v23   ;;  %v534_v26 = vld [vmem:[%s13107_s28 + $0x4d0] sm:$0xff]  }
  0x3d   : > { %527 = vst [vmem:[%s13112_s29 + $0x2c0] sm:$0xff] %v526_v24   ;;  %531 = vst [vmem:[%s13112_s29 + $0x2c8] sm:$0xff] %v530_v25   ;;  %v538_v27 = vld [vmem:[%s13107_s28 + $0x4d8] sm:$0xff]   ;;  %v542_v28 = vld [vmem:[%s13107_s28 + $0x4e0] sm:$0xff]  }
  0x3e   : > { %535 = vst [vmem:[%s13112_s29 + $0x2d0] sm:$0xff] %v534_v26   ;;  %539 = vst [vmem:[%s13112_s29 + $0x2d8] sm:$0xff] %v538_v27   ;;  %v546_v29 = vld [vmem:[%s13107_s28 + $0x4e8] sm:$0xff]   ;;  %v550_v30 = vld [vmem:[%s13107_s28 + $0x4f0] sm:$0xff]  }
  0x3f   : > { %543 = vst [vmem:[%s13112_s29 + $0x2e0] sm:$0xff] %v542_v28   ;;  %v554_v31 = vld [vmem:[%s13107_s28 + $0x4f8] sm:$0xff]   ;;  %547 = vst [vmem:[%s13112_s29 + $0x2e8] sm:$0xff] %v546_v29   ;;  %v558_v32 = vld [vmem:[%s13107_s28 + $0x600] sm:$0xff]  }
  0x40   : > { %551 = vst [vmem:[%s13112_s29 + $0x2f0] sm:$0xff] %v550_v30   ;;  %555 = vst [vmem:[%s13112_s29 + $0x2f8] sm:$0xff] %v554_v31   ;;  %v562_v33 = vld [vmem:[%s13107_s28 + $0x608] sm:$0xff]   ;;  %v566_v34 = vld [vmem:[%s13107_s28 + $0x610] sm:$0xff]  }
  0x41   : > { %559 = vst [vmem:[%s13112_s29 + $0x300] sm:$0xff] %v558_v32   ;;  %563 = vst [vmem:[%s13112_s29 + $0x308] sm:$0xff] %v562_v33   ;;  %v570_v35 = vld [vmem:[%s13107_s28 + $0x618] sm:$0xff]   ;;  %v574_v36 = vld [vmem:[%s13107_s28 + $0x620] sm:$0xff]  }
  0x42   : > { %567 = vst [vmem:[%s13112_s29 + $0x310] sm:$0xff] %v566_v34   ;;  %v578_v37 = vld [vmem:[%s13107_s28 + $0x628] sm:$0xff]   ;;  %571 = vst [vmem:[%s13112_s29 + $0x318] sm:$0xff] %v570_v35   ;;  %v582_v38 = vld [vmem:[%s13107_s28 + $0x630] sm:$0xff]  }
  0x43   : > { %575 = vst [vmem:[%s13112_s29 + $0x320] sm:$0xff] %v574_v36   ;;  %579 = vst [vmem:[%s13112_s29 + $0x328] sm:$0xff] %v578_v37   ;;  %v586_v39 = vld [vmem:[%s13107_s28 + $0x638] sm:$0xff]   ;;  %v590_v40 = vld [vmem:[%s13107_s28 + $0x640] sm:$0xff]  }
  0x44   : > { %583 = vst [vmem:[%s13112_s29 + $0x330] sm:$0xff] %v582_v38   ;;  %587 = vst [vmem:[%s13112_s29 + $0x338] sm:$0xff] %v586_v39   ;;  %v594_v41 = vld [vmem:[%s13107_s28 + $0x648] sm:$0xff]   ;;  %v598_v42 = vld [vmem:[%s13107_s28 + $0x650] sm:$0xff]  }
  0x45   : > { %591 = vst [vmem:[%s13112_s29 + $0x340] sm:$0xff] %v590_v40   ;;  %v602_v43 = vld [vmem:[%s13107_s28 + $0x658] sm:$0xff]   ;;  %595 = vst [vmem:[%s13112_s29 + $0x348] sm:$0xff] %v594_v41   ;;  %v606_v44 = vld [vmem:[%s13107_s28 + $0x660] sm:$0xff]  }
  0x46   : > { %599 = vst [vmem:[%s13112_s29 + $0x350] sm:$0xff] %v598_v42   ;;  %603 = vst [vmem:[%s13112_s29 + $0x358] sm:$0xff] %v602_v43   ;;  %v610_v45 = vld [vmem:[%s13107_s28 + $0x668] sm:$0xff]   ;;  %v614_v46 = vld [vmem:[%s13107_s28 + $0x670] sm:$0xff]  }
  0x47   : > { %607 = vst [vmem:[%s13112_s29 + $0x360] sm:$0xff] %v606_v44   ;;  %611 = vst [vmem:[%s13112_s29 + $0x368] sm:$0xff] %v610_v45   ;;  %v618_v47 = vld [vmem:[%s13107_s28 + $0x678] sm:$0xff]   ;;  %v622_v48 = vld [vmem:[%s13107_s28 + $0x680] sm:$0xff]  }
  0x48   : > { %615 = vst [vmem:[%s13112_s29 + $0x370] sm:$0xff] %v614_v46   ;;  %v626_v49 = vld [vmem:[%s13107_s28 + $0x688] sm:$0xff]   ;;  %619 = vst [vmem:[%s13112_s29 + $0x378] sm:$0xff] %v618_v47   ;;  %v630_v50 = vld [vmem:[%s13107_s28 + $0x690] sm:$0xff]  }
  0x49   : > { %623 = vst [vmem:[%s13112_s29 + $0x380] sm:$0xff] %v622_v48   ;;  %627 = vst [vmem:[%s13112_s29 + $0x388] sm:$0xff] %v626_v49   ;;  %v634_v51 = vld [vmem:[%s13107_s28 + $0x698] sm:$0xff]   ;;  %v638_v52 = vld [vmem:[%s13107_s28 + $0x6a0] sm:$0xff]  }
  0x4a   : > { %631 = vst [vmem:[%s13112_s29 + $0x390] sm:$0xff] %v630_v50   ;;  %635 = vst [vmem:[%s13112_s29 + $0x398] sm:$0xff] %v634_v51   ;;  %v642_v53 = vld [vmem:[%s13107_s28 + $0x6a8] sm:$0xff]   ;;  %v646_v54 = vld [vmem:[%s13107_s28 + $0x6b0] sm:$0xff]  }
  0x4b   : > { %639 = vst [vmem:[%s13112_s29 + $0x3a0] sm:$0xff] %v638_v52   ;;  %v650_v55 = vld [vmem:[%s13107_s28 + $0x6b8] sm:$0xff]   ;;  %643 = vst [vmem:[%s13112_s29 + $0x3a8] sm:$0xff] %v642_v53   ;;  %v654_v56 = vld [vmem:[%s13107_s28 + $0x6c0] sm:$0xff]  }
  0x4c   : > { %647 = vst [vmem:[%s13112_s29 + $0x3b0] sm:$0xff] %v646_v54   ;;  %651 = vst [vmem:[%s13112_s29 + $0x3b8] sm:$0xff] %v650_v55   ;;  %v658_v57 = vld [vmem:[%s13107_s28 + $0x6c8] sm:$0xff]   ;;  %v662_v58 = vld [vmem:[%s13107_s28 + $0x6d0] sm:$0xff]  }
  0x4d   : > { %655 = vst [vmem:[%s13112_s29 + $0x3c0] sm:$0xff] %v654_v56   ;;  %659 = vst [vmem:[%s13112_s29 + $0x3c8] sm:$0xff] %v658_v57   ;;  %v666_v59 = vld [vmem:[%s13107_s28 + $0x6d8] sm:$0xff]   ;;  %v670_v60 = vld [vmem:[%s13107_s28 + $0x6e0] sm:$0xff]  }
  0x4e   : > { %663 = vst [vmem:[%s13112_s29 + $0x3d0] sm:$0xff] %v662_v58   ;;  %v674_v61 = vld [vmem:[%s13107_s28 + $0x6e8] sm:$0xff]   ;;  %667 = vst [vmem:[%s13112_s29 + $0x3d8] sm:$0xff] %v666_v59   ;;  %v678_v62 = vld [vmem:[%s13107_s28 + $0x6f0] sm:$0xff]  }
  0x4f   : > { %671 = vst [vmem:[%s13112_s29 + $0x3e0] sm:$0xff] %v670_v60   ;;  %675 = vst [vmem:[%s13112_s29 + $0x3e8] sm:$0xff] %v674_v61   ;;  %v682_v63 = vld [vmem:[%s13107_s28 + $0x6f8] sm:$0xff]   ;;  %v686_v0 = vld [vmem:[%s13107_s28 + $0x800] sm:$0xff]  }
  0x50   : > { %679 = vst [vmem:[%s13112_s29 + $0x3f0] sm:$0xff] %v678_v62   ;;  %683 = vst [vmem:[%s13112_s29 + $0x3f8] sm:$0xff] %v682_v63   ;;  %v690_v1 = vld [vmem:[%s13107_s28 + $0x808] sm:$0xff]   ;;  %v694_v2 = vld [vmem:[%s13107_s28 + $0x810] sm:$0xff]  }
  0x51   : > { %687 = vst [vmem:[%s13112_s29 + $0x400] sm:$0xff] %v686_v0   ;;  %v698_v3 = vld [vmem:[%s13107_s28 + $0x818] sm:$0xff]   ;;  %691 = vst [vmem:[%s13112_s29 + $0x408] sm:$0xff] %v690_v1   ;;  %v702_v4 = vld [vmem:[%s13107_s28 + $0x820] sm:$0xff]  }
  0x52   : > { %695 = vst [vmem:[%s13112_s29 + $0x410] sm:$0xff] %v694_v2   ;;  %699 = vst [vmem:[%s13112_s29 + $0x418] sm:$0xff] %v698_v3   ;;  %v706_v5 = vld [vmem:[%s13107_s28 + $0x828] sm:$0xff]   ;;  %v710_v6 = vld [vmem:[%s13107_s28 + $0x830] sm:$0xff]  }
  0x53   : > { %703 = vst [vmem:[%s13112_s29 + $0x420] sm:$0xff] %v702_v4   ;;  %707 = vst [vmem:[%s13112_s29 + $0x428] sm:$0xff] %v706_v5   ;;  %v714_v7 = vld [vmem:[%s13107_s28 + $0x838] sm:$0xff]   ;;  %v718_v8 = vld [vmem:[%s13107_s28 + $0x840] sm:$0xff]  }
  0x54   : > { %711 = vst [vmem:[%s13112_s29 + $0x430] sm:$0xff] %v710_v6   ;;  %v722_v9 = vld [vmem:[%s13107_s28 + $0x848] sm:$0xff]   ;;  %715 = vst [vmem:[%s13112_s29 + $0x438] sm:$0xff] %v714_v7   ;;  %v726_v10 = vld [vmem:[%s13107_s28 + $0x850] sm:$0xff]  }
  0x55   : > { %719 = vst [vmem:[%s13112_s29 + $0x440] sm:$0xff] %v718_v8   ;;  %723 = vst [vmem:[%s13112_s29 + $0x448] sm:$0xff] %v722_v9   ;;  %v730_v11 = vld [vmem:[%s13107_s28 + $0x858] sm:$0xff]   ;;  %v734_v12 = vld [vmem:[%s13107_s28 + $0x860] sm:$0xff]  }
  0x56   : > { %727 = vst [vmem:[%s13112_s29 + $0x450] sm:$0xff] %v726_v10   ;;  %731 = vst [vmem:[%s13112_s29 + $0x458] sm:$0xff] %v730_v11   ;;  %v738_v13 = vld [vmem:[%s13107_s28 + $0x868] sm:$0xff]   ;;  %v742_v14 = vld [vmem:[%s13107_s28 + $0x870] sm:$0xff]  }
  0x57   : > { %735 = vst [vmem:[%s13112_s29 + $0x460] sm:$0xff] %v734_v12   ;;  %v746_v15 = vld [vmem:[%s13107_s28 + $0x878] sm:$0xff]   ;;  %739 = vst [vmem:[%s13112_s29 + $0x468] sm:$0xff] %v738_v13   ;;  %v750_v16 = vld [vmem:[%s13107_s28 + $0x880] sm:$0xff]  }
  0x58   : > { %743 = vst [vmem:[%s13112_s29 + $0x470] sm:$0xff] %v742_v14   ;;  %747 = vst [vmem:[%s13112_s29 + $0x478] sm:$0xff] %v746_v15   ;;  %v754_v17 = vld [vmem:[%s13107_s28 + $0x888] sm:$0xff]   ;;  %v758_v18 = vld [vmem:[%s13107_s28 + $0x890] sm:$0xff]  }
  0x59   : > { %751 = vst [vmem:[%s13112_s29 + $0x480] sm:$0xff] %v750_v16   ;;  %755 = vst [vmem:[%s13112_s29 + $0x488] sm:$0xff] %v754_v17   ;;  %v762_v19 = vld [vmem:[%s13107_s28 + $0x898] sm:$0xff]   ;;  %v766_v20 = vld [vmem:[%s13107_s28 + $0x8a0] sm:$0xff]  }
  0x5a   : > { %759 = vst [vmem:[%s13112_s29 + $0x490] sm:$0xff] %v758_v18   ;;  %v770_v21 = vld [vmem:[%s13107_s28 + $0x8a8] sm:$0xff]   ;;  %763 = vst [vmem:[%s13112_s29 + $0x498] sm:$0xff] %v762_v19   ;;  %v774_v22 = vld [vmem:[%s13107_s28 + $0x8b0] sm:$0xff]  }
  0x5b   : > { %767 = vst [vmem:[%s13112_s29 + $0x4a0] sm:$0xff] %v766_v20   ;;  %771 = vst [vmem:[%s13112_s29 + $0x4a8] sm:$0xff] %v770_v21   ;;  %v778_v23 = vld [vmem:[%s13107_s28 + $0x8b8] sm:$0xff]   ;;  %v782_v24 = vld [vmem:[%s13107_s28 + $0x8c0] sm:$0xff]  }
  0x5c   : > { %775 = vst [vmem:[%s13112_s29 + $0x4b0] sm:$0xff] %v774_v22   ;;  %779 = vst [vmem:[%s13112_s29 + $0x4b8] sm:$0xff] %v778_v23   ;;  %v786_v25 = vld [vmem:[%s13107_s28 + $0x8c8] sm:$0xff]   ;;  %v790_v26 = vld [vmem:[%s13107_s28 + $0x8d0] sm:$0xff]  }
  0x5d   : > { %783 = vst [vmem:[%s13112_s29 + $0x4c0] sm:$0xff] %v782_v24   ;;  %v794_v27 = vld [vmem:[%s13107_s28 + $0x8d8] sm:$0xff]   ;;  %787 = vst [vmem:[%s13112_s29 + $0x4c8] sm:$0xff] %v786_v25   ;;  %v798_v28 = vld [vmem:[%s13107_s28 + $0x8e0] sm:$0xff]  }
  0x5e   : > { %791 = vst [vmem:[%s13112_s29 + $0x4d0] sm:$0xff] %v790_v26   ;;  %795 = vst [vmem:[%s13112_s29 + $0x4d8] sm:$0xff] %v794_v27   ;;  %v802_v29 = vld [vmem:[%s13107_s28 + $0x8e8] sm:$0xff]   ;;  %v806_v30 = vld [vmem:[%s13107_s28 + $0x8f0] sm:$0xff]  }
  0x5f   : > { %799 = vst [vmem:[%s13112_s29 + $0x4e0] sm:$0xff] %v798_v28   ;;  %803 = vst [vmem:[%s13112_s29 + $0x4e8] sm:$0xff] %v802_v29   ;;  %v810_v31 = vld [vmem:[%s13107_s28 + $0x8f8] sm:$0xff]   ;;  %v814_v32 = vld [vmem:[%s13107_s28 + $0xa00] sm:$0xff]  }
  0x60   : > { %807 = vst [vmem:[%s13112_s29 + $0x4f0] sm:$0xff] %v806_v30   ;;  %v818_v33 = vld [vmem:[%s13107_s28 + $0xa08] sm:$0xff]   ;;  %811 = vst [vmem:[%s13112_s29 + $0x4f8] sm:$0xff] %v810_v31   ;;  %v822_v34 = vld [vmem:[%s13107_s28 + $0xa10] sm:$0xff]  }
  0x61   : > { %815 = vst [vmem:[%s13112_s29 + $0x500] sm:$0xff] %v814_v32   ;;  %819 = vst [vmem:[%s13112_s29 + $0x508] sm:$0xff] %v818_v33   ;;  %v826_v35 = vld [vmem:[%s13107_s28 + $0xa18] sm:$0xff]   ;;  %v830_v36 = vld [vmem:[%s13107_s28 + $0xa20] sm:$0xff]  }
  0x62   : > { %823 = vst [vmem:[%s13112_s29 + $0x510] sm:$0xff] %v822_v34   ;;  %827 = vst [vmem:[%s13112_s29 + $0x518] sm:$0xff] %v826_v35   ;;  %v834_v37 = vld [vmem:[%s13107_s28 + $0xa28] sm:$0xff]   ;;  %v838_v38 = vld [vmem:[%s13107_s28 + $0xa30] sm:$0xff]  }
  0x63   : > { %831 = vst [vmem:[%s13112_s29 + $0x520] sm:$0xff] %v830_v36   ;;  %v842_v39 = vld [vmem:[%s13107_s28 + $0xa38] sm:$0xff]   ;;  %835 = vst [vmem:[%s13112_s29 + $0x528] sm:$0xff] %v834_v37   ;;  %v846_v40 = vld [vmem:[%s13107_s28 + $0xa40] sm:$0xff]  }
  0x64   : > { %839 = vst [vmem:[%s13112_s29 + $0x530] sm:$0xff] %v838_v38   ;;  %843 = vst [vmem:[%s13112_s29 + $0x538] sm:$0xff] %v842_v39   ;;  %v850_v41 = vld [vmem:[%s13107_s28 + $0xa48] sm:$0xff]   ;;  %v854_v42 = vld [vmem:[%s13107_s28 + $0xa50] sm:$0xff]  }
  0x65   : > { %847 = vst [vmem:[%s13112_s29 + $0x540] sm:$0xff] %v846_v40   ;;  %851 = vst [vmem:[%s13112_s29 + $0x548] sm:$0xff] %v850_v41   ;;  %v858_v43 = vld [vmem:[%s13107_s28 + $0xa58] sm:$0xff]   ;;  %v862_v44 = vld [vmem:[%s13107_s28 + $0xa60] sm:$0xff]  }
  0x66   : > { %855 = vst [vmem:[%s13112_s29 + $0x550] sm:$0xff] %v854_v42   ;;  %v866_v45 = vld [vmem:[%s13107_s28 + $0xa68] sm:$0xff]   ;;  %859 = vst [vmem:[%s13112_s29 + $0x558] sm:$0xff] %v858_v43   ;;  %v870_v46 = vld [vmem:[%s13107_s28 + $0xa70] sm:$0xff]  }
  0x67   : > { %863 = vst [vmem:[%s13112_s29 + $0x560] sm:$0xff] %v862_v44   ;;  %867 = vst [vmem:[%s13112_s29 + $0x568] sm:$0xff] %v866_v45   ;;  %v874_v47 = vld [vmem:[%s13107_s28 + $0xa78] sm:$0xff]   ;;  %v878_v48 = vld [vmem:[%s13107_s28 + $0xa80] sm:$0xff]  }
  0x68   : > { %871 = vst [vmem:[%s13112_s29 + $0x570] sm:$0xff] %v870_v46   ;;  %875 = vst [vmem:[%s13112_s29 + $0x578] sm:$0xff] %v874_v47   ;;  %v882_v49 = vld [vmem:[%s13107_s28 + $0xa88] sm:$0xff]   ;;  %v886_v50 = vld [vmem:[%s13107_s28 + $0xa90] sm:$0xff]  }
  0x69   : > { %879 = vst [vmem:[%s13112_s29 + $0x580] sm:$0xff] %v878_v48   ;;  %v890_v51 = vld [vmem:[%s13107_s28 + $0xa98] sm:$0xff]   ;;  %883 = vst [vmem:[%s13112_s29 + $0x588] sm:$0xff] %v882_v49   ;;  %v894_v52 = vld [vmem:[%s13107_s28 + $0xaa0] sm:$0xff]  }
  0x6a   : > { %887 = vst [vmem:[%s13112_s29 + $0x590] sm:$0xff] %v886_v50   ;;  %891 = vst [vmem:[%s13112_s29 + $0x598] sm:$0xff] %v890_v51   ;;  %v898_v53 = vld [vmem:[%s13107_s28 + $0xaa8] sm:$0xff]   ;;  %v902_v54 = vld [vmem:[%s13107_s28 + $0xab0] sm:$0xff]  }
  0x6b   : > { %895 = vst [vmem:[%s13112_s29 + $0x5a0] sm:$0xff] %v894_v52   ;;  %899 = vst [vmem:[%s13112_s29 + $0x5a8] sm:$0xff] %v898_v53   ;;  %v906_v55 = vld [vmem:[%s13107_s28 + $0xab8] sm:$0xff]   ;;  %v910_v56 = vld [vmem:[%s13107_s28 + $0xac0] sm:$0xff]  }
  0x6c   : > { %903 = vst [vmem:[%s13112_s29 + $0x5b0] sm:$0xff] %v902_v54   ;;  %v914_v57 = vld [vmem:[%s13107_s28 + $0xac8] sm:$0xff]   ;;  %907 = vst [vmem:[%s13112_s29 + $0x5b8] sm:$0xff] %v906_v55   ;;  %v918_v58 = vld [vmem:[%s13107_s28 + $0xad0] sm:$0xff]  }
  0x6d   : > { %911 = vst [vmem:[%s13112_s29 + $0x5c0] sm:$0xff] %v910_v56   ;;  %915 = vst [vmem:[%s13112_s29 + $0x5c8] sm:$0xff] %v914_v57   ;;  %v922_v59 = vld [vmem:[%s13107_s28 + $0xad8] sm:$0xff]   ;;  %v926_v60 = vld [vmem:[%s13107_s28 + $0xae0] sm:$0xff]  }
  0x6e   : > { %919 = vst [vmem:[%s13112_s29 + $0x5d0] sm:$0xff] %v918_v58   ;;  %923 = vst [vmem:[%s13112_s29 + $0x5d8] sm:$0xff] %v922_v59   ;;  %v930_v61 = vld [vmem:[%s13107_s28 + $0xae8] sm:$0xff]   ;;  %v934_v62 = vld [vmem:[%s13107_s28 + $0xaf0] sm:$0xff]  }
  0x6f   : > { %927 = vst [vmem:[%s13112_s29 + $0x5e0] sm:$0xff] %v926_v60   ;;  %v938_v63 = vld [vmem:[%s13107_s28 + $0xaf8] sm:$0xff]   ;;  %931 = vst [vmem:[%s13112_s29 + $0x5e8] sm:$0xff] %v930_v61   ;;  %v942_v0 = vld [vmem:[%s13107_s28 + $0xc00] sm:$0xff]  }
  0x70   : > { %935 = vst [vmem:[%s13112_s29 + $0x5f0] sm:$0xff] %v934_v62   ;;  %939 = vst [vmem:[%s13112_s29 + $0x5f8] sm:$0xff] %v938_v63   ;;  %v946_v1 = vld [vmem:[%s13107_s28 + $0xc08] sm:$0xff]   ;;  %v950_v2 = vld [vmem:[%s13107_s28 + $0xc10] sm:$0xff]  }
  0x71   : > { %943 = vst [vmem:[%s13112_s29 + $0x600] sm:$0xff] %v942_v0   ;;  %947 = vst [vmem:[%s13112_s29 + $0x608] sm:$0xff] %v946_v1   ;;  %v954_v3 = vld [vmem:[%s13107_s28 + $0xc18] sm:$0xff]   ;;  %v958_v4 = vld [vmem:[%s13107_s28 + $0xc20] sm:$0xff]  }
  0x72   : > { %951 = vst [vmem:[%s13112_s29 + $0x610] sm:$0xff] %v950_v2   ;;  %v962_v5 = vld [vmem:[%s13107_s28 + $0xc28] sm:$0xff]   ;;  %955 = vst [vmem:[%s13112_s29 + $0x618] sm:$0xff] %v954_v3   ;;  %v966_v6 = vld [vmem:[%s13107_s28 + $0xc30] sm:$0xff]  }
  0x73   : > { %959 = vst [vmem:[%s13112_s29 + $0x620] sm:$0xff] %v958_v4   ;;  %963 = vst [vmem:[%s13112_s29 + $0x628] sm:$0xff] %v962_v5   ;;  %v970_v7 = vld [vmem:[%s13107_s28 + $0xc38] sm:$0xff]   ;;  %v974_v8 = vld [vmem:[%s13107_s28 + $0xc40] sm:$0xff]  }
  0x74   : > { %967 = vst [vmem:[%s13112_s29 + $0x630] sm:$0xff] %v966_v6   ;;  %971 = vst [vmem:[%s13112_s29 + $0x638] sm:$0xff] %v970_v7   ;;  %v978_v9 = vld [vmem:[%s13107_s28 + $0xc48] sm:$0xff]   ;;  %v982_v10 = vld [vmem:[%s13107_s28 + $0xc50] sm:$0xff]  }
  0x75   : > { %975 = vst [vmem:[%s13112_s29 + $0x640] sm:$0xff] %v974_v8   ;;  %v986_v11 = vld [vmem:[%s13107_s28 + $0xc58] sm:$0xff]   ;;  %979 = vst [vmem:[%s13112_s29 + $0x648] sm:$0xff] %v978_v9   ;;  %v990_v12 = vld [vmem:[%s13107_s28 + $0xc60] sm:$0xff]  }
  0x76   : > { %983 = vst [vmem:[%s13112_s29 + $0x650] sm:$0xff] %v982_v10   ;;  %987 = vst [vmem:[%s13112_s29 + $0x658] sm:$0xff] %v986_v11   ;;  %v994_v13 = vld [vmem:[%s13107_s28 + $0xc68] sm:$0xff]   ;;  %v998_v14 = vld [vmem:[%s13107_s28 + $0xc70] sm:$0xff]  }
  0x77   : > { %991 = vst [vmem:[%s13112_s29 + $0x660] sm:$0xff] %v990_v12   ;;  %995 = vst [vmem:[%s13112_s29 + $0x668] sm:$0xff] %v994_v13   ;;  %v1002_v15 = vld [vmem:[%s13107_s28 + $0xc78] sm:$0xff]   ;;  %v1006_v16 = vld [vmem:[%s13107_s28 + $0xc80] sm:$0xff]  }
  0x78   : > { %999 = vst [vmem:[%s13112_s29 + $0x670] sm:$0xff] %v998_v14   ;;  %v1010_v17 = vld [vmem:[%s13107_s28 + $0xc88] sm:$0xff]   ;;  %1003 = vst [vmem:[%s13112_s29 + $0x678] sm:$0xff] %v1002_v15   ;;  %v1014_v18 = vld [vmem:[%s13107_s28 + $0xc90] sm:$0xff]  }
  0x79   : > { %1007 = vst [vmem:[%s13112_s29 + $0x680] sm:$0xff] %v1006_v16   ;;  %1011 = vst [vmem:[%s13112_s29 + $0x688] sm:$0xff] %v1010_v17   ;;  %v1018_v19 = vld [vmem:[%s13107_s28 + $0xc98] sm:$0xff]   ;;  %v1022_v20 = vld [vmem:[%s13107_s28 + $0xca0] sm:$0xff]  }
  0x7a   : > { %1015 = vst [vmem:[%s13112_s29 + $0x690] sm:$0xff] %v1014_v18   ;;  %1019 = vst [vmem:[%s13112_s29 + $0x698] sm:$0xff] %v1018_v19   ;;  %v1026_v21 = vld [vmem:[%s13107_s28 + $0xca8] sm:$0xff]   ;;  %v1030_v22 = vld [vmem:[%s13107_s28 + $0xcb0] sm:$0xff]  }
  0x7b   : > { %1023 = vst [vmem:[%s13112_s29 + $0x6a0] sm:$0xff] %v1022_v20   ;;  %v1034_v23 = vld [vmem:[%s13107_s28 + $0xcb8] sm:$0xff]   ;;  %1027 = vst [vmem:[%s13112_s29 + $0x6a8] sm:$0xff] %v1026_v21   ;;  %v1038_v24 = vld [vmem:[%s13107_s28 + $0xcc0] sm:$0xff]  }
  0x7c   : > { %1031 = vst [vmem:[%s13112_s29 + $0x6b0] sm:$0xff] %v1030_v22   ;;  %1035 = vst [vmem:[%s13112_s29 + $0x6b8] sm:$0xff] %v1034_v23   ;;  %v1042_v25 = vld [vmem:[%s13107_s28 + $0xcc8] sm:$0xff]   ;;  %v1046_v26 = vld [vmem:[%s13107_s28 + $0xcd0] sm:$0xff]  }
  0x7d   : > { %1039 = vst [vmem:[%s13112_s29 + $0x6c0] sm:$0xff] %v1038_v24   ;;  %1043 = vst [vmem:[%s13112_s29 + $0x6c8] sm:$0xff] %v1042_v25   ;;  %v1050_v27 = vld [vmem:[%s13107_s28 + $0xcd8] sm:$0xff]   ;;  %v1054_v28 = vld [vmem:[%s13107_s28 + $0xce0] sm:$0xff]  }
  0x7e   : > { %1047 = vst [vmem:[%s13112_s29 + $0x6d0] sm:$0xff] %v1046_v26   ;;  %v1058_v29 = vld [vmem:[%s13107_s28 + $0xce8] sm:$0xff]   ;;  %1051 = vst [vmem:[%s13112_s29 + $0x6d8] sm:$0xff] %v1050_v27   ;;  %v1062_v30 = vld [vmem:[%s13107_s28 + $0xcf0] sm:$0xff]  }
  0x7f   : > { %1055 = vst [vmem:[%s13112_s29 + $0x6e0] sm:$0xff] %v1054_v28   ;;  %1059 = vst [vmem:[%s13112_s29 + $0x6e8] sm:$0xff] %v1058_v29   ;;  %v1066_v31 = vld [vmem:[%s13107_s28 + $0xcf8] sm:$0xff]   ;;  %v1070_v32 = vld [vmem:[%s13107_s28 + $0xe00] sm:$0xff]  }
  0x80   : > { %1063 = vst [vmem:[%s13112_s29 + $0x6f0] sm:$0xff] %v1062_v30   ;;  %1067 = vst [vmem:[%s13112_s29 + $0x6f8] sm:$0xff] %v1066_v31   ;;  %v1074_v33 = vld [vmem:[%s13107_s28 + $0xe08] sm:$0xff]   ;;  %v1078_v34 = vld [vmem:[%s13107_s28 + $0xe10] sm:$0xff]  }
  0x81   : > { %1071 = vst [vmem:[%s13112_s29 + $0x700] sm:$0xff] %v1070_v32   ;;  %v1082_v35 = vld [vmem:[%s13107_s28 + $0xe18] sm:$0xff]   ;;  %1075 = vst [vmem:[%s13112_s29 + $0x708] sm:$0xff] %v1074_v33   ;;  %v1086_v36 = vld [vmem:[%s13107_s28 + $0xe20] sm:$0xff]  }
  0x82   : > { %1079 = vst [vmem:[%s13112_s29 + $0x710] sm:$0xff] %v1078_v34   ;;  %1083 = vst [vmem:[%s13112_s29 + $0x718] sm:$0xff] %v1082_v35   ;;  %v1090_v37 = vld [vmem:[%s13107_s28 + $0xe28] sm:$0xff]   ;;  %v1094_v38 = vld [vmem:[%s13107_s28 + $0xe30] sm:$0xff]  }
  0x83   : > { %1087 = vst [vmem:[%s13112_s29 + $0x720] sm:$0xff] %v1086_v36   ;;  %1091 = vst [vmem:[%s13112_s29 + $0x728] sm:$0xff] %v1090_v37   ;;  %v1098_v39 = vld [vmem:[%s13107_s28 + $0xe38] sm:$0xff]   ;;  %v1102_v40 = vld [vmem:[%s13107_s28 + $0xe40] sm:$0xff]  }
  0x84   : > { %1095 = vst [vmem:[%s13112_s29 + $0x730] sm:$0xff] %v1094_v38   ;;  %v1106_v41 = vld [vmem:[%s13107_s28 + $0xe48] sm:$0xff]   ;;  %1099 = vst [vmem:[%s13112_s29 + $0x738] sm:$0xff] %v1098_v39   ;;  %v1110_v42 = vld [vmem:[%s13107_s28 + $0xe50] sm:$0xff]  }
  0x85   : > { %1103 = vst [vmem:[%s13112_s29 + $0x740] sm:$0xff] %v1102_v40   ;;  %1107 = vst [vmem:[%s13112_s29 + $0x748] sm:$0xff] %v1106_v41   ;;  %v1114_v43 = vld [vmem:[%s13107_s28 + $0xe58] sm:$0xff]   ;;  %v1118_v44 = vld [vmem:[%s13107_s28 + $0xe60] sm:$0xff]  }
  0x86   : > { %1111 = vst [vmem:[%s13112_s29 + $0x750] sm:$0xff] %v1110_v42   ;;  %1115 = vst [vmem:[%s13112_s29 + $0x758] sm:$0xff] %v1114_v43   ;;  %v1122_v45 = vld [vmem:[%s13107_s28 + $0xe68] sm:$0xff]   ;;  %v1126_v46 = vld [vmem:[%s13107_s28 + $0xe70] sm:$0xff]  }
  0x87   : > { %1119 = vst [vmem:[%s13112_s29 + $0x760] sm:$0xff] %v1118_v44   ;;  %v1130_v47 = vld [vmem:[%s13107_s28 + $0xe78] sm:$0xff]   ;;  %1123 = vst [vmem:[%s13112_s29 + $0x768] sm:$0xff] %v1122_v45   ;;  %v1134_v48 = vld [vmem:[%s13107_s28 + $0xe80] sm:$0xff]  }
  0x88   : > { %1127 = vst [vmem:[%s13112_s29 + $0x770] sm:$0xff] %v1126_v46   ;;  %1131 = vst [vmem:[%s13112_s29 + $0x778] sm:$0xff] %v1130_v47   ;;  %v1138_v49 = vld [vmem:[%s13107_s28 + $0xe88] sm:$0xff]   ;;  %v1142_v50 = vld [vmem:[%s13107_s28 + $0xe90] sm:$0xff]  }
  0x89   : > { %1135 = vst [vmem:[%s13112_s29 + $0x780] sm:$0xff] %v1134_v48   ;;  %1139 = vst [vmem:[%s13112_s29 + $0x788] sm:$0xff] %v1138_v49   ;;  %v1146_v51 = vld [vmem:[%s13107_s28 + $0xe98] sm:$0xff]   ;;  %v1150_v52 = vld [vmem:[%s13107_s28 + $0xea0] sm:$0xff]  }
  0x8a   : > { %1143 = vst [vmem:[%s13112_s29 + $0x790] sm:$0xff] %v1142_v50   ;;  %v1154_v53 = vld [vmem:[%s13107_s28 + $0xea8] sm:$0xff]   ;;  %1147 = vst [vmem:[%s13112_s29 + $0x798] sm:$0xff] %v1146_v51   ;;  %v1158_v54 = vld [vmem:[%s13107_s28 + $0xeb0] sm:$0xff]  }
  0x8b   : > { %1151 = vst [vmem:[%s13112_s29 + $0x7a0] sm:$0xff] %v1150_v52   ;;  %1155 = vst [vmem:[%s13112_s29 + $0x7a8] sm:$0xff] %v1154_v53   ;;  %v1162_v55 = vld [vmem:[%s13107_s28 + $0xeb8] sm:$0xff]   ;;  %v1166_v56 = vld [vmem:[%s13107_s28 + $0xec0] sm:$0xff]  }
  0x8c   : > { %1159 = vst [vmem:[%s13112_s29 + $0x7b0] sm:$0xff] %v1158_v54   ;;  %1163 = vst [vmem:[%s13112_s29 + $0x7b8] sm:$0xff] %v1162_v55   ;;  %v1170_v57 = vld [vmem:[%s13107_s28 + $0xec8] sm:$0xff]   ;;  %v1174_v58 = vld [vmem:[%s13107_s28 + $0xed0] sm:$0xff]  }
  0x8d   : > { %1167 = vst [vmem:[%s13112_s29 + $0x7c0] sm:$0xff] %v1166_v56   ;;  %v1178_v59 = vld [vmem:[%s13107_s28 + $0xed8] sm:$0xff]   ;;  %1171 = vst [vmem:[%s13112_s29 + $0x7c8] sm:$0xff] %v1170_v57   ;;  %v1182_v60 = vld [vmem:[%s13107_s28 + $0xee0] sm:$0xff]  }
  0x8e   : > { %1175 = vst [vmem:[%s13112_s29 + $0x7d0] sm:$0xff] %v1174_v58   ;;  %1179 = vst [vmem:[%s13112_s29 + $0x7d8] sm:$0xff] %v1178_v59   ;;  %v1186_v61 = vld [vmem:[%s13107_s28 + $0xee8] sm:$0xff]   ;;  %v1190_v62 = vld [vmem:[%s13107_s28 + $0xef0] sm:$0xff]  }
  0x8f   : > { %1183 = vst [vmem:[%s13112_s29 + $0x7e0] sm:$0xff] %v1182_v60   ;;  %1187 = vst [vmem:[%s13112_s29 + $0x7e8] sm:$0xff] %v1186_v61   ;;  %v1194_v63 = vld [vmem:[%s13107_s28 + $0xef8] sm:$0xff]  }
  0x90   : > { %1191 = vst [vmem:[%s13112_s29 + $0x7f0] sm:$0xff] %v1190_v62   ;;  %1195 = vst [vmem:[%s13112_s29 + $0x7f8] sm:$0xff] %v1194_v63  }
  0x91 PF: > { %4323 = sbr.rel (!%p13089_p3) target bundleno = 165 (0xa5), region = 76  ;;  %s4325_s30 = sand.u32 (%p13089_p3), 1, %s13021_s13  }
  0x92   : > { %s11591_s4 = sshll.u32 (%p13089_p3), %s13029_s15, 4  ;;  %s11545_s5 = sshll.u32 (%p13089_p3), %s4325_s30, 8 }
  0x93   : > { %s13630_s8 = scalar_lea.vmem (%p13089_p3), %s15902_s1, %s11591_s4  ;;  %s13635_s9 = scalar_lea.vmem (%p13089_p3), [#allocation4], %s11545_s5 }
  0x94   : > { %v4343_v0 = vld [vmem:[%s13630_s8] sm:$0xff] (%p13089_p3)  ;;  %v4345_v1 = vld [vmem:[%s13630_s8 + $0x8] sm:$0xff] (%p13089_p3) }
  0x95   : > { %v4347_v2 = vld [vmem:[%s13630_s8 + $0x20] sm:$0xff] (%p13089_p3)  ;;  %4344 = vst [vmem:[%s13635_s9] sm:$0xff] (%p13089_p3), %v4343_v0  ;;  %4346 = vst [vmem:[%s13635_s9 + $0x8] sm:$0xff] (%p13089_p3), %v4345_v1  ;;  %v4349_v3 = vld [vmem:[%s13630_s8 + $0x28] sm:$0xff] (%p13089_p3) }
  0x96   : > { %4348 = vst [vmem:[%s13635_s9 + $0x10] sm:$0xff] %v4347_v2  ;;  %v4351_v4 = vld [vmem:[%s13630_s8 + $0x40] sm:$0xff]  ;;  %v4353_v5 = vld [vmem:[%s13630_s8 + $0x48] sm:$0xff]  ;;  %4350 = vst [vmem:[%s13635_s9 + $0x18] sm:$0xff] %v4349_v3 }
  0x97   : > { %4352 = vst [vmem:[%s13635_s9 + $0x20] sm:$0xff] %v4351_v4  ;;  %4354 = vst [vmem:[%s13635_s9 + $0x28] sm:$0xff] %v4353_v5  ;;  %v4355_v6 = vld [vmem:[%s13630_s8 + $0x60] sm:$0xff]  ;;  %v4357_v7 = vld [vmem:[%s13630_s8 + $0x68] sm:$0xff] }
  0x98   : > { %v4359_v8 = vld [vmem:[%s13630_s8 + $0x80] sm:$0xff]  ;;  %4356 = vst [vmem:[%s13635_s9 + $0x30] sm:$0xff] %v4355_v6  ;;  %4358 = vst [vmem:[%s13635_s9 + $0x38] sm:$0xff] %v4357_v7  ;;  %v4361_v9 = vld [vmem:[%s13630_s8 + $0x88] sm:$0xff] }
  0x99   : > { %4360 = vst [vmem:[%s13635_s9 + $0x40] sm:$0xff] %v4359_v8  ;;  %v4363_v10 = vld [vmem:[%s13630_s8 + $0xa0] sm:$0xff]  ;;  %v4365_v11 = vld [vmem:[%s13630_s8 + $0xa8] sm:$0xff]  ;;  %4362 = vst [vmem:[%s13635_s9 + $0x48] sm:$0xff] %v4361_v9 }
  0x9a   : > { %4364 = vst [vmem:[%s13635_s9 + $0x50] sm:$0xff] %v4363_v10  ;;  %4366 = vst [vmem:[%s13635_s9 + $0x58] sm:$0xff] %v4365_v11  ;;  %v4367_v12 = vld [vmem:[%s13630_s8 + $0xc0] sm:$0xff]  ;;  %v4369_v13 = vld [vmem:[%s13630_s8 + $0xc8] sm:$0xff] }
  0x9b   : > { %v4371_v14 = vld [vmem:[%s13630_s8 + $0xe0] sm:$0xff]  ;;  %4368 = vst [vmem:[%s13635_s9 + $0x60] sm:$0xff] %v4367_v12  ;;  %4370 = vst [vmem:[%s13635_s9 + $0x68] sm:$0xff] %v4369_v13  ;;  %v4373_v15 = vld [vmem:[%s13630_s8 + $0xe8] sm:$0xff] }
  0x9c   : > { %4372 = vst [vmem:[%s13635_s9 + $0x70] sm:$0xff] %v4371_v14  ;;  %v4375_v16 = vld [vmem:[%s13630_s8 + $0x100] sm:$0xff]  ;;  %v4377_v17 = vld [vmem:[%s13630_s8 + $0x108] sm:$0xff]  ;;  %4374 = vst [vmem:[%s13635_s9 + $0x78] sm:$0xff] %v4373_v15 }
  0x9d   : > { %4376 = vst [vmem:[%s13635_s9 + $0x80] sm:$0xff] %v4375_v16  ;;  %4378 = vst [vmem:[%s13635_s9 + $0x88] sm:$0xff] %v4377_v17  ;;  %v4379_v18 = vld [vmem:[%s13630_s8 + $0x120] sm:$0xff]  ;;  %v4381_v19 = vld [vmem:[%s13630_s8 + $0x128] sm:$0xff] }
  0x9e   : > { %v4383_v20 = vld [vmem:[%s13630_s8 + $0x140] sm:$0xff]  ;;  %4380 = vst [vmem:[%s13635_s9 + $0x90] sm:$0xff] %v4379_v18  ;;  %4382 = vst [vmem:[%s13635_s9 + $0x98] sm:$0xff] %v4381_v19  ;;  %v4385_v21 = vld [vmem:[%s13630_s8 + $0x148] sm:$0xff] }
  0x9f   : > { %4384 = vst [vmem:[%s13635_s9 + $0xa0] sm:$0xff] %v4383_v20  ;;  %v4387_v22 = vld [vmem:[%s13630_s8 + $0x160] sm:$0xff]  ;;  %v4389_v23 = vld [vmem:[%s13630_s8 + $0x168] sm:$0xff]  ;;  %4386 = vst [vmem:[%s13635_s9 + $0xa8] sm:$0xff] %v4385_v21 }
  0xa0   : > { %4388 = vst [vmem:[%s13635_s9 + $0xb0] sm:$0xff] %v4387_v22  ;;  %4390 = vst [vmem:[%s13635_s9 + $0xb8] sm:$0xff] %v4389_v23  ;;  %v4391_v24 = vld [vmem:[%s13630_s8 + $0x180] sm:$0xff]  ;;  %v4393_v25 = vld [vmem:[%s13630_s8 + $0x188] sm:$0xff] }
  0xa1   : > { %v4395_v26 = vld [vmem:[%s13630_s8 + $0x1a0] sm:$0xff]  ;;  %4392 = vst [vmem:[%s13635_s9 + $0xc0] sm:$0xff] %v4391_v24  ;;  %4394 = vst [vmem:[%s13635_s9 + $0xc8] sm:$0xff] %v4393_v25  ;;  %v4397_v27 = vld [vmem:[%s13630_s8 + $0x1a8] sm:$0xff] }
  0xa2   : > { %4396 = vst [vmem:[%s13635_s9 + $0xd0] sm:$0xff] %v4395_v26  ;;  %v4399_v28 = vld [vmem:[%s13630_s8 + $0x1c0] sm:$0xff]  ;;  %v4401_v29 = vld [vmem:[%s13630_s8 + $0x1c8] sm:$0xff]  ;;  %4398 = vst [vmem:[%s13635_s9 + $0xd8] sm:$0xff] %v4397_v27 }
  0xa3   : > { %4400 = vst [vmem:[%s13635_s9 + $0xe0] sm:$0xff] %v4399_v28  ;;  %4402 = vst [vmem:[%s13635_s9 + $0xe8] sm:$0xff] %v4401_v29  ;;  %v4403_v30 = vld [vmem:[%s13630_s8 + $0x1e0] sm:$0xff]  ;;  %v4405_v31 = vld [vmem:[%s13630_s8 + $0x1e8] sm:$0xff] }
  0xa4   : > { %4404 = vst [vmem:[%s13635_s9 + $0xf0] sm:$0xff] %v4403_v30  ;;  %4406 = vst [vmem:[%s13635_s9 + $0xf8] sm:$0xff] %v4405_v31 }
  0xa5 PF: > { %p11548_p6 = scmp.ge.s32.totalorder %s13033_s16, 1  ;;  %p4411_p7 = scmp.lt.s32.totalorder %s13033_s16, 3 }
  0xa7   : > { %p4412_p8 = pnand %p11548_p6, %p4411_p7 }
  0xa8   : > { %s4418_s10 = sand.u32 (!%p4412_p8), 1, %s13017_s12   ;;  %p11551_p9 = scmp.ne.s32.totalorder (!%p4412_p8), %s13025_s14, 0 }
  0xa9   : > { %4415 = sbr.rel (%p4412_p8) target bundleno = 1580 (0x62c), region = 99  ;;  %s11549_s11 = sshll.u32 (!%p4412_p8), %s4418_s10, 11 }
  0xaa   : > { %s11550_s19 = sshll.u32 (!%p4412_p8), %s4418_s10, 8  ;;  %s13701_s20 = scalar_lea.vmem (!%p4412_p8), [#allocation3], %s11549_s11 }
  0xab   : > { %s13703_s21 = scalar_lea.vmem (!%p4412_p8), [#allocation4], %s11550_s19 }
  0xae   : > { %4454 = sbr.rel (%p11551_p9) target bundleno = 181 (0xb5), region = 111 }
  0xb3   : > { %v13035_v32 = vmov 0.0  }
  0xb4   : > { %4455 = vst [vmem:[#allocation2] sm:$0xff] %v13035_v32 }
  0xb5 PF: > { %v12616_v33 = vld [vmem:[%s13701_s20 + $0x8] sm:$0xff]   ;;  %vm5480_vm0 = vcmask 130048   ;;  %v11593_v34 = vld [vmem:[%s13701_s20] sm:$0xff]   ;;  %v12617_v39 = vld [vmem:[%s13701_s20 + $0x10] sm:$0xff]   ;;  %vm8597_vm1 = vcmask 130112   ;;  %vm8604_vm2 = vcmask 195712  }
  0xb6   : > { %v11598_v35 = vunpack.c.l.bf16 %v12616_v33  ;;  %v11594_v36 = vunpack.c.l.bf16 %v11593_v34  ;;  %v11599_v37 = vunpack.c.h.bf16 %v12616_v33  ;;  %v11595_v38 = vunpack.c.h.bf16 %v11593_v34  ;;  %v12618_v46 = vld [vmem:[%s13701_s20 + $0x18] sm:$0xff]   ;;  %v12619_v51 = vld [vmem:[%s13701_s20 + $0x20] sm:$0xff]   ;;  %v12620_v56 = vld [vmem:[%s13701_s20 + $0x28] sm:$0xff]   ;;  %p11584_p10 = scmp.ne.s32.totalorder %s13025_s14, 1 }
  0xb7   : > { %v11603_v44 = vunpack.c.h.bf16 %v12617_v39  ;;  %v11602_v45 = vunpack.c.l.bf16 %v12617_v39  ;;  %v11607_v49 = vunpack.c.h.bf16 %v12618_v46  ;;  %v11606_v50 = vunpack.c.l.bf16 %v12618_v46  ;;  %v12621_v57 = vld [vmem:[%s13701_s20 + $0x30] sm:$0xff]   ;;  %v12622_v2 = vld [vmem:[%s13701_s20 + $0x38] sm:$0xff]   ;;  %v12623_v7 = vld [vmem:[%s13701_s20 + $0x40] sm:$0xff]  }
  0xb8   : > { %v5487_v40 = vsel %vm5480_vm0, %v11598_v35, 0.0  ;;  %v5481_v41 = vsel %vm5480_vm0, %v11594_v36, 0.0  ;;  %v5490_v42 = vsel %vm5480_vm0, %v11599_v37, 0.0  ;;  %v5484_v43 = vsel %vm5480_vm0, %v11595_v38, 0.0  ;;  %v12624_v12 = vld [vmem:[%s13701_s20 + $0x48] sm:$0xff]   ;;  %v12625_v17 = vld [vmem:[%s13701_s20 + $0x50] sm:$0xff]  }
  0xb9   : > { %5488 = vadd.xlane.f32.xlu1 %v5487_v40  ;;  %5482 = vadd.xlane.f32.xlu0 %v5481_v41  ;;  %v5496_v47 = vsel %vm5480_vm0, %v11603_v44, 0.0  ;;  %v5493_v48 = vsel %vm5480_vm0, %v11602_v45, 0.0  ;;  %v5502_v52 = vsel %vm5480_vm0, %v11607_v49, 0.0  ;;  %v5499_v53 = vsel %vm5480_vm0, %v11606_v50, 0.0  ;;  %v12626_v22 = vld [vmem:[%s13701_s20 + $0x58] sm:$0xff]   ;;  %v12627_v27 = vld [vmem:[%s13701_s20 + $0x60] sm:$0xff]  }
  0xba   : > { %v11611_v54 = vunpack.c.h.bf16 %v12619_v51  ;;  %v11610_v55 = vunpack.c.l.bf16 %v12619_v51  ;;  %v11615_v60 = vunpack.c.h.bf16 %v12620_v56  ;;  %v11614_v61 = vunpack.c.l.bf16 %v12620_v56  ;;  %v12628_v32 = vld [vmem:[%s13701_s20 + $0x68] sm:$0xff]   ;;  %v12629_v37 = vld [vmem:[%s13701_s20 + $0x70] sm:$0xff]  }
  0xbb   : > { %v11619_v0 = vunpack.c.h.bf16 %v12621_v57  ;;  %v11618_v1 = vunpack.c.l.bf16 %v12621_v57  ;;  %v11623_v5 = vunpack.c.h.bf16 %v12622_v2  ;;  %v11622_v6 = vunpack.c.l.bf16 %v12622_v2  ;;  %v12633_v57 = vld [vmem:[%s13701_s20 + $0x90] sm:$0xff]  }
  0xbc   : > { %v5508_v58 = vsel %vm5480_vm0, %v11611_v54, 0.0  ;;  %v5505_v59 = vsel %vm5480_vm0, %v11610_v55, 0.0  ;;  %v5514_v62 = vsel %vm5480_vm0, %v11615_v60, 0.0  ;;  %v5511_v63 = vsel %vm5480_vm0, %v11614_v61, 0.0 }
  0xbd   : > { %5491 = vadd.xlane.f32.xlu1 %v5490_v42  ;;  %5485 = vadd.xlane.f32.xlu0 %v5484_v43  ;;  %v5520_v3 = vsel %vm5480_vm0, %v11619_v0, 0.0  ;;  %v5517_v4 = vsel %vm5480_vm0, %v11618_v1, 0.0  ;;  %v5526_v8 = vsel %vm5480_vm0, %v11623_v5, 0.0  ;;  %v5523_v9 = vsel %vm5480_vm0, %v11622_v6, 0.0  ;;  %v12630_v42 = vld [vmem:[%s13701_s20 + $0x78] sm:$0xff]  }
  0xbe   : > { %v11627_v10 = vunpack.c.h.bf16 %v12623_v7  ;;  %v11626_v11 = vunpack.c.l.bf16 %v12623_v7  ;;  %v11631_v15 = vunpack.c.h.bf16 %v12624_v12  ;;  %v11630_v16 = vunpack.c.l.bf16 %v12624_v12 }
  0xbf   : > { %v11635_v20 = vunpack.c.h.bf16 %v12625_v17  ;;  %v11634_v21 = vunpack.c.l.bf16 %v12625_v17  ;;  %v11639_v25 = vunpack.c.h.bf16 %v12626_v22  ;;  %v11638_v26 = vunpack.c.l.bf16 %v12626_v22 }
  0xc0   : > { %v5532_v13 = vsel %vm5480_vm0, %v11627_v10, 0.0  ;;  %v5529_v14 = vsel %vm5480_vm0, %v11626_v11, 0.0  ;;  %v5538_v18 = vsel %vm5480_vm0, %v11631_v15, 0.0  ;;  %v5535_v19 = vsel %vm5480_vm0, %v11630_v16, 0.0 }
  0xc1   : > { %5497 = vadd.xlane.f32.xlu1 %v5496_v47  ;;  %5494 = vadd.xlane.f32.xlu0 %v5493_v48  ;;  %v5544_v23 = vsel %vm5480_vm0, %v11635_v20, 0.0  ;;  %v5541_v24 = vsel %vm5480_vm0, %v11634_v21, 0.0  ;;  %v5550_v28 = vsel %vm5480_vm0, %v11639_v25, 0.0  ;;  %v5547_v29 = vsel %vm5480_vm0, %v11638_v26, 0.0  ;;  %v12631_v47 = vld [vmem:[%s13701_s20 + $0x80] sm:$0xff]  }
  0xc2   : > { %v11643_v30 = vunpack.c.h.bf16 %v12627_v27  ;;  %v11642_v31 = vunpack.c.l.bf16 %v12627_v27  ;;  %v11647_v35 = vunpack.c.h.bf16 %v12628_v32  ;;  %v11646_v36 = vunpack.c.l.bf16 %v12628_v32 }
  0xc3   : > { %v11651_v40 = vunpack.c.h.bf16 %v12629_v37  ;;  %v11650_v41 = vunpack.c.l.bf16 %v12629_v37  ;;  %v11655_v45 = vunpack.c.h.bf16 %v12630_v42  ;;  %v11654_v46 = vunpack.c.l.bf16 %v12630_v42 }
  0xc4   : > { %v5556_v33 = vsel %vm5480_vm0, %v11643_v30, 0.0  ;;  %v5553_v34 = vsel %vm5480_vm0, %v11642_v31, 0.0  ;;  %v5562_v38 = vsel %vm5480_vm0, %v11647_v35, 0.0  ;;  %v5559_v39 = vsel %vm5480_vm0, %v11646_v36, 0.0 }
  0xc5   : > { %5503 = vadd.xlane.f32.xlu1 %v5502_v52  ;;  %5500 = vadd.xlane.f32.xlu0 %v5499_v53  ;;  %v5568_v43 = vsel %vm5480_vm0, %v11651_v40, 0.0  ;;  %v5565_v44 = vsel %vm5480_vm0, %v11650_v41, 0.0  ;;  %v5574_v48 = vsel %vm5480_vm0, %v11655_v45, 0.0  ;;  %v5571_v49 = vsel %vm5480_vm0, %v11654_v46, 0.0  ;;  %v12632_v52 = vld [vmem:[%s13701_s20 + $0x88] sm:$0xff]  }
  0xc6   : > { %v11659_v50 = vunpack.c.h.bf16 %v12631_v47  ;;  %v11658_v51 = vunpack.c.l.bf16 %v12631_v47  ;;  %v11663_v55 = vunpack.c.h.bf16 %v12632_v52  ;;  %v11662_v56 = vunpack.c.l.bf16 %v12632_v52 }
  0xc7   : > { %v11667_v60 = vunpack.c.h.bf16 %v12633_v57  ;;  %v11666_v61 = vunpack.c.l.bf16 %v12633_v57  ;;  %vm8611_vm3 = vcmask 261312   ;;  %vm8618_vm4 = vcmask 326912  }
  0xc8   : > { %v5580_v53 = vsel %vm5480_vm0, %v11659_v50, 0.0  ;;  %v5577_v54 = vsel %vm5480_vm0, %v11658_v51, 0.0  ;;  %vm8625_vm5 = vcmask 392512   ;;  %vm8632_vm6 = vcmask 458112  }
  0xc9   : > { %5509 = vadd.xlane.f32.xlu1 %v5508_v58  ;;  %5506 = vadd.xlane.f32.xlu0 %v5505_v59  ;;  %v5586_v58 = vsel %vm5480_vm0, %v11663_v55, 0.0  ;;  %v5583_v59 = vsel %vm5480_vm0, %v11662_v56, 0.0  ;;  %v5589_v0 = vsel %vm5480_vm0, %v11666_v61, 0.0  ;;  %vm8639_vm7 = vcmask 523712  }
  0xca   : > { %vm8646_vm8 = vcmask 589312   ;;  %vm15906_vm9 = vcmask 654912   ;;  %vm8660_vm10 = vcmask 720512   ;;  %vm15905_vm11 = vcmask 786112  }
  0xcb   : > { %vm8674_vm12 = vcmask 851712   ;;  %vm8681_vm13 = vcmask 917312   ;;  %vm8688_vm14 = vcmask 982912   ;;  %vm8695_vm15 = vcmask 1048512  }
  0xcd   : > { %5515 = vadd.xlane.f32.xlu1 %v5514_v62  ;;  %5512 = vadd.xlane.f32.xlu0 %v5511_v63  ;;  %v12634_v62 = vld [vmem:[%s13701_s20 + $0x98] sm:$0xff]   ;;  %v5592_v63 = vsel %vm5480_vm0, %v11667_v60, 0.0 }
  0xce   : > { %v11671_v1 = vunpack.c.h.bf16 %v12634_v62  ;;  %v11670_v2 = vunpack.c.l.bf16 %v12634_v62 }
  0xd0   : > { %v5595_v5 = vsel %vm5480_vm0, %v11670_v2, 0.0 }
  0xd1   : > { %5521 = vadd.xlane.f32.xlu1 %v5520_v3  ;;  %5518 = vadd.xlane.f32.xlu0 %v5517_v4  ;;  %v12635_v3 = vld [vmem:[%s13701_s20 + $0xa0] sm:$0xff]   ;;  %v5598_v4 = vsel %vm5480_vm0, %v11671_v1, 0.0 }
  0xd2   : > { %v11675_v6 = vunpack.c.h.bf16 %v12635_v3  ;;  %v11674_v7 = vunpack.c.l.bf16 %v12635_v3 }
  0xd4   : > { %v5601_v10 = vsel %vm5480_vm0, %v11674_v7, 0.0 }
  0xd5   : > { %5527 = vadd.xlane.f32.xlu1 %v5526_v8  ;;  %5524 = vadd.xlane.f32.xlu0 %v5523_v9  ;;  %v12636_v8 = vld [vmem:[%s13701_s20 + $0xa8] sm:$0xff]   ;;  %v5604_v9 = vsel %vm5480_vm0, %v11675_v6, 0.0 }
  0xd6   : > { %v11679_v11 = vunpack.c.h.bf16 %v12636_v8  ;;  %v11678_v12 = vunpack.c.l.bf16 %v12636_v8 }
  0xd8   : > { %v5607_v15 = vsel %vm5480_vm0, %v11678_v12, 0.0 }
  0xd9   : > { %5533 = vadd.xlane.f32.xlu1 %v5532_v13  ;;  %5530 = vadd.xlane.f32.xlu0 %v5529_v14  ;;  %v12637_v13 = vld [vmem:[%s13701_s20 + $0xb0] sm:$0xff]   ;;  %v5610_v14 = vsel %vm5480_vm0, %v11679_v11, 0.0 }
  0xda   : > { %v11683_v16 = vunpack.c.h.bf16 %v12637_v13  ;;  %v11682_v17 = vunpack.c.l.bf16 %v12637_v13 }
  0xdc   : > { %v5613_v20 = vsel %vm5480_vm0, %v11682_v17, 0.0 }
  0xdd   : > { %5539 = vadd.xlane.f32.xlu1 %v5538_v18  ;;  %5536 = vadd.xlane.f32.xlu0 %v5535_v19  ;;  %v12638_v18 = vld [vmem:[%s13701_s20 + $0xb8] sm:$0xff]   ;;  %v5616_v19 = vsel %vm5480_vm0, %v11683_v16, 0.0  ;;  %v12651_v16 = vld [vmem:[%s13701_s20 + $0x120] sm:$0xff]  }
  0xde   : > { %v11687_v21 = vunpack.c.h.bf16 %v12638_v18  ;;  %v11686_v22 = vunpack.c.l.bf16 %v12638_v18 }
  0xe0   : > { %v5619_v25 = vsel %vm5480_vm0, %v11686_v22, 0.0  ;;  %v12652_v22 = vld [vmem:[%s13701_s20 + $0x128] sm:$0xff]  }
  0xe1   : > { %5545 = vadd.xlane.f32.xlu1 %v5544_v23  ;;  %5542 = vadd.xlane.f32.xlu0 %v5541_v24  ;;  %v12639_v23 = vld [vmem:[%s13701_s20 + $0xc0] sm:$0xff]   ;;  %v5622_v24 = vsel %vm5480_vm0, %v11687_v21, 0.0 }
  0xe2   : > { %v11691_v26 = vunpack.c.h.bf16 %v12639_v23  ;;  %v11690_v27 = vunpack.c.l.bf16 %v12639_v23  ;;  %v11739_v23 = vunpack.c.h.bf16 %v12651_v16 }
  0xe4   : > { %v5625_v30 = vsel %vm5480_vm0, %v11690_v27, 0.0 }
  0xe5   : > { %5551 = vadd.xlane.f32.xlu1 %v5550_v28  ;;  %5548 = vadd.xlane.f32.xlu0 %v5547_v29  ;;  %v12640_v28 = vld [vmem:[%s13701_s20 + $0xc8] sm:$0xff]   ;;  %v5628_v29 = vsel %vm5480_vm0, %v11691_v26, 0.0  ;;  %v11743_v26 = vunpack.c.h.bf16 %v12652_v22 }
  0xe6   : > { %v11695_v31 = vunpack.c.h.bf16 %v12640_v28  ;;  %v11694_v32 = vunpack.c.l.bf16 %v12640_v28 }
  0xe8   : > { %v5631_v35 = vsel %vm5480_vm0, %v11694_v32, 0.0 }
  0xe9   : > { %5557 = vadd.xlane.f32.xlu1 %v5556_v33  ;;  %5554 = vadd.xlane.f32.xlu0 %v5553_v34  ;;  %v12641_v33 = vld [vmem:[%s13701_s20 + $0xd0] sm:$0xff]   ;;  %v5634_v34 = vsel %vm5480_vm0, %v11695_v31, 0.0 }
  0xea   : > { %v11699_v36 = vunpack.c.h.bf16 %v12641_v33  ;;  %v11698_v37 = vunpack.c.l.bf16 %v12641_v33  ;;  %v5700_v33 = vsel %vm5480_vm0, %v11739_v23, 0.0 }
  0xec   : > { %v5637_v40 = vsel %vm5480_vm0, %v11698_v37, 0.0 }
  0xed   : > { %5563 = vadd.xlane.f32.xlu1 %v5562_v38  ;;  %5560 = vadd.xlane.f32.xlu0 %v5559_v39  ;;  %v12642_v38 = vld [vmem:[%s13701_s20 + $0xd8] sm:$0xff]   ;;  %v5640_v39 = vsel %vm5480_vm0, %v11699_v36, 0.0 }
  0xee   : > { %v11703_v41 = vunpack.c.h.bf16 %v12642_v38  ;;  %v11702_v42 = vunpack.c.l.bf16 %v12642_v38 }
  0xf0   : > { %v5643_v45 = vsel %vm5480_vm0, %v11702_v42, 0.0 }
  0xf1   : > { %5569 = vadd.xlane.f32.xlu1 %v5568_v43  ;;  %5566 = vadd.xlane.f32.xlu0 %v5565_v44  ;;  %v12643_v43 = vld [vmem:[%s13701_s20 + $0xe0] sm:$0xff]   ;;  %v5646_v44 = vsel %vm5480_vm0, %v11703_v41, 0.0  ;;  %v11742_v41 = vunpack.c.l.bf16 %v12652_v22 }
  0xf2   : > { %v11707_v46 = vunpack.c.h.bf16 %v12643_v43  ;;  %v11706_v47 = vunpack.c.l.bf16 %v12643_v43 }
  0xf4   : > { %v5649_v50 = vsel %vm5480_vm0, %v11706_v47, 0.0 }
  0xf5   : > { %5575 = vadd.xlane.f32.xlu1 %v5574_v48  ;;  %5572 = vadd.xlane.f32.xlu0 %v5571_v49  ;;  %v12644_v48 = vld [vmem:[%s13701_s20 + $0xe8] sm:$0xff]   ;;  %v5652_v49 = vsel %vm5480_vm0, %v11707_v46, 0.0 }
  0xf6   : > { %v11711_v51 = vunpack.c.h.bf16 %v12644_v48  ;;  %v11710_v52 = vunpack.c.l.bf16 %v12644_v48 }
  0xf8   : > { %v5655_v55 = vsel %vm5480_vm0, %v11710_v52, 0.0 }
  0xf9   : > { %5581 = vadd.xlane.f32.xlu1 %v5580_v53  ;;  %5578 = vadd.xlane.f32.xlu0 %v5577_v54  ;;  %v12645_v53 = vld [vmem:[%s13701_s20 + $0xf0] sm:$0xff]   ;;  %v5658_v54 = vsel %vm5480_vm0, %v11711_v51, 0.0 }
  0xfa   : > { %v11715_v56 = vunpack.c.h.bf16 %v12645_v53  ;;  %v11714_v57 = vunpack.c.l.bf16 %v12645_v53 }
  0xfc   : > { %v5661_v60 = vsel %vm5480_vm0, %v11714_v57, 0.0 }
  0xfd   : > { %5587 = vadd.xlane.f32.xlu1 %v5586_v58  ;;  %5584 = vadd.xlane.f32.xlu0 %v5583_v59  ;;  %v12646_v58 = vld [vmem:[%s13701_s20 + $0xf8] sm:$0xff]   ;;  %v5664_v59 = vsel %vm5480_vm0, %v11715_v56, 0.0 }
  0xfe   : > { %v11719_v61 = vunpack.c.h.bf16 %v12646_v58  ;;  %v11718_v62 = vunpack.c.l.bf16 %v12646_v58 }
 0x100   : > { %v5667_v1 = vsel %vm5480_vm0, %v11718_v62, 0.0 }
 0x101   : > { %5593 = vadd.xlane.f32.xlu1 %v5592_v63  ;;  %5590 = vadd.xlane.f32.xlu0 %v5589_v0  ;;  %v12647_v63 = vld [vmem:[%s13701_s20 + $0x100] sm:$0xff]   ;;  %v5670_v0 = vsel %vm5480_vm0, %v11719_v61, 0.0  ;;  %v12654_v61 = vld [vmem:[%s13701_s20 + $0x138] sm:$0xff]  }
 0x102   : > { %v11723_v2 = vunpack.c.h.bf16 %v12647_v63  ;;  %v11722_v3 = vunpack.c.l.bf16 %v12647_v63 }
 0x104   : > { %v5673_v6 = vsel %vm5480_vm0, %v11722_v3, 0.0 }
 0x105   : > { %5599 = vadd.xlane.f32.xlu1 %v5598_v4  ;;  %5596 = vadd.xlane.f32.xlu0 %v5595_v5  ;;  %v12648_v4 = vld [vmem:[%s13701_s20 + $0x108] sm:$0xff]   ;;  %v5676_v5 = vsel %vm5480_vm0, %v11723_v2, 0.0 }
 0x106   : > { %v11727_v7 = vunpack.c.h.bf16 %v12648_v4  ;;  %v11726_v8 = vunpack.c.l.bf16 %v12648_v4 }
 0x108   : > { %v5682_v11 = vsel %vm5480_vm0, %v11727_v7, 0.0  ;;  %v5679_v12 = vsel %vm5480_vm0, %v11726_v8, 0.0 }
 0x109   : > { %5605 = vadd.xlane.f32.xlu1 %v5604_v9  ;;  %5602 = vadd.xlane.f32.xlu0 %v5601_v10  ;;  %v12649_v9 = vld [vmem:[%s13701_s20 + $0x110] sm:$0xff]  }
 0x10a   : > { %v11731_v10 = vunpack.c.h.bf16 %v12649_v9  ;;  %v11730_v13 = vunpack.c.l.bf16 %v12649_v9 }
 0x10c   : > { %v5688_v18 = vsel %vm5480_vm0, %v11731_v10, 0.0 }
 0x10d   : > { %5611 = vadd.xlane.f32.xlu1 %v5610_v14  ;;  %5608 = vadd.xlane.f32.xlu0 %v5607_v15  ;;  %v12650_v14 = vld [vmem:[%s13701_s20 + $0x118] sm:$0xff]   ;;  %v8586_v15 = vlaneseq }
 0x10e   : > { %v11735_v17 = vunpack.c.h.bf16 %v12650_v14 }
 0x10f   : > { %v13813_v21 = vand.u32 127, %v8586_v15 }
 0x111   : > { %5617 = vadd.xlane.f32.xlu1 %v5616_v19  ;;  %5614 = vadd.xlane.f32.xlu0 %v5613_v20  ;;  %v5685_v19 = vsel %vm5480_vm0, %v11730_v13, 0.0  ;;  %v11734_v20 = vunpack.c.l.bf16 %v12650_v14  ;;  %v8599_v31 = vadd.s32 4294967280, %v13813_v21  ;;  %v8606_v32 = vadd.s32 4294967272, %v13813_v21 }
 0x112   : > { %v8613_v37 = vadd.s32 4294967264, %v13813_v21  ;;  %v8620_v38 = vadd.s32 4294967256, %v13813_v21  ;;  %v8627_v42 = vadd.s32 4294967248, %v13813_v21  ;;  %v8634_v47 = vadd.s32 4294967240, %v13813_v21 }
 0x113   : > { %v8641_v2 = vadd.s32 4294967232, %v13813_v21  ;;  %v8648_v3 = vadd.s32 4294967224, %v13813_v21  ;;  %v8655_v22 = vadd.s32 4294967216, %v13813_v21 }
 0x115   : > { %5623 = vadd.xlane.f32.xlu1 %v5622_v24  ;;  %5620 = vadd.xlane.f32.xlu0 %v5619_v25  ;;  %v11738_v24 = vunpack.c.l.bf16 %v12651_v16  ;;  %v13816_v25 = vshrl.u32 %v8586_v15, 7  ;;  %v11750_v15 = vunpack.c.l.bf16 %v12654_v61 }
 0x117   : > { %v5697_v36 = vsel %vm5480_vm0, %v11738_v24, 0.0  ;;  %v13835_v43 = vsub.s32 %v8599_v31, %v13816_v25 }
 0x119   : > { %5629 = vadd.xlane.f32.xlu1 %v5628_v29  ;;  %5626 = vadd.xlane.f32.xlu0 %v5625_v30  ;;  %v5694_v29 = vsel %vm5480_vm0, %v11735_v17, 0.0  ;;  %v5691_v30 = vsel %vm5480_vm0, %v11734_v20, 0.0  ;;  %v13869_v20 = vsub.s32 %v8648_v3, %v13816_v25 }
 0x11d   : > { %5635 = vadd.xlane.f32.xlu1 %v5634_v34  ;;  %5632 = vadd.xlane.f32.xlu0 %v5631_v35  ;;  %v12653_v34 = vld [vmem:[%s13701_s20 + $0x130] sm:$0xff]   ;;  %v8592_v35 = vadd.s32 4294967288, %v13813_v21 }
 0x11e   : > { %v11747_v48 = vunpack.c.h.bf16 %v12653_v34  ;;  %v11746_v56 = vunpack.c.l.bf16 %v12653_v34 }
 0x11f   : > { %v13842_v53 = vsub.s32 %v8592_v35, %v13816_v25 }
 0x120   : > { %v5709_v10 = vsel %vm5480_vm0, %v11746_v56, 0.0 }
 0x121   : > { %5641 = vadd.xlane.f32.xlu1 %v5640_v39  ;;  %5638 = vadd.xlane.f32.xlu0 %v5637_v40  ;;  %v13830_v39 = vsub.s32 %v13813_v21, %v13816_v25  ;;  %v5706_v40 = vsel %vm5480_vm0, %v11743_v26, 0.0 }
 0x125   : > { %5647 = vadd.xlane.f32.xlu1 %v5646_v44  ;;  %5644 = vadd.xlane.f32.xlu0 %v5643_v45  ;;  %v13838_v44 = vsub.s32 %v8606_v32, %v13816_v25  ;;  %v8662_v32 = vadd.s32 4294967208, %v13813_v21 }
 0x127   : > { %v13888_v56 = vsub.s32 %v8662_v32, %v13816_v25 }
 0x129   : > { %5653 = vadd.xlane.f32.xlu1 %v5652_v49  ;;  %5650 = vadd.xlane.f32.xlu0 %v5649_v50 }
 0x12d   : > { %5659 = vadd.xlane.f32.xlu1 %v5658_v54  ;;  %5656 = vadd.xlane.f32.xlu0 %v5655_v55  ;;  %v13845_v54 = vsub.s32 %v8613_v37, %v13816_v25  ;;  %v13848_v55 = vsub.s32 %v8620_v38, %v13816_v25 }
 0x131   : > { %5665 = vadd.xlane.f32.xlu1 %v5664_v59  ;;  %5662 = vadd.xlane.f32.xlu0 %v5661_v60  ;;  %v5703_v59 = vsel %vm5480_vm0, %v11742_v41, 0.0  ;;  %v13852_v60 = vsub.s32 %v8627_v42, %v13816_v25 }
 0x135   : > { %5671 = vadd.xlane.f32.xlu1 %v5670_v0  ;;  %5668 = vadd.xlane.f32.xlu0 %v5667_v1  ;;  %v13856_v0 = vsub.s32 %v8634_v47, %v13816_v25  ;;  %v5712_v1 = vsel %vm5480_vm0, %v11747_v48, 0.0 }
 0x139   : > { %5677 = vadd.xlane.f32.xlu1 %v5676_v5  ;;  %5674 = vadd.xlane.f32.xlu0 %v5673_v6 }
 0x13d   : > { %5683 = vadd.xlane.f32.xlu1 %v5682_v11  ;;  %5680 = vadd.xlane.f32.xlu0 %v5679_v12  ;;  %v11751_v11 = vunpack.c.h.bf16 %v12654_v61 }
 0x13f   : > { %v5718_v35 = vsel %vm5480_vm0, %v11751_v11, 0.0 }
 0x141   : > { %5689 = vadd.xlane.f32.xlu1 %v5688_v18  ;;  %5686 = vadd.xlane.f32.xlu0 %v5685_v19  ;;  %v13866_v19 = vsub.s32 %v8641_v2, %v13816_v25 }
 0x142   : > { %v5489_v27 = vpop.xlane.xlu1 %5488  ;;  %v5483_v28 = vpop.xlane.xlu0 %5482 }
 0x143   : > { %v7019_v49 = vmul.f32 0.0625, %v5489_v27  ;;  %v7017_v50 = vmul.f32 0.0625, %v5483_v28  ;;  %v12655_v28 = vld [vmem:[%s13701_s20 + $0x140] sm:$0xff]  }
 0x144   : > { %v11755_v42 = vunpack.c.h.bf16 %v12655_v28 }
 0x145   : > { %5695 = vadd.xlane.f32.xlu1 %v5694_v29  ;;  %5692 = vadd.xlane.f32.xlu0 %v5691_v30 }
 0x146   : > { %v5492_v45 = vpop.xlane.xlu1 %5491  ;;  %v5486_v46 = vpop.xlane.xlu0 %5485  ;;  %v5724_v2 = vsel %vm5480_vm0, %v11755_v42, 0.0 }
 0x147   : > { %v7020_v51 = vmul.f32 0.0625, %v5492_v45  ;;  %v7018_v52 = vmul.f32 0.0625, %v5486_v46  ;;  %v11754_v45 = vunpack.c.l.bf16 %v12655_v28  ;;  %v12658_v28 = vld [vmem:[%s13701_s20 + $0x158] sm:$0xff]  }
 0x149   : > { %v7531_v57 = vpack.c.bf16 %v7020_v51, %v7019_v49  ;;  %v7530_v58 = vpack.c.bf16 %v7018_v52, %v7017_v50  ;;  %5701 = vadd.xlane.f32.xlu1 %v5700_v33  ;;  %5698 = vadd.xlane.f32.xlu0 %v5697_v36  ;;  %v5715_v36 = vsel %vm5480_vm0, %v11750_v15, 0.0  ;;  %v12656_v50 = vld [vmem:[%s13701_s20 + $0x148] sm:$0xff]   ;;  %v13885_v52 = vsub.s32 %v8655_v22, %v13816_v25 }
 0x14a   : > { %v5498_v62 = vpop.xlane.xlu1 %5497  ;;  %v5495_v63 = vpop.xlane.xlu0 %5494  ;;  %v5721_v3 = vsel %vm5480_vm0, %v11754_v45, 0.0 }
 0x14b   : > { %v8076_v4 = vunpack.c.l.b16 %v7531_v57  ;;  %v8077_v5 = vunpack.c.h.b16 %v7531_v57  ;;  %v8074_v6 = vunpack.c.l.b16 %v7530_v58  ;;  %v8075_v7 = vunpack.c.h.b16 %v7530_v58 }
 0x14c   : > { %v7022_v8 = vmul.f32 0.0625, %v5498_v62  ;;  %v7021_v9 = vmul.f32 0.0625, %v5495_v63  ;;  %v8669_v57 = vadd.s32 4294967200, %v13813_v21 }
 0x14d   : > { %v8603_v12 = vrot.slane %v8076_v4, %v13835_v43  ;;  %v8591_v13 = vrot.slane %v8074_v6, %v13830_v39  ;;  %v8596_v14 = vrot.slane %v8075_v7, %v13842_v53  ;;  %5707 = vadd.xlane.f32.xlu1 %v5706_v40  ;;  %5704 = vadd.xlane.f32.xlu0 %v5703_v59  ;;  %v11759_v4 = vunpack.c.h.bf16 %v12656_v50  ;;  %v12657_v6 = vld [vmem:[%s13701_s20 + $0x150] sm:$0xff]  }
 0x14e   : > { %v7532_v16 = vpack.c.bf16 %v7022_v8, %v7021_v9  ;;  %v5504_v17 = vpop.xlane.xlu1 %5503  ;;  %v5501_v18 = vpop.xlane.xlu0 %5500  ;;  %v8610_v23 = vrot.slane %v8077_v5, %v13838_v44  ;;  %v11758_v5 = vunpack.c.l.bf16 %v12656_v50 }
 0x14f   : > { %v8598_v24 = vsel %vm8597_vm1, %v8596_v14, %v8591_v13  ;;  %v7024_v26 = vmul.f32 0.0625, %v5504_v17  ;;  %v7023_v27 = vmul.f32 0.0625, %v5501_v18  ;;  %v8676_v13 = vadd.s32 4294967192, %v13813_v21 }
 0x150   : > { %v8605_v29 = vsel %vm8604_vm2, %v8603_v12, %v8598_v24  ;;  %v8078_v30 = vunpack.c.l.b16 %v7532_v16  ;;  %v8079_v31 = vunpack.c.h.b16 %v7532_v16  ;;  %v13903_v16 = vsub.s32 %v8669_v57, %v13816_v25 }
 0x151   : > { %v8612_v33 = vsel %vm8611_vm3, %v8610_v23, %v8605_v29  ;;  %v7533_v34 = vpack.c.bf16 %v7024_v26, %v7023_v27  ;;  %5713 = vadd.xlane.f32.xlu1 %v5712_v1  ;;  %5710 = vadd.xlane.f32.xlu0 %v5709_v10  ;;  %v11763_v17 = vunpack.c.h.bf16 %v12657_v6  ;;  %v5730_v24 = vsel %vm5480_vm0, %v11759_v4, 0.0 }
 0x152   : > { %v8617_v37 = vrot.slane %v8078_v30, %v13845_v54  ;;  %v8624_v38 = vrot.slane %v8079_v31, %v13848_v55  ;;  %v5510_v40 = vpop.xlane.xlu1 %5509  ;;  %v5507_v41 = vpop.xlane.xlu0 %5506  ;;  %v8683_v26 = vadd.s32 4294967184, %v13813_v21  ;;  %v11762_v27 = vunpack.c.l.bf16 %v12657_v6 }
 0x153   : > { %v8080_v46 = vunpack.c.l.b16 %v7533_v34  ;;  %v8081_v47 = vunpack.c.h.b16 %v7533_v34  ;;  %v7026_v48 = vmul.f32 0.0625, %v5510_v40  ;;  %v7025_v49 = vmul.f32 0.0625, %v5507_v41 }
 0x154   : > { %v8619_v51 = vsel %vm8618_vm4, %v8617_v37, %v8612_v33  ;;  %v5727_v32 = vsel %vm5480_vm0, %v11758_v5, 0.0  ;;  %v13913_v37 = vsub.s32 %v8676_v13, %v13816_v25  ;;  %v5736_v40 = vsel %vm5480_vm0, %v11763_v17, 0.0 }
 0x155   : > { %v8626_v58 = vsel %vm8625_vm5, %v8624_v38, %v8619_v51  ;;  %v8631_v59 = vrot.slane %v8080_v46, %v13852_v60  ;;  %v8638_v61 = vrot.slane %v8081_v47, %v13856_v0  ;;  %v7534_v62 = vpack.c.bf16 %v7026_v48, %v7025_v49  ;;  %5719 = vadd.xlane.f32.xlu1 %v5718_v35 }
 0x156   : > { %5716 = vadd.xlane.f32.xlu0 %v5715_v36  ;;  %v5516_v63 = vpop.xlane.xlu1 %5515  ;;  %v5513_v1 = vpop.xlane.xlu0 %5512  ;;  %v8690_v36 = vadd.s32 4294967176, %v13813_v21  ;;  %v11767_v41 = vunpack.c.h.bf16 %v12658_v28  ;;  %v5733_v48 = vsel %vm5480_vm0, %v11762_v27, 0.0  ;;  %v11766_v49 = vunpack.c.l.bf16 %v12658_v28 }
 0x157   : > { %v8633_v7 = vsel %vm8632_vm6, %v8631_v59, %v8626_v58  ;;  %v8082_v8 = vunpack.c.l.b16 %v7534_v62  ;;  %v8083_v9 = vunpack.c.h.b16 %v7534_v62  ;;  %v7028_v10 = vmul.f32 0.0625, %v5516_v63  ;;  %v12659_v58 = vld [vmem:[%s13701_s20 + $0x160] sm:$0xff]  }
 0x158   : > { %v8640_v11 = vsel %vm8639_vm7, %v8638_v61, %v8633_v7  ;;  %v7027_v12 = vmul.f32 0.0625, %v5513_v1  ;;  %v13922_v61 = vsub.s32 %v8683_v26, %v13816_v25  ;;  %v13925_v62 = vsub.s32 %v8690_v36, %v13816_v25 }
 0x159   : > { %v8645_v14 = vrot.slane %v8082_v8, %v13866_v19  ;;  %v8652_v15 = vrot.slane %v8083_v9, %v13869_v20  ;;  %5725 = vadd.xlane.f32.xlu1 %v5724_v2  ;;  %v5742_v6 = vsel %vm5480_vm0, %v11767_v41, 0.0  ;;  %v5739_v7 = vsel %vm5480_vm0, %v11766_v49, 0.0 }
 0x15a   : > { %v7535_v18 = vpack.c.bf16 %v7028_v10, %v7027_v12  ;;  %5722 = vadd.xlane.f32.xlu0 %v5721_v3  ;;  %v5522_v22 = vpop.xlane.xlu1 %5521  ;;  %v5519_v23 = vpop.xlane.xlu0 %5518  ;;  %v11771_v8 = vunpack.c.h.bf16 %v12659_v58  ;;  %v11770_v9 = vunpack.c.l.bf16 %v12659_v58  ;;  %v12660_v10 = vld [vmem:[%s13701_s20 + $0x168] sm:$0xff]   ;;  %v12662_v58 = vld [vmem:[%s13701_s20 + $0x178] sm:$0xff]  }
 0x15b   : > { %v8647_v29 = vsel %vm8646_vm8, %v8645_v14, %v8640_v11  ;;  %v7030_v30 = vmul.f32 0.0625, %v5522_v22  ;;  %v7029_v31 = vmul.f32 0.0625, %v5519_v23  ;;  %v11775_v22 = vunpack.c.h.bf16 %v12660_v10 }
 0x15c   : > { %v8654_v33 = vsel %vm15906_vm9, %v8652_v15, %v8647_v29  ;;  %v8084_v34 = vunpack.c.l.b16 %v7535_v18  ;;  %v8085_v35 = vunpack.c.h.b16 %v7535_v18  ;;  %v5748_v27 = vsel %vm5480_vm0, %v11771_v8, 0.0  ;;  %v12661_v29 = vld [vmem:[%s13701_s20 + $0x170] sm:$0xff]  }
 0x15d   : > { %v7536_v38 = vpack.c.bf16 %v7030_v30, %v7029_v31  ;;  %5731 = vadd.xlane.f32.xlu1 %v5730_v24  ;;  %v11774_v28 = vunpack.c.l.bf16 %v12660_v10  ;;  %v11779_v41 = vunpack.c.h.bf16 %v12661_v29  ;;  %v11778_v49 = vunpack.c.l.bf16 %v12661_v29 }
 0x15e   : > { %v8659_v42 = vrot.slane %v8084_v34, %v13885_v52  ;;  %v8666_v45 = vrot.slane %v8085_v35, %v13888_v56  ;;  %5728 = vadd.xlane.f32.xlu0 %v5727_v32  ;;  %v5528_v46 = vpop.xlane.xlu1 %5527  ;;  %v5525_v47 = vpop.xlane.xlu0 %5524  ;;  %v11782_v8 = vunpack.c.l.bf16 %v12662_v58 }
 0x15f   : > { %v8086_v21 = vunpack.c.l.b16 %v7536_v38  ;;  %v8087_v50 = vunpack.c.h.b16 %v7536_v38  ;;  %v7032_v51 = vmul.f32 0.0625, %v5528_v46  ;;  %v7031_v57 = vmul.f32 0.0625, %v5525_v47 }
 0x160   : > { %v8661_v59 = vsel %vm8660_vm10, %v8659_v42, %v8654_v33  ;;  %v5745_v33 = vsel %vm5480_vm0, %v11770_v9, 0.0  ;;  %v12663_v9 = vld [vmem:[%s13701_s20 + $0x180] sm:$0xff]  }
 0x161   : > { %v8668_v63 = vsel %vm15905_vm11, %v8666_v45, %v8661_v59  ;;  %v8673_v1 = vrot.slane %v8086_v21, %v13903_v16  ;;  %v8680_v2 = vrot.slane %v8087_v50, %v13913_v37  ;;  %v7537_v3 = vpack.c.bf16 %v7032_v51, %v7031_v57  ;;  %5737 = vadd.xlane.f32.xlu1 %v5736_v40 }
 0x162   : > { %5734 = vadd.xlane.f32.xlu0 %v5733_v48  ;;  %v5534_v4 = vpop.xlane.xlu1 %5533  ;;  %v5531_v5 = vpop.xlane.xlu0 %5530  ;;  %v5754_v40 = vsel %vm5480_vm0, %v11775_v22, 0.0  ;;  %v5751_v48 = vsel %vm5480_vm0, %v11774_v28, 0.0  ;;  %v11786_v22 = vunpack.c.l.bf16 %v12663_v9 }
 0x163   : > { %v8675_v25 = vsel %vm8674_vm12, %v8673_v1, %v8668_v63  ;;  %v8088_v11 = vunpack.c.l.b16 %v7537_v3  ;;  %v8089_v12 = vunpack.c.h.b16 %v7537_v3  ;;  %v7034_v13 = vmul.f32 0.0625, %v5534_v4 }
 0x164   : > { %v8682_v14 = vsel %vm8681_vm13, %v8680_v2, %v8675_v25  ;;  %v7033_v15 = vmul.f32 0.0625, %v5531_v5  ;;  %v5760_v2 = vsel %vm5480_vm0, %v11779_v41, 0.0  ;;  %v5769_v41 = vsel %vm5480_vm0, %v11786_v22, 0.0 }
 0x165   : > { %v8687_v17 = vrot.slane %v8088_v11, %v13922_v61  ;;  %v8694_v18 = vrot.slane %v8089_v12, %v13925_v62  ;;  %5743 = vadd.xlane.f32.xlu1 %v5742_v6  ;;  %v5757_v6 = vsel %vm5480_vm0, %v11778_v49, 0.0 }
 0x166   : > { %v7538_v23 = vpack.c.bf16 %v7034_v13, %v7033_v15  ;;  %5740 = vadd.xlane.f32.xlu0 %v5739_v7  ;;  %v5540_v24 = vpop.xlane.xlu1 %5539  ;;  %v5537_v26 = vpop.xlane.xlu0 %5536  ;;  %v11783_v7 = vunpack.c.h.bf16 %v12662_v58  ;;  %v12665_v58 = vld [vmem:[%s13701_s20 + $0x190] sm:$0xff]  }
 0x167   : > { %v8689_v30 = vsel %vm8688_vm14, %v8687_v17, %v8682_v14  ;;  %v7036_v31 = vmul.f32 0.0625, %v5540_v24  ;;  %v7035_v32 = vmul.f32 0.0625, %v5537_v26 }
 0x168   : > { %v13942_v34 = vsel %vm8695_vm15, %v8694_v18, %v8689_v30  ;;  %v8090_v35 = vunpack.c.l.b16 %v7538_v23  ;;  %v8091_v36 = vunpack.c.h.b16 %v7538_v23  ;;  %v11787_v18 = vunpack.c.h.bf16 %v12663_v9 }
 0x169   : > { %v7539_v38 = vpack.c.bf16 %v7036_v31, %v7035_v32  ;;  %5749 = vadd.xlane.f32.xlu1 %v5748_v27  ;;  %v5766_v27 = vsel %vm5480_vm0, %v11783_v7, 0.0  ;;  %v5763_v31 = vsel %vm5480_vm0, %v11782_v8, 0.0  ;;  %v12664_v32 = vld [vmem:[%s13701_s20 + $0x188] sm:$0xff]   ;;  %v11795_v8 = vunpack.c.h.bf16 %v12665_v58 }
 0x16a   : > { %v8700_v42 = vrot.slane %v8090_v35, %v13830_v39  ;;  %v8704_v45 = vrot.slane %v8091_v36, %v13842_v53  ;;  %5746 = vadd.xlane.f32.xlu0 %v5745_v33  ;;  %v5546_v46 = vpop.xlane.xlu1 %5545  ;;  %v5543_v47 = vpop.xlane.xlu0 %5542  ;;  %v11790_v49 = vunpack.c.l.bf16 %v12664_v32  ;;  %v11794_v9 = vunpack.c.l.bf16 %v12665_v58 }
 0x16b   : > { %v8092_v21 = vunpack.c.l.b16 %v7539_v38  ;;  %v8093_v50 = vunpack.c.h.b16 %v7539_v38  ;;  %v7038_v51 = vmul.f32 0.0625, %v5546_v46  ;;  %v7037_v57 = vmul.f32 0.0625, %v5543_v47 }
 0x16c   : > { %v8705_v3 = vsel %vm8597_vm1, %v8704_v45, %v8700_v42  ;;  %v5775_v7 = vsel %vm5480_vm0, %v11790_v49, 0.0 }
 0x16d   : > { %v8709_v59 = vrot.slane %v8092_v21, %v13835_v43  ;;  %v8714_v63 = vrot.slane %v8093_v50, %v13838_v44  ;;  %v7540_v1 = vpack.c.bf16 %v7038_v51, %v7037_v57  ;;  %5755 = vadd.xlane.f32.xlu1 %v5754_v40  ;;  %v5772_v40 = vsel %vm5480_vm0, %v11787_v18, 0.0 }
 0x16e   : > { %5752 = vadd.xlane.f32.xlu0 %v5751_v48  ;;  %v5552_v4 = vpop.xlane.xlu1 %5551  ;;  %v5549_v5 = vpop.xlane.xlu0 %5548  ;;  %v11791_v48 = vunpack.c.h.bf16 %v12664_v32  ;;  %v5781_v32 = vsel %vm5480_vm0, %v11794_v9, 0.0 }
 0x16f   : > { %v8710_v10 = vsel %vm8604_vm2, %v8709_v59, %v8705_v3  ;;  %v8094_v25 = vunpack.c.l.b16 %v7540_v1  ;;  %v8095_v11 = vunpack.c.h.b16 %v7540_v1  ;;  %v7040_v12 = vmul.f32 0.0625, %v5552_v4 }
 0x170   : > { %v8715_v13 = vsel %vm8611_vm3, %v8714_v63, %v8710_v10  ;;  %v7039_v14 = vmul.f32 0.0625, %v5549_v5  ;;  %v12666_v10 = vld [vmem:[%s13701_s20 + $0x198] sm:$0xff]  }
 0x171   : > { %v8719_v15 = vrot.slane %v8094_v25, %v13845_v54  ;;  %v8724_v17 = vrot.slane %v8095_v11, %v13848_v55  ;;  %5761 = vadd.xlane.f32.xlu1 %v5760_v2  ;;  %v11799_v22 = vunpack.c.h.bf16 %v12666_v10 }
 0x172   : > { %v7541_v23 = vpack.c.bf16 %v7040_v12, %v7039_v14  ;;  %5758 = vadd.xlane.f32.xlu0 %v5757_v6  ;;  %v5558_v24 = vpop.xlane.xlu1 %5557  ;;  %v5555_v26 = vpop.xlane.xlu0 %5554  ;;  %v5778_v6 = vsel %vm5480_vm0, %v11791_v48, 0.0 }
 0x173   : > { %v8720_v28 = vsel %vm8618_vm4, %v8719_v15, %v8715_v13  ;;  %v7042_v29 = vmul.f32 0.0625, %v5558_v24  ;;  %v7041_v30 = vmul.f32 0.0625, %v5555_v26 }
 0x174   : > { %v8725_v33 = vsel %vm8625_vm5, %v8724_v17, %v8720_v28  ;;  %v8096_v35 = vunpack.c.l.b16 %v7541_v23  ;;  %v8097_v36 = vunpack.c.h.b16 %v7541_v23  ;;  %v11798_v23 = vunpack.c.l.bf16 %v12666_v10 }
 0x175   : > { %v7542_v38 = vpack.c.bf16 %v7042_v29, %v7041_v30  ;;  %5767 = vadd.xlane.f32.xlu1 %v5766_v27  ;;  %v5784_v28 = vsel %vm5480_vm0, %v11795_v8, 0.0 }
 0x176   : > { %v8729_v42 = vrot.slane %v8096_v35, %v13852_v60  ;;  %v8734_v45 = vrot.slane %v8097_v36, %v13856_v0  ;;  %5764 = vadd.xlane.f32.xlu0 %v5763_v31  ;;  %v5564_v46 = vpop.xlane.xlu1 %5563  ;;  %v5561_v47 = vpop.xlane.xlu0 %5560 }
 0x177   : > { %v8098_v21 = vunpack.c.l.b16 %v7542_v38  ;;  %v8099_v50 = vunpack.c.h.b16 %v7542_v38  ;;  %v7044_v51 = vmul.f32 0.0625, %v5564_v46  ;;  %v7043_v57 = vmul.f32 0.0625, %v5561_v47 }
 0x178   : > { %v8730_v59 = vsel %vm8632_vm6, %v8729_v42, %v8725_v33  ;;  %v12667_v33 = vld [vmem:[%s13701_s20 + $0x1a0] sm:$0xff]   ;;  %v5787_v42 = vsel %vm5480_vm0, %v11798_v23, 0.0 }
 0x179   : > { %v8735_v63 = vsel %vm8639_vm7, %v8734_v45, %v8730_v59  ;;  %v8739_v1 = vrot.slane %v8098_v21, %v13866_v19  ;;  %v8744_v2 = vrot.slane %v8099_v50, %v13869_v20  ;;  %v7543_v3 = vpack.c.bf16 %v7044_v51, %v7043_v57  ;;  %5773 = vadd.xlane.f32.xlu1 %v5772_v40  ;;  %v12668_v59 = vld [vmem:[%s13701_s20 + $0x1a8] sm:$0xff]  }
 0x17a   : > { %5770 = vadd.xlane.f32.xlu0 %v5769_v41  ;;  %v5570_v4 = vpop.xlane.xlu1 %5569  ;;  %v5567_v5 = vpop.xlane.xlu0 %5566  ;;  %v5790_v41 = vsel %vm5480_vm0, %v11799_v22, 0.0  ;;  %v11803_v49 = vunpack.c.h.bf16 %v12667_v33  ;;  %v11802_v21 = vunpack.c.l.bf16 %v12667_v33  ;;  %v11807_v9 = vunpack.c.h.bf16 %v12668_v59 }
 0x17b   : > { %v8740_v25 = vsel %vm8646_vm8, %v8739_v1, %v8735_v63  ;;  %v8100_v11 = vunpack.c.l.b16 %v7543_v3  ;;  %v8101_v12 = vunpack.c.h.b16 %v7543_v3  ;;  %v7046_v13 = vmul.f32 0.0625, %v5570_v4 }
 0x17c   : > { %v8745_v14 = vsel %vm15906_vm9, %v8744_v2, %v8740_v25  ;;  %v7045_v15 = vmul.f32 0.0625, %v5567_v5  ;;  %v5793_v8 = vsel %vm5480_vm0, %v11802_v21, 0.0  ;;  %v11806_v10 = vunpack.c.l.bf16 %v12668_v59  ;;  %v12669_v25 = vld [vmem:[%s13701_s20 + $0x1b0] sm:$0xff]   ;;  %v12671_v59 = vld [vmem:[%s13701_s20 + $0x1c0] sm:$0xff]  }
 0x17d   : > { %v8749_v17 = vrot.slane %v8100_v11, %v13885_v52  ;;  %v8754_v18 = vrot.slane %v8101_v12, %v13888_v56  ;;  %5779 = vadd.xlane.f32.xlu1 %v5778_v6  ;;  %v11810_v22 = vunpack.c.l.bf16 %v12669_v25 }
 0x17e   : > { %v7544_v24 = vpack.c.bf16 %v7046_v13, %v7045_v15  ;;  %5776 = vadd.xlane.f32.xlu0 %v5775_v7  ;;  %v5576_v26 = vpop.xlane.xlu1 %5575  ;;  %v5573_v27 = vpop.xlane.xlu0 %5572  ;;  %v5796_v7 = vsel %vm5480_vm0, %v11803_v49, 0.0  ;;  %v5799_v33 = vsel %vm5480_vm0, %v11806_v10, 0.0  ;;  %v11818_v10 = vunpack.c.l.bf16 %v12671_v59 }
 0x17f   : > { %v8750_v29 = vsel %vm8660_vm10, %v8749_v17, %v8745_v14  ;;  %v7048_v30 = vmul.f32 0.0625, %v5576_v26  ;;  %v7047_v31 = vmul.f32 0.0625, %v5573_v27 }
 0x180   : > { %v8755_v35 = vsel %vm15905_vm11, %v8754_v18, %v8750_v29  ;;  %v8102_v36 = vunpack.c.l.b16 %v7544_v24  ;;  %v8103_v38 = vunpack.c.h.b16 %v7544_v24  ;;  %v11811_v18 = vunpack.c.h.bf16 %v12669_v25  ;;  %v12672_v25 = vld [vmem:[%s13701_s20 + $0x1c8] sm:$0xff]  }
 0x181   : > { %v7545_v40 = vpack.c.bf16 %v7048_v30, %v7047_v31  ;;  %5785 = vadd.xlane.f32.xlu1 %v5784_v28  ;;  %v5802_v29 = vsel %vm5480_vm0, %v11807_v9, 0.0  ;;  %v12670_v30 = vld [vmem:[%s13701_s20 + $0x1b8] sm:$0xff]   ;;  %v11819_v9 = vunpack.c.h.bf16 %v12671_v59 }
 0x182   : > { %v8759_v45 = vrot.slane %v8102_v36, %v13903_v16  ;;  %v8764_v46 = vrot.slane %v8103_v38, %v13913_v37  ;;  %5782 = vadd.xlane.f32.xlu0 %v5781_v32  ;;  %v5582_v47 = vpop.xlane.xlu1 %5581  ;;  %v5579_v48 = vpop.xlane.xlu0 %5578  ;;  %v11814_v21 = vunpack.c.l.bf16 %v12670_v30 }
 0x183   : > { %v8104_v50 = vunpack.c.l.b16 %v7545_v40  ;;  %v8105_v51 = vunpack.c.h.b16 %v7545_v40  ;;  %v7050_v57 = vmul.f32 0.0625, %v5582_v47  ;;  %v7049_v58 = vmul.f32 0.0625, %v5579_v48 }
 0x184   : > { %v8760_v63 = vsel %vm8674_vm12, %v8759_v45, %v8755_v35  ;;  %v5808_v40 = vsel %vm5480_vm0, %v11811_v18, 0.0 }
 0x185   : > { %v8765_v1 = vsel %vm8681_vm13, %v8764_v46, %v8760_v63  ;;  %v8769_v2 = vrot.slane %v8104_v50, %v13922_v61  ;;  %v8774_v3 = vrot.slane %v8105_v51, %v13925_v62  ;;  %v7546_v4 = vpack.c.bf16 %v7050_v57, %v7049_v58  ;;  %5791 = vadd.xlane.f32.xlu1 %v5790_v41 }
 0x186   : > { %5788 = vadd.xlane.f32.xlu0 %v5787_v42  ;;  %v5588_v5 = vpop.xlane.xlu1 %5587  ;;  %v5585_v6 = vpop.xlane.xlu0 %5584  ;;  %v5805_v41 = vsel %vm5480_vm0, %v11810_v22, 0.0  ;;  %v11815_v42 = vunpack.c.h.bf16 %v12670_v30  ;;  %v5820_v30 = vsel %vm5480_vm0, %v11819_v9, 0.0 }
 0x187   : > { %v8770_v11 = vsel %vm8688_vm14, %v8769_v2, %v8765_v1  ;;  %v8106_v12 = vunpack.c.l.b16 %v7546_v4  ;;  %v8107_v13 = vunpack.c.h.b16 %v7546_v4  ;;  %v7052_v14 = vmul.f32 0.0625, %v5588_v5 }
 0x188   : > { %v13999_v15 = vsel %vm8695_vm15, %v8774_v3, %v8770_v11  ;;  %v7051_v17 = vmul.f32 0.0625, %v5585_v6 }
 0x189   : > { %5797 = vadd.xlane.f32.xlu1 %v5796_v7  ;;  %v8779_v23 = vrot.slane %v8106_v12, %v13830_v39  ;;  %v8783_v24 = vrot.slane %v8107_v13, %v13842_v53  ;;  %v5814_v7 = vsel %vm5480_vm0, %v11815_v42, 0.0 }
 0x18a   : > { %v7547_v26 = vpack.c.bf16 %v7052_v14, %v7051_v17  ;;  %5794 = vadd.xlane.f32.xlu0 %v5793_v8  ;;  %v5594_v27 = vpop.xlane.xlu1 %5593  ;;  %v5591_v28 = vpop.xlane.xlu0 %5590  ;;  %v5811_v8 = vsel %vm5480_vm0, %v11814_v21, 0.0 }
 0x18b   : > { %v7054_v31 = vmul.f32 0.0625, %v5594_v27  ;;  %v7053_v32 = vmul.f32 0.0625, %v5591_v28  ;;  %v8784_v45 = vsel %vm8597_vm1, %v8783_v24, %v8779_v23  ;;  %v11823_v24 = vunpack.c.h.bf16 %v12672_v25 }
 0x18c   : > { %v8108_v35 = vunpack.c.l.b16 %v7547_v26  ;;  %v8109_v36 = vunpack.c.h.b16 %v7547_v26  ;;  %v11822_v26 = vunpack.c.l.bf16 %v12672_v25 }
 0x18d   : > { %v7548_v38 = vpack.c.bf16 %v7054_v31, %v7053_v32  ;;  %5803 = vadd.xlane.f32.xlu1 %v5802_v29 }
 0x18e   : > { %v8788_v46 = vrot.slane %v8108_v35, %v13835_v43  ;;  %v8793_v47 = vrot.slane %v8109_v36, %v13838_v44  ;;  %5800 = vadd.xlane.f32.xlu0 %v5799_v33  ;;  %v5600_v48 = vpop.xlane.xlu1 %5599  ;;  %v5597_v49 = vpop.xlane.xlu0 %5596  ;;  %v5817_v35 = vsel %vm5480_vm0, %v11818_v10, 0.0  ;;  %v12673_v36 = vld [vmem:[%s13701_s20 + $0x1d0] sm:$0xff]  }
 0x18f   : > { %v8110_v50 = vunpack.c.l.b16 %v7548_v38  ;;  %v8111_v51 = vunpack.c.h.b16 %v7548_v38  ;;  %v7056_v57 = vmul.f32 0.0625, %v5600_v48  ;;  %v7055_v58 = vmul.f32 0.0625, %v5597_v49 }
 0x190   : > { %v8789_v63 = vsel %vm8604_vm2, %v8788_v46, %v8784_v45  ;;  %v5826_v45 = vsel %vm5480_vm0, %v11823_v24, 0.0  ;;  %v5823_v46 = vsel %vm5480_vm0, %v11822_v26, 0.0 }
 0x191   : > { %v8794_v1 = vsel %vm8611_vm3, %v8793_v47, %v8789_v63  ;;  %v8798_v2 = vrot.slane %v8110_v50, %v13845_v54  ;;  %v8803_v3 = vrot.slane %v8111_v51, %v13848_v55  ;;  %v7549_v4 = vpack.c.bf16 %v7056_v57, %v7055_v58  ;;  %5809 = vadd.xlane.f32.xlu1 %v5808_v40 }
 0x192   : > { %5806 = vadd.xlane.f32.xlu0 %v5805_v41  ;;  %v5606_v5 = vpop.xlane.xlu1 %5605  ;;  %v5603_v6 = vpop.xlane.xlu0 %5602  ;;  %v11827_v50 = vunpack.c.h.bf16 %v12673_v36  ;;  %v11826_v51 = vunpack.c.l.bf16 %v12673_v36 }
 0x193   : > { %v8799_v11 = vsel %vm8618_vm4, %v8798_v2, %v8794_v1  ;;  %v8112_v12 = vunpack.c.l.b16 %v7549_v4  ;;  %v8113_v13 = vunpack.c.h.b16 %v7549_v4  ;;  %v7058_v14 = vmul.f32 0.0625, %v5606_v5  ;;  %v12674_v1 = vld [vmem:[%s13701_s20 + $0x1d8] sm:$0xff]  }
 0x194   : > { %v8804_v17 = vsel %vm8625_vm5, %v8803_v3, %v8799_v11  ;;  %v7057_v18 = vmul.f32 0.0625, %v5603_v6  ;;  %v5832_v9 = vsel %vm5480_vm0, %v11827_v50, 0.0  ;;  %v5829_v10 = vsel %vm5480_vm0, %v11826_v51, 0.0 }
 0x195   : > { %v8808_v22 = vrot.slane %v8112_v12, %v13852_v60  ;;  %v8813_v23 = vrot.slane %v8113_v13, %v13856_v0  ;;  %5815 = vadd.xlane.f32.xlu1 %v5814_v7  ;;  %v11831_v25 = vunpack.c.h.bf16 %v12674_v1  ;;  %v11830_v11 = vunpack.c.l.bf16 %v12674_v1  ;;  %v12675_v12 = vld [vmem:[%s13701_s20 + $0x1e0] sm:$0xff]  }
 0x196   : > { %v7550_v27 = vpack.c.bf16 %v7058_v14, %v7057_v18  ;;  %5812 = vadd.xlane.f32.xlu0 %v5811_v8  ;;  %v5612_v28 = vpop.xlane.xlu1 %5611  ;;  %v5609_v29 = vpop.xlane.xlu0 %5608 }
 0x197   : > { %v8809_v31 = vsel %vm8632_vm6, %v8808_v22, %v8804_v17  ;;  %v7060_v32 = vmul.f32 0.0625, %v5612_v28  ;;  %v7059_v33 = vmul.f32 0.0625, %v5609_v29 }
 0x198   : > { %v8814_v38 = vsel %vm8639_vm7, %v8813_v23, %v8809_v31  ;;  %v8114_v40 = vunpack.c.l.b16 %v7550_v27  ;;  %v8115_v41 = vunpack.c.h.b16 %v7550_v27  ;;  %v11835_v27 = vunpack.c.h.bf16 %v12675_v12 }
 0x199   : > { %v7551_v42 = vpack.c.bf16 %v7060_v32, %v7059_v33  ;;  %5821 = vadd.xlane.f32.xlu1 %v5820_v30  ;;  %v5838_v31 = vsel %vm5480_vm0, %v11831_v25, 0.0  ;;  %v11834_v32 = vunpack.c.l.bf16 %v12675_v12  ;;  %v12676_v33 = vld [vmem:[%s13701_s20 + $0x1e8] sm:$0xff]  }
 0x19a   : > { %v8818_v47 = vrot.slane %v8114_v40, %v13866_v19  ;;  %v8823_v48 = vrot.slane %v8115_v41, %v13869_v20  ;;  %5818 = vadd.xlane.f32.xlu0 %v5817_v35  ;;  %v5618_v49 = vpop.xlane.xlu1 %5617  ;;  %v5615_v21 = vpop.xlane.xlu0 %5614  ;;  %v5835_v40 = vsel %vm5480_vm0, %v11830_v11, 0.0 }
 0x19b   : > { %v8116_v57 = vunpack.c.l.b16 %v7551_v42  ;;  %v8117_v58 = vunpack.c.h.b16 %v7551_v42  ;;  %v7062_v59 = vmul.f32 0.0625, %v5618_v49  ;;  %v7061_v63 = vmul.f32 0.0625, %v5615_v21 }
 0x19c   : > { %v8819_v2 = vsel %vm8646_vm8, %v8818_v47, %v8814_v38  ;;  %v5844_v47 = vsel %vm5480_vm0, %v11835_v27, 0.0 }
 0x19d   : > { %v8824_v3 = vsel %vm15906_vm9, %v8823_v48, %v8819_v2  ;;  %v8828_v4 = vrot.slane %v8116_v57, %v13885_v52  ;;  %v8833_v5 = vrot.slane %v8117_v58, %v13888_v56  ;;  %v7552_v6 = vpack.c.bf16 %v7062_v59, %v7061_v63  ;;  %5827 = vadd.xlane.f32.xlu1 %v5826_v45 }
 0x19e   : > { %5824 = vadd.xlane.f32.xlu0 %v5823_v46  ;;  %v5624_v7 = vpop.xlane.xlu1 %5623  ;;  %v5621_v8 = vpop.xlane.xlu0 %5620  ;;  %v11839_v48 = vunpack.c.h.bf16 %v12676_v33  ;;  %v5841_v57 = vsel %vm5480_vm0, %v11834_v32, 0.0  ;;  %v11838_v58 = vunpack.c.l.bf16 %v12676_v33 }
 0x19f   : > { %v8829_v13 = vsel %vm8660_vm10, %v8828_v4, %v8824_v3  ;;  %v8118_v14 = vunpack.c.l.b16 %v7552_v6  ;;  %v8119_v17 = vunpack.c.h.b16 %v7552_v6  ;;  %v7064_v18 = vmul.f32 0.0625, %v5624_v7  ;;  %v12677_v3 = vld [vmem:[%s13701_s20 + $0x1f0] sm:$0xff]  }
 0x1a0   : > { %v8834_v22 = vsel %vm15905_vm11, %v8833_v5, %v8829_v13  ;;  %v7063_v23 = vmul.f32 0.0625, %v5621_v8  ;;  %v5850_v7 = vsel %vm5480_vm0, %v11839_v48, 0.0  ;;  %v5847_v11 = vsel %vm5480_vm0, %v11838_v58, 0.0  ;;  %v12678_v13 = vld [vmem:[%s13701_s20 + $0x1f8] sm:$0xff]  }
 0x1a1   : > { %v8838_v24 = vrot.slane %v8118_v14, %v13903_v16  ;;  %v8843_v26 = vrot.slane %v8119_v17, %v13913_v37  ;;  %5833 = vadd.xlane.f32.xlu1 %v5832_v9  ;;  %v11843_v12 = vunpack.c.h.bf16 %v12677_v3  ;;  %v11847_v27 = vunpack.c.h.bf16 %v12678_v13 }
 0x1a2   : > { %v7553_v28 = vpack.c.bf16 %v7064_v18, %v7063_v23  ;;  %5830 = vadd.xlane.f32.xlu0 %v5829_v10  ;;  %v5630_v29 = vpop.xlane.xlu1 %5629  ;;  %v5627_v30 = vpop.xlane.xlu0 %5626 }
 0x1a3   : > { %v8839_v35 = vsel %vm8674_vm12, %v8838_v24, %v8834_v22  ;;  %v7066_v36 = vmul.f32 0.0625, %v5630_v29  ;;  %v7065_v38 = vmul.f32 0.0625, %v5627_v30  ;;  %v11842_v22 = vunpack.c.l.bf16 %v12677_v3 }
 0x1a4   : > { %v8844_v41 = vsel %vm8681_vm13, %v8843_v26, %v8839_v35  ;;  %v8120_v42 = vunpack.c.l.b16 %v7553_v28  ;;  %v8121_v45 = vunpack.c.h.b16 %v7553_v28  ;;  %v11846_v28 = vunpack.c.l.bf16 %v12678_v13 }
 0x1a5   : > { %v7554_v46 = vpack.c.bf16 %v7066_v36, %v7065_v38  ;;  %5839 = vadd.xlane.f32.xlu1 %v5838_v31  ;;  %v5856_v33 = vsel %vm5480_vm0, %v11843_v12, 0.0  ;;  %v5862_v48 = vsel %vm5480_vm0, %v11847_v27, 0.0 }
 0x1a6   : > { %v8848_v49 = vrot.slane %v8120_v42, %v13922_v61  ;;  %v8853_v21 = vrot.slane %v8121_v45, %v13925_v62  ;;  %5836 = vadd.xlane.f32.xlu0 %v5835_v40  ;;  %v5636_v50 = vpop.xlane.xlu1 %5635  ;;  %v5633_v51 = vpop.xlane.xlu0 %5632  ;;  %v5853_v40 = vsel %vm5480_vm0, %v11842_v22, 0.0 }
 0x1a7   : > { %v8122_v59 = vunpack.c.l.b16 %v7554_v46  ;;  %v8123_v63 = vunpack.c.h.b16 %v7554_v46  ;;  %v7068_v1 = vmul.f32 0.0625, %v5636_v50  ;;  %v7067_v2 = vmul.f32 0.0625, %v5633_v51 }
 0x1a8   : > { %v8849_v4 = vsel %vm8688_vm14, %v8848_v49, %v8844_v41  ;;  %v12679_v41 = vld [vmem:[%s13701_s20 + $0x200] sm:$0xff]   ;;  %v5859_v49 = vsel %vm5480_vm0, %v11846_v28, 0.0 }
 0x1a9   : > { %v14056_v5 = vsel %vm8695_vm15, %v8853_v21, %v8849_v4  ;;  %v7555_v6 = vpack.c.bf16 %v7068_v1, %v7067_v2  ;;  %5845 = vadd.xlane.f32.xlu1 %v5844_v47  ;;  %v8858_v8 = vrot.slane %v8122_v59, %v13830_v39  ;;  %v8862_v9 = vrot.slane %v8123_v63, %v13842_v53  ;;  %v12680_v4 = vld [vmem:[%s13701_s20 + $0x208] sm:$0xff]  }
 0x1aa   : > { %5842 = vadd.xlane.f32.xlu0 %v5841_v57  ;;  %v5642_v10 = vpop.xlane.xlu1 %5641  ;;  %v5639_v25 = vpop.xlane.xlu0 %5638  ;;  %v11851_v58 = vunpack.c.h.bf16 %v12679_v41  ;;  %v11850_v59 = vunpack.c.l.bf16 %v12679_v41 }
 0x1ab   : > { %v8124_v14 = vunpack.c.l.b16 %v7555_v6  ;;  %v8125_v17 = vunpack.c.h.b16 %v7555_v6  ;;  %v7070_v18 = vmul.f32 0.0625, %v5642_v10  ;;  %v7069_v23 = vmul.f32 0.0625, %v5639_v25 }
 0x1ac   : > { %v8863_v29 = vsel %vm8597_vm1, %v8862_v9, %v8858_v8  ;;  %v5868_v12 = vsel %vm5480_vm0, %v11851_v58, 0.0  ;;  %v5865_v13 = vsel %vm5480_vm0, %v11850_v59, 0.0 }
 0x1ad   : > { %v8867_v24 = vrot.slane %v8124_v14, %v13835_v43  ;;  %v8872_v26 = vrot.slane %v8125_v17, %v13838_v44  ;;  %5851 = vadd.xlane.f32.xlu1 %v5850_v7  ;;  %v7556_v30 = vpack.c.bf16 %v7070_v18, %v7069_v23  ;;  %v11855_v14 = vunpack.c.h.bf16 %v12680_v4  ;;  %v12681_v18 = vld [vmem:[%s13701_s20 + $0x210] sm:$0xff]  }
 0x1ae   : > { %5848 = vadd.xlane.f32.xlu0 %v5847_v11  ;;  %v5648_v31 = vpop.xlane.xlu1 %5647  ;;  %v5645_v32 = vpop.xlane.xlu0 %5644  ;;  %v11854_v17 = vunpack.c.l.bf16 %v12680_v4 }
 0x1af   : > { %v8868_v35 = vsel %vm8604_vm2, %v8867_v24, %v8863_v29  ;;  %v7072_v36 = vmul.f32 0.0625, %v5648_v31  ;;  %v7071_v38 = vmul.f32 0.0625, %v5645_v32  ;;  %v8126_v45 = vunpack.c.l.b16 %v7556_v30 }
 0x1b0   : > { %v8873_v42 = vsel %vm8611_vm3, %v8872_v26, %v8868_v35  ;;  %v8127_v46 = vunpack.c.h.b16 %v7556_v30  ;;  %v11859_v31 = vunpack.c.h.bf16 %v12681_v18  ;;  %v11858_v32 = vunpack.c.l.bf16 %v12681_v18 }
 0x1b1   : > { %v7557_v47 = vpack.c.bf16 %v7072_v36, %v7071_v38  ;;  %5857 = vadd.xlane.f32.xlu1 %v5856_v33  ;;  %v8877_v21 = vrot.slane %v8126_v45, %v13845_v54  ;;  %v5874_v38 = vsel %vm5480_vm0, %v11855_v14, 0.0  ;;  %v5871_v45 = vsel %vm5480_vm0, %v11854_v17, 0.0 }
 0x1b2   : > { %v8882_v50 = vrot.slane %v8127_v46, %v13848_v55  ;;  %5854 = vadd.xlane.f32.xlu0 %v5853_v40  ;;  %v5654_v51 = vpop.xlane.xlu1 %5653  ;;  %v5651_v57 = vpop.xlane.xlu0 %5650  ;;  %v12682_v46 = vld [vmem:[%s13701_s20 + $0x218] sm:$0xff]  }
 0x1b3   : > { %v8128_v63 = vunpack.c.l.b16 %v7557_v47  ;;  %v8129_v1 = vunpack.c.h.b16 %v7557_v47  ;;  %v7074_v2 = vmul.f32 0.0625, %v5654_v51  ;;  %v7073_v3 = vmul.f32 0.0625, %v5651_v57 }
 0x1b4   : > { %v8878_v6 = vsel %vm8618_vm4, %v8877_v21, %v8873_v42  ;;  %v5877_v51 = vsel %vm5480_vm0, %v11858_v32, 0.0 }
 0x1b5   : > { %v8883_v7 = vsel %vm8625_vm5, %v8882_v50, %v8878_v6  ;;  %v8887_v8 = vrot.slane %v8128_v63, %v13852_v60  ;;  %v8892_v9 = vrot.slane %v8129_v1, %v13856_v0  ;;  %v7558_v10 = vpack.c.bf16 %v7074_v2, %v7073_v3  ;;  %5863 = vadd.xlane.f32.xlu1 %v5862_v48 }
 0x1b6   : > { %5860 = vadd.xlane.f32.xlu0 %v5859_v49  ;;  %v5660_v25 = vpop.xlane.xlu1 %5659  ;;  %v5657_v11 = vpop.xlane.xlu0 %5656  ;;  %v5880_v50 = vsel %vm5480_vm0, %v11859_v31, 0.0  ;;  %v11863_v1 = vunpack.c.h.bf16 %v12682_v46  ;;  %v11862_v2 = vunpack.c.l.bf16 %v12682_v46 }
 0x1b7   : > { %v8888_v22 = vsel %vm8632_vm6, %v8887_v8, %v8883_v7  ;;  %v8130_v23 = vunpack.c.l.b16 %v7558_v10  ;;  %v8131_v24 = vunpack.c.h.b16 %v7558_v10  ;;  %v7076_v26 = vmul.f32 0.0625, %v5660_v25  ;;  %v12683_v8 = vld [vmem:[%s13701_s20 + $0x220] sm:$0xff]  }
 0x1b8   : > { %v8893_v27 = vsel %vm8639_vm7, %v8892_v9, %v8888_v22  ;;  %v7075_v28 = vmul.f32 0.0625, %v5657_v11  ;;  %v5886_v17 = vsel %vm5480_vm0, %v11863_v1, 0.0  ;;  %v5883_v18 = vsel %vm5480_vm0, %v11862_v2, 0.0 }
 0x1b9   : > { %v8897_v29 = vrot.slane %v8130_v23, %v13866_v19  ;;  %v8902_v30 = vrot.slane %v8131_v24, %v13869_v20  ;;  %5869 = vadd.xlane.f32.xlu1 %v5868_v12  ;;  %v11867_v22 = vunpack.c.h.bf16 %v12683_v8  ;;  %v11866_v23 = vunpack.c.l.bf16 %v12683_v8  ;;  %v12684_v24 = vld [vmem:[%s13701_s20 + $0x228] sm:$0xff]  }
 0x1ba   : > { %v7559_v33 = vpack.c.bf16 %v7076_v26, %v7075_v28  ;;  %5866 = vadd.xlane.f32.xlu0 %v5865_v13  ;;  %v5666_v35 = vpop.xlane.xlu1 %5665  ;;  %v5663_v36 = vpop.xlane.xlu0 %5662 }
 0x1bb   : > { %v8898_v40 = vsel %vm8646_vm8, %v8897_v29, %v8893_v27  ;;  %v7078_v41 = vmul.f32 0.0625, %v5666_v35  ;;  %v7077_v42 = vmul.f32 0.0625, %v5663_v36  ;;  %v11871_v35 = vunpack.c.h.bf16 %v12684_v24 }
 0x1bc   : > { %v8903_v47 = vsel %vm15906_vm9, %v8902_v30, %v8898_v40  ;;  %v8132_v48 = vunpack.c.l.b16 %v7559_v33  ;;  %v8133_v49 = vunpack.c.h.b16 %v7559_v33 }
 0x1bd   : > { %v7560_v21 = vpack.c.bf16 %v7078_v41, %v7077_v42  ;;  %5875 = vadd.xlane.f32.xlu1 %v5874_v38  ;;  %v5892_v41 = vsel %vm5480_vm0, %v11867_v22, 0.0  ;;  %v11870_v42 = vunpack.c.l.bf16 %v12684_v24 }
 0x1be   : > { %v8907_v57 = vrot.slane %v8132_v48, %v13885_v52  ;;  %v8912_v58 = vrot.slane %v8133_v49, %v13888_v56  ;;  %5872 = vadd.xlane.f32.xlu0 %v5871_v45  ;;  %v5672_v59 = vpop.xlane.xlu1 %5671  ;;  %v5669_v63 = vpop.xlane.xlu0 %5668  ;;  %v12685_v45 = vld [vmem:[%s13701_s20 + $0x230] sm:$0xff]   ;;  %v5889_v49 = vsel %vm5480_vm0, %v11866_v23, 0.0 }
 0x1bf   : > { %v8134_v3 = vunpack.c.l.b16 %v7560_v21  ;;  %v8135_v4 = vunpack.c.h.b16 %v7560_v21  ;;  %v7080_v6 = vmul.f32 0.0625, %v5672_v59  ;;  %v7079_v7 = vmul.f32 0.0625, %v5669_v63 }
 0x1c0   : > { %v8908_v9 = vsel %vm8660_vm10, %v8907_v57, %v8903_v47  ;;  %v11875_v59 = vunpack.c.h.bf16 %v12685_v45 }
 0x1c1   : > { %v8913_v10 = vsel %vm15905_vm11, %v8912_v58, %v8908_v9  ;;  %v8917_v25 = vrot.slane %v8134_v3, %v13903_v16  ;;  %v8922_v11 = vrot.slane %v8135_v4, %v13913_v37  ;;  %v7561_v12 = vpack.c.bf16 %v7080_v6, %v7079_v7  ;;  %5881 = vadd.xlane.f32.xlu1 %v5880_v50 }
 0x1c2   : > { %5878 = vadd.xlane.f32.xlu0 %v5877_v51  ;;  %v5678_v13 = vpop.xlane.xlu1 %5677  ;;  %v5675_v14 = vpop.xlane.xlu0 %5674  ;;  %v5898_v58 = vsel %vm5480_vm0, %v11871_v35, 0.0  ;;  %v5895_v4 = vsel %vm5480_vm0, %v11870_v42, 0.0  ;;  %v11874_v6 = vunpack.c.l.bf16 %v12685_v45 }
 0x1c3   : > { %v8918_v26 = vsel %vm8674_vm12, %v8917_v25, %v8913_v10  ;;  %v8136_v27 = vunpack.c.l.b16 %v7561_v12  ;;  %v8137_v28 = vunpack.c.h.b16 %v7561_v12  ;;  %v7082_v29 = vmul.f32 0.0625, %v5678_v13  ;;  %v12686_v25 = vld [vmem:[%s13701_s20 + $0x238] sm:$0xff]  }
 0x1c4   : > { %v8923_v30 = vsel %vm8681_vm13, %v8922_v11, %v8918_v26  ;;  %v7081_v31 = vmul.f32 0.0625, %v5675_v14  ;;  %v5904_v14 = vsel %vm5480_vm0, %v11875_v59, 0.0  ;;  %v5901_v23 = vsel %vm5480_vm0, %v11874_v6, 0.0 }
 0x1c5   : > { %v8927_v32 = vrot.slane %v8136_v27, %v13922_v61  ;;  %v8932_v33 = vrot.slane %v8137_v28, %v13925_v62  ;;  %5887 = vadd.xlane.f32.xlu1 %v5886_v17  ;;  %v11879_v24 = vunpack.c.h.bf16 %v12686_v25  ;;  %v11878_v26 = vunpack.c.l.bf16 %v12686_v25  ;;  %v12687_v27 = vld [vmem:[%s13701_s20 + $0x240] sm:$0xff]  }
 0x1c6   : > { %v7562_v36 = vpack.c.bf16 %v7082_v29, %v7081_v31  ;;  %5884 = vadd.xlane.f32.xlu0 %v5883_v18  ;;  %v5684_v38 = vpop.xlane.xlu1 %5683  ;;  %v5681_v40 = vpop.xlane.xlu0 %5680 }
 0x1c7   : > { %v8928_v46 = vsel %vm8688_vm14, %v8927_v32, %v8923_v30  ;;  %v7084_v47 = vmul.f32 0.0625, %v5684_v38  ;;  %v7083_v48 = vmul.f32 0.0625, %v5681_v40  ;;  %v11883_v38 = vunpack.c.h.bf16 %v12687_v27 }
 0x1c8   : > { %v14113_v21 = vsel %vm8695_vm15, %v8932_v33, %v8928_v46  ;;  %v8138_v50 = vunpack.c.l.b16 %v7562_v36  ;;  %v8139_v51 = vunpack.c.h.b16 %v7562_v36  ;;  %v5910_v45 = vsel %vm5480_vm0, %v11879_v24, 0.0 }
 0x1c9   : > { %v7563_v57 = vpack.c.bf16 %v7084_v47, %v7083_v48  ;;  %5893 = vadd.xlane.f32.xlu1 %v5892_v41  ;;  %v11882_v46 = vunpack.c.l.bf16 %v12687_v27 }
 0x1ca   : > { %v8937_v63 = vrot.slane %v8138_v50, %v13830_v39  ;;  %v8941_v1 = vrot.slane %v8139_v51, %v13842_v53  ;;  %5890 = vadd.xlane.f32.xlu0 %v5889_v49  ;;  %v5690_v2 = vpop.xlane.xlu1 %5689  ;;  %v5687_v3 = vpop.xlane.xlu0 %5686  ;;  %v5907_v50 = vsel %vm5480_vm0, %v11878_v26, 0.0  ;;  %v12688_v51 = vld [vmem:[%s13701_s20 + $0x248] sm:$0xff]  }
 0x1cb   : > { %v8140_v7 = vunpack.c.l.b16 %v7563_v57  ;;  %v8141_v8 = vunpack.c.h.b16 %v7563_v57  ;;  %v7086_v9 = vmul.f32 0.0625, %v5690_v2  ;;  %v7085_v10 = vmul.f32 0.0625, %v5687_v3 }
 0x1cc   : > { %v8942_v17 = vsel %vm8597_vm1, %v8941_v1, %v8937_v63  ;;  %v5916_v1 = vsel %vm5480_vm0, %v11883_v38, 0.0  ;;  %v5913_v6 = vsel %vm5480_vm0, %v11882_v46, 0.0 }
 0x1cd   : > { %v8946_v11 = vrot.slane %v8140_v7, %v13835_v43  ;;  %v8951_v12 = vrot.slane %v8141_v8, %v13838_v44  ;;  %v7564_v13 = vpack.c.bf16 %v7086_v9, %v7085_v10  ;;  %5899 = vadd.xlane.f32.xlu1 %v5898_v58  ;;  %v11887_v7 = vunpack.c.h.bf16 %v12688_v51  ;;  %v12689_v8 = vld [vmem:[%s13701_s20 + $0x250] sm:$0xff]  }
 0x1ce   : > { %5896 = vadd.xlane.f32.xlu0 %v5895_v4  ;;  %v5696_v18 = vpop.xlane.xlu1 %5695  ;;  %v5693_v22 = vpop.xlane.xlu0 %5692 }
 0x1cf   : > { %v8947_v28 = vsel %vm8604_vm2, %v8946_v11, %v8942_v17  ;;  %v8142_v29 = vunpack.c.l.b16 %v7564_v13  ;;  %v8143_v30 = vunpack.c.h.b16 %v7564_v13  ;;  %v7088_v31 = vmul.f32 0.0625, %v5696_v18 }
 0x1d0   : > { %v8952_v32 = vsel %vm8611_vm3, %v8951_v12, %v8947_v28  ;;  %v7087_v33 = vmul.f32 0.0625, %v5693_v22  ;;  %v11886_v12 = vunpack.c.l.bf16 %v12688_v51  ;;  %v5922_v27 = vsel %vm5480_vm0, %v11887_v7, 0.0 }
 0x1d1   : > { %v8956_v35 = vrot.slane %v8142_v29, %v13845_v54  ;;  %v8961_v36 = vrot.slane %v8143_v30, %v13848_v55  ;;  %5905 = vadd.xlane.f32.xlu1 %v5904_v14 }
 0x1d2   : > { %v7565_v40 = vpack.c.bf16 %v7088_v31, %v7087_v33  ;;  %5902 = vadd.xlane.f32.xlu0 %v5901_v23  ;;  %v5702_v41 = vpop.xlane.xlu1 %5701  ;;  %v5699_v42 = vpop.xlane.xlu0 %5698  ;;  %v11891_v23 = vunpack.c.h.bf16 %v12689_v8  ;;  %v5919_v31 = vsel %vm5480_vm0, %v11886_v12, 0.0  ;;  %v12690_v33 = vld [vmem:[%s13701_s20 + $0x258] sm:$0xff]  }
 0x1d3   : > { %v8957_v47 = vsel %vm8618_vm4, %v8956_v35, %v8952_v32  ;;  %v7090_v48 = vmul.f32 0.0625, %v5702_v41  ;;  %v7089_v49 = vmul.f32 0.0625, %v5699_v42  ;;  %v11890_v32 = vunpack.c.l.bf16 %v12689_v8 }
 0x1d4   : > { %v8962_v57 = vsel %vm8625_vm5, %v8961_v36, %v8957_v47  ;;  %v8144_v58 = vunpack.c.l.b16 %v7565_v40  ;;  %v8145_v59 = vunpack.c.h.b16 %v7565_v40  ;;  %v5928_v41 = vsel %vm5480_vm0, %v11891_v23, 0.0 }
 0x1d5   : > { %v7566_v63 = vpack.c.bf16 %v7090_v48, %v7089_v49  ;;  %5911 = vadd.xlane.f32.xlu1 %v5910_v45  ;;  %v11895_v48 = vunpack.c.h.bf16 %v12690_v33  ;;  %v12691_v49 = vld [vmem:[%s13701_s20 + $0x260] sm:$0xff]  }
 0x1d6   : > { %v8966_v2 = vrot.slane %v8144_v58, %v13852_v60  ;;  %v8971_v3 = vrot.slane %v8145_v59, %v13856_v0  ;;  %5908 = vadd.xlane.f32.xlu0 %v5907_v50  ;;  %v5708_v4 = vpop.xlane.xlu1 %5707  ;;  %v5705_v11 = vpop.xlane.xlu0 %5704  ;;  %v11894_v58 = vunpack.c.l.bf16 %v12690_v33  ;;  %v12693_v33 = vld [vmem:[%s13701_s20 + $0x270] sm:$0xff]  }
 0x1d7   : > { %v8146_v9 = vunpack.c.l.b16 %v7566_v63  ;;  %v8147_v10 = vunpack.c.h.b16 %v7566_v63  ;;  %v7092_v25 = vmul.f32 0.0625, %v5708_v4  ;;  %v7091_v14 = vmul.f32 0.0625, %v5705_v11 }
 0x1d8   : > { %v8967_v13 = vsel %vm8632_vm6, %v8966_v2, %v8962_v57  ;;  %v5925_v57 = vsel %vm5480_vm0, %v11890_v32, 0.0  ;;  %v11899_v4 = vunpack.c.h.bf16 %v12691_v49 }
 0x1d9   : > { %v8972_v17 = vsel %vm8639_vm7, %v8971_v3, %v8967_v13  ;;  %v8976_v18 = vrot.slane %v8146_v9, %v13866_v19  ;;  %v8981_v22 = vrot.slane %v8147_v10, %v13869_v20  ;;  %5917 = vadd.xlane.f32.xlu1 %v5916_v1  ;;  %v7567_v24 = vpack.c.bf16 %v7092_v25, %v7091_v14  ;;  %v12692_v25 = vld [vmem:[%s13701_s20 + $0x268] sm:$0xff]  }
 0x1da   : > { %5914 = vadd.xlane.f32.xlu0 %v5913_v6  ;;  %v5714_v26 = vpop.xlane.xlu1 %5713  ;;  %v5711_v30 = vpop.xlane.xlu0 %5710  ;;  %v5934_v10 = vsel %vm5480_vm0, %v11895_v48, 0.0  ;;  %v5931_v13 = vsel %vm5480_vm0, %v11894_v58, 0.0  ;;  %v11898_v14 = vunpack.c.l.bf16 %v12691_v49  ;;  %v11902_v32 = vunpack.c.l.bf16 %v12692_v25 }
 0x1db   : > { %v8977_v28 = vsel %vm8646_vm8, %v8976_v18, %v8972_v17  ;;  %v7094_v29 = vmul.f32 0.0625, %v5714_v26  ;;  %v8148_v36 = vunpack.c.l.b16 %v7567_v24  ;;  %v8149_v38 = vunpack.c.h.b16 %v7567_v24 }
 0x1dc   : > { %v8982_v35 = vsel %vm15906_vm9, %v8981_v22, %v8977_v28  ;;  %v7093_v40 = vmul.f32 0.0625, %v5711_v30  ;;  %v5940_v26 = vsel %vm5480_vm0, %v11899_v4, 0.0 }
 0x1dd   : > { %5923 = vadd.xlane.f32.xlu1 %v5922_v27  ;;  %v8986_v42 = vrot.slane %v8148_v36, %v13885_v52  ;;  %v8991_v45 = vrot.slane %v8149_v38, %v13888_v56  ;;  %v11903_v27 = vunpack.c.h.bf16 %v12692_v25  ;;  %v5937_v38 = vsel %vm5480_vm0, %v11898_v14, 0.0 }
 0x1de   : > { %v7568_v46 = vpack.c.bf16 %v7094_v29, %v7093_v40  ;;  %5920 = vadd.xlane.f32.xlu0 %v5919_v31  ;;  %v5720_v47 = vpop.xlane.xlu1 %5719 }
 0x1df   : > { %v7096_v50 = vmul.f32 0.0625, %v5720_v47  ;;  %v5717_v51 = vpop.xlane.xlu0 %5716  ;;  %v8987_v59 = vsel %vm8660_vm10, %v8986_v42, %v8982_v35  ;;  %v11907_v47 = vunpack.c.h.bf16 %v12693_v33 }
 0x1e0   : > { %v8150_v63 = vunpack.c.l.b16 %v7568_v46  ;;  %v8151_v1 = vunpack.c.h.b16 %v7568_v46  ;;  %v7095_v2 = vmul.f32 0.0625, %v5717_v51  ;;  %v8992_v3 = vsel %vm15905_vm11, %v8991_v45, %v8987_v59 }
 0x1e1   : > { %5929 = vadd.xlane.f32.xlu1 %v5928_v41  ;;  %vm11146_vm11 = vcmask 1041409   ;;  %v5946_v51 = vsel %vm5480_vm0, %v11903_v27, 0.0 }
 0x1e2   : > { %v8996_v6 = vrot.slane %v8150_v63, %v13903_v16  ;;  %v9001_v7 = vrot.slane %v8151_v1, %v13913_v37  ;;  %v7569_v8 = vpack.c.bf16 %v7096_v50, %v7095_v2  ;;  %5926 = vadd.xlane.f32.xlu0 %v5925_v57  ;;  %v5726_v9 = vpop.xlane.xlu1 %5725  ;;  %v5943_v57 = vsel %vm5480_vm0, %v11902_v32, 0.0 }
 0x1e3   : > { %v7098_v11 = vmul.f32 0.0625, %v5726_v9  ;;  %v5723_v12 = vpop.xlane.xlu0 %5722  ;;  %v11906_v2 = vunpack.c.l.bf16 %v12693_v33 }
 0x1e4   : > { %v8997_v17 = vsel %vm8674_vm12, %v8996_v6, %v8992_v3  ;;  %v8152_v18 = vunpack.c.l.b16 %v7569_v8  ;;  %v8153_v22 = vunpack.c.h.b16 %v7569_v8  ;;  %v7097_v23 = vmul.f32 0.0625, %v5723_v12  ;;  %v12694_v3 = vld [vmem:[%s13701_s20 + $0x278] sm:$0xff]   ;;  %v12695_v12 = vld [vmem:[%s13701_s20 + $0x280] sm:$0xff]  }
 0x1e5   : > { %v9002_v24 = vsel %vm8681_vm13, %v9001_v7, %v8997_v17  ;;  %5935 = vadd.xlane.f32.xlu1 %v5934_v10  ;;  %v5952_v7 = vsel %vm5480_vm0, %v11907_v47, 0.0 }
 0x1e6   : > { %v9006_v28 = vrot.slane %v8152_v18, %v13922_v61  ;;  %v9011_v29 = vrot.slane %v8153_v22, %v13925_v62  ;;  %v7570_v30 = vpack.c.bf16 %v7098_v11, %v7097_v23  ;;  %5932 = vadd.xlane.f32.xlu0 %v5931_v13  ;;  %v5732_v31 = vpop.xlane.xlu1 %5731  ;;  %v11911_v11 = vunpack.c.h.bf16 %v12694_v3 }
 0x1e7   : > { %v7100_v35 = vmul.f32 0.0625, %v5732_v31  ;;  %v5729_v36 = vpop.xlane.xlu0 %5728  ;;  %v5949_v18 = vsel %vm5480_vm0, %v11906_v2, 0.0  ;;  %v11910_v22 = vunpack.c.l.bf16 %v12694_v3  ;;  %v12697_v2 = vld [vmem:[%s13701_s20 + $0x290] sm:$0xff]  }
 0x1e8   : > { %v9007_v40 = vsel %vm8688_vm14, %v9006_v28, %v9002_v24  ;;  %v8154_v41 = vunpack.c.l.b16 %v7570_v30  ;;  %v8155_v42 = vunpack.c.h.b16 %v7570_v30  ;;  %v7099_v45 = vmul.f32 0.0625, %v5729_v36 }
 0x1e9   : > { %v9012_v46 = vsel %vm8695_vm15, %v9011_v29, %v9007_v40  ;;  %5941 = vadd.xlane.f32.xlu1 %v5940_v26  ;;  %v11915_v29 = vunpack.c.h.bf16 %v12695_v12  ;;  %v5955_v40 = vsel %vm5480_vm0, %v11910_v22, 0.0 }
 0x1ea   : > { %v14172_v48 = vsel %vm11146_vm11, %v9012_v46, %v13942_v34  ;;  %v7571_v49 = vpack.c.bf16 %v7100_v35, %v7099_v45  ;;  %5938 = vadd.xlane.f32.xlu0 %v5937_v38  ;;  %v5738_v50 = vpop.xlane.xlu1 %5737  ;;  %v9016_v58 = vrot.slane %v8154_v41, %v13830_v39  ;;  %v9020_v59 = vrot.slane %v8155_v42, %v13842_v53  ;;  %v12696_v42 = vld [vmem:[%s13701_s20 + $0x288] sm:$0xff]  }
 0x1eb   : > { %v7102_v63 = vmul.f32 0.0625, %v5738_v50  ;;  %v5735_v1 = vpop.xlane.xlu0 %5734  ;;  %v5958_v35 = vsel %vm5480_vm0, %v11911_v11, 0.0  ;;  %v11914_v41 = vunpack.c.l.bf16 %v12695_v12  ;;  %v11923_v11 = vunpack.c.h.bf16 %v12697_v2 }
 0x1ec   : > { %v8156_v4 = vunpack.c.l.b16 %v7571_v49  ;;  %v8157_v6 = vunpack.c.h.b16 %v7571_v49  ;;  %v7101_v34 = vmul.f32 0.0625, %v5735_v1  ;;  %v9021_v13 = vsel %vm8597_vm1, %v9020_v59, %v9016_v58 }
 0x1ed   : > { %5947 = vadd.xlane.f32.xlu1 %v5946_v51  ;;  %v5964_v51 = vsel %vm5480_vm0, %v11915_v29, 0.0  ;;  %v11919_v1 = vunpack.c.h.bf16 %v12696_v42 }
 0x1ee   : > { %v9025_v8 = vrot.slane %v8156_v4, %v13835_v43  ;;  %v9030_v9 = vrot.slane %v8157_v6, %v13838_v44  ;;  %v7572_v10 = vpack.c.bf16 %v7102_v63, %v7101_v34  ;;  %5944 = vadd.xlane.f32.xlu0 %v5943_v57  ;;  %v5744_v25 = vpop.xlane.xlu1 %5743  ;;  %v5961_v6 = vsel %vm5480_vm0, %v11914_v41, 0.0 }
 0x1ef   : > { %v7104_v14 = vmul.f32 0.0625, %v5744_v25  ;;  %v5741_v17 = vpop.xlane.xlu0 %5740  ;;  %v11918_v34 = vunpack.c.l.bf16 %v12696_v42  ;;  %v12699_v42 = vld [vmem:[%s13701_s20 + $0x2a0] sm:$0xff]  }
 0x1f0   : > { %v9026_v23 = vsel %vm8604_vm2, %v9025_v8, %v9021_v13  ;;  %v8158_v24 = vunpack.c.l.b16 %v7572_v10  ;;  %v8159_v26 = vunpack.c.h.b16 %v7572_v10  ;;  %v7103_v27 = vmul.f32 0.0625, %v5741_v17 }
 0x1f1   : > { %v9031_v28 = vsel %vm8611_vm3, %v9030_v9, %v9026_v23  ;;  %5953 = vadd.xlane.f32.xlu1 %v5952_v7 }
 0x1f2   : > { %v9035_v30 = vrot.slane %v8158_v24, %v13845_v54  ;;  %v9040_v31 = vrot.slane %v8159_v26, %v13848_v55  ;;  %v7573_v32 = vpack.c.bf16 %v7104_v14, %v7103_v27  ;;  %5950 = vadd.xlane.f32.xlu0 %v5949_v18  ;;  %v5750_v33 = vpop.xlane.xlu1 %5749  ;;  %v5970_v18 = vsel %vm5480_vm0, %v11919_v1, 0.0  ;;  %v12698_v27 = vld [vmem:[%s13701_s20 + $0x298] sm:$0xff]  }
 0x1f3   : > { %v7106_v36 = vmul.f32 0.0625, %v5750_v33  ;;  %v5747_v38 = vpop.xlane.xlu0 %5746  ;;  %v5967_v24 = vsel %vm5480_vm0, %v11918_v34, 0.0  ;;  %v11922_v26 = vunpack.c.l.bf16 %v12697_v2  ;;  %v5976_v33 = vsel %vm5480_vm0, %v11923_v11, 0.0  ;;  %v12700_v34 = vld [vmem:[%s13701_s20 + $0x2a8] sm:$0xff]  }
 0x1f4   : > { %v9036_v45 = vsel %vm8618_vm4, %v9035_v30, %v9031_v28  ;;  %v8160_v46 = vunpack.c.l.b16 %v7573_v32  ;;  %v8161_v47 = vunpack.c.h.b16 %v7573_v32  ;;  %v7105_v49 = vmul.f32 0.0625, %v5747_v38 }
 0x1f5   : > { %v9041_v50 = vsel %vm8625_vm5, %v9040_v31, %v9036_v45  ;;  %5959 = vadd.xlane.f32.xlu1 %v5958_v35  ;;  %v11927_v41 = vunpack.c.h.bf16 %v12698_v27 }
 0x1f6   : > { %v9045_v57 = vrot.slane %v8160_v46, %v13852_v60  ;;  %v9050_v58 = vrot.slane %v8161_v47, %v13856_v0  ;;  %v7574_v59 = vpack.c.bf16 %v7106_v36, %v7105_v49  ;;  %5956 = vadd.xlane.f32.xlu0 %v5955_v40  ;;  %v5756_v63 = vpop.xlane.xlu1 %5755  ;;  %v5973_v47 = vsel %vm5480_vm0, %v11922_v26, 0.0 }
 0x1f7   : > { %v7108_v3 = vmul.f32 0.0625, %v5756_v63  ;;  %v5753_v4 = vpop.xlane.xlu0 %5752  ;;  %v11926_v49 = vunpack.c.l.bf16 %v12698_v27  ;;  %v11931_v63 = vunpack.c.h.bf16 %v12699_v42  ;;  %v11934_v27 = vunpack.c.l.bf16 %v12700_v34 }
 0x1f8   : > { %v9046_v7 = vsel %vm8632_vm6, %v9045_v57, %v9041_v50  ;;  %v8162_v8 = vunpack.c.l.b16 %v7574_v59  ;;  %v8163_v9 = vunpack.c.h.b16 %v7574_v59  ;;  %v7107_v10 = vmul.f32 0.0625, %v5753_v4 }
 0x1f9   : > { %v9051_v25 = vsel %vm8639_vm7, %v9050_v58, %v9046_v7  ;;  %5965 = vadd.xlane.f32.xlu1 %v5964_v51 }
 0x1fa   : > { %v9055_v12 = vrot.slane %v8162_v8, %v13866_v19  ;;  %v9060_v13 = vrot.slane %v8163_v9, %v13869_v20  ;;  %v7575_v14 = vpack.c.bf16 %v7108_v3, %v7107_v10  ;;  %5962 = vadd.xlane.f32.xlu0 %v5961_v6  ;;  %v5762_v17 = vpop.xlane.xlu1 %5761  ;;  %v5982_v6 = vsel %vm5480_vm0, %v11927_v41, 0.0 }
 0x1fb   : > { %v7110_v22 = vmul.f32 0.0625, %v5762_v17  ;;  %v5759_v23 = vpop.xlane.xlu0 %5758  ;;  %v5979_v9 = vsel %vm5480_vm0, %v11926_v49, 0.0  ;;  %v11930_v10 = vunpack.c.l.bf16 %v12699_v42  ;;  %v5988_v17 = vsel %vm5480_vm0, %v11931_v63, 0.0 }
 0x1fc   : > { %v9056_v28 = vsel %vm8646_vm8, %v9055_v12, %v9051_v25  ;;  %v8164_v29 = vunpack.c.l.b16 %v7575_v14  ;;  %v8165_v30 = vunpack.c.h.b16 %v7575_v14  ;;  %v7109_v31 = vmul.f32 0.0625, %v5759_v23 }
 0x1fd   : > { %v9061_v32 = vsel %vm15906_vm9, %v9060_v13, %v9056_v28  ;;  %5971 = vadd.xlane.f32.xlu1 %v5970_v18  ;;  %vm15908_vm9 = vcmask 786112   ;;  %v11935_v18 = vunpack.c.h.bf16 %v12700_v34  ;;  %v12701_v28 = vld [vmem:[%s13701_s20 + $0x2b0] sm:$0xff]  }
 0x1fe   : > { %v9065_v35 = vrot.slane %v8164_v29, %v13885_v52  ;;  %v9070_v36 = vrot.slane %v8165_v30, %v13888_v56  ;;  %v7576_v38 = vpack.c.bf16 %v7110_v22, %v7109_v31  ;;  %5968 = vadd.xlane.f32.xlu0 %v5967_v24  ;;  %v5768_v40 = vpop.xlane.xlu1 %5767  ;;  %v5985_v31 = vsel %vm5480_vm0, %v11930_v10, 0.0 }
 0x1ff   : > { %v7112_v45 = vmul.f32 0.0625, %v5768_v40  ;;  %v5765_v46 = vpop.xlane.xlu0 %5764  ;;  %v11939_v40 = vunpack.c.h.bf16 %v12701_v28 }
 0x200   : > { %v9066_v50 = vsel %vm8660_vm10, %v9065_v35, %v9061_v32  ;;  %v8166_v51 = vunpack.c.l.b16 %v7576_v38  ;;  %v8167_v57 = vunpack.c.h.b16 %v7576_v38  ;;  %v7111_v58 = vmul.f32 0.0625, %v5765_v46 }
 0x201   : > { %v9071_v59 = vsel %vm15908_vm9, %v9070_v36, %v9066_v50  ;;  %5977 = vadd.xlane.f32.xlu1 %v5976_v33  ;;  %v5991_v46 = vsel %vm5480_vm0, %v11934_v27, 0.0  ;;  %vm15909_vm9 = vcmask 654912  }
 0x202   : > { %v9075_v1 = vrot.slane %v8166_v51, %v13903_v16  ;;  %v9080_v2 = vrot.slane %v8167_v57, %v13913_v37  ;;  %v7577_v3 = vpack.c.bf16 %v7112_v45, %v7111_v58  ;;  %5974 = vadd.xlane.f32.xlu0 %v5973_v47  ;;  %v5774_v4 = vpop.xlane.xlu1 %5773  ;;  %v5994_v45 = vsel %vm5480_vm0, %v11935_v18, 0.0 }
 0x203   : > { %v7114_v7 = vmul.f32 0.0625, %v5774_v4  ;;  %v5771_v8 = vpop.xlane.xlu0 %5770  ;;  %v11938_v58 = vunpack.c.l.bf16 %v12701_v28 }
 0x204   : > { %v9076_v25 = vsel %vm8674_vm12, %v9075_v1, %v9071_v59  ;;  %v8168_v11 = vunpack.c.l.b16 %v7577_v3  ;;  %v8169_v12 = vunpack.c.h.b16 %v7577_v3  ;;  %v7113_v13 = vmul.f32 0.0625, %v5771_v8  ;;  %v12702_v59 = vld [vmem:[%s13701_s20 + $0x2b8] sm:$0xff]   ;;  %v12703_v8 = vld [vmem:[%s13701_s20 + $0x2c0] sm:$0xff]  }
 0x205   : > { %v9081_v14 = vsel %vm8681_vm13, %v9080_v2, %v9076_v25  ;;  %5983 = vadd.xlane.f32.xlu1 %v5982_v6  ;;  %v6000_v3 = vsel %vm5480_vm0, %v11939_v40, 0.0 }
 0x206   : > { %v9085_v22 = vrot.slane %v8168_v11, %v13922_v61  ;;  %v9090_v23 = vrot.slane %v8169_v12, %v13925_v62  ;;  %v7578_v24 = vpack.c.bf16 %v7114_v7, %v7113_v13  ;;  %5980 = vadd.xlane.f32.xlu0 %v5979_v9  ;;  %v5780_v26 = vpop.xlane.xlu1 %5779  ;;  %v11943_v7 = vunpack.c.h.bf16 %v12702_v59 }
 0x207   : > { %v7116_v29 = vmul.f32 0.0625, %v5780_v26  ;;  %v5777_v30 = vpop.xlane.xlu0 %5776  ;;  %v5997_v11 = vsel %vm5480_vm0, %v11938_v58, 0.0  ;;  %v11942_v12 = vunpack.c.l.bf16 %v12702_v59  ;;  %v12705_v58 = vld [vmem:[%s13701_s20 + $0x2d0] sm:$0xff]  }
 0x208   : > { %v9086_v32 = vsel %vm8688_vm14, %v9085_v22, %v9081_v14  ;;  %v8170_v33 = vunpack.c.l.b16 %v7578_v24  ;;  %v8171_v35 = vunpack.c.h.b16 %v7578_v24  ;;  %v7115_v36 = vmul.f32 0.0625, %v5777_v30 }
 0x209   : > { %v9091_v38 = vsel %vm8695_vm15, %v9090_v23, %v9086_v32  ;;  %5989 = vadd.xlane.f32.xlu1 %v5988_v17  ;;  %v11947_v23 = vunpack.c.h.bf16 %v12703_v8  ;;  %v6003_v32 = vsel %vm5480_vm0, %v11942_v12, 0.0 }
 0x20a   : > { %v7579_v41 = vpack.c.bf16 %v7116_v29, %v7115_v36  ;;  %5986 = vadd.xlane.f32.xlu0 %v5985_v31  ;;  %v5786_v42 = vpop.xlane.xlu1 %5785  ;;  %v14233_v47 = vsel %vm11146_vm11, %v9091_v38, %v13999_v15  ;;  %v9095_v49 = vrot.slane %v8170_v33, %v13830_v39  ;;  %v9099_v50 = vrot.slane %v8171_v35, %v13842_v53  ;;  %v12704_v35 = vld [vmem:[%s13701_s20 + $0x2c8] sm:$0xff]  }
 0x20b   : > { %v7118_v51 = vmul.f32 0.0625, %v5786_v42  ;;  %v5783_v57 = vpop.xlane.xlu0 %5782  ;;  %v6006_v29 = vsel %vm5480_vm0, %v11943_v7, 0.0  ;;  %v11946_v33 = vunpack.c.l.bf16 %v12703_v8  ;;  %v11955_v7 = vunpack.c.h.bf16 %v12705_v58 }
 0x20c   : > { %v8172_v63 = vunpack.c.l.b16 %v7579_v41  ;;  %v8173_v1 = vunpack.c.h.b16 %v7579_v41  ;;  %v7117_v2 = vmul.f32 0.0625, %v5783_v57  ;;  %v9100_v9 = vsel %vm8597_vm1, %v9099_v50, %v9095_v49 }
 0x20d   : > { %5995 = vadd.xlane.f32.xlu1 %v5994_v45  ;;  %v6012_v45 = vsel %vm5480_vm0, %v11947_v23, 0.0  ;;  %v11951_v57 = vunpack.c.h.bf16 %v12704_v35 }
 0x20e   : > { %v9104_v4 = vrot.slane %v8172_v63, %v13835_v43  ;;  %v9109_v15 = vrot.slane %v8173_v1, %v13838_v44  ;;  %v7580_v6 = vpack.c.bf16 %v7118_v51, %v7117_v2  ;;  %5992 = vadd.xlane.f32.xlu0 %v5991_v46  ;;  %v5792_v34 = vpop.xlane.xlu1 %5791  ;;  %v6009_v1 = vsel %vm5480_vm0, %v11946_v33, 0.0 }
 0x20f   : > { %v7120_v10 = vmul.f32 0.0625, %v5792_v34  ;;  %v5789_v25 = vpop.xlane.xlu0 %5788  ;;  %v11950_v2 = vunpack.c.l.bf16 %v12704_v35  ;;  %v12707_v35 = vld [vmem:[%s13701_s20 + $0x2e0] sm:$0xff]  }
 0x210   : > { %v9105_v13 = vsel %vm8604_vm2, %v9104_v4, %v9100_v9  ;;  %v8174_v14 = vunpack.c.l.b16 %v7580_v6  ;;  %v8175_v17 = vunpack.c.h.b16 %v7580_v6  ;;  %v7119_v18 = vmul.f32 0.0625, %v5789_v25 }
 0x211   : > { %v9110_v22 = vsel %vm8611_vm3, %v9109_v15, %v9105_v13  ;;  %6001 = vadd.xlane.f32.xlu1 %v6000_v3 }
 0x212   : > { %v9114_v24 = vrot.slane %v8174_v14, %v13845_v54  ;;  %v9119_v26 = vrot.slane %v8175_v17, %v13848_v55  ;;  %v7581_v27 = vpack.c.bf16 %v7120_v10, %v7119_v18  ;;  %5998 = vadd.xlane.f32.xlu0 %v5997_v11  ;;  %v5798_v28 = vpop.xlane.xlu1 %5797  ;;  %v6018_v11 = vsel %vm5480_vm0, %v11951_v57, 0.0  ;;  %v12706_v18 = vld [vmem:[%s13701_s20 + $0x2d8] sm:$0xff]  }
 0x213   : > { %v7122_v30 = vmul.f32 0.0625, %v5798_v28  ;;  %v5795_v31 = vpop.xlane.xlu0 %5794  ;;  %v6015_v14 = vsel %vm5480_vm0, %v11950_v2, 0.0  ;;  %v11954_v17 = vunpack.c.l.bf16 %v12705_v58  ;;  %v6024_v28 = vsel %vm5480_vm0, %v11955_v7, 0.0  ;;  %v12708_v2 = vld [vmem:[%s13701_s20 + $0x2e8] sm:$0xff]  }
 0x214   : > { %v9115_v36 = vsel %vm8618_vm4, %v9114_v24, %v9110_v22  ;;  %v8176_v38 = vunpack.c.l.b16 %v7581_v27  ;;  %v8177_v40 = vunpack.c.h.b16 %v7581_v27  ;;  %v7121_v41 = vmul.f32 0.0625, %v5795_v31 }
 0x215   : > { %v9120_v42 = vsel %vm8625_vm5, %v9119_v26, %v9115_v36  ;;  %6007 = vadd.xlane.f32.xlu1 %v6006_v29  ;;  %v11959_v33 = vunpack.c.h.bf16 %v12706_v18 }
 0x216   : > { %v9124_v46 = vrot.slane %v8176_v38, %v13852_v60  ;;  %v9129_v49 = vrot.slane %v8177_v40, %v13856_v0  ;;  %v7582_v50 = vpack.c.bf16 %v7122_v30, %v7121_v41  ;;  %6004 = vadd.xlane.f32.xlu0 %v6003_v32  ;;  %v5804_v51 = vpop.xlane.xlu1 %5803  ;;  %v6021_v40 = vsel %vm5480_vm0, %v11954_v17, 0.0 }
 0x217   : > { %v7124_v59 = vmul.f32 0.0625, %v5804_v51  ;;  %v5801_v63 = vpop.xlane.xlu0 %5800  ;;  %v11958_v41 = vunpack.c.l.bf16 %v12706_v18  ;;  %v11963_v51 = vunpack.c.h.bf16 %v12707_v35  ;;  %v11966_v18 = vunpack.c.l.bf16 %v12708_v2 }
 0x218   : > { %v9125_v3 = vsel %vm8632_vm6, %v9124_v46, %v9120_v42  ;;  %v8178_v4 = vunpack.c.l.b16 %v7582_v50  ;;  %v8179_v15 = vunpack.c.h.b16 %v7582_v50  ;;  %v7123_v6 = vmul.f32 0.0625, %v5801_v63 }
 0x219   : > { %v9130_v34 = vsel %vm8639_vm7, %v9129_v49, %v9125_v3  ;;  %6013 = vadd.xlane.f32.xlu1 %v6012_v45 }
 0x21a   : > { %v9134_v8 = vrot.slane %v8178_v4, %v13866_v19  ;;  %v9139_v9 = vrot.slane %v8179_v15, %v13869_v20  ;;  %v7583_v10 = vpack.c.bf16 %v7124_v59, %v7123_v6  ;;  %6010 = vadd.xlane.f32.xlu0 %v6009_v1  ;;  %v5810_v25 = vpop.xlane.xlu1 %5809  ;;  %v6030_v1 = vsel %vm5480_vm0, %v11959_v33, 0.0 }
 0x21b   : > { %v7126_v12 = vmul.f32 0.0625, %v5810_v25  ;;  %v5807_v13 = vpop.xlane.xlu0 %5806  ;;  %v6027_v15 = vsel %vm5480_vm0, %v11958_v41, 0.0  ;;  %v11962_v6 = vunpack.c.l.bf16 %v12707_v35  ;;  %v6036_v25 = vsel %vm5480_vm0, %v11963_v51, 0.0 }
 0x21c   : > { %v9135_v22 = vsel %vm8646_vm8, %v9134_v8, %v9130_v34  ;;  %v8180_v23 = vunpack.c.l.b16 %v7583_v10  ;;  %v8181_v24 = vunpack.c.h.b16 %v7583_v10  ;;  %v7125_v26 = vmul.f32 0.0625, %v5807_v13 }
 0x21d   : > { %v9140_v27 = vsel %vm15909_vm9, %v9139_v9, %v9135_v22  ;;  %6019 = vadd.xlane.f32.xlu1 %v6018_v11  ;;  %vm15910_vm9 = vcmask 786112   ;;  %v11967_v11 = vunpack.c.h.bf16 %v12708_v2  ;;  %v12709_v22 = vld [vmem:[%s13701_s20 + $0x2f0] sm:$0xff]  }
 0x21e   : > { %v9144_v29 = vrot.slane %v8180_v23, %v13885_v52  ;;  %v9149_v30 = vrot.slane %v8181_v24, %v13888_v56  ;;  %v7584_v31 = vpack.c.bf16 %v7126_v12, %v7125_v26  ;;  %6016 = vadd.xlane.f32.xlu0 %v6015_v14  ;;  %v5816_v32 = vpop.xlane.xlu1 %5815  ;;  %v6033_v26 = vsel %vm5480_vm0, %v11962_v6, 0.0 }
 0x21f   : > { %v7128_v36 = vmul.f32 0.0625, %v5816_v32  ;;  %v5813_v38 = vpop.xlane.xlu0 %5812  ;;  %v11971_v32 = vunpack.c.h.bf16 %v12709_v22 }
 0x220   : > { %v9145_v42 = vsel %vm8660_vm10, %v9144_v29, %v9140_v27  ;;  %v8182_v45 = vunpack.c.l.b16 %v7584_v31  ;;  %v8183_v46 = vunpack.c.h.b16 %v7584_v31  ;;  %v7127_v49 = vmul.f32 0.0625, %v5813_v38 }
 0x221   : > { %v9150_v50 = vsel %vm15910_vm9, %v9149_v30, %v9145_v42  ;;  %6025 = vadd.xlane.f32.xlu1 %v6024_v28  ;;  %v6042_v38 = vsel %vm5480_vm0, %v11967_v11, 0.0  ;;  %vm15911_vm9 = vcmask 654912  }
 0x222   : > { %v9154_v57 = vrot.slane %v8182_v45, %v13903_v16  ;;  %v9159_v58 = vrot.slane %v8183_v46, %v13913_v37  ;;  %v7585_v59 = vpack.c.bf16 %v7128_v36, %v7127_v49  ;;  %6022 = vadd.xlane.f32.xlu0 %v6021_v40  ;;  %v5822_v63 = vpop.xlane.xlu1 %5821  ;;  %v6039_v40 = vsel %vm5480_vm0, %v11966_v18, 0.0 }
 0x223   : > { %v7130_v3 = vmul.f32 0.0625, %v5822_v63  ;;  %v5819_v4 = vpop.xlane.xlu0 %5818  ;;  %v11970_v49 = vunpack.c.l.bf16 %v12709_v22 }
 0x224   : > { %v9155_v34 = vsel %vm8674_vm12, %v9154_v57, %v9150_v50  ;;  %v8184_v7 = vunpack.c.l.b16 %v7585_v59  ;;  %v8185_v8 = vunpack.c.h.b16 %v7585_v59  ;;  %v7129_v9 = vmul.f32 0.0625, %v5819_v4  ;;  %v12710_v50 = vld [vmem:[%s13701_s20 + $0x2f8] sm:$0xff]   ;;  %v12711_v4 = vld [vmem:[%s13701_s20 + $0x300] sm:$0xff]  }
 0x225   : > { %v9160_v10 = vsel %vm8681_vm13, %v9159_v58, %v9155_v34  ;;  %6031 = vadd.xlane.f32.xlu1 %v6030_v1  ;;  %v6048_v58 = vsel %vm5480_vm0, %v11971_v32, 0.0 }
 0x226   : > { %v9164_v12 = vrot.slane %v8184_v7, %v13922_v61  ;;  %v9169_v13 = vrot.slane %v8185_v8, %v13925_v62  ;;  %v7586_v14 = vpack.c.bf16 %v7130_v3, %v7129_v9  ;;  %6028 = vadd.xlane.f32.xlu0 %v6027_v15  ;;  %v5828_v17 = vpop.xlane.xlu1 %5827  ;;  %v11975_v3 = vunpack.c.h.bf16 %v12710_v50 }
 0x227   : > { %v7132_v23 = vmul.f32 0.0625, %v5828_v17  ;;  %v5825_v24 = vpop.xlane.xlu0 %5824  ;;  %v6045_v7 = vsel %vm5480_vm0, %v11970_v49, 0.0  ;;  %v11974_v8 = vunpack.c.l.bf16 %v12710_v50  ;;  %v12713_v49 = vld [vmem:[%s13701_s20 + $0x310] sm:$0xff]  }
 0x228   : > { %v9165_v27 = vsel %vm8688_vm14, %v9164_v12, %v9160_v10  ;;  %v8186_v28 = vunpack.c.l.b16 %v7586_v14  ;;  %v8187_v29 = vunpack.c.h.b16 %v7586_v14  ;;  %v7131_v30 = vmul.f32 0.0625, %v5825_v24 }
 0x229   : > { %v9170_v31 = vsel %vm8695_vm15, %v9169_v13, %v9165_v27  ;;  %6037 = vadd.xlane.f32.xlu1 %v6036_v25  ;;  %v11979_v13 = vunpack.c.h.bf16 %v12711_v4  ;;  %v6051_v27 = vsel %vm5480_vm0, %v11974_v8, 0.0 }
 0x22a   : > { %v14290_v33 = vsel %vm11146_vm11, %v9170_v31, %v14056_v5  ;;  %v7587_v35 = vpack.c.bf16 %v7132_v23, %v7131_v30  ;;  %6034 = vadd.xlane.f32.xlu0 %v6033_v26  ;;  %v5834_v36 = vpop.xlane.xlu1 %5833  ;;  %v9174_v41 = vrot.slane %v8186_v28, %v13830_v39  ;;  %v9178_v42 = vrot.slane %v8187_v29, %v13842_v53  ;;  %v12712_v29 = vld [vmem:[%s13701_s20 + $0x308] sm:$0xff]  }
 0x22b   : > { %v7134_v45 = vmul.f32 0.0625, %v5834_v36  ;;  %v5831_v46 = vpop.xlane.xlu0 %5830  ;;  %v6054_v23 = vsel %vm5480_vm0, %v11975_v3, 0.0  ;;  %v11978_v28 = vunpack.c.l.bf16 %v12711_v4  ;;  %v11987_v3 = vunpack.c.h.bf16 %v12713_v49 }
 0x22c   : > { %v8188_v51 = vunpack.c.l.b16 %v7587_v35  ;;  %v8189_v57 = vunpack.c.h.b16 %v7587_v35  ;;  %v7133_v5 = vmul.f32 0.0625, %v5831_v46  ;;  %v9179_v15 = vsel %vm8597_vm1, %v9178_v42, %v9174_v41 }
 0x22d   : > { %6043 = vadd.xlane.f32.xlu1 %v6042_v38  ;;  %v6060_v38 = vsel %vm5480_vm0, %v11979_v13, 0.0  ;;  %v11983_v46 = vunpack.c.h.bf16 %v12712_v29 }
 0x22e   : > { %v9183_v59 = vrot.slane %v8188_v51, %v13835_v43  ;;  %v9188_v63 = vrot.slane %v8189_v57, %v13838_v44  ;;  %v7588_v1 = vpack.c.bf16 %v7134_v45, %v7133_v5  ;;  %6040 = vadd.xlane.f32.xlu0 %v6039_v40  ;;  %v5840_v2 = vpop.xlane.xlu1 %5839  ;;  %v6057_v57 = vsel %vm5480_vm0, %v11978_v28, 0.0 }
 0x22f   : > { %v7136_v6 = vmul.f32 0.0625, %v5840_v2  ;;  %v5837_v34 = vpop.xlane.xlu0 %5836  ;;  %v11982_v5 = vunpack.c.l.bf16 %v12712_v29  ;;  %v12715_v29 = vld [vmem:[%s13701_s20 + $0x320] sm:$0xff]  }
 0x230   : > { %v9184_v9 = vsel %vm8604_vm2, %v9183_v59, %v9179_v15  ;;  %v8190_v10 = vunpack.c.l.b16 %v7588_v1  ;;  %v8191_v25 = vunpack.c.h.b16 %v7588_v1  ;;  %v7135_v11 = vmul.f32 0.0625, %v5837_v34 }
 0x231   : > { %v9189_v12 = vsel %vm8611_vm3, %v9188_v63, %v9184_v9  ;;  %6049 = vadd.xlane.f32.xlu1 %v6048_v58 }
 0x232   : > { %v9193_v14 = vrot.slane %v8190_v10, %v13845_v54  ;;  %v9198_v17 = vrot.slane %v8191_v25, %v13848_v55  ;;  %v7589_v18 = vpack.c.bf16 %v7136_v6, %v7135_v11  ;;  %6046 = vadd.xlane.f32.xlu0 %v6045_v7  ;;  %v5846_v22 = vpop.xlane.xlu1 %5845  ;;  %v6066_v7 = vsel %vm5480_vm0, %v11983_v46, 0.0  ;;  %v12714_v11 = vld [vmem:[%s13701_s20 + $0x318] sm:$0xff]  }
 0x233   : > { %v7138_v24 = vmul.f32 0.0625, %v5846_v22  ;;  %v5843_v26 = vpop.xlane.xlu0 %5842  ;;  %v6063_v10 = vsel %vm5480_vm0, %v11982_v5, 0.0  ;;  %v11986_v25 = vunpack.c.l.bf16 %v12713_v49  ;;  %v6072_v22 = vsel %vm5480_vm0, %v11987_v3, 0.0  ;;  %v12716_v5 = vld [vmem:[%s13701_s20 + $0x328] sm:$0xff]  }
 0x234   : > { %v9194_v30 = vsel %vm8618_vm4, %v9193_v14, %v9189_v12  ;;  %v8192_v31 = vunpack.c.l.b16 %v7589_v18  ;;  %v8193_v32 = vunpack.c.h.b16 %v7589_v18  ;;  %v7137_v35 = vmul.f32 0.0625, %v5843_v26 }
 0x235   : > { %v9199_v36 = vsel %vm8625_vm5, %v9198_v17, %v9194_v30  ;;  %6055 = vadd.xlane.f32.xlu1 %v6054_v23  ;;  %v11991_v28 = vunpack.c.h.bf16 %v12714_v11 }
 0x236   : > { %v9203_v40 = vrot.slane %v8192_v31, %v13852_v60  ;;  %v9208_v41 = vrot.slane %v8193_v32, %v13856_v0  ;;  %v7590_v42 = vpack.c.bf16 %v7138_v24, %v7137_v35  ;;  %6052 = vadd.xlane.f32.xlu0 %v6051_v27  ;;  %v5852_v45 = vpop.xlane.xlu1 %5851  ;;  %v6069_v32 = vsel %vm5480_vm0, %v11986_v25, 0.0 }
 0x237   : > { %v7140_v50 = vmul.f32 0.0625, %v5852_v45  ;;  %v5849_v51 = vpop.xlane.xlu0 %5848  ;;  %v11990_v35 = vunpack.c.l.bf16 %v12714_v11  ;;  %v11995_v45 = vunpack.c.h.bf16 %v12715_v29  ;;  %v11998_v11 = vunpack.c.l.bf16 %v12716_v5 }
 0x238   : > { %v9204_v58 = vsel %vm8632_vm6, %v9203_v40, %v9199_v36  ;;  %v8194_v59 = vunpack.c.l.b16 %v7590_v42  ;;  %v8195_v63 = vunpack.c.h.b16 %v7590_v42  ;;  %v7139_v1 = vmul.f32 0.0625, %v5849_v51 }
 0x239   : > { %v9209_v2 = vsel %vm8639_vm7, %v9208_v41, %v9204_v58  ;;  %6061 = vadd.xlane.f32.xlu1 %v6060_v38 }
 0x23a   : > { %v9213_v4 = vrot.slane %v8194_v59, %v13866_v19  ;;  %v9218_v15 = vrot.slane %v8195_v63, %v13869_v20  ;;  %v7591_v6 = vpack.c.bf16 %v7140_v50, %v7139_v1  ;;  %6058 = vadd.xlane.f32.xlu0 %v6057_v57  ;;  %v5858_v34 = vpop.xlane.xlu1 %5857  ;;  %v6078_v57 = vsel %vm5480_vm0, %v11991_v28, 0.0 }
 0x23b   : > { %v7142_v8 = vmul.f32 0.0625, %v5858_v34  ;;  %v5855_v9 = vpop.xlane.xlu0 %5854  ;;  %v6075_v63 = vsel %vm5480_vm0, %v11990_v35, 0.0  ;;  %v11994_v1 = vunpack.c.l.bf16 %v12715_v29  ;;  %v6084_v34 = vsel %vm5480_vm0, %v11995_v45, 0.0 }
 0x23c   : > { %v9214_v12 = vsel %vm8646_vm8, %v9213_v4, %v9209_v2  ;;  %v8196_v13 = vunpack.c.l.b16 %v7591_v6  ;;  %v8197_v14 = vunpack.c.h.b16 %v7591_v6  ;;  %v7141_v17 = vmul.f32 0.0625, %v5855_v9 }
 0x23d   : > { %v9219_v18 = vsel %vm15911_vm9, %v9218_v15, %v9214_v12  ;;  %6067 = vadd.xlane.f32.xlu1 %v6066_v7  ;;  %vm15912_vm9 = vcmask 786112   ;;  %v11999_v7 = vunpack.c.h.bf16 %v12716_v5  ;;  %v12717_v12 = vld [vmem:[%s13701_s20 + $0x330] sm:$0xff]  }
 0x23e   : > { %v9223_v23 = vrot.slane %v8196_v13, %v13885_v52  ;;  %v9228_v24 = vrot.slane %v8197_v14, %v13888_v56  ;;  %v7592_v26 = vpack.c.bf16 %v7142_v8, %v7141_v17  ;;  %6064 = vadd.xlane.f32.xlu0 %v6063_v10  ;;  %v5864_v27 = vpop.xlane.xlu1 %5863  ;;  %v6081_v17 = vsel %vm5480_vm0, %v11994_v1, 0.0 }
 0x23f   : > { %v7144_v30 = vmul.f32 0.0625, %v5864_v27  ;;  %v5861_v31 = vpop.xlane.xlu0 %5860  ;;  %v12003_v27 = vunpack.c.h.bf16 %v12717_v12 }
 0x240   : > { %v9224_v36 = vsel %vm8660_vm10, %v9223_v23, %v9219_v18  ;;  %v8198_v38 = vunpack.c.l.b16 %v7592_v26  ;;  %v8199_v40 = vunpack.c.h.b16 %v7592_v26  ;;  %v7143_v41 = vmul.f32 0.0625, %v5861_v31 }
 0x241   : > { %v9229_v42 = vsel %vm15912_vm9, %v9228_v24, %v9224_v36  ;;  %6073 = vadd.xlane.f32.xlu1 %v6072_v22  ;;  %v6087_v31 = vsel %vm5480_vm0, %v11998_v11, 0.0 }
 0x242   : > { %v9233_v46 = vrot.slane %v8198_v38, %v13903_v16  ;;  %v9238_v49 = vrot.slane %v8199_v40, %v13913_v37  ;;  %v7593_v50 = vpack.c.bf16 %v7144_v30, %v7143_v41  ;;  %6070 = vadd.xlane.f32.xlu0 %v6069_v32  ;;  %v5870_v51 = vpop.xlane.xlu1 %5869  ;;  %v6090_v30 = vsel %vm5480_vm0, %v11999_v7, 0.0 }
 0x243   : > { %v7146_v58 = vmul.f32 0.0625, %v5870_v51  ;;  %v5867_v59 = vpop.xlane.xlu0 %5866  ;;  %v12002_v41 = vunpack.c.l.bf16 %v12717_v12 }
 0x244   : > { %v9234_v2 = vsel %vm8674_vm12, %v9233_v46, %v9229_v42  ;;  %v8200_v3 = vunpack.c.l.b16 %v7593_v50  ;;  %v8201_v4 = vunpack.c.h.b16 %v7593_v50  ;;  %v7145_v15 = vmul.f32 0.0625, %v5867_v59  ;;  %v12718_v42 = vld [vmem:[%s13701_s20 + $0x338] sm:$0xff]   ;;  %v12719_v59 = vld [vmem:[%s13701_s20 + $0x340] sm:$0xff]  }
 0x245   : > { %v9239_v6 = vsel %vm8681_vm13, %v9238_v49, %v9234_v2  ;;  %6079 = vadd.xlane.f32.xlu1 %v6078_v57  ;;  %v6096_v50 = vsel %vm5480_vm0, %v12003_v27, 0.0 }
 0x246   : > { %v9243_v8 = vrot.slane %v8200_v3, %v13922_v61  ;;  %v9248_v9 = vrot.slane %v8201_v4, %v13925_v62  ;;  %v7594_v10 = vpack.c.bf16 %v7146_v58, %v7145_v15  ;;  %6076 = vadd.xlane.f32.xlu0 %v6075_v63  ;;  %v5876_v25 = vpop.xlane.xlu1 %5875  ;;  %v12007_v58 = vunpack.c.h.bf16 %v12718_v42 }
 0x247   : > { %v7148_v13 = vmul.f32 0.0625, %v5876_v25  ;;  %v5873_v14 = vpop.xlane.xlu0 %5872  ;;  %v6093_v3 = vsel %vm5480_vm0, %v12002_v41, 0.0  ;;  %v12006_v4 = vunpack.c.l.bf16 %v12718_v42  ;;  %v12721_v41 = vld [vmem:[%s13701_s20 + $0x350] sm:$0xff]  }
 0x248   : > { %v9244_v18 = vsel %vm8688_vm14, %v9243_v8, %v9239_v6  ;;  %v8202_v22 = vunpack.c.l.b16 %v7594_v10  ;;  %v8203_v23 = vunpack.c.h.b16 %v7594_v10  ;;  %v7147_v24 = vmul.f32 0.0625, %v5873_v14 }
 0x249   : > { %v9249_v26 = vsel %vm8695_vm15, %v9248_v9, %v9244_v18  ;;  %6085 = vadd.xlane.f32.xlu1 %v6084_v34  ;;  %v12011_v9 = vunpack.c.h.bf16 %v12719_v59  ;;  %v6099_v18 = vsel %vm5480_vm0, %v12006_v4, 0.0 }
 0x24a   : > { %v7595_v28 = vpack.c.bf16 %v7148_v13, %v7147_v24  ;;  %6082 = vadd.xlane.f32.xlu0 %v6081_v17  ;;  %v5882_v29 = vpop.xlane.xlu1 %5881  ;;  %v14351_v32 = vsel %vm11146_vm11, %v9249_v26, %v14113_v21  ;;  %v9253_v35 = vrot.slane %v8202_v22, %v13830_v39  ;;  %v9257_v36 = vrot.slane %v8203_v23, %v13842_v53  ;;  %v12720_v23 = vld [vmem:[%s13701_s20 + $0x348] sm:$0xff]  }
 0x24b   : > { %v7150_v38 = vmul.f32 0.0625, %v5882_v29  ;;  %v5879_v40 = vpop.xlane.xlu0 %5878  ;;  %v6102_v13 = vsel %vm5480_vm0, %v12007_v58, 0.0  ;;  %v12010_v22 = vunpack.c.l.bf16 %v12719_v59  ;;  %v12019_v58 = vunpack.c.h.bf16 %v12721_v41 }
 0x24c   : > { %v8204_v45 = vunpack.c.l.b16 %v7595_v28  ;;  %v8205_v46 = vunpack.c.h.b16 %v7595_v28  ;;  %v7149_v49 = vmul.f32 0.0625, %v5879_v40  ;;  %v9258_v63 = vsel %vm8597_vm1, %v9257_v36, %v9253_v35 }
 0x24d   : > { %6091 = vadd.xlane.f32.xlu1 %v6090_v30  ;;  %v6108_v30 = vsel %vm5480_vm0, %v12011_v9, 0.0  ;;  %v12015_v40 = vunpack.c.h.bf16 %v12720_v23  ;;  %vm15913_vm11 = vcmask 654912  }
 0x24e   : > { %v9262_v51 = vrot.slane %v8204_v45, %v13835_v43  ;;  %v9267_v21 = vrot.slane %v8205_v46, %v13838_v44  ;;  %v7596_v57 = vpack.c.bf16 %v7150_v38, %v7149_v49  ;;  %6088 = vadd.xlane.f32.xlu0 %v6087_v31  ;;  %v5888_v5 = vpop.xlane.xlu1 %5887  ;;  %v6105_v46 = vsel %vm5480_vm0, %v12010_v22, 0.0 }
 0x24f   : > { %v7152_v1 = vmul.f32 0.0625, %v5888_v5  ;;  %v5885_v2 = vpop.xlane.xlu0 %5884  ;;  %v12014_v49 = vunpack.c.l.bf16 %v12720_v23  ;;  %v12723_v23 = vld [vmem:[%s13701_s20 + $0x360] sm:$0xff]  }
 0x250   : > { %v9263_v15 = vsel %vm8604_vm2, %v9262_v51, %v9258_v63  ;;  %v8206_v6 = vunpack.c.l.b16 %v7596_v57  ;;  %v8207_v34 = vunpack.c.h.b16 %v7596_v57  ;;  %v7151_v7 = vmul.f32 0.0625, %v5885_v2 }
 0x251   : > { %v9268_v8 = vsel %vm8611_vm3, %v9267_v21, %v9263_v15  ;;  %6097 = vadd.xlane.f32.xlu1 %v6096_v50 }
 0x252   : > { %v9272_v10 = vrot.slane %v8206_v6, %v13845_v54  ;;  %v9277_v25 = vrot.slane %v8207_v34, %v13848_v55  ;;  %v7597_v11 = vpack.c.bf16 %v7152_v1, %v7151_v7  ;;  %6094 = vadd.xlane.f32.xlu0 %v6093_v3  ;;  %v5894_v12 = vpop.xlane.xlu1 %5893  ;;  %v6114_v3 = vsel %vm5480_vm0, %v12015_v40, 0.0  ;;  %v12722_v7 = vld [vmem:[%s13701_s20 + $0x358] sm:$0xff]  }
 0x253   : > { %v7154_v14 = vmul.f32 0.0625, %v5894_v12  ;;  %v5891_v17 = vpop.xlane.xlu0 %5890  ;;  %v6111_v6 = vsel %vm5480_vm0, %v12014_v49, 0.0  ;;  %v12018_v34 = vunpack.c.l.bf16 %v12721_v41  ;;  %v6120_v12 = vsel %vm5480_vm0, %v12019_v58, 0.0  ;;  %v12724_v49 = vld [vmem:[%s13701_s20 + $0x368] sm:$0xff]  }
 0x254   : > { %v9273_v24 = vsel %vm8618_vm4, %v9272_v10, %v9268_v8  ;;  %v8208_v26 = vunpack.c.l.b16 %v7597_v11  ;;  %v8209_v27 = vunpack.c.h.b16 %v7597_v11  ;;  %v7153_v28 = vmul.f32 0.0625, %v5891_v17 }
 0x255   : > { %v9278_v29 = vsel %vm8625_vm5, %v9277_v25, %v9273_v24  ;;  %6103 = vadd.xlane.f32.xlu1 %v6102_v13  ;;  %v12023_v22 = vunpack.c.h.bf16 %v12722_v7 }
 0x256   : > { %v9282_v31 = vrot.slane %v8208_v26, %v13852_v60  ;;  %v9287_v35 = vrot.slane %v8209_v27, %v13856_v0  ;;  %v7598_v36 = vpack.c.bf16 %v7154_v14, %v7153_v28  ;;  %6100 = vadd.xlane.f32.xlu0 %v6099_v18  ;;  %v5900_v38 = vpop.xlane.xlu1 %5899  ;;  %v6117_v27 = vsel %vm5480_vm0, %v12018_v34, 0.0 }
 0x257   : > { %v7156_v42 = vmul.f32 0.0625, %v5900_v38  ;;  %v5897_v45 = vpop.xlane.xlu0 %5896  ;;  %v12022_v28 = vunpack.c.l.bf16 %v12722_v7  ;;  %v12027_v38 = vunpack.c.h.bf16 %v12723_v23  ;;  %v12030_v7 = vunpack.c.l.bf16 %v12724_v49 }
 0x258   : > { %v9283_v50 = vsel %vm8632_vm6, %v9282_v31, %v9278_v29  ;;  %v8210_v51 = vunpack.c.l.b16 %v7598_v36  ;;  %v8211_v21 = vunpack.c.h.b16 %v7598_v36  ;;  %v7155_v57 = vmul.f32 0.0625, %v5897_v45 }
 0x259   : > { %v9288_v5 = vsel %vm8639_vm7, %v9287_v35, %v9283_v50  ;;  %6109 = vadd.xlane.f32.xlu1 %v6108_v30 }
 0x25a   : > { %v9292_v59 = vrot.slane %v8210_v51, %v13866_v19  ;;  %v9297_v63 = vrot.slane %v8211_v21, %v13869_v20  ;;  %v7599_v1 = vpack.c.bf16 %v7156_v42, %v7155_v57  ;;  %6106 = vadd.xlane.f32.xlu0 %v6105_v46  ;;  %v5906_v2 = vpop.xlane.xlu1 %5905  ;;  %v6126_v46 = vsel %vm5480_vm0, %v12023_v22, 0.0 }
 0x25b   : > { %v7158_v4 = vmul.f32 0.0625, %v5906_v2  ;;  %v5903_v15 = vpop.xlane.xlu0 %5902  ;;  %v6123_v21 = vsel %vm5480_vm0, %v12022_v28, 0.0  ;;  %v12026_v57 = vunpack.c.l.bf16 %v12723_v23  ;;  %v6132_v2 = vsel %vm5480_vm0, %v12027_v38, 0.0 }
 0x25c   : > { %v9293_v8 = vsel %vm8646_vm8, %v9292_v59, %v9288_v5  ;;  %v8212_v9 = vunpack.c.l.b16 %v7599_v1  ;;  %v8213_v10 = vunpack.c.h.b16 %v7599_v1  ;;  %v7157_v25 = vmul.f32 0.0625, %v5903_v15 }
 0x25d   : > { %v9298_v11 = vsel %vm15913_vm11, %v9297_v63, %v9293_v8  ;;  %6115 = vadd.xlane.f32.xlu1 %v6114_v3  ;;  %v12031_v3 = vunpack.c.h.bf16 %v12724_v49  ;;  %v12725_v8 = vld [vmem:[%s13701_s20 + $0x370] sm:$0xff]   ;;  %vm11148_vm11 = vcmask 1042434  }
 0x25e   : > { %v9302_v13 = vrot.slane %v8212_v9, %v13885_v52  ;;  %v9307_v14 = vrot.slane %v8213_v10, %v13888_v56  ;;  %v7600_v17 = vpack.c.bf16 %v7158_v4, %v7157_v25  ;;  %6112 = vadd.xlane.f32.xlu0 %v6111_v6  ;;  %v5912_v18 = vpop.xlane.xlu1 %5911  ;;  %v6129_v25 = vsel %vm5480_vm0, %v12026_v57, 0.0 }
 0x25f   : > { %v7160_v24 = vmul.f32 0.0625, %v5912_v18  ;;  %v5909_v26 = vpop.xlane.xlu0 %5908  ;;  %v12035_v18 = vunpack.c.h.bf16 %v12725_v8 }
 0x260   : > { %v9303_v29 = vsel %vm8660_vm10, %v9302_v13, %v9298_v11  ;;  %v8214_v30 = vunpack.c.l.b16 %v7600_v17  ;;  %v8215_v31 = vunpack.c.h.b16 %v7600_v17  ;;  %v7159_v35 = vmul.f32 0.0625, %v5909_v26 }
 0x261   : > { %v9308_v36 = vsel %vm15912_vm9, %v9307_v14, %v9303_v29  ;;  %6121 = vadd.xlane.f32.xlu1 %v6120_v12  ;;  %v6138_v26 = vsel %vm5480_vm0, %v12031_v3, 0.0  ;;  %vm15914_vm9 = vcmask 654912  }
 0x262   : > { %v9312_v40 = vrot.slane %v8214_v30, %v13903_v16  ;;  %v9317_v41 = vrot.slane %v8215_v31, %v13913_v37  ;;  %v7601_v42 = vpack.c.bf16 %v7160_v24, %v7159_v35  ;;  %6118 = vadd.xlane.f32.xlu0 %v6117_v27  ;;  %v5918_v45 = vpop.xlane.xlu1 %5917  ;;  %v6135_v27 = vsel %vm5480_vm0, %v12030_v7, 0.0 }
 0x263   : > { %v7162_v50 = vmul.f32 0.0625, %v5918_v45  ;;  %v5915_v51 = vpop.xlane.xlu0 %5914  ;;  %v12034_v35 = vunpack.c.l.bf16 %v12725_v8 }
 0x264   : > { %v9313_v5 = vsel %vm8674_vm12, %v9312_v40, %v9308_v36  ;;  %v8216_v58 = vunpack.c.l.b16 %v7601_v42  ;;  %v8217_v59 = vunpack.c.h.b16 %v7601_v42  ;;  %v7161_v63 = vmul.f32 0.0625, %v5915_v51  ;;  %v12726_v36 = vld [vmem:[%s13701_s20 + $0x378] sm:$0xff]   ;;  %v12727_v51 = vld [vmem:[%s13701_s20 + $0x380] sm:$0xff]  }
 0x265   : > { %v9318_v1 = vsel %vm8681_vm13, %v9317_v41, %v9313_v5  ;;  %6127 = vadd.xlane.f32.xlu1 %v6126_v46  ;;  %v6144_v41 = vsel %vm5480_vm0, %v12035_v18, 0.0 }
 0x266   : > { %v9322_v4 = vrot.slane %v8216_v58, %v13922_v61  ;;  %v9327_v15 = vrot.slane %v8217_v59, %v13925_v62  ;;  %v7602_v6 = vpack.c.bf16 %v7162_v50, %v7161_v63  ;;  %6124 = vadd.xlane.f32.xlu0 %v6123_v21  ;;  %v5924_v34 = vpop.xlane.xlu1 %5923  ;;  %v12039_v50 = vunpack.c.h.bf16 %v12726_v36 }
 0x267   : > { %v7164_v9 = vmul.f32 0.0625, %v5924_v34  ;;  %v5921_v10 = vpop.xlane.xlu0 %5920  ;;  %v6141_v58 = vsel %vm5480_vm0, %v12034_v35, 0.0  ;;  %v12038_v59 = vunpack.c.l.bf16 %v12726_v36  ;;  %v12729_v35 = vld [vmem:[%s13701_s20 + $0x390] sm:$0xff]  }
 0x268   : > { %v9323_v11 = vsel %vm8688_vm14, %v9322_v4, %v9318_v1  ;;  %v8218_v12 = vunpack.c.l.b16 %v7602_v6  ;;  %v8219_v13 = vunpack.c.h.b16 %v7602_v6  ;;  %v7163_v14 = vmul.f32 0.0625, %v5921_v10 }
 0x269   : > { %v9328_v17 = vsel %vm8695_vm15, %v9327_v15, %v9323_v11  ;;  %6133 = vadd.xlane.f32.xlu1 %v6132_v2  ;;  %v12043_v15 = vunpack.c.h.bf16 %v12727_v51  ;;  %v6147_v11 = vsel %vm5480_vm0, %v12038_v59, 0.0 }
 0x26a   : > { %v14408_v22 = vsel %vm11148_vm11, %v9328_v17, %v14172_v48  ;;  %v7603_v23 = vpack.c.bf16 %v7164_v9, %v7163_v14  ;;  %6130 = vadd.xlane.f32.xlu0 %v6129_v25  ;;  %v5930_v24 = vpop.xlane.xlu1 %5929  ;;  %v9332_v28 = vrot.slane %v8218_v12, %v13830_v39  ;;  %v9336_v29 = vrot.slane %v8219_v13, %v13842_v53  ;;  %v12728_v13 = vld [vmem:[%s13701_s20 + $0x388] sm:$0xff]  }
 0x26b   : > { %v7166_v30 = vmul.f32 0.0625, %v5930_v24  ;;  %v5927_v31 = vpop.xlane.xlu0 %5926  ;;  %v6150_v9 = vsel %vm5480_vm0, %v12039_v50, 0.0  ;;  %v12042_v12 = vunpack.c.l.bf16 %v12727_v51  ;;  %v12051_v50 = vunpack.c.h.bf16 %v12729_v35 }
 0x26c   : > { %v8220_v38 = vunpack.c.l.b16 %v7603_v23  ;;  %v8221_v40 = vunpack.c.h.b16 %v7603_v23  ;;  %v7165_v48 = vmul.f32 0.0625, %v5927_v31  ;;  %v9337_v21 = vsel %vm8597_vm1, %v9336_v29, %v9332_v28 }
 0x26d   : > { %6139 = vadd.xlane.f32.xlu1 %v6138_v26  ;;  %v6156_v26 = vsel %vm5480_vm0, %v12043_v15, 0.0  ;;  %v12047_v31 = vunpack.c.h.bf16 %v12728_v13 }
 0x26e   : > { %v9341_v42 = vrot.slane %v8220_v38, %v13835_v43  ;;  %v9346_v45 = vrot.slane %v8221_v40, %v13838_v44  ;;  %v7604_v46 = vpack.c.bf16 %v7166_v30, %v7165_v48  ;;  %6136 = vadd.xlane.f32.xlu0 %v6135_v27  ;;  %v5936_v49 = vpop.xlane.xlu1 %5935  ;;  %v6153_v40 = vsel %vm5480_vm0, %v12042_v12, 0.0 }
 0x26f   : > { %v7168_v57 = vmul.f32 0.0625, %v5936_v49  ;;  %v5933_v5 = vpop.xlane.xlu0 %5932  ;;  %v12046_v48 = vunpack.c.l.bf16 %v12728_v13  ;;  %v12731_v13 = vld [vmem:[%s13701_s20 + $0x3a0] sm:$0xff]  }
 0x270   : > { %v9342_v63 = vsel %vm8604_vm2, %v9341_v42, %v9337_v21  ;;  %v8222_v1 = vunpack.c.l.b16 %v7604_v46  ;;  %v8223_v2 = vunpack.c.h.b16 %v7604_v46  ;;  %v7167_v3 = vmul.f32 0.0625, %v5933_v5 }
 0x271   : > { %v9347_v4 = vsel %vm8611_vm3, %v9346_v45, %v9342_v63  ;;  %6145 = vadd.xlane.f32.xlu1 %v6144_v41 }
 0x272   : > { %v9351_v6 = vrot.slane %v8222_v1, %v13845_v54  ;;  %v9356_v34 = vrot.slane %v8223_v2, %v13848_v55  ;;  %v7605_v7 = vpack.c.bf16 %v7168_v57, %v7167_v3  ;;  %6142 = vadd.xlane.f32.xlu0 %v6141_v58  ;;  %v5942_v8 = vpop.xlane.xlu1 %5941  ;;  %v6162_v58 = vsel %vm5480_vm0, %v12047_v31, 0.0  ;;  %v12730_v3 = vld [vmem:[%s13701_s20 + $0x398] sm:$0xff]  }
 0x273   : > { %v7170_v10 = vmul.f32 0.0625, %v5942_v8  ;;  %v5939_v25 = vpop.xlane.xlu0 %5938  ;;  %v6159_v1 = vsel %vm5480_vm0, %v12046_v48, 0.0  ;;  %v12050_v2 = vunpack.c.l.bf16 %v12729_v35  ;;  %v6168_v8 = vsel %vm5480_vm0, %v12051_v50, 0.0  ;;  %v12732_v48 = vld [vmem:[%s13701_s20 + $0x3a8] sm:$0xff]  }
 0x274   : > { %v9352_v14 = vsel %vm8618_vm4, %v9351_v6, %v9347_v4  ;;  %v8224_v17 = vunpack.c.l.b16 %v7605_v7  ;;  %v8225_v18 = vunpack.c.h.b16 %v7605_v7  ;;  %v7169_v23 = vmul.f32 0.0625, %v5939_v25 }
 0x275   : > { %v9357_v24 = vsel %vm8625_vm5, %v9356_v34, %v9352_v14  ;;  %6151 = vadd.xlane.f32.xlu1 %v6150_v9  ;;  %v12055_v12 = vunpack.c.h.bf16 %v12730_v3 }
 0x276   : > { %v9361_v27 = vrot.slane %v8224_v17, %v13852_v60  ;;  %v9366_v28 = vrot.slane %v8225_v18, %v13856_v0  ;;  %v7606_v29 = vpack.c.bf16 %v7170_v10, %v7169_v23  ;;  %6148 = vadd.xlane.f32.xlu0 %v6147_v11  ;;  %v5948_v30 = vpop.xlane.xlu1 %5947  ;;  %v6165_v18 = vsel %vm5480_vm0, %v12050_v2, 0.0 }
 0x277   : > { %v7172_v36 = vmul.f32 0.0625, %v5948_v30  ;;  %v5945_v38 = vpop.xlane.xlu0 %5944  ;;  %v12054_v23 = vunpack.c.l.bf16 %v12730_v3  ;;  %v12059_v30 = vunpack.c.h.bf16 %v12731_v13  ;;  %v12062_v3 = vunpack.c.l.bf16 %v12732_v48 }
 0x278   : > { %v9362_v41 = vsel %vm8632_vm6, %v9361_v27, %v9357_v24  ;;  %v8226_v42 = vunpack.c.l.b16 %v7606_v29  ;;  %v8227_v45 = vunpack.c.h.b16 %v7606_v29  ;;  %v7171_v46 = vmul.f32 0.0625, %v5945_v38 }
 0x279   : > { %v9367_v49 = vsel %vm8639_vm7, %v9366_v28, %v9362_v41  ;;  %6157 = vadd.xlane.f32.xlu1 %v6156_v26 }
 0x27a   : > { %v9371_v51 = vrot.slane %v8226_v42, %v13866_v19  ;;  %v9376_v21 = vrot.slane %v8227_v45, %v13869_v20  ;;  %v7607_v57 = vpack.c.bf16 %v7172_v36, %v7171_v46  ;;  %6154 = vadd.xlane.f32.xlu0 %v6153_v40  ;;  %v5954_v5 = vpop.xlane.xlu1 %5953  ;;  %v6174_v40 = vsel %vm5480_vm0, %v12055_v12, 0.0 }
 0x27b   : > { %v7174_v59 = vmul.f32 0.0625, %v5954_v5  ;;  %v5951_v63 = vpop.xlane.xlu0 %5950  ;;  %v6171_v45 = vsel %vm5480_vm0, %v12054_v23, 0.0  ;;  %v12058_v46 = vunpack.c.l.bf16 %v12731_v13  ;;  %v6180_v5 = vsel %vm5480_vm0, %v12059_v30, 0.0 }
 0x27c   : > { %v9372_v4 = vsel %vm8646_vm8, %v9371_v51, %v9367_v49  ;;  %v8228_v15 = vunpack.c.l.b16 %v7607_v57  ;;  %v8229_v6 = vunpack.c.h.b16 %v7607_v57  ;;  %v7173_v34 = vmul.f32 0.0625, %v5951_v63 }
 0x27d   : > { %v9377_v7 = vsel %vm15914_vm9, %v9376_v21, %v9372_v4  ;;  %6163 = vadd.xlane.f32.xlu1 %v6162_v58  ;;  %vm15915_vm9 = vcmask 786112   ;;  %v12063_v58 = vunpack.c.h.bf16 %v12732_v48  ;;  %v12733_v4 = vld [vmem:[%s13701_s20 + $0x3b0] sm:$0xff]  }
 0x27e   : > { %v9381_v9 = vrot.slane %v8228_v15, %v13885_v52  ;;  %v9386_v10 = vrot.slane %v8229_v6, %v13888_v56  ;;  %v7608_v25 = vpack.c.bf16 %v7174_v59, %v7173_v34  ;;  %6160 = vadd.xlane.f32.xlu0 %v6159_v1  ;;  %v5960_v11 = vpop.xlane.xlu1 %5959  ;;  %v6177_v34 = vsel %vm5480_vm0, %v12058_v46, 0.0 }
 0x27f   : > { %v7176_v14 = vmul.f32 0.0625, %v5960_v11  ;;  %v5957_v17 = vpop.xlane.xlu0 %5956  ;;  %v12067_v11 = vunpack.c.h.bf16 %v12733_v4 }
 0x280   : > { %v9382_v24 = vsel %vm8660_vm10, %v9381_v9, %v9377_v7  ;;  %v8230_v26 = vunpack.c.l.b16 %v7608_v25  ;;  %v8231_v27 = vunpack.c.h.b16 %v7608_v25  ;;  %v7175_v28 = vmul.f32 0.0625, %v5957_v17 }
 0x281   : > { %v9387_v29 = vsel %vm15915_vm9, %v9386_v10, %v9382_v24  ;;  %6169 = vadd.xlane.f32.xlu1 %v6168_v8  ;;  %v6183_v17 = vsel %vm5480_vm0, %v12062_v3, 0.0  ;;  %vm15916_vm9 = vcmask 654912  }
 0x282   : > { %v9391_v31 = vrot.slane %v8230_v26, %v13903_v16  ;;  %v9396_v35 = vrot.slane %v8231_v27, %v13913_v37  ;;  %v7609_v36 = vpack.c.bf16 %v7176_v14, %v7175_v28  ;;  %6166 = vadd.xlane.f32.xlu0 %v6165_v18  ;;  %v5966_v38 = vpop.xlane.xlu1 %5965  ;;  %v6186_v14 = vsel %vm5480_vm0, %v12063_v58, 0.0 }
 0x283   : > { %v7178_v41 = vmul.f32 0.0625, %v5966_v38  ;;  %v5963_v42 = vpop.xlane.xlu0 %5962  ;;  %v12066_v28 = vunpack.c.l.bf16 %v12733_v4 }
 0x284   : > { %v9392_v49 = vsel %vm8674_vm12, %v9391_v31, %v9387_v29  ;;  %v8232_v50 = vunpack.c.l.b16 %v7609_v36  ;;  %v8233_v51 = vunpack.c.h.b16 %v7609_v36  ;;  %v7177_v21 = vmul.f32 0.0625, %v5963_v42  ;;  %v12734_v29 = vld [vmem:[%s13701_s20 + $0x3b8] sm:$0xff]   ;;  %v12735_v42 = vld [vmem:[%s13701_s20 + $0x3c0] sm:$0xff]  }
 0x285   : > { %v9397_v57 = vsel %vm8681_vm13, %v9396_v35, %v9392_v49  ;;  %6175 = vadd.xlane.f32.xlu1 %v6174_v40  ;;  %v6192_v36 = vsel %vm5480_vm0, %v12067_v11, 0.0 }
 0x286   : > { %v9401_v59 = vrot.slane %v8232_v50, %v13922_v61  ;;  %v9406_v63 = vrot.slane %v8233_v51, %v13925_v62  ;;  %v7610_v1 = vpack.c.bf16 %v7178_v41, %v7177_v21  ;;  %6172 = vadd.xlane.f32.xlu0 %v6171_v45  ;;  %v5972_v2 = vpop.xlane.xlu1 %5971  ;;  %v12071_v41 = vunpack.c.h.bf16 %v12734_v29 }
 0x287   : > { %v7180_v15 = vmul.f32 0.0625, %v5972_v2  ;;  %v5969_v6 = vpop.xlane.xlu0 %5968  ;;  %v6189_v50 = vsel %vm5480_vm0, %v12066_v28, 0.0  ;;  %v12070_v51 = vunpack.c.l.bf16 %v12734_v29  ;;  %v12737_v28 = vld [vmem:[%s13701_s20 + $0x3d0] sm:$0xff]  }
 0x288   : > { %v9402_v7 = vsel %vm8688_vm14, %v9401_v59, %v9397_v57  ;;  %v8234_v8 = vunpack.c.l.b16 %v7610_v1  ;;  %v8235_v9 = vunpack.c.h.b16 %v7610_v1  ;;  %v7179_v10 = vmul.f32 0.0625, %v5969_v6 }
 0x289   : > { %v9407_v25 = vsel %vm8695_vm15, %v9406_v63, %v9402_v7  ;;  %6181 = vadd.xlane.f32.xlu1 %v6180_v5  ;;  %v12075_v63 = vunpack.c.h.bf16 %v12735_v42  ;;  %v6195_v7 = vsel %vm5480_vm0, %v12070_v51, 0.0 }
 0x28a   : > { %v7611_v12 = vpack.c.bf16 %v7180_v15, %v7179_v10  ;;  %6178 = vadd.xlane.f32.xlu0 %v6177_v34  ;;  %v5978_v13 = vpop.xlane.xlu1 %5977  ;;  %v14469_v18 = vsel %vm11148_vm11, %v9407_v25, %v14233_v47  ;;  %v9411_v23 = vrot.slane %v8234_v8, %v13830_v39  ;;  %v9415_v24 = vrot.slane %v8235_v9, %v13842_v53  ;;  %v12736_v9 = vld [vmem:[%s13701_s20 + $0x3c8] sm:$0xff]  }
 0x28b   : > { %v7182_v26 = vmul.f32 0.0625, %v5978_v13  ;;  %v5975_v27 = vpop.xlane.xlu0 %5974  ;;  %v6198_v15 = vsel %vm5480_vm0, %v12071_v41, 0.0  ;;  %v12074_v8 = vunpack.c.l.bf16 %v12735_v42  ;;  %v12083_v41 = vunpack.c.h.bf16 %v12737_v28 }
 0x28c   : > { %v8236_v30 = vunpack.c.l.b16 %v7611_v12  ;;  %v8237_v31 = vunpack.c.h.b16 %v7611_v12  ;;  %v7181_v35 = vmul.f32 0.0625, %v5975_v27  ;;  %v9416_v45 = vsel %vm8597_vm1, %v9415_v24, %v9411_v23 }
 0x28d   : > { %6187 = vadd.xlane.f32.xlu1 %v6186_v14  ;;  %v6204_v14 = vsel %vm5480_vm0, %v12075_v63, 0.0  ;;  %v12079_v27 = vunpack.c.h.bf16 %v12736_v9 }
 0x28e   : > { %v9420_v38 = vrot.slane %v8236_v30, %v13835_v43  ;;  %v9425_v47 = vrot.slane %v8237_v31, %v13838_v44  ;;  %v7612_v40 = vpack.c.bf16 %v7182_v26, %v7181_v35  ;;  %6184 = vadd.xlane.f32.xlu0 %v6183_v17  ;;  %v5984_v48 = vpop.xlane.xlu1 %5983  ;;  %v6201_v31 = vsel %vm5480_vm0, %v12074_v8, 0.0 }
 0x28f   : > { %v7184_v46 = vmul.f32 0.0625, %v5984_v48  ;;  %v5981_v49 = vpop.xlane.xlu0 %5980  ;;  %v12078_v35 = vunpack.c.l.bf16 %v12736_v9  ;;  %v12739_v9 = vld [vmem:[%s13701_s20 + $0x3e0] sm:$0xff]  }
 0x290   : > { %v9421_v21 = vsel %vm8604_vm2, %v9420_v38, %v9416_v45  ;;  %v8238_v57 = vunpack.c.l.b16 %v7612_v40  ;;  %v8239_v5 = vunpack.c.h.b16 %v7612_v40  ;;  %v7183_v58 = vmul.f32 0.0625, %v5981_v49 }
 0x291   : > { %v9426_v59 = vsel %vm8611_vm3, %v9425_v47, %v9421_v21  ;;  %6193 = vadd.xlane.f32.xlu1 %v6192_v36 }
 0x292   : > { %v9430_v1 = vrot.slane %v8238_v57, %v13845_v54  ;;  %v9435_v2 = vrot.slane %v8239_v5, %v13848_v55  ;;  %v7613_v3 = vpack.c.bf16 %v7184_v46, %v7183_v58  ;;  %6190 = vadd.xlane.f32.xlu0 %v6189_v50  ;;  %v5990_v4 = vpop.xlane.xlu1 %5989  ;;  %v6210_v50 = vsel %vm5480_vm0, %v12079_v27, 0.0  ;;  %v12738_v58 = vld [vmem:[%s13701_s20 + $0x3d8] sm:$0xff]  }
 0x293   : > { %v7186_v6 = vmul.f32 0.0625, %v5990_v4  ;;  %v5987_v34 = vpop.xlane.xlu0 %5986  ;;  %v6207_v57 = vsel %vm5480_vm0, %v12078_v35, 0.0  ;;  %v12082_v5 = vunpack.c.l.bf16 %v12737_v28  ;;  %v6216_v4 = vsel %vm5480_vm0, %v12083_v41, 0.0  ;;  %v12740_v35 = vld [vmem:[%s13701_s20 + $0x3e8] sm:$0xff]  }
 0x294   : > { %v9431_v10 = vsel %vm8618_vm4, %v9430_v1, %v9426_v59  ;;  %v8240_v25 = vunpack.c.l.b16 %v7613_v3  ;;  %v8241_v11 = vunpack.c.h.b16 %v7613_v3  ;;  %v7185_v12 = vmul.f32 0.0625, %v5987_v34 }
 0x295   : > { %v9436_v13 = vsel %vm8625_vm5, %v9435_v2, %v9431_v10  ;;  %6199 = vadd.xlane.f32.xlu1 %v6198_v15  ;;  %v12087_v8 = vunpack.c.h.bf16 %v12738_v58 }
 0x296   : > { %v9440_v17 = vrot.slane %v8240_v25, %v13852_v60  ;;  %v9445_v23 = vrot.slane %v8241_v11, %v13856_v0  ;;  %v7614_v24 = vpack.c.bf16 %v7186_v6, %v7185_v12  ;;  %6196 = vadd.xlane.f32.xlu0 %v6195_v7  ;;  %v5996_v26 = vpop.xlane.xlu1 %5995  ;;  %v6213_v11 = vsel %vm5480_vm0, %v12082_v5, 0.0 }
 0x297   : > { %v7188_v29 = vmul.f32 0.0625, %v5996_v26  ;;  %v5993_v30 = vpop.xlane.xlu0 %5992  ;;  %v12086_v12 = vunpack.c.l.bf16 %v12738_v58  ;;  %v12091_v26 = vunpack.c.h.bf16 %v12739_v9  ;;  %v12094_v58 = vunpack.c.l.bf16 %v12740_v35 }
 0x298   : > { %v9441_v36 = vsel %vm8632_vm6, %v9440_v17, %v9436_v13  ;;  %v8242_v38 = vunpack.c.l.b16 %v7614_v24  ;;  %v8243_v47 = vunpack.c.h.b16 %v7614_v24  ;;  %v7187_v40 = vmul.f32 0.0625, %v5993_v30 }
 0x299   : > { %v9446_v48 = vsel %vm8639_vm7, %v9445_v23, %v9441_v36  ;;  %6205 = vadd.xlane.f32.xlu1 %v6204_v14 }
 0x29a   : > { %v9450_v42 = vrot.slane %v8242_v38, %v13866_v19  ;;  %v9455_v45 = vrot.slane %v8243_v47, %v13869_v20  ;;  %v7615_v46 = vpack.c.bf16 %v7188_v29, %v7187_v40  ;;  %6202 = vadd.xlane.f32.xlu0 %v6201_v31  ;;  %v6002_v49 = vpop.xlane.xlu1 %6001  ;;  %v6222_v31 = vsel %vm5480_vm0, %v12087_v8, 0.0 }
 0x29b   : > { %v7190_v51 = vmul.f32 0.0625, %v6002_v49  ;;  %v5999_v21 = vpop.xlane.xlu0 %5998  ;;  %v6219_v47 = vsel %vm5480_vm0, %v12086_v12, 0.0  ;;  %v12090_v40 = vunpack.c.l.bf16 %v12739_v9  ;;  %v6228_v49 = vsel %vm5480_vm0, %v12091_v26, 0.0 }
 0x29c   : > { %v9451_v59 = vsel %vm8646_vm8, %v9450_v42, %v9446_v48  ;;  %v8244_v63 = vunpack.c.l.b16 %v7615_v46  ;;  %v8245_v1 = vunpack.c.h.b16 %v7615_v46  ;;  %v7189_v2 = vmul.f32 0.0625, %v5999_v21 }
 0x29d   : > { %v9456_v3 = vsel %vm15916_vm9, %v9455_v45, %v9451_v59  ;;  %6211 = vadd.xlane.f32.xlu1 %v6210_v50  ;;  %vm15917_vm9 = vcmask 786112   ;;  %v12095_v50 = vunpack.c.h.bf16 %v12740_v35  ;;  %v12741_v59 = vld [vmem:[%s13701_s20 + $0x3f0] sm:$0xff]  }
 0x29e   : > { %v9460_v15 = vrot.slane %v8244_v63, %v13885_v52  ;;  %v9465_v6 = vrot.slane %v8245_v1, %v13888_v56  ;;  %v7616_v34 = vpack.c.bf16 %v7190_v51, %v7189_v2  ;;  %6208 = vadd.xlane.f32.xlu0 %v6207_v57  ;;  %v6008_v7 = vpop.xlane.xlu1 %6007  ;;  %v6225_v2 = vsel %vm5480_vm0, %v12090_v40, 0.0 }
 0x29f   : > { %v7192_v10 = vmul.f32 0.0625, %v6008_v7  ;;  %v6005_v25 = vpop.xlane.xlu0 %6004  ;;  %v12099_v7 = vunpack.c.h.bf16 %v12741_v59 }
 0x2a0   : > { %v9461_v13 = vsel %vm8660_vm10, %v9460_v15, %v9456_v3  ;;  %v8246_v14 = vunpack.c.l.b16 %v7616_v34  ;;  %v8247_v17 = vunpack.c.h.b16 %v7616_v34  ;;  %v7191_v23 = vmul.f32 0.0625, %v6005_v25 }
 0x2a1   : > { %v9466_v24 = vsel %vm15917_vm9, %v9465_v6, %v9461_v13  ;;  %6217 = vadd.xlane.f32.xlu1 %v6216_v4  ;;  %v6234_v25 = vsel %vm5480_vm0, %v12095_v50, 0.0  ;;  %vm15918_vm9 = vcmask 654912  }
 0x2a2   : > { %v9470_v27 = vrot.slane %v8246_v14, %v13903_v16  ;;  %v9475_v28 = vrot.slane %v8247_v17, %v13913_v37  ;;  %v7617_v29 = vpack.c.bf16 %v7192_v10, %v7191_v23  ;;  %6214 = vadd.xlane.f32.xlu0 %v6213_v11  ;;  %v6014_v30 = vpop.xlane.xlu1 %6013  ;;  %v6231_v11 = vsel %vm5480_vm0, %v12094_v58, 0.0 }
 0x2a3   : > { %v7194_v36 = vmul.f32 0.0625, %v6014_v30  ;;  %v6011_v38 = vpop.xlane.xlu0 %6010  ;;  %v12098_v23 = vunpack.c.l.bf16 %v12741_v59 }
 0x2a4   : > { %v9471_v48 = vsel %vm8674_vm12, %v9470_v27, %v9466_v24  ;;  %v8248_v41 = vunpack.c.l.b16 %v7617_v29  ;;  %v8249_v42 = vunpack.c.h.b16 %v7617_v29  ;;  %v7193_v45 = vmul.f32 0.0625, %v6011_v38  ;;  %v12742_v24 = vld [vmem:[%s13701_s20 + $0x3f8] sm:$0xff]   ;;  %v12743_v38 = vld [vmem:[%s13701_s20 + $0x400] sm:$0xff]  }
 0x2a5   : > { %v9476_v46 = vsel %vm8681_vm13, %v9475_v28, %v9471_v48  ;;  %6223 = vadd.xlane.f32.xlu1 %v6222_v31  ;;  %v6240_v28 = vsel %vm5480_vm0, %v12099_v7, 0.0 }
 0x2a6   : > { %v9480_v51 = vrot.slane %v8248_v41, %v13922_v61  ;;  %v9485_v21 = vrot.slane %v8249_v42, %v13925_v62  ;;  %v7618_v57 = vpack.c.bf16 %v7194_v36, %v7193_v45  ;;  %6220 = vadd.xlane.f32.xlu0 %v6219_v47  ;;  %v6020_v5 = vpop.xlane.xlu1 %6019  ;;  %v12103_v36 = vunpack.c.h.bf16 %v12742_v24 }
 0x2a7   : > { %v7196_v63 = vmul.f32 0.0625, %v6020_v5  ;;  %v6017_v1 = vpop.xlane.xlu0 %6016  ;;  %v6237_v41 = vsel %vm5480_vm0, %v12098_v23, 0.0  ;;  %v12102_v42 = vunpack.c.l.bf16 %v12742_v24  ;;  %v12745_v23 = vld [vmem:[%s13701_s20 + $0x410] sm:$0xff]  }
 0x2a8   : > { %v9481_v3 = vsel %vm8688_vm14, %v9480_v51, %v9476_v46  ;;  %v8250_v4 = vunpack.c.l.b16 %v7618_v57  ;;  %v8251_v15 = vunpack.c.h.b16 %v7618_v57  ;;  %v7195_v6 = vmul.f32 0.0625, %v6017_v1 }
 0x2a9   : > { %v9486_v34 = vsel %vm8695_vm15, %v9485_v21, %v9481_v3  ;;  %6229 = vadd.xlane.f32.xlu1 %v6228_v49  ;;  %v12107_v21 = vunpack.c.h.bf16 %v12743_v38  ;;  %v6243_v3 = vsel %vm5480_vm0, %v12102_v42, 0.0 }
 0x2aa   : > { %v14526_v8 = vsel %vm11148_vm11, %v9486_v34, %v14290_v33  ;;  %v7619_v9 = vpack.c.bf16 %v7196_v63, %v7195_v6  ;;  %6226 = vadd.xlane.f32.xlu0 %v6225_v2  ;;  %v6026_v10 = vpop.xlane.xlu1 %6025  ;;  %v9490_v12 = vrot.slane %v8250_v4, %v13830_v39  ;;  %v9494_v13 = vrot.slane %v8251_v15, %v13842_v53  ;;  %v12744_v15 = vld [vmem:[%s13701_s20 + $0x408] sm:$0xff]  }
 0x2ab   : > { %v7198_v14 = vmul.f32 0.0625, %v6026_v10  ;;  %v6023_v17 = vpop.xlane.xlu0 %6022  ;;  %v6246_v63 = vsel %vm5480_vm0, %v12103_v36, 0.0  ;;  %v12106_v4 = vunpack.c.l.bf16 %v12743_v38  ;;  %v12115_v36 = vunpack.c.h.bf16 %v12745_v23 }
 0x2ac   : > { %v8252_v26 = vunpack.c.l.b16 %v7619_v9  ;;  %v8253_v27 = vunpack.c.h.b16 %v7619_v9  ;;  %v7197_v33 = vmul.f32 0.0625, %v6023_v17  ;;  %v9495_v47 = vsel %vm8597_vm1, %v9494_v13, %v9490_v12 }
 0x2ad   : > { %6235 = vadd.xlane.f32.xlu1 %v6234_v25  ;;  %v6252_v25 = vsel %vm5480_vm0, %v12107_v21, 0.0  ;;  %v12111_v17 = vunpack.c.h.bf16 %v12744_v15 }
 0x2ae   : > { %v9499_v29 = vrot.slane %v8252_v26, %v13835_v43  ;;  %v9504_v30 = vrot.slane %v8253_v27, %v13838_v44  ;;  %v7620_v31 = vpack.c.bf16 %v7198_v14, %v7197_v33  ;;  %6232 = vadd.xlane.f32.xlu0 %v6231_v11  ;;  %v6032_v35 = vpop.xlane.xlu1 %6031  ;;  %v6249_v27 = vsel %vm5480_vm0, %v12106_v4, 0.0 }
 0x2af   : > { %v7200_v40 = vmul.f32 0.0625, %v6032_v35  ;;  %v6029_v48 = vpop.xlane.xlu0 %6028  ;;  %v12110_v33 = vunpack.c.l.bf16 %v12744_v15  ;;  %v12747_v15 = vld [vmem:[%s13701_s20 + $0x420] sm:$0xff]  }
 0x2b0   : > { %v9500_v45 = vsel %vm8604_vm2, %v9499_v29, %v9495_v47  ;;  %v8254_v46 = vunpack.c.l.b16 %v7620_v31  ;;  %v8255_v49 = vunpack.c.h.b16 %v7620_v31  ;;  %v7199_v50 = vmul.f32 0.0625, %v6029_v48 }
 0x2b1   : > { %v9505_v51 = vsel %vm8611_vm3, %v9504_v30, %v9500_v45  ;;  %6241 = vadd.xlane.f32.xlu1 %v6240_v28 }
 0x2b2   : > { %v9509_v57 = vrot.slane %v8254_v46, %v13845_v54  ;;  %v9514_v5 = vrot.slane %v8255_v49, %v13848_v55  ;;  %v7621_v58 = vpack.c.bf16 %v7200_v40, %v7199_v50  ;;  %6238 = vadd.xlane.f32.xlu0 %v6237_v41  ;;  %v6038_v59 = vpop.xlane.xlu1 %6037  ;;  %v6258_v41 = vsel %vm5480_vm0, %v12111_v17, 0.0  ;;  %v12746_v50 = vld [vmem:[%s13701_s20 + $0x418] sm:$0xff]  }
 0x2b3   : > { %v7202_v1 = vmul.f32 0.0625, %v6038_v59  ;;  %v6035_v2 = vpop.xlane.xlu0 %6034  ;;  %v6255_v46 = vsel %vm5480_vm0, %v12110_v33, 0.0  ;;  %v12114_v49 = vunpack.c.l.bf16 %v12745_v23  ;;  %v6264_v59 = vsel %vm5480_vm0, %v12115_v36, 0.0  ;;  %v12748_v33 = vld [vmem:[%s13701_s20 + $0x428] sm:$0xff]  }
 0x2b4   : > { %v9510_v6 = vsel %vm8618_vm4, %v9509_v57, %v9505_v51  ;;  %v8256_v34 = vunpack.c.l.b16 %v7621_v58  ;;  %v8257_v7 = vunpack.c.h.b16 %v7621_v58  ;;  %v7201_v9 = vmul.f32 0.0625, %v6035_v2 }
 0x2b5   : > { %v9515_v10 = vsel %vm8625_vm5, %v9514_v5, %v9510_v6  ;;  %6247 = vadd.xlane.f32.xlu1 %v6246_v63  ;;  %v12119_v4 = vunpack.c.h.bf16 %v12746_v50 }
 0x2b6   : > { %v9519_v11 = vrot.slane %v8256_v34, %v13852_v60  ;;  %v9524_v12 = vrot.slane %v8257_v7, %v13856_v0  ;;  %v7622_v13 = vpack.c.bf16 %v7202_v1, %v7201_v9  ;;  %6244 = vadd.xlane.f32.xlu0 %v6243_v3  ;;  %v6044_v14 = vpop.xlane.xlu1 %6043  ;;  %v6261_v7 = vsel %vm5480_vm0, %v12114_v49, 0.0 }
 0x2b7   : > { %v7204_v24 = vmul.f32 0.0625, %v6044_v14  ;;  %v6041_v26 = vpop.xlane.xlu0 %6040  ;;  %v12118_v9 = vunpack.c.l.bf16 %v12746_v50  ;;  %v12123_v14 = vunpack.c.h.bf16 %v12747_v15  ;;  %v12126_v50 = vunpack.c.l.bf16 %v12748_v33 }
 0x2b8   : > { %v9520_v28 = vsel %vm8632_vm6, %v9519_v11, %v9515_v10  ;;  %v8258_v29 = vunpack.c.l.b16 %v7622_v13  ;;  %v8259_v30 = vunpack.c.h.b16 %v7622_v13  ;;  %v7203_v31 = vmul.f32 0.0625, %v6041_v26 }
 0x2b9   : > { %v9525_v35 = vsel %vm8639_vm7, %v9524_v12, %v9520_v28  ;;  %6253 = vadd.xlane.f32.xlu1 %v6252_v25 }
 0x2ba   : > { %v9529_v38 = vrot.slane %v8258_v29, %v13866_v19  ;;  %v9534_v47 = vrot.slane %v8259_v30, %v13869_v20  ;;  %v7623_v40 = vpack.c.bf16 %v7204_v24, %v7203_v31  ;;  %6250 = vadd.xlane.f32.xlu0 %v6249_v27  ;;  %v6050_v48 = vpop.xlane.xlu1 %6049  ;;  %v6270_v27 = vsel %vm5480_vm0, %v12119_v4, 0.0 }
 0x2bb   : > { %v7206_v42 = vmul.f32 0.0625, %v6050_v48  ;;  %v6047_v45 = vpop.xlane.xlu0 %6046  ;;  %v6267_v30 = vsel %vm5480_vm0, %v12118_v9, 0.0  ;;  %v12122_v31 = vunpack.c.l.bf16 %v12747_v15  ;;  %v6276_v48 = vsel %vm5480_vm0, %v12123_v14, 0.0 }
 0x2bc   : > { %v9530_v51 = vsel %vm8646_vm8, %v9529_v38, %v9525_v35  ;;  %v8260_v21 = vunpack.c.l.b16 %v7623_v40  ;;  %v8261_v57 = vunpack.c.h.b16 %v7623_v40  ;;  %v7205_v5 = vmul.f32 0.0625, %v6047_v45 }
 0x2bd   : > { %v9535_v58 = vsel %vm15918_vm9, %v9534_v47, %v9530_v51  ;;  %6259 = vadd.xlane.f32.xlu1 %v6258_v41  ;;  %vm15919_vm9 = vcmask 786112   ;;  %v12127_v41 = vunpack.c.h.bf16 %v12748_v33  ;;  %v12749_v51 = vld [vmem:[%s13701_s20 + $0x430] sm:$0xff]  }
 0x2be   : > { %v9539_v63 = vrot.slane %v8260_v21, %v13885_v52  ;;  %v9544_v1 = vrot.slane %v8261_v57, %v13888_v56  ;;  %v7624_v2 = vpack.c.bf16 %v7206_v42, %v7205_v5  ;;  %6256 = vadd.xlane.f32.xlu0 %v6255_v46  ;;  %v6056_v3 = vpop.xlane.xlu1 %6055  ;;  %v6273_v5 = vsel %vm5480_vm0, %v12122_v31, 0.0 }
 0x2bf   : > { %v7208_v6 = vmul.f32 0.0625, %v6056_v3  ;;  %v6053_v34 = vpop.xlane.xlu0 %6052  ;;  %v12131_v3 = vunpack.c.h.bf16 %v12749_v51 }
 0x2c0   : > { %v9540_v10 = vsel %vm8660_vm10, %v9539_v63, %v9535_v58  ;;  %v8262_v25 = vunpack.c.l.b16 %v7624_v2  ;;  %v8263_v11 = vunpack.c.h.b16 %v7624_v2  ;;  %v7207_v12 = vmul.f32 0.0625, %v6053_v34 }
 0x2c1   : > { %v9545_v13 = vsel %vm15919_vm9, %v9544_v1, %v9540_v10  ;;  %6265 = vadd.xlane.f32.xlu1 %v6264_v59  ;;  %v6279_v34 = vsel %vm5480_vm0, %v12126_v50, 0.0 }
 0x2c2   : > { %v9549_v17 = vrot.slane %v8262_v25, %v13903_v16  ;;  %v9554_v23 = vrot.slane %v8263_v11, %v13913_v37  ;;  %v7625_v24 = vpack.c.bf16 %v7208_v6, %v7207_v12  ;;  %6262 = vadd.xlane.f32.xlu0 %v6261_v7  ;;  %v6062_v26 = vpop.xlane.xlu1 %6061  ;;  %v6282_v6 = vsel %vm5480_vm0, %v12127_v41, 0.0 }
 0x2c3   : > { %v7210_v28 = vmul.f32 0.0625, %v6062_v26  ;;  %v6059_v29 = vpop.xlane.xlu0 %6058  ;;  %v12130_v12 = vunpack.c.l.bf16 %v12749_v51 }
 0x2c4   : > { %v9550_v35 = vsel %vm8674_vm12, %v9549_v17, %v9545_v13  ;;  %v8264_v36 = vunpack.c.l.b16 %v7625_v24  ;;  %v8265_v38 = vunpack.c.h.b16 %v7625_v24  ;;  %v7209_v47 = vmul.f32 0.0625, %v6059_v29  ;;  %v12750_v13 = vld [vmem:[%s13701_s20 + $0x438] sm:$0xff]   ;;  %v12751_v29 = vld [vmem:[%s13701_s20 + $0x440] sm:$0xff]  }
 0x2c5   : > { %v9555_v40 = vsel %vm8681_vm13, %v9554_v23, %v9550_v35  ;;  %6271 = vadd.xlane.f32.xlu1 %v6270_v27  ;;  %v6288_v24 = vsel %vm5480_vm0, %v12131_v3, 0.0 }
 0x2c6   : > { %v9559_v42 = vrot.slane %v8264_v36, %v13922_v61  ;;  %v9564_v45 = vrot.slane %v8265_v38, %v13925_v62  ;;  %v7626_v46 = vpack.c.bf16 %v7210_v28, %v7209_v47  ;;  %6268 = vadd.xlane.f32.xlu0 %v6267_v30  ;;  %v6068_v49 = vpop.xlane.xlu1 %6067  ;;  %v12135_v28 = vunpack.c.h.bf16 %v12750_v13 }
 0x2c7   : > { %v7212_v21 = vmul.f32 0.0625, %v6068_v49  ;;  %v6065_v57 = vpop.xlane.xlu0 %6064  ;;  %v6285_v36 = vsel %vm5480_vm0, %v12130_v12, 0.0  ;;  %v12134_v38 = vunpack.c.l.bf16 %v12750_v13  ;;  %v12753_v12 = vld [vmem:[%s13701_s20 + $0x450] sm:$0xff]  }
 0x2c8   : > { %v9560_v58 = vsel %vm8688_vm14, %v9559_v42, %v9555_v40  ;;  %v8266_v59 = vunpack.c.l.b16 %v7626_v46  ;;  %v8267_v63 = vunpack.c.h.b16 %v7626_v46  ;;  %v7211_v1 = vmul.f32 0.0625, %v6065_v57 }
 0x2c9   : > { %v9565_v2 = vsel %vm8695_vm15, %v9564_v45, %v9560_v58  ;;  %6277 = vadd.xlane.f32.xlu1 %v6276_v48  ;;  %v12139_v45 = vunpack.c.h.bf16 %v12751_v29  ;;  %v6291_v58 = vsel %vm5480_vm0, %v12134_v38, 0.0 }
 0x2ca   : > { %v7627_v4 = vpack.c.bf16 %v7212_v21, %v7211_v1  ;;  %6274 = vadd.xlane.f32.xlu0 %v6273_v5  ;;  %v6074_v15 = vpop.xlane.xlu1 %6073  ;;  %v14587_v7 = vsel %vm11148_vm11, %v9565_v2, %v14351_v32  ;;  %v9569_v9 = vrot.slane %v8266_v59, %v13830_v39  ;;  %v9573_v10 = vrot.slane %v8267_v63, %v13842_v53  ;;  %v12752_v63 = vld [vmem:[%s13701_s20 + $0x448] sm:$0xff]  }
 0x2cb   : > { %v7214_v25 = vmul.f32 0.0625, %v6074_v15  ;;  %v6071_v11 = vpop.xlane.xlu0 %6070  ;;  %v6294_v21 = vsel %vm5480_vm0, %v12135_v28, 0.0  ;;  %v12138_v59 = vunpack.c.l.bf16 %v12751_v29  ;;  %v12147_v28 = vunpack.c.h.bf16 %v12753_v12 }
 0x2cc   : > { %v8268_v14 = vunpack.c.l.b16 %v7627_v4  ;;  %v8269_v17 = vunpack.c.h.b16 %v7627_v4  ;;  %v7213_v23 = vmul.f32 0.0625, %v6071_v11  ;;  %v9574_v30 = vsel %vm8597_vm1, %v9573_v10, %v9569_v9 }
 0x2cd   : > { %6283 = vadd.xlane.f32.xlu1 %v6282_v6  ;;  %v6300_v6 = vsel %vm5480_vm0, %v12139_v45, 0.0  ;;  %v12143_v11 = vunpack.c.h.bf16 %v12752_v63  ;;  %vm15920_vm11 = vcmask 654912  }
 0x2ce   : > { %v9578_v26 = vrot.slane %v8268_v14, %v13835_v43  ;;  %v9583_v32 = vrot.slane %v8269_v17, %v13838_v44  ;;  %v7628_v27 = vpack.c.bf16 %v7214_v25, %v7213_v23  ;;  %6280 = vadd.xlane.f32.xlu0 %v6279_v34  ;;  %v6080_v33 = vpop.xlane.xlu1 %6079  ;;  %v6297_v17 = vsel %vm5480_vm0, %v12138_v59, 0.0 }
 0x2cf   : > { %v7216_v31 = vmul.f32 0.0625, %v6080_v33  ;;  %v6077_v35 = vpop.xlane.xlu0 %6076  ;;  %v12142_v23 = vunpack.c.l.bf16 %v12752_v63  ;;  %v12755_v63 = vld [vmem:[%s13701_s20 + $0x460] sm:$0xff]  }
 0x2d0   : > { %v9579_v47 = vsel %vm8604_vm2, %v9578_v26, %v9574_v30  ;;  %v8270_v40 = vunpack.c.l.b16 %v7628_v27  ;;  %v8271_v48 = vunpack.c.h.b16 %v7628_v27  ;;  %v7215_v41 = vmul.f32 0.0625, %v6077_v35 }
 0x2d1   : > { %v9584_v42 = vsel %vm8611_vm3, %v9583_v32, %v9579_v47  ;;  %6289 = vadd.xlane.f32.xlu1 %v6288_v24 }
 0x2d2   : > { %v9588_v46 = vrot.slane %v8270_v40, %v13845_v54  ;;  %v9593_v49 = vrot.slane %v8271_v48, %v13848_v55  ;;  %v7629_v50 = vpack.c.bf16 %v7216_v31, %v7215_v41  ;;  %6286 = vadd.xlane.f32.xlu0 %v6285_v36  ;;  %v6086_v51 = vpop.xlane.xlu1 %6085  ;;  %v6306_v36 = vsel %vm5480_vm0, %v12143_v11, 0.0  ;;  %v12754_v41 = vld [vmem:[%s13701_s20 + $0x458] sm:$0xff]  }
 0x2d3   : > { %v7218_v57 = vmul.f32 0.0625, %v6086_v51  ;;  %v6083_v5 = vpop.xlane.xlu0 %6082  ;;  %v6303_v40 = vsel %vm5480_vm0, %v12142_v23, 0.0  ;;  %v12146_v48 = vunpack.c.l.bf16 %v12753_v12  ;;  %v6312_v51 = vsel %vm5480_vm0, %v12147_v28, 0.0  ;;  %v12756_v23 = vld [vmem:[%s13701_s20 + $0x468] sm:$0xff]  }
 0x2d4   : > { %v9589_v1 = vsel %vm8618_vm4, %v9588_v46, %v9584_v42  ;;  %v8272_v2 = vunpack.c.l.b16 %v7629_v50  ;;  %v8273_v3 = vunpack.c.h.b16 %v7629_v50  ;;  %v7217_v4 = vmul.f32 0.0625, %v6083_v5 }
 0x2d5   : > { %v9594_v15 = vsel %vm8625_vm5, %v9593_v49, %v9589_v1  ;;  %6295 = vadd.xlane.f32.xlu1 %v6294_v21  ;;  %v12151_v59 = vunpack.c.h.bf16 %v12754_v41 }
 0x2d6   : > { %v9598_v34 = vrot.slane %v8272_v2, %v13852_v60  ;;  %v9603_v9 = vrot.slane %v8273_v3, %v13856_v0  ;;  %v7630_v10 = vpack.c.bf16 %v7218_v57, %v7217_v4  ;;  %6292 = vadd.xlane.f32.xlu0 %v6291_v58  ;;  %v6092_v25 = vpop.xlane.xlu1 %6091  ;;  %v6309_v3 = vsel %vm5480_vm0, %v12146_v48, 0.0 }
 0x2d7   : > { %v7220_v13 = vmul.f32 0.0625, %v6092_v25  ;;  %v6089_v14 = vpop.xlane.xlu0 %6088  ;;  %v12150_v4 = vunpack.c.l.bf16 %v12754_v41  ;;  %v12155_v25 = vunpack.c.h.bf16 %v12755_v63  ;;  %v12158_v41 = vunpack.c.l.bf16 %v12756_v23 }
 0x2d8   : > { %v9599_v24 = vsel %vm8632_vm6, %v9598_v34, %v9594_v15  ;;  %v8274_v26 = vunpack.c.l.b16 %v7630_v10  ;;  %v8275_v32 = vunpack.c.h.b16 %v7630_v10  ;;  %v7219_v27 = vmul.f32 0.0625, %v6089_v14 }
 0x2d9   : > { %v9604_v33 = vsel %vm8639_vm7, %v9603_v9, %v9599_v24  ;;  %6301 = vadd.xlane.f32.xlu1 %v6300_v6 }
 0x2da   : > { %v9608_v29 = vrot.slane %v8274_v26, %v13866_v19  ;;  %v9613_v30 = vrot.slane %v8275_v32, %v13869_v20  ;;  %v7631_v31 = vpack.c.bf16 %v7220_v13, %v7219_v27  ;;  %6298 = vadd.xlane.f32.xlu0 %v6297_v17  ;;  %v6098_v35 = vpop.xlane.xlu1 %6097  ;;  %v6318_v17 = vsel %vm5480_vm0, %v12151_v59, 0.0 }
 0x2db   : > { %v7222_v38 = vmul.f32 0.0625, %v6098_v35  ;;  %v6095_v47 = vpop.xlane.xlu0 %6094  ;;  %v6315_v32 = vsel %vm5480_vm0, %v12150_v4, 0.0  ;;  %v12154_v27 = vunpack.c.l.bf16 %v12755_v63  ;;  %v6324_v35 = vsel %vm5480_vm0, %v12155_v25, 0.0 }
 0x2dc   : > { %v9609_v42 = vsel %vm8646_vm8, %v9608_v29, %v9604_v33  ;;  %v8276_v45 = vunpack.c.l.b16 %v7631_v31  ;;  %v8277_v46 = vunpack.c.h.b16 %v7631_v31  ;;  %v7221_v49 = vmul.f32 0.0625, %v6095_v47 }
 0x2dd   : > { %v9614_v50 = vsel %vm15920_vm11, %v9613_v30, %v9609_v42  ;;  %6307 = vadd.xlane.f32.xlu1 %v6306_v36  ;;  %v12159_v36 = vunpack.c.h.bf16 %v12756_v23  ;;  %v12757_v42 = vld [vmem:[%s13701_s20 + $0x470] sm:$0xff]   ;;  %vm11150_vm11 = vcmask 1043459  }
 0x2de   : > { %v9618_v21 = vrot.slane %v8276_v45, %v13885_v52  ;;  %v9623_v57 = vrot.slane %v8277_v46, %v13888_v56  ;;  %v7632_v5 = vpack.c.bf16 %v7222_v38, %v7221_v49  ;;  %6304 = vadd.xlane.f32.xlu0 %v6303_v40  ;;  %v6104_v58 = vpop.xlane.xlu1 %6103  ;;  %v6321_v49 = vsel %vm5480_vm0, %v12154_v27, 0.0 }
 0x2df   : > { %v7224_v1 = vmul.f32 0.0625, %v6104_v58  ;;  %v6101_v2 = vpop.xlane.xlu0 %6100  ;;  %v12163_v58 = vunpack.c.h.bf16 %v12757_v42 }
 0x2e0   : > { %v9619_v15 = vsel %vm8660_vm10, %v9618_v21, %v9614_v50  ;;  %v8278_v6 = vunpack.c.l.b16 %v7632_v5  ;;  %v8279_v34 = vunpack.c.h.b16 %v7632_v5  ;;  %v7223_v9 = vmul.f32 0.0625, %v6101_v2 }
 0x2e1   : > { %v9624_v10 = vsel %vm15919_vm9, %v9623_v57, %v9619_v15  ;;  %6313 = vadd.xlane.f32.xlu1 %v6312_v51  ;;  %v6327_v2 = vsel %vm5480_vm0, %v12158_v41, 0.0  ;;  %vm15921_vm9 = vcmask 654912  }
 0x2e2   : > { %v9628_v11 = vrot.slane %v8278_v6, %v13903_v16  ;;  %v9633_v12 = vrot.slane %v8279_v34, %v13913_v37  ;;  %v7633_v13 = vpack.c.bf16 %v7224_v1, %v7223_v9  ;;  %6310 = vadd.xlane.f32.xlu0 %v6309_v3  ;;  %v6110_v14 = vpop.xlane.xlu1 %6109  ;;  %v6330_v1 = vsel %vm5480_vm0, %v12159_v36, 0.0 }
 0x2e3   : > { %v7226_v24 = vmul.f32 0.0625, %v6110_v14  ;;  %v6107_v26 = vpop.xlane.xlu0 %6106  ;;  %v12162_v9 = vunpack.c.l.bf16 %v12757_v42 }
 0x2e4   : > { %v9629_v33 = vsel %vm8674_vm12, %v9628_v11, %v9624_v10  ;;  %v8280_v28 = vunpack.c.l.b16 %v7633_v13  ;;  %v8281_v29 = vunpack.c.h.b16 %v7633_v13  ;;  %v7225_v30 = vmul.f32 0.0625, %v6107_v26  ;;  %v12758_v10 = vld [vmem:[%s13701_s20 + $0x478] sm:$0xff]   ;;  %v12759_v26 = vld [vmem:[%s13701_s20 + $0x480] sm:$0xff]  }
 0x2e5   : > { %v9634_v31 = vsel %vm8681_vm13, %v9633_v12, %v9629_v33  ;;  %6319 = vadd.xlane.f32.xlu1 %v6318_v17  ;;  %v6336_v13 = vsel %vm5480_vm0, %v12163_v58, 0.0 }
 0x2e6   : > { %v9638_v38 = vrot.slane %v8280_v28, %v13922_v61  ;;  %v9643_v47 = vrot.slane %v8281_v29, %v13925_v62  ;;  %v7634_v40 = vpack.c.bf16 %v7226_v24, %v7225_v30  ;;  %6316 = vadd.xlane.f32.xlu0 %v6315_v32  ;;  %v6116_v48 = vpop.xlane.xlu1 %6115  ;;  %v12167_v24 = vunpack.c.h.bf16 %v12758_v10 }
 0x2e7   : > { %v7228_v45 = vmul.f32 0.0625, %v6116_v48  ;;  %v6113_v46 = vpop.xlane.xlu0 %6112  ;;  %v6333_v28 = vsel %vm5480_vm0, %v12162_v9, 0.0  ;;  %v12166_v29 = vunpack.c.l.bf16 %v12758_v10  ;;  %v12761_v9 = vld [vmem:[%s13701_s20 + $0x490] sm:$0xff]  }
 0x2e8   : > { %v9639_v50 = vsel %vm8688_vm14, %v9638_v38, %v9634_v31  ;;  %v8282_v51 = vunpack.c.l.b16 %v7634_v40  ;;  %v8283_v21 = vunpack.c.h.b16 %v7634_v40  ;;  %v7227_v57 = vmul.f32 0.0625, %v6113_v46 }
 0x2e9   : > { %v9644_v5 = vsel %vm8695_vm15, %v9643_v47, %v9639_v50  ;;  %6325 = vadd.xlane.f32.xlu1 %v6324_v35  ;;  %v12171_v47 = vunpack.c.h.bf16 %v12759_v26  ;;  %v6339_v50 = vsel %vm5480_vm0, %v12166_v29, 0.0 }
 0x2ea   : > { %v7635_v59 = vpack.c.bf16 %v7228_v45, %v7227_v57  ;;  %6322 = vadd.xlane.f32.xlu0 %v6321_v49  ;;  %v6122_v63 = vpop.xlane.xlu1 %6121  ;;  %v14646_v3 = vsel %vm11150_vm11, %v9644_v5, %v14408_v22  ;;  %v9648_v4 = vrot.slane %v8282_v51, %v13830_v39  ;;  %v9652_v15 = vrot.slane %v8283_v21, %v13842_v53  ;;  %v12760_v21 = vld [vmem:[%s13701_s20 + $0x488] sm:$0xff]  }
 0x2eb   : > { %v7230_v6 = vmul.f32 0.0625, %v6122_v63  ;;  %v6119_v34 = vpop.xlane.xlu0 %6118  ;;  %v6342_v45 = vsel %vm5480_vm0, %v12167_v24, 0.0  ;;  %v12170_v51 = vunpack.c.l.bf16 %v12759_v26  ;;  %v12179_v24 = vunpack.c.h.bf16 %v12761_v9 }
 0x2ec   : > { %v8284_v25 = vunpack.c.l.b16 %v7635_v59  ;;  %v8285_v11 = vunpack.c.h.b16 %v7635_v59  ;;  %v7229_v12 = vmul.f32 0.0625, %v6119_v34  ;;  %v9653_v32 = vsel %vm8597_vm1, %v9652_v15, %v9648_v4 }
 0x2ed   : > { %6331 = vadd.xlane.f32.xlu1 %v6330_v1  ;;  %v6348_v1 = vsel %vm5480_vm0, %v12171_v47, 0.0  ;;  %v12175_v34 = vunpack.c.h.bf16 %v12760_v21 }
 0x2ee   : > { %v9657_v14 = vrot.slane %v8284_v25, %v13835_v43  ;;  %v9662_v22 = vrot.slane %v8285_v11, %v13838_v44  ;;  %v7636_v17 = vpack.c.bf16 %v7230_v6, %v7229_v12  ;;  %6328 = vadd.xlane.f32.xlu0 %v6327_v2  ;;  %v6128_v23 = vpop.xlane.xlu1 %6127  ;;  %v6345_v11 = vsel %vm5480_vm0, %v12170_v51, 0.0 }
 0x2ef   : > { %v7232_v27 = vmul.f32 0.0625, %v6128_v23  ;;  %v6125_v33 = vpop.xlane.xlu0 %6124  ;;  %v12174_v12 = vunpack.c.l.bf16 %v12760_v21  ;;  %v12763_v21 = vld [vmem:[%s13701_s20 + $0x4a0] sm:$0xff]  }
 0x2f0   : > { %v9658_v30 = vsel %vm8604_vm2, %v9657_v14, %v9653_v32  ;;  %v8286_v31 = vunpack.c.l.b16 %v7636_v17  ;;  %v8287_v35 = vunpack.c.h.b16 %v7636_v17  ;;  %v7231_v36 = vmul.f32 0.0625, %v6125_v33 }
 0x2f1   : > { %v9663_v38 = vsel %vm8611_vm3, %v9662_v22, %v9658_v30  ;;  %6337 = vadd.xlane.f32.xlu1 %v6336_v13 }
 0x2f2   : > { %v9667_v40 = vrot.slane %v8286_v31, %v13845_v54  ;;  %v9672_v48 = vrot.slane %v8287_v35, %v13848_v55  ;;  %v7637_v41 = vpack.c.bf16 %v7232_v27, %v7231_v36  ;;  %6334 = vadd.xlane.f32.xlu0 %v6333_v28  ;;  %v6134_v42 = vpop.xlane.xlu1 %6133  ;;  %v6354_v28 = vsel %vm5480_vm0, %v12175_v34, 0.0  ;;  %v12762_v36 = vld [vmem:[%s13701_s20 + $0x498] sm:$0xff]  }
 0x2f3   : > { %v7234_v46 = vmul.f32 0.0625, %v6134_v42  ;;  %v6131_v49 = vpop.xlane.xlu0 %6130  ;;  %v6351_v31 = vsel %vm5480_vm0, %v12174_v12, 0.0  ;;  %v12178_v35 = vunpack.c.l.bf16 %v12761_v9  ;;  %v6360_v42 = vsel %vm5480_vm0, %v12179_v24, 0.0  ;;  %v12764_v12 = vld [vmem:[%s13701_s20 + $0x4a8] sm:$0xff]  }
 0x2f4   : > { %v9668_v57 = vsel %vm8618_vm4, %v9667_v40, %v9663_v38  ;;  %v8288_v5 = vunpack.c.l.b16 %v7637_v41  ;;  %v8289_v58 = vunpack.c.h.b16 %v7637_v41  ;;  %v7233_v59 = vmul.f32 0.0625, %v6131_v49 }
 0x2f5   : > { %v9673_v63 = vsel %vm8625_vm5, %v9672_v48, %v9668_v57  ;;  %6343 = vadd.xlane.f32.xlu1 %v6342_v45  ;;  %v12183_v51 = vunpack.c.h.bf16 %v12762_v36 }
 0x2f6   : > { %v9677_v2 = vrot.slane %v8288_v5, %v13852_v60  ;;  %v9682_v4 = vrot.slane %v8289_v58, %v13856_v0  ;;  %v7638_v15 = vpack.c.bf16 %v7234_v46, %v7233_v59  ;;  %6340 = vadd.xlane.f32.xlu0 %v6339_v50  ;;  %v6140_v6 = vpop.xlane.xlu1 %6139  ;;  %v6357_v58 = vsel %vm5480_vm0, %v12178_v35, 0.0 }
 0x2f7   : > { %v7236_v10 = vmul.f32 0.0625, %v6140_v6  ;;  %v6137_v25 = vpop.xlane.xlu0 %6136  ;;  %v12182_v59 = vunpack.c.l.bf16 %v12762_v36  ;;  %v12187_v6 = vunpack.c.h.bf16 %v12763_v21  ;;  %v12190_v36 = vunpack.c.l.bf16 %v12764_v12 }
 0x2f8   : > { %v9678_v13 = vsel %vm8632_vm6, %v9677_v2, %v9673_v63  ;;  %v8290_v14 = vunpack.c.l.b16 %v7638_v15  ;;  %v8291_v22 = vunpack.c.h.b16 %v7638_v15  ;;  %v7235_v17 = vmul.f32 0.0625, %v6137_v25 }
 0x2f9   : > { %v9683_v23 = vsel %vm8639_vm7, %v9682_v4, %v9678_v13  ;;  %6349 = vadd.xlane.f32.xlu1 %v6348_v1 }
 0x2fa   : > { %v9687_v26 = vrot.slane %v8290_v14, %v13866_v19  ;;  %v9692_v32 = vrot.slane %v8291_v22, %v13869_v20  ;;  %v7639_v27 = vpack.c.bf16 %v7236_v10, %v7235_v17  ;;  %6346 = vadd.xlane.f32.xlu0 %v6345_v11  ;;  %v6146_v33 = vpop.xlane.xlu1 %6145  ;;  %v6366_v11 = vsel %vm5480_vm0, %v12183_v51, 0.0 }
 0x2fb   : > { %v7238_v29 = vmul.f32 0.0625, %v6146_v33  ;;  %v6143_v30 = vpop.xlane.xlu0 %6142  ;;  %v6363_v22 = vsel %vm5480_vm0, %v12182_v59, 0.0  ;;  %v12186_v17 = vunpack.c.l.bf16 %v12763_v21  ;;  %v6372_v33 = vsel %vm5480_vm0, %v12187_v6, 0.0 }
 0x2fc   : > { %v9688_v38 = vsel %vm8646_vm8, %v9687_v26, %v9683_v23  ;;  %v8292_v47 = vunpack.c.l.b16 %v7639_v27  ;;  %v8293_v40 = vunpack.c.h.b16 %v7639_v27  ;;  %v7237_v48 = vmul.f32 0.0625, %v6143_v30 }
 0x2fd   : > { %v9693_v41 = vsel %vm15921_vm9, %v9692_v32, %v9688_v38  ;;  %6355 = vadd.xlane.f32.xlu1 %v6354_v28  ;;  %vm15922_vm9 = vcmask 786112   ;;  %v12191_v28 = vunpack.c.h.bf16 %v12764_v12  ;;  %v12765_v38 = vld [vmem:[%s13701_s20 + $0x4b0] sm:$0xff]  }
 0x2fe   : > { %v9697_v45 = vrot.slane %v8292_v47, %v13885_v52  ;;  %v9702_v46 = vrot.slane %v8293_v40, %v13888_v56  ;;  %v7640_v49 = vpack.c.bf16 %v7238_v29, %v7237_v48  ;;  %6352 = vadd.xlane.f32.xlu0 %v6351_v31  ;;  %v6152_v50 = vpop.xlane.xlu1 %6151  ;;  %v6369_v48 = vsel %vm5480_vm0, %v12186_v17, 0.0 }
 0x2ff   : > { %v7240_v57 = vmul.f32 0.0625, %v6152_v50  ;;  %v6149_v5 = vpop.xlane.xlu0 %6148 }
 0x300   : > { %v9698_v63 = vsel %vm8660_vm10, %v9697_v45, %v9693_v41  ;;  %v8294_v1 = vunpack.c.l.b16 %v7640_v49  ;;  %v8295_v2 = vunpack.c.h.b16 %v7640_v49  ;;  %v7239_v4 = vmul.f32 0.0625, %v6149_v5 }
 0x301   : > { %v9703_v15 = vsel %vm15922_vm9, %v9702_v46, %v9698_v63  ;;  %6361 = vadd.xlane.f32.xlu1 %v6360_v42  ;;  %v12195_v49 = vunpack.c.h.bf16 %v12765_v38  ;;  %v6375_v5 = vsel %vm5480_vm0, %v12190_v36, 0.0  ;;  %vm15923_vm9 = vcmask 654912  }
 0x302   : > { %v9707_v34 = vrot.slane %v8294_v1, %v13903_v16  ;;  %v9712_v9 = vrot.slane %v8295_v2, %v13913_v37  ;;  %v7641_v10 = vpack.c.bf16 %v7240_v57, %v7239_v4  ;;  %6358 = vadd.xlane.f32.xlu0 %v6357_v58  ;;  %v6158_v25 = vpop.xlane.xlu1 %6157  ;;  %v6378_v57 = vsel %vm5480_vm0, %v12191_v28, 0.0 }
 0x303   : > { %v7242_v13 = vmul.f32 0.0625, %v6158_v25  ;;  %v6155_v14 = vpop.xlane.xlu0 %6154  ;;  %v12194_v4 = vunpack.c.l.bf16 %v12765_v38 }
 0x304   : > { %v9708_v23 = vsel %vm8674_vm12, %v9707_v34, %v9703_v15  ;;  %v8296_v24 = vunpack.c.l.b16 %v7641_v10  ;;  %v8297_v26 = vunpack.c.h.b16 %v7641_v10  ;;  %v7241_v32 = vmul.f32 0.0625, %v6155_v14  ;;  %v12766_v15 = vld [vmem:[%s13701_s20 + $0x4b8] sm:$0xff]   ;;  %v12767_v14 = vld [vmem:[%s13701_s20 + $0x4c0] sm:$0xff]  }
 0x305   : > { %v9713_v27 = vsel %vm8681_vm13, %v9712_v9, %v9708_v23  ;;  %6367 = vadd.xlane.f32.xlu1 %v6366_v11  ;;  %v6384_v10 = vsel %vm5480_vm0, %v12195_v49, 0.0 }
 0x306   : > { %v9717_v29 = vrot.slane %v8296_v24, %v13922_v61  ;;  %v9722_v30 = vrot.slane %v8297_v26, %v13925_v62  ;;  %v7642_v31 = vpack.c.bf16 %v7242_v13, %v7241_v32  ;;  %6364 = vadd.xlane.f32.xlu0 %v6363_v22  ;;  %v6164_v35 = vpop.xlane.xlu1 %6163  ;;  %v12199_v13 = vunpack.c.h.bf16 %v12766_v15 }
 0x307   : > { %v7244_v47 = vmul.f32 0.0625, %v6164_v35  ;;  %v6161_v40 = vpop.xlane.xlu0 %6160  ;;  %v6381_v24 = vsel %vm5480_vm0, %v12194_v4, 0.0  ;;  %v12198_v26 = vunpack.c.l.bf16 %v12766_v15  ;;  %v12769_v4 = vld [vmem:[%s13701_s20 + $0x4d0] sm:$0xff]  }
 0x308   : > { %v9718_v41 = vsel %vm8688_vm14, %v9717_v29, %v9713_v27  ;;  %v8298_v42 = vunpack.c.l.b16 %v7642_v31  ;;  %v8299_v45 = vunpack.c.h.b16 %v7642_v31  ;;  %v7243_v46 = vmul.f32 0.0625, %v6161_v40 }
 0x309   : > { %6373 = vadd.xlane.f32.xlu1 %v6372_v33  ;;  %v9723_v50 = vsel %vm8695_vm15, %v9722_v30, %v9718_v41  ;;  %v12203_v30 = vunpack.c.h.bf16 %v12767_v14  ;;  %v6387_v41 = vsel %vm5480_vm0, %v12198_v26, 0.0 }
 0x30a   : > { %v7643_v51 = vpack.c.bf16 %v7244_v47, %v7243_v46  ;;  %6370 = vadd.xlane.f32.xlu0 %v6369_v48  ;;  %v6170_v21 = vpop.xlane.xlu1 %6169  ;;  %v14705_v58 = vsel %vm11150_vm11, %v9723_v50, %v14469_v18  ;;  %v9727_v59 = vrot.slane %v8298_v42, %v13830_v39  ;;  %v9731_v63 = vrot.slane %v8299_v45, %v13842_v53  ;;  %v12768_v45 = vld [vmem:[%s13701_s20 + $0x4c8] sm:$0xff]  }
 0x30b   : > { %v7246_v1 = vmul.f32 0.0625, %v6170_v21  ;;  %v6167_v2 = vpop.xlane.xlu0 %6166  ;;  %v6390_v47 = vsel %vm5480_vm0, %v12199_v13, 0.0  ;;  %v12202_v42 = vunpack.c.l.bf16 %v12767_v14  ;;  %v12211_v13 = vunpack.c.h.bf16 %v12769_v4 }
 0x30c   : > { %v8300_v6 = vunpack.c.l.b16 %v7643_v51  ;;  %v8301_v34 = vunpack.c.h.b16 %v7643_v51  ;;  %v7245_v9 = vmul.f32 0.0625, %v6167_v2  ;;  %v9732_v22 = vsel %vm8597_vm1, %v9731_v63, %v9727_v59 }
 0x30d   : > { %6379 = vadd.xlane.f32.xlu1 %v6378_v57  ;;  %v6396_v57 = vsel %vm5480_vm0, %v12203_v30, 0.0  ;;  %v12207_v2 = vunpack.c.h.bf16 %v12768_v45 }
 0x30e   : > { %v9736_v25 = vrot.slane %v8300_v6, %v13835_v43  ;;  %v9741_v18 = vrot.slane %v8301_v34, %v13838_v44  ;;  %v7644_v11 = vpack.c.bf16 %v7246_v1, %v7245_v9  ;;  %6376 = vadd.xlane.f32.xlu0 %v6375_v5  ;;  %v6176_v12 = vpop.xlane.xlu1 %6175  ;;  %v6393_v34 = vsel %vm5480_vm0, %v12202_v42, 0.0 }
 0x30f   : > { %v7248_v17 = vmul.f32 0.0625, %v6176_v12  ;;  %v6173_v23 = vpop.xlane.xlu0 %6172  ;;  %v12206_v9 = vunpack.c.l.bf16 %v12768_v45  ;;  %v12771_v45 = vld [vmem:[%s13701_s20 + $0x4e0] sm:$0xff]  }
 0x310   : > { %v9737_v32 = vsel %vm8604_vm2, %v9736_v25, %v9732_v22  ;;  %v8302_v27 = vunpack.c.l.b16 %v7644_v11  ;;  %v8303_v33 = vunpack.c.h.b16 %v7644_v11  ;;  %v7247_v28 = vmul.f32 0.0625, %v6173_v23 }
 0x311   : > { %v9742_v29 = vsel %vm8611_vm3, %v9741_v18, %v9737_v32  ;;  %6385 = vadd.xlane.f32.xlu1 %v6384_v10 }
 0x312   : > { %v9746_v31 = vrot.slane %v8302_v27, %v13845_v54  ;;  %v9751_v35 = vrot.slane %v8303_v33, %v13848_v55  ;;  %v7645_v36 = vpack.c.bf16 %v7248_v17, %v7247_v28  ;;  %6382 = vadd.xlane.f32.xlu0 %v6381_v24  ;;  %v6182_v38 = vpop.xlane.xlu1 %6181  ;;  %v6402_v24 = vsel %vm5480_vm0, %v12207_v2, 0.0  ;;  %v12770_v28 = vld [vmem:[%s13701_s20 + $0x4d8] sm:$0xff]  }
 0x313   : > { %v7250_v40 = vmul.f32 0.0625, %v6182_v38  ;;  %v6179_v48 = vpop.xlane.xlu0 %6178  ;;  %v6399_v27 = vsel %vm5480_vm0, %v12206_v9, 0.0  ;;  %v12210_v33 = vunpack.c.l.bf16 %v12769_v4  ;;  %v6408_v38 = vsel %vm5480_vm0, %v12211_v13, 0.0  ;;  %v12772_v9 = vld [vmem:[%s13701_s20 + $0x4e8] sm:$0xff]  }
 0x314   : > { %v9747_v46 = vsel %vm8618_vm4, %v9746_v31, %v9742_v29  ;;  %v8304_v49 = vunpack.c.l.b16 %v7645_v36  ;;  %v8305_v50 = vunpack.c.h.b16 %v7645_v36  ;;  %v7249_v51 = vmul.f32 0.0625, %v6179_v48 }
 0x315   : > { %v9752_v21 = vsel %vm8625_vm5, %v9751_v35, %v9747_v46  ;;  %6391 = vadd.xlane.f32.xlu1 %v6390_v47  ;;  %v12215_v42 = vunpack.c.h.bf16 %v12770_v28 }
 0x316   : > { %v9756_v5 = vrot.slane %v8304_v49, %v13852_v60  ;;  %v9761_v59 = vrot.slane %v8305_v50, %v13856_v0  ;;  %v7646_v63 = vpack.c.bf16 %v7250_v40, %v7249_v51  ;;  %6388 = vadd.xlane.f32.xlu0 %v6387_v41  ;;  %v6188_v1 = vpop.xlane.xlu1 %6187  ;;  %v6405_v50 = vsel %vm5480_vm0, %v12210_v33, 0.0 }
 0x317   : > { %v7252_v15 = vmul.f32 0.0625, %v6188_v1  ;;  %v6185_v6 = vpop.xlane.xlu0 %6184  ;;  %v12214_v51 = vunpack.c.l.bf16 %v12770_v28  ;;  %v12219_v1 = vunpack.c.h.bf16 %v12771_v45  ;;  %v12222_v28 = vunpack.c.l.bf16 %v12772_v9 }
 0x318   : > { %v9757_v10 = vsel %vm8632_vm6, %v9756_v5, %v9752_v21  ;;  %v8306_v25 = vunpack.c.l.b16 %v7646_v63  ;;  %v8307_v18 = vunpack.c.h.b16 %v7646_v63  ;;  %v7251_v11 = vmul.f32 0.0625, %v6185_v6 }
 0x319   : > { %v9762_v12 = vsel %vm8639_vm7, %v9761_v59, %v9757_v10  ;;  %6397 = vadd.xlane.f32.xlu1 %v6396_v57 }
 0x31a   : > { %v9766_v14 = vrot.slane %v8306_v25, %v13866_v19  ;;  %v9771_v22 = vrot.slane %v8307_v18, %v13869_v20  ;;  %v7647_v17 = vpack.c.bf16 %v7252_v15, %v7251_v11  ;;  %6394 = vadd.xlane.f32.xlu0 %v6393_v34  ;;  %v6194_v23 = vpop.xlane.xlu1 %6193  ;;  %v6414_v34 = vsel %vm5480_vm0, %v12215_v42, 0.0 }
 0x31b   : > { %v7254_v26 = vmul.f32 0.0625, %v6194_v23  ;;  %v6191_v32 = vpop.xlane.xlu0 %6190  ;;  %v6411_v18 = vsel %vm5480_vm0, %v12214_v51, 0.0  ;;  %v12218_v11 = vunpack.c.l.bf16 %v12771_v45  ;;  %v6420_v23 = vsel %vm5480_vm0, %v12219_v1, 0.0 }
 0x31c   : > { %v9767_v29 = vsel %vm8646_vm8, %v9766_v14, %v9762_v12  ;;  %v8308_v30 = vunpack.c.l.b16 %v7647_v17  ;;  %v8309_v31 = vunpack.c.h.b16 %v7647_v17  ;;  %v7253_v35 = vmul.f32 0.0625, %v6191_v32 }
 0x31d   : > { %v9772_v36 = vsel %vm15923_vm9, %v9771_v22, %v9767_v29  ;;  %6403 = vadd.xlane.f32.xlu1 %v6402_v24  ;;  %vm15924_vm9 = vcmask 786112   ;;  %v12223_v24 = vunpack.c.h.bf16 %v12772_v9  ;;  %v12773_v29 = vld [vmem:[%s13701_s20 + $0x4f0] sm:$0xff]  }
 0x31e   : > { %v9776_v47 = vrot.slane %v8308_v30, %v13885_v52  ;;  %v9781_v40 = vrot.slane %v8309_v31, %v13888_v56  ;;  %v7648_v48 = vpack.c.bf16 %v7254_v26, %v7253_v35  ;;  %6400 = vadd.xlane.f32.xlu0 %v6399_v27  ;;  %v6200_v41 = vpop.xlane.xlu1 %6199  ;;  %v6417_v35 = vsel %vm5480_vm0, %v12218_v11, 0.0 }
 0x31f   : > { %v7256_v46 = vmul.f32 0.0625, %v6200_v41  ;;  %v6197_v49 = vpop.xlane.xlu0 %6196  ;;  %v12227_v41 = vunpack.c.h.bf16 %v12773_v29 }
 0x320   : > { %v9777_v21 = vsel %vm8660_vm10, %v9776_v47, %v9772_v36  ;;  %v8310_v57 = vunpack.c.l.b16 %v7648_v48  ;;  %v8311_v5 = vunpack.c.h.b16 %v7648_v48  ;;  %v7255_v59 = vmul.f32 0.0625, %v6197_v49 }
 0x321   : > { %v9782_v63 = vsel %vm15924_vm9, %v9781_v40, %v9777_v21  ;;  %6409 = vadd.xlane.f32.xlu1 %v6408_v38  ;;  %v6423_v49 = vsel %vm5480_vm0, %v12222_v28, 0.0  ;;  %vm15925_vm9 = vcmask 654912  }
 0x322   : > { %v9786_v2 = vrot.slane %v8310_v57, %v13903_v16  ;;  %v9791_v4 = vrot.slane %v8311_v5, %v13913_v37  ;;  %v7649_v15 = vpack.c.bf16 %v7256_v46, %v7255_v59  ;;  %6406 = vadd.xlane.f32.xlu0 %v6405_v50  ;;  %v6206_v6 = vpop.xlane.xlu1 %6205  ;;  %v6426_v46 = vsel %vm5480_vm0, %v12223_v24, 0.0 }
 0x323   : > { %v7258_v10 = vmul.f32 0.0625, %v6206_v6  ;;  %v6203_v25 = vpop.xlane.xlu0 %6202  ;;  %v12226_v59 = vunpack.c.l.bf16 %v12773_v29 }
 0x324   : > { %v9787_v12 = vsel %vm8674_vm12, %v9786_v2, %v9782_v63  ;;  %v8312_v13 = vunpack.c.l.b16 %v7649_v15  ;;  %v8313_v14 = vunpack.c.h.b16 %v7649_v15  ;;  %v7257_v22 = vmul.f32 0.0625, %v6203_v25  ;;  %v12774_v63 = vld [vmem:[%s13701_s20 + $0x4f8] sm:$0xff]   ;;  %v12775_v25 = vld [vmem:[%s13701_s20 + $0x500] sm:$0xff]  }
 0x325   : > { %v9792_v17 = vsel %vm8681_vm13, %v9791_v4, %v9787_v12  ;;  %6415 = vadd.xlane.f32.xlu1 %v6414_v34  ;;  %v6432_v15 = vsel %vm5480_vm0, %v12227_v41, 0.0 }
 0x326   : > { %v9796_v26 = vrot.slane %v8312_v13, %v13922_v61  ;;  %v9801_v32 = vrot.slane %v8313_v14, %v13925_v62  ;;  %v7650_v27 = vpack.c.bf16 %v7258_v10, %v7257_v22  ;;  %6412 = vadd.xlane.f32.xlu0 %v6411_v18  ;;  %v6212_v33 = vpop.xlane.xlu1 %6211  ;;  %v12231_v10 = vunpack.c.h.bf16 %v12774_v63 }
 0x327   : > { %v7260_v30 = vmul.f32 0.0625, %v6212_v33  ;;  %v6209_v31 = vpop.xlane.xlu0 %6208  ;;  %v6429_v13 = vsel %vm5480_vm0, %v12226_v59, 0.0  ;;  %v12230_v14 = vunpack.c.l.bf16 %v12774_v63  ;;  %v12777_v59 = vld [vmem:[%s13701_s20 + $0x510] sm:$0xff]  }
 0x328   : > { %v9797_v36 = vsel %vm8688_vm14, %v9796_v26, %v9792_v17  ;;  %v8314_v38 = vunpack.c.l.b16 %v7650_v27  ;;  %v8315_v47 = vunpack.c.h.b16 %v7650_v27  ;;  %v7259_v40 = vmul.f32 0.0625, %v6209_v31 }
 0x329   : > { %v9802_v48 = vsel %vm8695_vm15, %v9801_v32, %v9797_v36  ;;  %6421 = vadd.xlane.f32.xlu1 %v6420_v23  ;;  %v12235_v32 = vunpack.c.h.bf16 %v12775_v25  ;;  %v6435_v36 = vsel %vm5480_vm0, %v12230_v14, 0.0 }
 0x32a   : > { %v7651_v42 = vpack.c.bf16 %v7260_v30, %v7259_v40  ;;  %6418 = vadd.xlane.f32.xlu0 %v6417_v35  ;;  %v6218_v45 = vpop.xlane.xlu1 %6217  ;;  %v14764_v50 = vsel %vm11150_vm11, %v9802_v48, %v14526_v8  ;;  %v9806_v51 = vrot.slane %v8314_v38, %v13830_v39  ;;  %v9810_v21 = vrot.slane %v8315_v47, %v13842_v53  ;;  %v12776_v47 = vld [vmem:[%s13701_s20 + $0x508] sm:$0xff]  }
 0x32b   : > { %v7262_v57 = vmul.f32 0.0625, %v6218_v45  ;;  %v6215_v5 = vpop.xlane.xlu0 %6214  ;;  %v6438_v30 = vsel %vm5480_vm0, %v12231_v10, 0.0  ;;  %v12234_v38 = vunpack.c.l.bf16 %v12775_v25  ;;  %v12243_v10 = vunpack.c.h.bf16 %v12777_v59 }
 0x32c   : > { %v8316_v1 = vunpack.c.l.b16 %v7651_v42  ;;  %v8317_v2 = vunpack.c.h.b16 %v7651_v42  ;;  %v7261_v4 = vmul.f32 0.0625, %v6215_v5  ;;  %v9811_v18 = vsel %vm8597_vm1, %v9810_v21, %v9806_v51 }
 0x32d   : > { %6427 = vadd.xlane.f32.xlu1 %v6426_v46  ;;  %v6444_v46 = vsel %vm5480_vm0, %v12235_v32, 0.0  ;;  %v12239_v5 = vunpack.c.h.bf16 %v12776_v47 }
 0x32e   : > { %v9815_v6 = vrot.slane %v8316_v1, %v13835_v43  ;;  %v9820_v8 = vrot.slane %v8317_v2, %v13838_v44  ;;  %v7652_v34 = vpack.c.bf16 %v7262_v57, %v7261_v4  ;;  %6424 = vadd.xlane.f32.xlu0 %v6423_v49  ;;  %v6224_v9 = vpop.xlane.xlu1 %6223  ;;  %v6441_v2 = vsel %vm5480_vm0, %v12234_v38, 0.0 }
 0x32f   : > { %v7264_v11 = vmul.f32 0.0625, %v6224_v9  ;;  %v6221_v12 = vpop.xlane.xlu0 %6220  ;;  %v12238_v4 = vunpack.c.l.bf16 %v12776_v47  ;;  %v12779_v47 = vld [vmem:[%s13701_s20 + $0x520] sm:$0xff]  }
 0x330   : > { %v9816_v22 = vsel %vm8604_vm2, %v9815_v6, %v9811_v18  ;;  %v8318_v17 = vunpack.c.l.b16 %v7652_v34  ;;  %v8319_v23 = vunpack.c.h.b16 %v7652_v34  ;;  %v7263_v24 = vmul.f32 0.0625, %v6221_v12 }
 0x331   : > { %v9821_v26 = vsel %vm8611_vm3, %v9820_v8, %v9816_v22  ;;  %6433 = vadd.xlane.f32.xlu1 %v6432_v15 }
 0x332   : > { %v9825_v27 = vrot.slane %v8318_v17, %v13845_v54  ;;  %v9830_v33 = vrot.slane %v8319_v23, %v13848_v55  ;;  %v7653_v28 = vpack.c.bf16 %v7264_v11, %v7263_v24  ;;  %6430 = vadd.xlane.f32.xlu0 %v6429_v13  ;;  %v6230_v29 = vpop.xlane.xlu1 %6229  ;;  %v6450_v13 = vsel %vm5480_vm0, %v12239_v5, 0.0  ;;  %v12778_v24 = vld [vmem:[%s13701_s20 + $0x518] sm:$0xff]  }
 0x333   : > { %v7266_v31 = vmul.f32 0.0625, %v6230_v29  ;;  %v6227_v35 = vpop.xlane.xlu0 %6226  ;;  %v6447_v17 = vsel %vm5480_vm0, %v12238_v4, 0.0  ;;  %v12242_v23 = vunpack.c.l.bf16 %v12777_v59  ;;  %v6456_v29 = vsel %vm5480_vm0, %v12243_v10, 0.0  ;;  %v12780_v4 = vld [vmem:[%s13701_s20 + $0x528] sm:$0xff]  }
 0x334   : > { %v9826_v40 = vsel %vm8618_vm4, %v9825_v27, %v9821_v26  ;;  %v8320_v48 = vunpack.c.l.b16 %v7653_v28  ;;  %v8321_v41 = vunpack.c.h.b16 %v7653_v28  ;;  %v7265_v42 = vmul.f32 0.0625, %v6227_v35 }
 0x335   : > { %v9831_v45 = vsel %vm8625_vm5, %v9830_v33, %v9826_v40  ;;  %6439 = vadd.xlane.f32.xlu1 %v6438_v30  ;;  %v12247_v38 = vunpack.c.h.bf16 %v12778_v24 }
 0x336   : > { %v9835_v49 = vrot.slane %v8320_v48, %v13852_v60  ;;  %v9840_v51 = vrot.slane %v8321_v41, %v13856_v0  ;;  %v7654_v21 = vpack.c.bf16 %v7266_v31, %v7265_v42  ;;  %6436 = vadd.xlane.f32.xlu0 %v6435_v36  ;;  %v6236_v57 = vpop.xlane.xlu1 %6235  ;;  %v6453_v41 = vsel %vm5480_vm0, %v12242_v23, 0.0 }
 0x337   : > { %v7268_v63 = vmul.f32 0.0625, %v6236_v57  ;;  %v6233_v1 = vpop.xlane.xlu0 %6232  ;;  %v12246_v42 = vunpack.c.l.bf16 %v12778_v24  ;;  %v12251_v57 = vunpack.c.h.bf16 %v12779_v47  ;;  %v12254_v24 = vunpack.c.l.bf16 %v12780_v4 }
 0x338   : > { %v9836_v15 = vsel %vm8632_vm6, %v9835_v49, %v9831_v45  ;;  %v8322_v6 = vunpack.c.l.b16 %v7654_v21  ;;  %v8323_v8 = vunpack.c.h.b16 %v7654_v21  ;;  %v7267_v34 = vmul.f32 0.0625, %v6233_v1 }
 0x339   : > { %v9841_v9 = vsel %vm8639_vm7, %v9840_v51, %v9836_v15  ;;  %6445 = vadd.xlane.f32.xlu1 %v6444_v46 }
 0x33a   : > { %v9845_v25 = vrot.slane %v8322_v6, %v13866_v19  ;;  %v9850_v18 = vrot.slane %v8323_v8, %v13869_v20  ;;  %v7655_v11 = vpack.c.bf16 %v7268_v63, %v7267_v34  ;;  %6442 = vadd.xlane.f32.xlu0 %v6441_v2  ;;  %v6242_v12 = vpop.xlane.xlu1 %6241  ;;  %v6462_v2 = vsel %vm5480_vm0, %v12247_v38, 0.0 }
 0x33b   : > { %v7270_v14 = vmul.f32 0.0625, %v6242_v12  ;;  %v6239_v22 = vpop.xlane.xlu0 %6238  ;;  %v6459_v8 = vsel %vm5480_vm0, %v12246_v42, 0.0  ;;  %v12250_v34 = vunpack.c.l.bf16 %v12779_v47  ;;  %v6468_v12 = vsel %vm5480_vm0, %v12251_v57, 0.0 }
 0x33c   : > { %v9846_v26 = vsel %vm8646_vm8, %v9845_v25, %v9841_v9  ;;  %v8324_v32 = vunpack.c.l.b16 %v7655_v11  ;;  %v8325_v27 = vunpack.c.h.b16 %v7655_v11  ;;  %v7269_v33 = vmul.f32 0.0625, %v6239_v22 }
 0x33d   : > { %v9851_v28 = vsel %vm15925_vm9, %v9850_v18, %v9846_v26  ;;  %6451 = vadd.xlane.f32.xlu1 %v6450_v13  ;;  %vm15926_vm9 = vcmask 786112   ;;  %v12255_v13 = vunpack.c.h.bf16 %v12780_v4  ;;  %v12781_v26 = vld [vmem:[%s13701_s20 + $0x530] sm:$0xff]  }
 0x33e   : > { %v9855_v30 = vrot.slane %v8324_v32, %v13885_v52  ;;  %v9860_v31 = vrot.slane %v8325_v27, %v13888_v56  ;;  %v7656_v35 = vpack.c.bf16 %v7270_v14, %v7269_v33  ;;  %6448 = vadd.xlane.f32.xlu0 %v6447_v17  ;;  %v6248_v36 = vpop.xlane.xlu1 %6247  ;;  %v6465_v33 = vsel %vm5480_vm0, %v12250_v34, 0.0 }
 0x33f   : > { %v7272_v40 = vmul.f32 0.0625, %v6248_v36  ;;  %v6245_v48 = vpop.xlane.xlu0 %6244 }
 0x340   : > { %v9856_v45 = vsel %vm8660_vm10, %v9855_v30, %v9851_v28  ;;  %v8326_v46 = vunpack.c.l.b16 %v7656_v35  ;;  %v8327_v49 = vunpack.c.h.b16 %v7656_v35  ;;  %v7271_v51 = vmul.f32 0.0625, %v6245_v48 }
 0x341   : > { %v9861_v21 = vsel %vm15926_vm9, %v9860_v31, %v9856_v45  ;;  %6457 = vadd.xlane.f32.xlu1 %v6456_v29  ;;  %v12259_v35 = vunpack.c.h.bf16 %v12781_v26  ;;  %v6471_v48 = vsel %vm5480_vm0, %v12254_v24, 0.0 }
 0x342   : > { %v9865_v5 = vrot.slane %v8326_v46, %v13903_v16  ;;  %v9870_v59 = vrot.slane %v8327_v49, %v13913_v37  ;;  %v7657_v63 = vpack.c.bf16 %v7272_v40, %v7271_v51  ;;  %6454 = vadd.xlane.f32.xlu0 %v6453_v41  ;;  %v6254_v1 = vpop.xlane.xlu1 %6253  ;;  %v6474_v40 = vsel %vm5480_vm0, %v12255_v13, 0.0 }
 0x343   : > { %v7274_v15 = vmul.f32 0.0625, %v6254_v1  ;;  %v6251_v6 = vpop.xlane.xlu0 %6250  ;;  %v12258_v51 = vunpack.c.l.bf16 %v12781_v26 }
 0x344   : > { %v9866_v9 = vsel %vm8674_vm12, %v9865_v5, %v9861_v21  ;;  %v8328_v10 = vunpack.c.l.b16 %v7657_v63  ;;  %v8329_v25 = vunpack.c.h.b16 %v7657_v63  ;;  %v7273_v18 = vmul.f32 0.0625, %v6251_v6  ;;  %v12782_v21 = vld [vmem:[%s13701_s20 + $0x538] sm:$0xff]   ;;  %v12783_v6 = vld [vmem:[%s13701_s20 + $0x540] sm:$0xff]  }
 0x345   : > { %v9871_v11 = vsel %vm8681_vm13, %v9870_v59, %v9866_v9  ;;  %6463 = vadd.xlane.f32.xlu1 %v6462_v2  ;;  %v6480_v63 = vsel %vm5480_vm0, %v12259_v35, 0.0 }
 0x346   : > { %v9875_v14 = vrot.slane %v8328_v10, %v13922_v61  ;;  %v9880_v22 = vrot.slane %v8329_v25, %v13925_v62  ;;  %v7658_v17 = vpack.c.bf16 %v7274_v15, %v7273_v18  ;;  %6460 = vadd.xlane.f32.xlu0 %v6459_v8  ;;  %v6260_v23 = vpop.xlane.xlu1 %6259  ;;  %v12263_v15 = vunpack.c.h.bf16 %v12782_v21 }
 0x347   : > { %v7276_v32 = vmul.f32 0.0625, %v6260_v23  ;;  %v6257_v27 = vpop.xlane.xlu0 %6256  ;;  %v6477_v10 = vsel %vm5480_vm0, %v12258_v51, 0.0  ;;  %v12262_v25 = vunpack.c.l.bf16 %v12782_v21  ;;  %v12785_v51 = vld [vmem:[%s13701_s20 + $0x550] sm:$0xff]  }
 0x348   : > { %v9876_v28 = vsel %vm8688_vm14, %v9875_v14, %v9871_v11  ;;  %v8330_v29 = vunpack.c.l.b16 %v7658_v17  ;;  %v8331_v30 = vunpack.c.h.b16 %v7658_v17  ;;  %v7275_v31 = vmul.f32 0.0625, %v6257_v27 }
 0x349   : > { %6469 = vadd.xlane.f32.xlu1 %v6468_v12  ;;  %v9881_v36 = vsel %vm8695_vm15, %v9880_v22, %v9876_v28  ;;  %v12267_v22 = vunpack.c.h.bf16 %v12783_v6  ;;  %v6483_v28 = vsel %vm5480_vm0, %v12262_v25, 0.0 }
 0x34a   : > { %v7659_v38 = vpack.c.bf16 %v7276_v32, %v7275_v31  ;;  %6466 = vadd.xlane.f32.xlu0 %v6465_v33  ;;  %v6266_v47 = vpop.xlane.xlu1 %6265  ;;  %v14823_v41 = vsel %vm11150_vm11, %v9881_v36, %v14587_v7  ;;  %v9885_v42 = vrot.slane %v8330_v29, %v13830_v39  ;;  %v9889_v45 = vrot.slane %v8331_v30, %v13842_v53  ;;  %v12784_v30 = vld [vmem:[%s13701_s20 + $0x548] sm:$0xff]  }
 0x34b   : > { %v7278_v46 = vmul.f32 0.0625, %v6266_v47  ;;  %v6263_v49 = vpop.xlane.xlu0 %6262  ;;  %v6486_v32 = vsel %vm5480_vm0, %v12263_v15, 0.0  ;;  %v12266_v29 = vunpack.c.l.bf16 %v12783_v6  ;;  %v12275_v15 = vunpack.c.h.bf16 %v12785_v51 }
 0x34c   : > { %v8332_v57 = vunpack.c.l.b16 %v7659_v38  ;;  %v8333_v5 = vunpack.c.h.b16 %v7659_v38  ;;  %v7277_v59 = vmul.f32 0.0625, %v6263_v49  ;;  %v9890_v8 = vsel %vm8597_vm1, %v9889_v45, %v9885_v42 }
 0x34d   : > { %6475 = vadd.xlane.f32.xlu1 %v6474_v40  ;;  %v6492_v40 = vsel %vm5480_vm0, %v12267_v22, 0.0  ;;  %v12271_v49 = vunpack.c.h.bf16 %v12784_v30  ;;  %vm15927_vm11 = vcmask 654912  }
 0x34e   : > { %v9894_v1 = vrot.slane %v8332_v57, %v13835_v43  ;;  %v9899_v7 = vrot.slane %v8333_v5, %v13838_v44  ;;  %v7660_v2 = vpack.c.bf16 %v7278_v46, %v7277_v59  ;;  %6472 = vadd.xlane.f32.xlu0 %v6471_v48  ;;  %v6272_v4 = vpop.xlane.xlu1 %6271  ;;  %v6489_v5 = vsel %vm5480_vm0, %v12266_v29, 0.0 }
 0x34f   : > { %v7280_v34 = vmul.f32 0.0625, %v6272_v4  ;;  %v6269_v9 = vpop.xlane.xlu0 %6268  ;;  %v12270_v59 = vunpack.c.l.bf16 %v12784_v30  ;;  %v12787_v30 = vld [vmem:[%s13701_s20 + $0x560] sm:$0xff]  }
 0x350   : > { %v9895_v18 = vsel %vm8604_vm2, %v9894_v1, %v9890_v8  ;;  %v8334_v11 = vunpack.c.l.b16 %v7660_v2  ;;  %v8335_v12 = vunpack.c.h.b16 %v7660_v2  ;;  %v7279_v13 = vmul.f32 0.0625, %v6269_v9 }
 0x351   : > { %v9900_v14 = vsel %vm8611_vm3, %v9899_v7, %v9895_v18  ;;  %6481 = vadd.xlane.f32.xlu1 %v6480_v63 }
 0x352   : > { %v9904_v17 = vrot.slane %v8334_v11, %v13845_v54  ;;  %v9909_v23 = vrot.slane %v8335_v12, %v13848_v55  ;;  %v7661_v24 = vpack.c.bf16 %v7280_v34, %v7279_v13  ;;  %6478 = vadd.xlane.f32.xlu0 %v6477_v10  ;;  %v6278_v26 = vpop.xlane.xlu1 %6277  ;;  %v6498_v10 = vsel %vm5480_vm0, %v12271_v49, 0.0  ;;  %v12786_v13 = vld [vmem:[%s13701_s20 + $0x558] sm:$0xff]  }
 0x353   : > { %v7282_v27 = vmul.f32 0.0625, %v6278_v26  ;;  %v6275_v33 = vpop.xlane.xlu0 %6274  ;;  %v6495_v11 = vsel %vm5480_vm0, %v12270_v59, 0.0  ;;  %v12274_v12 = vunpack.c.l.bf16 %v12785_v51  ;;  %v6504_v26 = vsel %vm5480_vm0, %v12275_v15, 0.0  ;;  %v12788_v59 = vld [vmem:[%s13701_s20 + $0x568] sm:$0xff]  }
 0x354   : > { %v9905_v31 = vsel %vm8618_vm4, %v9904_v17, %v9900_v14  ;;  %v8336_v35 = vunpack.c.l.b16 %v7661_v24  ;;  %v8337_v36 = vunpack.c.h.b16 %v7661_v24  ;;  %v7281_v38 = vmul.f32 0.0625, %v6275_v33 }
 0x355   : > { %v9910_v47 = vsel %vm8625_vm5, %v9909_v23, %v9905_v31  ;;  %6487 = vadd.xlane.f32.xlu1 %v6486_v32  ;;  %v12279_v29 = vunpack.c.h.bf16 %v12786_v13 }
 0x356   : > { %v9914_v48 = vrot.slane %v8336_v35, %v13852_v60  ;;  %v9919_v42 = vrot.slane %v8337_v36, %v13856_v0  ;;  %v7662_v45 = vpack.c.bf16 %v7282_v27, %v7281_v38  ;;  %6484 = vadd.xlane.f32.xlu0 %v6483_v28  ;;  %v6284_v46 = vpop.xlane.xlu1 %6283  ;;  %v6501_v36 = vsel %vm5480_vm0, %v12274_v12, 0.0 }
 0x357   : > { %v7284_v21 = vmul.f32 0.0625, %v6284_v46  ;;  %v6281_v57 = vpop.xlane.xlu0 %6280  ;;  %v12278_v38 = vunpack.c.l.bf16 %v12786_v13  ;;  %v12283_v46 = vunpack.c.h.bf16 %v12787_v30  ;;  %v12286_v13 = vunpack.c.l.bf16 %v12788_v59 }
 0x358   : > { %v9915_v63 = vsel %vm8632_vm6, %v9914_v48, %v9910_v47  ;;  %v8338_v1 = vunpack.c.l.b16 %v7662_v45  ;;  %v8339_v7 = vunpack.c.h.b16 %v7662_v45  ;;  %v7283_v2 = vmul.f32 0.0625, %v6281_v57 }
 0x359   : > { %v9920_v4 = vsel %vm8639_vm7, %v9919_v42, %v9915_v63  ;;  %6493 = vadd.xlane.f32.xlu1 %v6492_v40 }
 0x35a   : > { %v9924_v6 = vrot.slane %v8338_v1, %v13866_v19  ;;  %v9929_v8 = vrot.slane %v8339_v7, %v13869_v20  ;;  %v7663_v34 = vpack.c.bf16 %v7284_v21, %v7283_v2  ;;  %6490 = vadd.xlane.f32.xlu0 %v6489_v5  ;;  %v6290_v9 = vpop.xlane.xlu1 %6289  ;;  %v6510_v5 = vsel %vm5480_vm0, %v12279_v29, 0.0 }
 0x35b   : > { %v7286_v25 = vmul.f32 0.0625, %v6290_v9  ;;  %v6287_v18 = vpop.xlane.xlu0 %6286  ;;  %v6507_v7 = vsel %vm5480_vm0, %v12278_v38, 0.0  ;;  %v12282_v2 = vunpack.c.l.bf16 %v12787_v30  ;;  %v6516_v9 = vsel %vm5480_vm0, %v12283_v46, 0.0 }
 0x35c   : > { %v9925_v14 = vsel %vm8646_vm8, %v9924_v6, %v9920_v4  ;;  %v8340_v22 = vunpack.c.l.b16 %v7663_v34  ;;  %v8341_v17 = vunpack.c.h.b16 %v7663_v34  ;;  %v7285_v23 = vmul.f32 0.0625, %v6287_v18 }
 0x35d   : > { %v9930_v24 = vsel %vm15927_vm11, %v9929_v8, %v9925_v14  ;;  %6499 = vadd.xlane.f32.xlu1 %v6498_v10  ;;  %v12287_v10 = vunpack.c.h.bf16 %v12788_v59  ;;  %v12789_v14 = vld [vmem:[%s13701_s20 + $0x570] sm:$0xff]   ;;  %vm11152_vm11 = vcmask 1044484  }
 0x35e   : > { %v9934_v32 = vrot.slane %v8340_v22, %v13885_v52  ;;  %v9939_v27 = vrot.slane %v8341_v17, %v13888_v56  ;;  %v7664_v33 = vpack.c.bf16 %v7286_v25, %v7285_v23  ;;  %6496 = vadd.xlane.f32.xlu0 %v6495_v11  ;;  %v6296_v28 = vpop.xlane.xlu1 %6295  ;;  %v6513_v23 = vsel %vm5480_vm0, %v12282_v2, 0.0 }
 0x35f   : > { %v7288_v31 = vmul.f32 0.0625, %v6296_v28  ;;  %v6293_v35 = vpop.xlane.xlu0 %6292  ;;  %v12291_v28 = vunpack.c.h.bf16 %v12789_v14 }
 0x360   : > { %v9935_v47 = vsel %vm8660_vm10, %v9934_v32, %v9930_v24  ;;  %v8342_v40 = vunpack.c.l.b16 %v7664_v33  ;;  %v8343_v48 = vunpack.c.h.b16 %v7664_v33  ;;  %v7287_v42 = vmul.f32 0.0625, %v6293_v35 }
 0x361   : > { %v9940_v45 = vsel %vm15926_vm9, %v9939_v27, %v9935_v47  ;;  %6505 = vadd.xlane.f32.xlu1 %v6504_v26  ;;  %v6519_v35 = vsel %vm5480_vm0, %v12286_v13, 0.0  ;;  %vm15928_vm9 = vcmask 654912  }
 0x362   : > { %v9944_v49 = vrot.slane %v8342_v40, %v13903_v16  ;;  %v9949_v51 = vrot.slane %v8343_v48, %v13913_v37  ;;  %v7665_v21 = vpack.c.bf16 %v7288_v31, %v7287_v42  ;;  %6502 = vadd.xlane.f32.xlu0 %v6501_v36  ;;  %v6302_v57 = vpop.xlane.xlu1 %6301  ;;  %v6522_v31 = vsel %vm5480_vm0, %v12287_v10, 0.0 }
 0x363   : > { %v7290_v63 = vmul.f32 0.0625, %v6302_v57  ;;  %v6299_v1 = vpop.xlane.xlu0 %6298  ;;  %v12290_v42 = vunpack.c.l.bf16 %v12789_v14 }
 0x364   : > { %v9945_v4 = vsel %vm8674_vm12, %v9944_v49, %v9940_v45  ;;  %v8344_v15 = vunpack.c.l.b16 %v7665_v21  ;;  %v8345_v6 = vunpack.c.h.b16 %v7665_v21  ;;  %v7289_v8 = vmul.f32 0.0625, %v6299_v1  ;;  %v12790_v45 = vld [vmem:[%s13701_s20 + $0x578] sm:$0xff]   ;;  %v12791_v1 = vld [vmem:[%s13701_s20 + $0x580] sm:$0xff]  }
 0x365   : > { %v9950_v34 = vsel %vm8681_vm13, %v9949_v51, %v9945_v4  ;;  %6511 = vadd.xlane.f32.xlu1 %v6510_v5  ;;  %v6528_v21 = vsel %vm5480_vm0, %v12291_v28, 0.0 }
 0x366   : > { %v9954_v25 = vrot.slane %v8344_v15, %v13922_v61  ;;  %v9959_v18 = vrot.slane %v8345_v6, %v13925_v62  ;;  %v7666_v11 = vpack.c.bf16 %v7290_v63, %v7289_v8  ;;  %6508 = vadd.xlane.f32.xlu0 %v6507_v7  ;;  %v6308_v12 = vpop.xlane.xlu1 %6307  ;;  %v12295_v63 = vunpack.c.h.bf16 %v12790_v45 }
 0x367   : > { %v7292_v22 = vmul.f32 0.0625, %v6308_v12  ;;  %v6305_v17 = vpop.xlane.xlu0 %6304  ;;  %v6525_v15 = vsel %vm5480_vm0, %v12290_v42, 0.0  ;;  %v12294_v6 = vunpack.c.l.bf16 %v12790_v45  ;;  %v12793_v42 = vld [vmem:[%s13701_s20 + $0x590] sm:$0xff]  }
 0x368   : > { %v9955_v24 = vsel %vm8688_vm14, %v9954_v25, %v9950_v34  ;;  %v8346_v26 = vunpack.c.l.b16 %v7666_v11  ;;  %v8347_v32 = vunpack.c.h.b16 %v7666_v11  ;;  %v7291_v27 = vmul.f32 0.0625, %v6305_v17 }
 0x369   : > { %v9960_v33 = vsel %vm8695_vm15, %v9959_v18, %v9955_v24  ;;  %6517 = vadd.xlane.f32.xlu1 %v6516_v9  ;;  %v12299_v18 = vunpack.c.h.bf16 %v12791_v1  ;;  %v6531_v24 = vsel %vm5480_vm0, %v12294_v6, 0.0 }
 0x36a   : > { %v7667_v29 = vpack.c.bf16 %v7292_v22, %v7291_v27  ;;  %6514 = vadd.xlane.f32.xlu0 %v6513_v23  ;;  %v6314_v30 = vpop.xlane.xlu1 %6313  ;;  %v14882_v36 = vsel %vm11152_vm11, %v9960_v33, %v14646_v3  ;;  %v9964_v38 = vrot.slane %v8346_v26, %v13830_v39  ;;  %v9968_v47 = vrot.slane %v8347_v32, %v13842_v53  ;;  %v12792_v32 = vld [vmem:[%s13701_s20 + $0x588] sm:$0xff]  }
 0x36b   : > { %v7294_v40 = vmul.f32 0.0625, %v6314_v30  ;;  %v6311_v48 = vpop.xlane.xlu0 %6310  ;;  %v6534_v22 = vsel %vm5480_vm0, %v12295_v63, 0.0  ;;  %v12298_v26 = vunpack.c.l.bf16 %v12791_v1  ;;  %v12307_v63 = vunpack.c.h.bf16 %v12793_v42 }
 0x36c   : > { %v8348_v46 = vunpack.c.l.b16 %v7667_v29  ;;  %v8349_v49 = vunpack.c.h.b16 %v7667_v29  ;;  %v7293_v51 = vmul.f32 0.0625, %v6311_v48  ;;  %v9969_v7 = vsel %vm8597_vm1, %v9968_v47, %v9964_v38 }
 0x36d   : > { %6523 = vadd.xlane.f32.xlu1 %v6522_v31  ;;  %v6540_v31 = vsel %vm5480_vm0, %v12299_v18, 0.0  ;;  %v12303_v48 = vunpack.c.h.bf16 %v12792_v32 }
 0x36e   : > { %v9973_v57 = vrot.slane %v8348_v46, %v13835_v43  ;;  %v9978_v3 = vrot.slane %v8349_v49, %v13838_v44  ;;  %v7668_v5 = vpack.c.bf16 %v7294_v40, %v7293_v51  ;;  %6520 = vadd.xlane.f32.xlu0 %v6519_v35  ;;  %v6320_v59 = vpop.xlane.xlu1 %6319  ;;  %v6537_v49 = vsel %vm5480_vm0, %v12298_v26, 0.0 }
 0x36f   : > { %v7296_v2 = vmul.f32 0.0625, %v6320_v59  ;;  %v6317_v4 = vpop.xlane.xlu0 %6316  ;;  %v12302_v51 = vunpack.c.l.bf16 %v12792_v32  ;;  %v12795_v32 = vld [vmem:[%s13701_s20 + $0x5a0] sm:$0xff]  }
 0x370   : > { %v9974_v8 = vsel %vm8604_vm2, %v9973_v57, %v9969_v7  ;;  %v8350_v34 = vunpack.c.l.b16 %v7668_v5  ;;  %v8351_v9 = vunpack.c.h.b16 %v7668_v5  ;;  %v7295_v10 = vmul.f32 0.0625, %v6317_v4 }
 0x371   : > { %v9979_v25 = vsel %vm8611_vm3, %v9978_v3, %v9974_v8  ;;  %6529 = vadd.xlane.f32.xlu1 %v6528_v21 }
 0x372   : > { %v9983_v11 = vrot.slane %v8350_v34, %v13845_v54  ;;  %v9988_v12 = vrot.slane %v8351_v9, %v13848_v55  ;;  %v7669_v13 = vpack.c.bf16 %v7296_v2, %v7295_v10  ;;  %6526 = vadd.xlane.f32.xlu0 %v6525_v15  ;;  %v6326_v14 = vpop.xlane.xlu1 %6325  ;;  %v6546_v15 = vsel %vm5480_vm0, %v12303_v48, 0.0  ;;  %v12794_v10 = vld [vmem:[%s13701_s20 + $0x598] sm:$0xff]  }
 0x373   : > { %v7298_v17 = vmul.f32 0.0625, %v6326_v14  ;;  %v6323_v23 = vpop.xlane.xlu0 %6322  ;;  %v6543_v34 = vsel %vm5480_vm0, %v12302_v51, 0.0  ;;  %v12306_v9 = vunpack.c.l.bf16 %v12793_v42  ;;  %v6552_v14 = vsel %vm5480_vm0, %v12307_v63, 0.0  ;;  %v12796_v51 = vld [vmem:[%s13701_s20 + $0x5a8] sm:$0xff]  }
 0x374   : > { %v9984_v27 = vsel %vm8618_vm4, %v9983_v11, %v9979_v25  ;;  %v8352_v33 = vunpack.c.l.b16 %v7669_v13  ;;  %v8353_v28 = vunpack.c.h.b16 %v7669_v13  ;;  %v7297_v29 = vmul.f32 0.0625, %v6323_v23 }
 0x375   : > { %v9989_v30 = vsel %vm8625_vm5, %v9988_v12, %v9984_v27  ;;  %6535 = vadd.xlane.f32.xlu1 %v6534_v22  ;;  %v12311_v26 = vunpack.c.h.bf16 %v12794_v10 }
 0x376   : > { %v9993_v35 = vrot.slane %v8352_v33, %v13852_v60  ;;  %v9998_v38 = vrot.slane %v8353_v28, %v13856_v0  ;;  %v7670_v47 = vpack.c.bf16 %v7298_v17, %v7297_v29  ;;  %6532 = vadd.xlane.f32.xlu0 %v6531_v24  ;;  %v6332_v40 = vpop.xlane.xlu1 %6331  ;;  %v6549_v28 = vsel %vm5480_vm0, %v12306_v9, 0.0 }
 0x377   : > { %v7300_v45 = vmul.f32 0.0625, %v6332_v40  ;;  %v6329_v46 = vpop.xlane.xlu0 %6328  ;;  %v12310_v29 = vunpack.c.l.bf16 %v12794_v10  ;;  %v12315_v40 = vunpack.c.h.bf16 %v12795_v32  ;;  %v12318_v10 = vunpack.c.l.bf16 %v12796_v51 }
 0x378   : > { %v9994_v21 = vsel %vm8632_vm6, %v9993_v35, %v9989_v30  ;;  %v8354_v57 = vunpack.c.l.b16 %v7670_v47  ;;  %v8355_v3 = vunpack.c.h.b16 %v7670_v47  ;;  %v7299_v5 = vmul.f32 0.0625, %v6329_v46 }
 0x379   : > { %v9999_v59 = vsel %vm8639_vm7, %v9998_v38, %v9994_v21  ;;  %6541 = vadd.xlane.f32.xlu1 %v6540_v31 }
 0x37a   : > { %v10003_v1 = vrot.slane %v8354_v57, %v13866_v19  ;;  %v10008_v7 = vrot.slane %v8355_v3, %v13869_v20  ;;  %v7671_v2 = vpack.c.bf16 %v7300_v45, %v7299_v5  ;;  %6538 = vadd.xlane.f32.xlu0 %v6537_v49  ;;  %v6338_v4 = vpop.xlane.xlu1 %6337  ;;  %v6558_v49 = vsel %vm5480_vm0, %v12311_v26, 0.0 }
 0x37b   : > { %v7302_v6 = vmul.f32 0.0625, %v6338_v4  ;;  %v6335_v8 = vpop.xlane.xlu0 %6334  ;;  %v6555_v3 = vsel %vm5480_vm0, %v12310_v29, 0.0  ;;  %v12314_v5 = vunpack.c.l.bf16 %v12795_v32  ;;  %v6564_v4 = vsel %vm5480_vm0, %v12315_v40, 0.0 }
 0x37c   : > { %v10004_v25 = vsel %vm8646_vm8, %v10003_v1, %v9999_v59  ;;  %v8356_v18 = vunpack.c.l.b16 %v7671_v2  ;;  %v8357_v11 = vunpack.c.h.b16 %v7671_v2  ;;  %v7301_v12 = vmul.f32 0.0625, %v6335_v8 }
 0x37d   : > { %v10009_v13 = vsel %vm15928_vm9, %v10008_v7, %v10004_v25  ;;  %6547 = vadd.xlane.f32.xlu1 %v6546_v15  ;;  %vm15929_vm9 = vcmask 786112   ;;  %v12319_v15 = vunpack.c.h.bf16 %v12796_v51  ;;  %v12799_v25 = vld [vmem:[%s13701_s20 + $0x5c0] sm:$0xff]  }
 0x37e   : > { %v10013_v22 = vrot.slane %v8356_v18, %v13885_v52  ;;  %v10018_v17 = vrot.slane %v8357_v11, %v13888_v56  ;;  %v7672_v23 = vpack.c.bf16 %v7302_v6, %v7301_v12  ;;  %6544 = vadd.xlane.f32.xlu0 %v6543_v34  ;;  %v6344_v24 = vpop.xlane.xlu1 %6343  ;;  %v6561_v12 = vsel %vm5480_vm0, %v12314_v5, 0.0 }
 0x37f   : > { %v7304_v27 = vmul.f32 0.0625, %v6344_v24  ;;  %v6341_v33 = vpop.xlane.xlu0 %6340 }
 0x380   : > { %v10014_v30 = vsel %vm8660_vm10, %v10013_v22, %v10009_v13  ;;  %v8358_v31 = vunpack.c.l.b16 %v7672_v23  ;;  %v8359_v35 = vunpack.c.h.b16 %v7672_v23  ;;  %v7303_v38 = vmul.f32 0.0625, %v6341_v33 }
 0x381   : > { %v10019_v47 = vsel %vm15929_vm9, %v10018_v17, %v10014_v30  ;;  %6553 = vadd.xlane.f32.xlu1 %v6552_v14  ;;  %v12331_v23 = vunpack.c.h.bf16 %v12799_v25  ;;  %v6567_v33 = vsel %vm5480_vm0, %v12318_v10, 0.0  ;;  %vm15930_vm9 = vcmask 654912  }
 0x382   : > { %v10023_v48 = vrot.slane %v8358_v31, %v13903_v16  ;;  %v10028_v42 = vrot.slane %v8359_v35, %v13913_v37  ;;  %v7673_v45 = vpack.c.bf16 %v7304_v27, %v7303_v38  ;;  %6550 = vadd.xlane.f32.xlu0 %v6549_v28  ;;  %v6350_v46 = vpop.xlane.xlu1 %6349  ;;  %v6570_v27 = vsel %vm5480_vm0, %v12319_v15, 0.0 }
 0x383   : > { %v7306_v21 = vmul.f32 0.0625, %v6350_v46  ;;  %v6347_v57 = vpop.xlane.xlu0 %6346  ;;  %v12330_v38 = vunpack.c.l.bf16 %v12799_v25 }
 0x384   : > { %v10024_v59 = vsel %vm8674_vm12, %v10023_v48, %v10019_v47  ;;  %v8360_v63 = vunpack.c.l.b16 %v7673_v45  ;;  %v8361_v1 = vunpack.c.h.b16 %v7673_v45  ;;  %v7305_v7 = vmul.f32 0.0625, %v6347_v57  ;;  %v12800_v47 = vld [vmem:[%s13701_s20 + $0x5c8] sm:$0xff]   ;;  %v12815_v57 = vld [vmem:[%s13701_s20 + $0x640] sm:$0xff]  }
 0x385   : > { %v10029_v2 = vsel %vm8681_vm13, %v10028_v42, %v10024_v59  ;;  %6559 = vadd.xlane.f32.xlu1 %v6558_v49  ;;  %v6588_v45 = vsel %vm5480_vm0, %v12331_v23, 0.0 }
 0x386   : > { %v10033_v6 = vrot.slane %v8360_v63, %v13922_v61  ;;  %v10038_v8 = vrot.slane %v8361_v1, %v13925_v62  ;;  %v7674_v34 = vpack.c.bf16 %v7306_v21, %v7305_v7  ;;  %6556 = vadd.xlane.f32.xlu0 %v6555_v3  ;;  %v6356_v9 = vpop.xlane.xlu1 %6355  ;;  %v12335_v21 = vunpack.c.h.bf16 %v12800_v47 }
 0x387   : > { %v7308_v18 = vmul.f32 0.0625, %v6356_v9  ;;  %v6353_v11 = vpop.xlane.xlu0 %6352  ;;  %v6585_v63 = vsel %vm5480_vm0, %v12330_v38, 0.0  ;;  %v12334_v1 = vunpack.c.l.bf16 %v12800_v47  ;;  %v12807_v38 = vld [vmem:[%s13701_s20 + $0x600] sm:$0xff]  }
 0x388   : > { %v8362_v13 = vunpack.c.l.b16 %v7674_v34  ;;  %v8363_v14 = vunpack.c.h.b16 %v7674_v34  ;;  %v7307_v22 = vmul.f32 0.0625, %v6353_v11  ;;  %v10034_v17 = vsel %vm8688_vm14, %v10033_v6, %v10029_v2 }
 0x389   : > { %6565 = vadd.xlane.f32.xlu1 %v6564_v4  ;;  %v10039_v24 = vsel %vm8695_vm15, %v10038_v8, %v10034_v17  ;;  %v12395_v8 = vunpack.c.h.bf16 %v12815_v57 }
 0x38a   : > { %v7675_v26 = vpack.c.bf16 %v7308_v18, %v7307_v22  ;;  %6562 = vadd.xlane.f32.xlu0 %v6561_v12  ;;  %v6362_v32 = vpop.xlane.xlu1 %6361  ;;  %v14941_v28 = vsel %vm11152_vm11, %v10039_v24, %v14705_v58  ;;  %v10043_v29 = vrot.slane %v8362_v13, %v13830_v39  ;;  %v10047_v30 = vrot.slane %v8363_v14, %v13842_v53  ;;  %v12831_v22 = vld [vmem:[%s13701_s20 + $0x6c0] sm:$0xff]  }
 0x38b   : > { %v7310_v31 = vmul.f32 0.0625, %v6362_v32  ;;  %v6359_v35 = vpop.xlane.xlu0 %6358  ;;  %v6594_v18 = vsel %vm5480_vm0, %v12335_v21, 0.0  ;;  %v6591_v13 = vsel %vm5480_vm0, %v12334_v1, 0.0  ;;  %v12394_v14 = vunpack.c.l.bf16 %v12815_v57 }
 0x38c   : > { %v8364_v40 = vunpack.c.l.b16 %v7675_v26  ;;  %v8365_v48 = vunpack.c.h.b16 %v7675_v26  ;;  %v7309_v42 = vmul.f32 0.0625, %v6359_v35  ;;  %v10048_v3 = vsel %vm8597_vm1, %v10047_v30, %v10043_v29 }
 0x38d   : > { %6571 = vadd.xlane.f32.xlu1 %v6570_v27  ;;  %v6684_v27 = vsel %vm5480_vm0, %v12395_v8, 0.0  ;;  %v12459_v35 = vunpack.c.h.bf16 %v12831_v22  ;;  %v12363_v21 = vunpack.c.h.bf16 %v12807_v38 }
 0x38e   : > { %v10052_v46 = vrot.slane %v8364_v40, %v13835_v43  ;;  %v10057_v58 = vrot.slane %v8365_v48, %v13838_v44  ;;  %v7676_v49 = vpack.c.bf16 %v7310_v31, %v7309_v42  ;;  %6568 = vadd.xlane.f32.xlu0 %v6567_v33  ;;  %v6368_v51 = vpop.xlane.xlu1 %6367  ;;  %v6681_v48 = vsel %vm5480_vm0, %v12394_v14, 0.0 }
 0x38f   : > { %v7312_v5 = vmul.f32 0.0625, %v6368_v51  ;;  %v6365_v59 = vpop.xlane.xlu0 %6364  ;;  %v12458_v42 = vunpack.c.l.bf16 %v12831_v22  ;;  %v12823_v22 = vld [vmem:[%s13701_s20 + $0x680] sm:$0xff]  }
 0x390   : > { %v10053_v7 = vsel %vm8604_vm2, %v10052_v46, %v10048_v3  ;;  %v8366_v2 = vunpack.c.l.b16 %v7676_v49  ;;  %v8367_v4 = vunpack.c.h.b16 %v7676_v49  ;;  %v7311_v15 = vmul.f32 0.0625, %v6365_v59 }
 0x391   : > { %v10058_v6 = vsel %vm8611_vm3, %v10057_v58, %v10053_v7  ;;  %6589 = vadd.xlane.f32.xlu1 %v6588_v45 }
 0x392   : > { %v10062_v34 = vrot.slane %v8366_v2, %v13845_v54  ;;  %v10067_v9 = vrot.slane %v8367_v4, %v13848_v55  ;;  %v7677_v10 = vpack.c.bf16 %v7312_v5, %v7311_v15  ;;  %6586 = vadd.xlane.f32.xlu0 %v6585_v63  ;;  %v6374_v25 = vpop.xlane.xlu1 %6373  ;;  %v6780_v63 = vsel %vm5480_vm0, %v12459_v35, 0.0  ;;  %v12816_v15 = vld [vmem:[%s13701_s20 + $0x648] sm:$0xff]  }
 0x393   : > { %v7314_v11 = vmul.f32 0.0625, %v6374_v25  ;;  %v6371_v12 = vpop.xlane.xlu0 %6370  ;;  %v6777_v2 = vsel %vm5480_vm0, %v12458_v42, 0.0  ;;  %v12362_v4 = vunpack.c.l.bf16 %v12807_v38  ;;  %v6636_v25 = vsel %vm5480_vm0, %v12363_v21, 0.0  ;;  %v12832_v42 = vld [vmem:[%s13701_s20 + $0x6c8] sm:$0xff]  }
 0x394   : > { %v10063_v17 = vsel %vm8618_vm4, %v10062_v34, %v10058_v6  ;;  %v8368_v23 = vunpack.c.l.b16 %v7677_v10  ;;  %v8369_v24 = vunpack.c.h.b16 %v7677_v10  ;;  %v7313_v26 = vmul.f32 0.0625, %v6371_v12 }
 0x395   : > { %v10068_v32 = vsel %vm8625_vm5, %v10067_v9, %v10063_v17  ;;  %6595 = vadd.xlane.f32.xlu1 %v6594_v18  ;;  %v12399_v14 = vunpack.c.h.bf16 %v12816_v15 }
 0x396   : > { %v10072_v33 = vrot.slane %v8368_v23, %v13852_v60  ;;  %v10077_v29 = vrot.slane %v8369_v24, %v13856_v0  ;;  %v7678_v30 = vpack.c.bf16 %v7314_v11, %v7313_v26  ;;  %6592 = vadd.xlane.f32.xlu0 %v6591_v13  ;;  %v6380_v31 = vpop.xlane.xlu1 %6379  ;;  %v6633_v24 = vsel %vm5480_vm0, %v12362_v4, 0.0 }
 0x397   : > { %v7316_v47 = vmul.f32 0.0625, %v6380_v31  ;;  %v6377_v40 = vpop.xlane.xlu0 %6376  ;;  %v12398_v26 = vunpack.c.l.bf16 %v12816_v15  ;;  %v12427_v31 = vunpack.c.h.bf16 %v12823_v22  ;;  %v12462_v15 = vunpack.c.l.bf16 %v12832_v42 }
 0x398   : > { %v10073_v45 = vsel %vm8632_vm6, %v10072_v33, %v10068_v32  ;;  %v8370_v46 = vunpack.c.l.b16 %v7678_v30  ;;  %v8371_v58 = vunpack.c.h.b16 %v7678_v30  ;;  %v7315_v49 = vmul.f32 0.0625, %v6377_v40 }
 0x399   : > { %v10078_v51 = vsel %vm8639_vm7, %v10077_v29, %v10073_v45  ;;  %6685 = vadd.xlane.f32.xlu1 %v6684_v27 }
 0x39a   : > { %v10082_v57 = vrot.slane %v8370_v46, %v13866_v19  ;;  %v10087_v3 = vrot.slane %v8371_v58, %v13869_v20  ;;  %v7679_v5 = vpack.c.bf16 %v7316_v47, %v7315_v49  ;;  %6682 = vadd.xlane.f32.xlu0 %v6681_v48  ;;  %v6386_v59 = vpop.xlane.xlu1 %6385  ;;  %v6690_v48 = vsel %vm5480_vm0, %v12399_v14, 0.0 }
 0x39b   : > { %v7318_v1 = vmul.f32 0.0625, %v6386_v59  ;;  %v6383_v7 = vpop.xlane.xlu0 %6382  ;;  %v6687_v58 = vsel %vm5480_vm0, %v12398_v26, 0.0  ;;  %v12426_v49 = vunpack.c.l.bf16 %v12823_v22  ;;  %v6732_v59 = vsel %vm5480_vm0, %v12427_v31, 0.0 }
 0x39c   : > { %v10083_v6 = vsel %vm8646_vm8, %v10082_v57, %v10078_v51  ;;  %v8372_v8 = vunpack.c.l.b16 %v7679_v5  ;;  %v8373_v34 = vunpack.c.h.b16 %v7679_v5  ;;  %v7317_v9 = vmul.f32 0.0625, %v6383_v7 }
 0x39d   : > { %v10088_v10 = vsel %vm15930_vm9, %v10087_v3, %v10083_v6  ;;  %6781 = vadd.xlane.f32.xlu1 %v6780_v63  ;;  %vm15931_vm9 = vcmask 786112   ;;  %v12463_v63 = vunpack.c.h.bf16 %v12832_v42  ;;  %v12847_v6 = vld [vmem:[%s13701_s20 + $0x740] sm:$0xff]  }
 0x39e   : > { %v10092_v18 = vrot.slane %v8372_v8, %v13885_v52  ;;  %v10097_v11 = vrot.slane %v8373_v34, %v13888_v56  ;;  %v7680_v12 = vpack.c.bf16 %v7318_v1, %v7317_v9  ;;  %6778 = vadd.xlane.f32.xlu0 %v6777_v2  ;;  %v6392_v13 = vpop.xlane.xlu1 %6391  ;;  %v6729_v9 = vsel %vm5480_vm0, %v12426_v49, 0.0 }
 0x39f   : > { %v7320_v17 = vmul.f32 0.0625, %v6392_v13  ;;  %v6389_v23 = vpop.xlane.xlu0 %6388  ;;  %v12523_v13 = vunpack.c.h.bf16 %v12847_v6 }
 0x3a0   : > { %v10093_v32 = vsel %vm8660_vm10, %v10092_v18, %v10088_v10  ;;  %v8374_v27 = vunpack.c.l.b16 %v7680_v12  ;;  %v8375_v33 = vunpack.c.h.b16 %v7680_v12  ;;  %v7319_v29 = vmul.f32 0.0625, %v6389_v23 }
 0x3a1   : > { %v10098_v30 = vsel %vm15931_vm9, %v10097_v11, %v10093_v32  ;;  %6637 = vadd.xlane.f32.xlu1 %v6636_v25  ;;  %v6783_v23 = vsel %vm5480_vm0, %v12462_v15, 0.0  ;;  %vm15932_vm9 = vcmask 654912  }
 0x3a2   : > { %v10102_v35 = vrot.slane %v8374_v27, %v13903_v16  ;;  %v10107_v38 = vrot.slane %v8375_v33, %v13913_v37  ;;  %v7681_v47 = vpack.c.bf16 %v7320_v17, %v7319_v29  ;;  %6634 = vadd.xlane.f32.xlu0 %v6633_v24  ;;  %v6398_v40 = vpop.xlane.xlu1 %6397  ;;  %v6786_v17 = vsel %vm5480_vm0, %v12463_v63, 0.0 }
 0x3a3   : > { %v7322_v45 = vmul.f32 0.0625, %v6398_v40  ;;  %v6395_v46 = vpop.xlane.xlu0 %6394  ;;  %v12522_v29 = vunpack.c.l.bf16 %v12847_v6 }
 0x3a4   : > { %v10103_v51 = vsel %vm8674_vm12, %v10102_v35, %v10098_v30  ;;  %v8376_v21 = vunpack.c.l.b16 %v7681_v47  ;;  %v8377_v57 = vunpack.c.h.b16 %v7681_v47  ;;  %v7321_v3 = vmul.f32 0.0625, %v6395_v46  ;;  %v12863_v30 = vld [vmem:[%s13701_s20 + $0x7c0] sm:$0xff]   ;;  %v12801_v46 = vld [vmem:[%s13701_s20 + $0x5d0] sm:$0xff]  }
 0x3a5   : > { %v10108_v5 = vsel %vm8681_vm13, %v10107_v38, %v10103_v51  ;;  %6691 = vadd.xlane.f32.xlu1 %v6690_v48  ;;  %v6876_v47 = vsel %vm5480_vm0, %v12523_v13, 0.0 }
 0x3a6   : > { %v10112_v1 = vrot.slane %v8376_v21, %v13922_v61  ;;  %v10117_v7 = vrot.slane %v8377_v57, %v13925_v62  ;;  %v7682_v2 = vpack.c.bf16 %v7322_v45, %v7321_v3  ;;  %6688 = vadd.xlane.f32.xlu0 %v6687_v58  ;;  %v6404_v4 = vpop.xlane.xlu1 %6403  ;;  %v12587_v45 = vunpack.c.h.bf16 %v12863_v30 }
 0x3a7   : > { %v7324_v8 = vmul.f32 0.0625, %v6404_v4  ;;  %v6401_v34 = vpop.xlane.xlu0 %6400  ;;  %v6873_v21 = vsel %vm5480_vm0, %v12522_v29, 0.0  ;;  %v12586_v57 = vunpack.c.l.bf16 %v12863_v30  ;;  %v12824_v29 = vld [vmem:[%s13701_s20 + $0x688] sm:$0xff]  }
 0x3a8   : > { %v10113_v10 = vsel %vm8688_vm14, %v10112_v1, %v10108_v5  ;;  %v8378_v25 = vunpack.c.l.b16 %v7682_v2  ;;  %v8379_v18 = vunpack.c.h.b16 %v7682_v2  ;;  %v7323_v11 = vmul.f32 0.0625, %v6401_v34 }
 0x3a9   : > { %v10118_v12 = vsel %vm8695_vm15, %v10117_v7, %v10113_v10  ;;  %6733 = vadd.xlane.f32.xlu1 %v6732_v59  ;;  %v12339_v7 = vunpack.c.h.bf16 %v12801_v46  ;;  %v6969_v10 = vsel %vm5480_vm0, %v12586_v57, 0.0 }
 0x3aa   : > { %v7683_v14 = vpack.c.bf16 %v7324_v8, %v7323_v11  ;;  %6730 = vadd.xlane.f32.xlu0 %v6729_v9  ;;  %v6410_v22 = vpop.xlane.xlu1 %6409  ;;  %v15000_v24 = vsel %vm11152_vm11, %v10118_v12, %v14764_v50  ;;  %v10122_v26 = vrot.slane %v8378_v25, %v13830_v39  ;;  %v10126_v32 = vrot.slane %v8379_v18, %v13842_v53  ;;  %v12808_v18 = vld [vmem:[%s13701_s20 + $0x608] sm:$0xff]  }
 0x3ab   : > { %v7326_v27 = vmul.f32 0.0625, %v6410_v22  ;;  %v6407_v33 = vpop.xlane.xlu0 %6406  ;;  %v6972_v8 = vsel %vm5480_vm0, %v12587_v45, 0.0  ;;  %v12338_v25 = vunpack.c.l.bf16 %v12801_v46  ;;  %v12431_v45 = vunpack.c.h.bf16 %v12824_v29 }
 0x3ac   : > { %v8380_v31 = vunpack.c.l.b16 %v7683_v14  ;;  %v8381_v35 = vunpack.c.h.b16 %v7683_v14  ;;  %v7325_v38 = vmul.f32 0.0625, %v6407_v33  ;;  %v10127_v58 = vsel %vm8597_vm1, %v10126_v32, %v10122_v26 }
 0x3ad   : > { %6787 = vadd.xlane.f32.xlu1 %v6786_v17  ;;  %v6600_v17 = vsel %vm5480_vm0, %v12339_v7, 0.0  ;;  %v12367_v33 = vunpack.c.h.bf16 %v12808_v18 }
 0x3ae   : > { %v10131_v40 = vrot.slane %v8380_v31, %v13835_v43  ;;  %v10136_v50 = vrot.slane %v8381_v35, %v13838_v44  ;;  %v7684_v48 = vpack.c.bf16 %v7326_v27, %v7325_v38  ;;  %6784 = vadd.xlane.f32.xlu0 %v6783_v23  ;;  %v6416_v42 = vpop.xlane.xlu1 %6415  ;;  %v6597_v35 = vsel %vm5480_vm0, %v12338_v25, 0.0 }
 0x3af   : > { %v7328_v49 = vmul.f32 0.0625, %v6416_v42  ;;  %v6413_v51 = vpop.xlane.xlu0 %6412  ;;  %v12366_v38 = vunpack.c.l.bf16 %v12808_v18  ;;  %v12848_v18 = vld [vmem:[%s13701_s20 + $0x748] sm:$0xff]  }
 0x3b0   : > { %v10132_v3 = vsel %vm8604_vm2, %v10131_v40, %v10127_v58  ;;  %v8382_v5 = vunpack.c.l.b16 %v7684_v48  ;;  %v8383_v59 = vunpack.c.h.b16 %v7684_v48  ;;  %v7327_v63 = vmul.f32 0.0625, %v6413_v51 }
 0x3b1   : > { %v10137_v1 = vsel %vm8611_vm3, %v10136_v50, %v10132_v3  ;;  %6877 = vadd.xlane.f32.xlu1 %v6876_v47 }
 0x3b2   : > { %v10141_v2 = vrot.slane %v8382_v5, %v13845_v54  ;;  %v10146_v4 = vrot.slane %v8383_v59, %v13848_v55  ;;  %v7685_v15 = vpack.c.bf16 %v7328_v49, %v7327_v63  ;;  %6874 = vadd.xlane.f32.xlu0 %v6873_v21  ;;  %v6422_v6 = vpop.xlane.xlu1 %6421  ;;  %v6642_v21 = vsel %vm5480_vm0, %v12367_v33, 0.0  ;;  %v12839_v63 = vld [vmem:[%s13701_s20 + $0x700] sm:$0xff]  }
 0x3b3   : > { %v7330_v34 = vmul.f32 0.0625, %v6422_v6  ;;  %v6419_v9 = vpop.xlane.xlu0 %6418  ;;  %v6639_v5 = vsel %vm5480_vm0, %v12366_v38, 0.0  ;;  %v12430_v59 = vunpack.c.l.bf16 %v12824_v29  ;;  %v6738_v6 = vsel %vm5480_vm0, %v12431_v45, 0.0  ;;  %v12855_v38 = vld [vmem:[%s13701_s20 + $0x780] sm:$0xff]  }
 0x3b4   : > { %v10142_v11 = vsel %vm8618_vm4, %v10141_v2, %v10137_v1  ;;  %v8384_v12 = vunpack.c.l.b16 %v7685_v15  ;;  %v8385_v13 = vunpack.c.h.b16 %v7685_v15  ;;  %v7329_v14 = vmul.f32 0.0625, %v6419_v9 }
 0x3b5   : > { %v10147_v22 = vsel %vm8625_vm5, %v10146_v4, %v10142_v11  ;;  %6973 = vadd.xlane.f32.xlu1 %v6972_v8  ;;  %v12491_v25 = vunpack.c.h.bf16 %v12839_v63 }
 0x3b6   : > { %v10151_v23 = vrot.slane %v8384_v12, %v13852_v60  ;;  %v10156_v26 = vrot.slane %v8385_v13, %v13856_v0  ;;  %v7686_v32 = vpack.c.bf16 %v7330_v34, %v7329_v14  ;;  %6970 = vadd.xlane.f32.xlu0 %v6969_v10  ;;  %v6428_v27 = vpop.xlane.xlu1 %6427  ;;  %v6735_v13 = vsel %vm5480_vm0, %v12430_v59, 0.0 }
 0x3b7   : > { %v7332_v30 = vmul.f32 0.0625, %v6428_v27  ;;  %v6425_v31 = vpop.xlane.xlu0 %6424  ;;  %v12490_v14 = vunpack.c.l.bf16 %v12839_v63  ;;  %v12527_v27 = vunpack.c.h.bf16 %v12848_v18  ;;  %v12554_v63 = vunpack.c.l.bf16 %v12855_v38 }
 0x3b8   : > { %v10152_v47 = vsel %vm8632_vm6, %v10151_v23, %v10147_v22  ;;  %v8386_v40 = vunpack.c.l.b16 %v7686_v32  ;;  %v8387_v50 = vunpack.c.h.b16 %v7686_v32  ;;  %v7331_v48 = vmul.f32 0.0625, %v6425_v31 }
 0x3b9   : > { %v10157_v42 = vsel %vm8639_vm7, %v10156_v26, %v10152_v47  ;;  %6601 = vadd.xlane.f32.xlu1 %v6600_v17 }
 0x3ba   : > { %v10161_v46 = vrot.slane %v8386_v40, %v13866_v19  ;;  %v10166_v58 = vrot.slane %v8387_v50, %v13869_v20  ;;  %v7687_v49 = vpack.c.bf16 %v7332_v30, %v7331_v48  ;;  %6598 = vadd.xlane.f32.xlu0 %v6597_v35  ;;  %v6434_v51 = vpop.xlane.xlu1 %6433  ;;  %v6828_v35 = vsel %vm5480_vm0, %v12491_v25, 0.0 }
 0x3bb   : > { %v7334_v57 = vmul.f32 0.0625, %v6434_v51  ;;  %v6431_v3 = vpop.xlane.xlu0 %6430  ;;  %v6825_v50 = vsel %vm5480_vm0, %v12490_v14, 0.0  ;;  %v12526_v48 = vunpack.c.l.bf16 %v12848_v18  ;;  %v6882_v51 = vsel %vm5480_vm0, %v12527_v27, 0.0 }
 0x3bc   : > { %v10162_v1 = vsel %vm8646_vm8, %v10161_v46, %v10157_v42  ;;  %v8388_v7 = vunpack.c.l.b16 %v7687_v49  ;;  %v8389_v2 = vunpack.c.h.b16 %v7687_v49  ;;  %v7333_v4 = vmul.f32 0.0625, %v6431_v3 }
 0x3bd   : > { %v10167_v15 = vsel %vm15932_vm9, %v10166_v58, %v10162_v1  ;;  %6643 = vadd.xlane.f32.xlu1 %v6642_v21  ;;  %vm15933_vm9 = vcmask 786112   ;;  %v12555_v21 = vunpack.c.h.bf16 %v12855_v38  ;;  %v12864_v1 = vld [vmem:[%s13701_s20 + $0x7c8] sm:$0xff]  }
 0x3be   : > { %v10171_v8 = vrot.slane %v8388_v7, %v13885_v52  ;;  %v10176_v34 = vrot.slane %v8389_v2, %v13888_v56  ;;  %v7688_v9 = vpack.c.bf16 %v7334_v57, %v7333_v4  ;;  %6640 = vadd.xlane.f32.xlu0 %v6639_v5  ;;  %v6440_v10 = vpop.xlane.xlu1 %6439  ;;  %v6879_v4 = vsel %vm5480_vm0, %v12526_v48, 0.0 }
 0x3bf   : > { %v7336_v11 = vmul.f32 0.0625, %v6440_v10  ;;  %v6437_v12 = vpop.xlane.xlu0 %6436 }
 0x3c0   : > { %v10172_v22 = vsel %vm8660_vm10, %v10171_v8, %v10167_v15  ;;  %v8390_v17 = vunpack.c.l.b16 %v7688_v9  ;;  %v8391_v23 = vunpack.c.h.b16 %v7688_v9  ;;  %v7335_v26 = vmul.f32 0.0625, %v6437_v12 }
 0x3c1   : > { %v10177_v32 = vsel %vm15933_vm9, %v10176_v34, %v10172_v22  ;;  %6739 = vadd.xlane.f32.xlu1 %v6738_v6  ;;  %v12591_v9 = vunpack.c.h.bf16 %v12864_v1  ;;  %v6921_v12 = vsel %vm5480_vm0, %v12554_v63, 0.0 }
 0x3c2   : > { %v10181_v33 = vrot.slane %v8390_v17, %v13903_v16  ;;  %v10186_v29 = vrot.slane %v8391_v23, %v13913_v37  ;;  %v7689_v30 = vpack.c.bf16 %v7336_v11, %v7335_v26  ;;  %6736 = vadd.xlane.f32.xlu0 %v6735_v13  ;;  %v6446_v31 = vpop.xlane.xlu1 %6445  ;;  %v6924_v11 = vsel %vm5480_vm0, %v12555_v21, 0.0 }
 0x3c3   : > { %v7338_v47 = vmul.f32 0.0625, %v6446_v31  ;;  %v6443_v40 = vpop.xlane.xlu0 %6442  ;;  %v12590_v26 = vunpack.c.l.bf16 %v12864_v1 }
 0x3c4   : > { %v10182_v42 = vsel %vm8674_vm12, %v10181_v33, %v10177_v32  ;;  %v8392_v45 = vunpack.c.l.b16 %v7689_v30  ;;  %v8393_v46 = vunpack.c.h.b16 %v7689_v30  ;;  %v7337_v58 = vmul.f32 0.0625, %v6443_v40  ;;  %v12817_v32 = vld [vmem:[%s13701_s20 + $0x650] sm:$0xff]  }
 0x3c5   : > { %v10187_v49 = vsel %vm8681_vm13, %v10186_v29, %v10182_v42  ;;  %6829 = vadd.xlane.f32.xlu1 %v6828_v35  ;;  %v6978_v30 = vsel %vm5480_vm0, %v12591_v9, 0.0  ;;  %v12833_v40 = vld [vmem:[%s13701_s20 + $0x6d0] sm:$0xff]  }
 0x3c6   : > { %v10191_v57 = vrot.slane %v8392_v45, %v13922_v61  ;;  %v10196_v3 = vrot.slane %v8393_v46, %v13925_v62  ;;  %v7690_v5 = vpack.c.bf16 %v7338_v47, %v7337_v58  ;;  %6826 = vadd.xlane.f32.xlu0 %v6825_v50  ;;  %v6452_v59 = vpop.xlane.xlu1 %6451  ;;  %v12403_v47 = vunpack.c.h.bf16 %v12817_v32 }
 0x3c7   : > { %v7340_v7 = vmul.f32 0.0625, %v6452_v59  ;;  %v6449_v2 = vpop.xlane.xlu0 %6448  ;;  %v6975_v45 = vsel %vm5480_vm0, %v12590_v26, 0.0  ;;  %v12402_v46 = vunpack.c.l.bf16 %v12817_v32  ;;  %v12856_v26 = vld [vmem:[%s13701_s20 + $0x788] sm:$0xff]  }
 0x3c8   : > { %v8394_v15 = vunpack.c.l.b16 %v7690_v5  ;;  %v8395_v6 = vunpack.c.h.b16 %v7690_v5  ;;  %v7339_v8 = vmul.f32 0.0625, %v6449_v2  ;;  %v10192_v34 = vsel %vm8688_vm14, %v10191_v57, %v10187_v49 }
 0x3c9   : > { %6883 = vadd.xlane.f32.xlu1 %v6882_v51  ;;  %v10197_v10 = vsel %vm8695_vm15, %v10196_v3, %v10192_v34  ;;  %v12467_v3 = vunpack.c.h.bf16 %v12833_v40 }
 0x3ca   : > { %v7691_v25 = vpack.c.bf16 %v7340_v7, %v7339_v8  ;;  %6880 = vadd.xlane.f32.xlu0 %v6879_v4  ;;  %v6458_v18 = vpop.xlane.xlu1 %6457  ;;  %v15059_v13 = vsel %vm11152_vm11, %v10197_v10, %v14823_v41  ;;  %v10201_v14 = vrot.slane %v8394_v15, %v13830_v39  ;;  %v10205_v22 = vrot.slane %v8395_v6, %v13842_v53  ;;  %v12840_v8 = vld [vmem:[%s13701_s20 + $0x708] sm:$0xff]  }
 0x3cb   : > { %v7342_v17 = vmul.f32 0.0625, %v6458_v18  ;;  %v6455_v23 = vpop.xlane.xlu0 %6454  ;;  %v6696_v7 = vsel %vm5480_vm0, %v12403_v47, 0.0  ;;  %v6693_v15 = vsel %vm5480_vm0, %v12402_v46, 0.0  ;;  %v12466_v6 = vunpack.c.l.bf16 %v12833_v40 }
 0x3cc   : > { %v8396_v27 = vunpack.c.l.b16 %v7691_v25  ;;  %v8397_v33 = vunpack.c.h.b16 %v7691_v25  ;;  %v7341_v29 = vmul.f32 0.0625, %v6455_v23  ;;  %v10206_v50 = vsel %vm8597_vm1, %v10205_v22, %v10201_v14 }
 0x3cd   : > { %6925 = vadd.xlane.f32.xlu1 %v6924_v11  ;;  %v6792_v11 = vsel %vm5480_vm0, %v12467_v3, 0.0  ;;  %v12495_v23 = vunpack.c.h.bf16 %v12840_v8  ;;  %v12559_v47 = vunpack.c.h.bf16 %v12856_v26  ;;  %vm15934_vm11 = vcmask 654912  }
 0x3ce   : > { %v10210_v31 = vrot.slane %v8396_v27, %v13835_v43  ;;  %v10215_v41 = vrot.slane %v8397_v33, %v13838_v44  ;;  %v7692_v35 = vpack.c.bf16 %v7342_v17, %v7341_v29  ;;  %6922 = vadd.xlane.f32.xlu0 %v6921_v12  ;;  %v6464_v38 = vpop.xlane.xlu1 %6463  ;;  %v6789_v33 = vsel %vm5480_vm0, %v12466_v6, 0.0 }
 0x3cf   : > { %v7344_v48 = vmul.f32 0.0625, %v6464_v38  ;;  %v6461_v42 = vpop.xlane.xlu0 %6460  ;;  %v12494_v29 = vunpack.c.l.bf16 %v12840_v8  ;;  %v12809_v8 = vld [vmem:[%s13701_s20 + $0x610] sm:$0xff]  }
 0x3d0   : > { %v10211_v58 = vsel %vm8604_vm2, %v10210_v31, %v10206_v50  ;;  %v8398_v49 = vunpack.c.l.b16 %v7692_v35  ;;  %v8399_v51 = vunpack.c.h.b16 %v7692_v35  ;;  %v7343_v21 = vmul.f32 0.0625, %v6461_v42 }
 0x3d1   : > { %v10216_v57 = vsel %vm8611_vm3, %v10215_v41, %v10211_v58  ;;  %6979 = vadd.xlane.f32.xlu1 %v6978_v30 }
 0x3d2   : > { %v10220_v5 = vrot.slane %v8398_v49, %v13845_v54  ;;  %v10225_v59 = vrot.slane %v8399_v51, %v13848_v55  ;;  %v7693_v63 = vpack.c.bf16 %v7344_v48, %v7343_v21  ;;  %6976 = vadd.xlane.f32.xlu0 %v6975_v45  ;;  %v6470_v1 = vpop.xlane.xlu1 %6469  ;;  %v6834_v45 = vsel %vm5480_vm0, %v12495_v23, 0.0  ;;  %v12802_v21 = vld [vmem:[%s13701_s20 + $0x5d8] sm:$0xff]  }
 0x3d3   : > { %v7346_v2 = vmul.f32 0.0625, %v6470_v1  ;;  %v6467_v4 = vpop.xlane.xlu0 %6466  ;;  %v6831_v49 = vsel %vm5480_vm0, %v12494_v29, 0.0  ;;  %v12558_v51 = vunpack.c.l.bf16 %v12856_v26  ;;  %v6930_v1 = vsel %vm5480_vm0, %v12559_v47, 0.0  ;;  %v12825_v29 = vld [vmem:[%s13701_s20 + $0x690] sm:$0xff]  }
 0x3d4   : > { %v10221_v34 = vsel %vm8618_vm4, %v10220_v5, %v10216_v57  ;;  %v8400_v9 = vunpack.c.l.b16 %v7693_v63  ;;  %v8401_v10 = vunpack.c.h.b16 %v7693_v63  ;;  %v7345_v25 = vmul.f32 0.0625, %v6467_v4 }
 0x3d5   : > { %v10226_v18 = vsel %vm8625_vm5, %v10225_v59, %v10221_v34  ;;  %6697 = vadd.xlane.f32.xlu1 %v6696_v7  ;;  %v12343_v6 = vunpack.c.h.bf16 %v12802_v21 }
 0x3d6   : > { %v10230_v12 = vrot.slane %v8400_v9, %v13852_v60  ;;  %v10235_v14 = vrot.slane %v8401_v10, %v13856_v0  ;;  %v7694_v22 = vpack.c.bf16 %v7346_v2, %v7345_v25  ;;  %6694 = vadd.xlane.f32.xlu0 %v6693_v15  ;;  %v6476_v17 = vpop.xlane.xlu1 %6475  ;;  %v6927_v10 = vsel %vm5480_vm0, %v12558_v51, 0.0 }
 0x3d7   : > { %v7348_v32 = vmul.f32 0.0625, %v6476_v17  ;;  %v6473_v27 = vpop.xlane.xlu0 %6472  ;;  %v12342_v25 = vunpack.c.l.bf16 %v12802_v21  ;;  %v12371_v17 = vunpack.c.h.bf16 %v12809_v8  ;;  %v12434_v21 = vunpack.c.l.bf16 %v12825_v29 }
 0x3d8   : > { %v10231_v30 = vsel %vm8632_vm6, %v10230_v12, %v10226_v18  ;;  %v8402_v31 = vunpack.c.l.b16 %v7694_v22  ;;  %v8403_v41 = vunpack.c.h.b16 %v7694_v22  ;;  %v7347_v35 = vmul.f32 0.0625, %v6473_v27 }
 0x3d9   : > { %v10236_v38 = vsel %vm8639_vm7, %v10235_v14, %v10231_v30  ;;  %6793 = vadd.xlane.f32.xlu1 %v6792_v11 }
 0x3da   : > { %v10240_v40 = vrot.slane %v8402_v31, %v13866_v19  ;;  %v10245_v50 = vrot.slane %v8403_v41, %v13869_v20  ;;  %v7695_v48 = vpack.c.bf16 %v7348_v32, %v7347_v35  ;;  %6790 = vadd.xlane.f32.xlu0 %v6789_v33  ;;  %v6482_v42 = vpop.xlane.xlu1 %6481  ;;  %v6606_v33 = vsel %vm5480_vm0, %v12343_v6, 0.0 }
 0x3db   : > { %v7350_v46 = vmul.f32 0.0625, %v6482_v42  ;;  %v6479_v58 = vpop.xlane.xlu0 %6478  ;;  %v6603_v41 = vsel %vm5480_vm0, %v12342_v25, 0.0  ;;  %v12370_v35 = vunpack.c.l.bf16 %v12809_v8  ;;  %v6648_v42 = vsel %vm5480_vm0, %v12371_v17, 0.0 }
 0x3dc   : > { %v10241_v57 = vsel %vm8646_vm8, %v10240_v40, %v10236_v38  ;;  %v8404_v3 = vunpack.c.l.b16 %v7695_v48  ;;  %v8405_v5 = vunpack.c.h.b16 %v7695_v48  ;;  %v7349_v59 = vmul.f32 0.0625, %v6479_v58 }
 0x3dd   : > { %v10246_v63 = vsel %vm15934_vm11, %v10245_v50, %v10241_v57  ;;  %6835 = vadd.xlane.f32.xlu1 %v6834_v45  ;;  %v12435_v45 = vunpack.c.h.bf16 %v12825_v29  ;;  %v12849_v57 = vld [vmem:[%s13701_s20 + $0x750] sm:$0xff]   ;;  %vm11154_vm11 = vcmask 1045509  }
 0x3de   : > { %v10250_v7 = vrot.slane %v8404_v3, %v13885_v52  ;;  %v10255_v2 = vrot.slane %v8405_v5, %v13888_v56  ;;  %v7696_v4 = vpack.c.bf16 %v7350_v46, %v7349_v59  ;;  %6832 = vadd.xlane.f32.xlu0 %v6831_v49  ;;  %v6488_v15 = vpop.xlane.xlu1 %6487  ;;  %v6645_v59 = vsel %vm5480_vm0, %v12370_v35, 0.0 }
 0x3df   : > { %v7352_v34 = vmul.f32 0.0625, %v6488_v15  ;;  %v6485_v9 = vpop.xlane.xlu0 %6484 }
 0x3e0   : > { %v10251_v18 = vsel %vm8660_vm10, %v10250_v7, %v10246_v63  ;;  %v8406_v11 = vunpack.c.l.b16 %v7696_v4  ;;  %v8407_v12 = vunpack.c.h.b16 %v7696_v4  ;;  %v7351_v14 = vmul.f32 0.0625, %v6485_v9 }
 0x3e1   : > { %v10256_v22 = vsel %vm15933_vm9, %v10255_v2, %v10251_v18  ;;  %6931 = vadd.xlane.f32.xlu1 %v6930_v1  ;;  %v12531_v4 = vunpack.c.h.bf16 %v12849_v57  ;;  %v6741_v9 = vsel %vm5480_vm0, %v12434_v21, 0.0  ;;  %vm15935_vm9 = vcmask 654912  }
 0x3e2   : > { %v10260_v23 = vrot.slane %v8406_v11, %v13903_v16  ;;  %v10265_v26 = vrot.slane %v8407_v12, %v13913_v37  ;;  %v7697_v32 = vpack.c.bf16 %v7352_v34, %v7351_v14  ;;  %6928 = vadd.xlane.f32.xlu0 %v6927_v10  ;;  %v6494_v27 = vpop.xlane.xlu1 %6493  ;;  %v6744_v34 = vsel %vm5480_vm0, %v12435_v45, 0.0 }
 0x3e3   : > { %v7354_v30 = vmul.f32 0.0625, %v6494_v27  ;;  %v6491_v31 = vpop.xlane.xlu0 %6490  ;;  %v12530_v14 = vunpack.c.l.bf16 %v12849_v57 }
 0x3e4   : > { %v10261_v38 = vsel %vm8674_vm12, %v10260_v23, %v10256_v22  ;;  %v8408_v47 = vunpack.c.l.b16 %v7697_v32  ;;  %v8409_v40 = vunpack.c.h.b16 %v7697_v32  ;;  %v7353_v50 = vmul.f32 0.0625, %v6491_v31  ;;  %v12865_v22 = vld [vmem:[%s13701_s20 + $0x7d0] sm:$0xff]   ;;  %v12818_v31 = vld [vmem:[%s13701_s20 + $0x658] sm:$0xff]  }
 0x3e5   : > { %v10266_v48 = vsel %vm8681_vm13, %v10265_v26, %v10261_v38  ;;  %6607 = vadd.xlane.f32.xlu1 %v6606_v33  ;;  %v6888_v32 = vsel %vm5480_vm0, %v12531_v4, 0.0 }
 0x3e6   : > { %v10270_v46 = vrot.slane %v8408_v47, %v13922_v61  ;;  %v10275_v58 = vrot.slane %v8409_v40, %v13925_v62  ;;  %v7698_v49 = vpack.c.bf16 %v7354_v30, %v7353_v50  ;;  %6604 = vadd.xlane.f32.xlu0 %v6603_v41  ;;  %v6500_v51 = vpop.xlane.xlu1 %6499  ;;  %v12595_v30 = vunpack.c.h.bf16 %v12865_v22 }
 0x3e7   : > { %v7356_v3 = vmul.f32 0.0625, %v6500_v51  ;;  %v6497_v5 = vpop.xlane.xlu0 %6496  ;;  %v6885_v47 = vsel %vm5480_vm0, %v12530_v14, 0.0  ;;  %v12594_v40 = vunpack.c.l.bf16 %v12865_v22  ;;  %v12841_v14 = vld [vmem:[%s13701_s20 + $0x710] sm:$0xff]  }
 0x3e8   : > { %v10271_v63 = vsel %vm8688_vm14, %v10270_v46, %v10266_v48  ;;  %v8410_v1 = vunpack.c.l.b16 %v7698_v49  ;;  %v8411_v7 = vunpack.c.h.b16 %v7698_v49  ;;  %v7355_v2 = vmul.f32 0.0625, %v6497_v5 }
 0x3e9   : > { %6649 = vadd.xlane.f32.xlu1 %v6648_v42  ;;  %v10276_v15 = vsel %vm8695_vm15, %v10275_v58, %v10271_v63  ;;  %v12407_v58 = vunpack.c.h.bf16 %v12818_v31  ;;  %v6981_v63 = vsel %vm5480_vm0, %v12594_v40, 0.0 }
 0x3ea   : > { %v7699_v6 = vpack.c.bf16 %v7356_v3, %v7355_v2  ;;  %6646 = vadd.xlane.f32.xlu0 %v6645_v59  ;;  %v6506_v8 = vpop.xlane.xlu1 %6505  ;;  %v15118_v10 = vsel %vm11154_vm11, %v10276_v15, %v14882_v36  ;;  %v10280_v25 = vrot.slane %v8410_v1, %v13830_v39  ;;  %v10284_v18 = vrot.slane %v8411_v7, %v13842_v53  ;;  %v12834_v7 = vld [vmem:[%s13701_s20 + $0x6d8] sm:$0xff]  }
 0x3eb   : > { %v7358_v11 = vmul.f32 0.0625, %v6506_v8  ;;  %v6503_v12 = vpop.xlane.xlu0 %6502  ;;  %v6984_v3 = vsel %vm5480_vm0, %v12595_v30, 0.0  ;;  %v12406_v1 = vunpack.c.l.bf16 %v12818_v31  ;;  %v12499_v30 = vunpack.c.h.bf16 %v12841_v14 }
 0x3ec   : > { %v8412_v17 = vunpack.c.l.b16 %v7699_v6  ;;  %v8413_v23 = vunpack.c.h.b16 %v7699_v6  ;;  %v7357_v26 = vmul.f32 0.0625, %v6503_v12  ;;  %v10285_v41 = vsel %vm8597_vm1, %v10284_v18, %v10280_v25 }
 0x3ed   : > { %6745 = vadd.xlane.f32.xlu1 %v6744_v34  ;;  %v6702_v34 = vsel %vm5480_vm0, %v12407_v58, 0.0  ;;  %v12471_v12 = vunpack.c.h.bf16 %v12834_v7 }
 0x3ee   : > { %v10289_v27 = vrot.slane %v8412_v17, %v13835_v43  ;;  %v10294_v36 = vrot.slane %v8413_v23, %v13838_v44  ;;  %v7700_v33 = vpack.c.bf16 %v7358_v11, %v7357_v26  ;;  %6742 = vadd.xlane.f32.xlu0 %v6741_v9  ;;  %v6512_v29 = vpop.xlane.xlu1 %6511  ;;  %v6699_v23 = vsel %vm5480_vm0, %v12406_v1, 0.0 }
 0x3ef   : > { %v7360_v35 = vmul.f32 0.0625, %v6512_v29  ;;  %v6509_v38 = vpop.xlane.xlu0 %6508  ;;  %v12470_v26 = vunpack.c.l.bf16 %v12834_v7  ;;  %v12803_v7 = vld [vmem:[%s13701_s20 + $0x5e0] sm:$0xff]  }
 0x3f0   : > { %v10290_v50 = vsel %vm8604_vm2, %v10289_v27, %v10285_v41  ;;  %v8414_v48 = vunpack.c.l.b16 %v7700_v33  ;;  %v8415_v42 = vunpack.c.h.b16 %v7700_v33  ;;  %v7359_v45 = vmul.f32 0.0625, %v6509_v38 }
 0x3f1   : > { %v10295_v46 = vsel %vm8611_vm3, %v10294_v36, %v10290_v50  ;;  %6889 = vadd.xlane.f32.xlu1 %v6888_v32 }
 0x3f2   : > { %v10299_v49 = vrot.slane %v8414_v48, %v13845_v54  ;;  %v10304_v51 = vrot.slane %v8415_v42, %v13848_v55  ;;  %v7701_v21 = vpack.c.bf16 %v7360_v35, %v7359_v45  ;;  %6886 = vadd.xlane.f32.xlu0 %v6885_v47  ;;  %v6518_v57 = vpop.xlane.xlu1 %6517  ;;  %v6798_v47 = vsel %vm5480_vm0, %v12471_v12, 0.0  ;;  %v12857_v45 = vld [vmem:[%s13701_s20 + $0x790] sm:$0xff]  }
 0x3f3   : > { %v7362_v5 = vmul.f32 0.0625, %v6518_v57  ;;  %v6515_v59 = vpop.xlane.xlu0 %6514  ;;  %v6795_v48 = vsel %vm5480_vm0, %v12470_v26, 0.0  ;;  %v12498_v42 = vunpack.c.l.bf16 %v12841_v14  ;;  %v6840_v57 = vsel %vm5480_vm0, %v12499_v30, 0.0  ;;  %v12810_v26 = vld [vmem:[%s13701_s20 + $0x618] sm:$0xff]  }
 0x3f4   : > { %v10300_v2 = vsel %vm8618_vm4, %v10299_v49, %v10295_v46  ;;  %v8416_v4 = vunpack.c.l.b16 %v7701_v21  ;;  %v8417_v15 = vunpack.c.h.b16 %v7701_v21  ;;  %v7361_v6 = vmul.f32 0.0625, %v6515_v59 }
 0x3f5   : > { %v10305_v8 = vsel %vm8625_vm5, %v10304_v51, %v10300_v2  ;;  %6985 = vadd.xlane.f32.xlu1 %v6984_v3  ;;  %v12563_v1 = vunpack.c.h.bf16 %v12857_v45 }
 0x3f6   : > { %v10309_v9 = vrot.slane %v8416_v4, %v13852_v60  ;;  %v10314_v25 = vrot.slane %v8417_v15, %v13856_v0  ;;  %v7702_v18 = vpack.c.bf16 %v7362_v5, %v7361_v6  ;;  %6982 = vadd.xlane.f32.xlu0 %v6981_v63  ;;  %v6524_v11 = vpop.xlane.xlu1 %6523  ;;  %v6837_v15 = vsel %vm5480_vm0, %v12498_v42, 0.0 }
 0x3f7   : > { %v7364_v22 = vmul.f32 0.0625, %v6524_v11  ;;  %v6521_v17 = vpop.xlane.xlu0 %6520  ;;  %v12562_v6 = vunpack.c.l.bf16 %v12857_v45  ;;  %v12347_v11 = vunpack.c.h.bf16 %v12803_v7  ;;  %v12374_v45 = vunpack.c.l.bf16 %v12810_v26 }
 0x3f8   : > { %v10310_v32 = vsel %vm8632_vm6, %v10309_v9, %v10305_v8  ;;  %v8418_v27 = vunpack.c.l.b16 %v7702_v18  ;;  %v8419_v36 = vunpack.c.h.b16 %v7702_v18  ;;  %v7363_v33 = vmul.f32 0.0625, %v6521_v17 }
 0x3f9   : > { %v10315_v29 = vsel %vm8639_vm7, %v10314_v25, %v10310_v32  ;;  %6703 = vadd.xlane.f32.xlu1 %v6702_v34 }
 0x3fa   : > { %v10319_v31 = vrot.slane %v8418_v27, %v13866_v19  ;;  %v10324_v41 = vrot.slane %v8419_v36, %v13869_v20  ;;  %v7703_v35 = vpack.c.bf16 %v7364_v22, %v7363_v33  ;;  %6700 = vadd.xlane.f32.xlu0 %v6699_v23  ;;  %v6530_v38 = vpop.xlane.xlu1 %6529  ;;  %v6936_v23 = vsel %vm5480_vm0, %v12563_v1, 0.0 }
 0x3fb   : > { %v7366_v40 = vmul.f32 0.0625, %v6530_v38  ;;  %v6527_v50 = vpop.xlane.xlu0 %6526  ;;  %v6933_v36 = vsel %vm5480_vm0, %v12562_v6, 0.0  ;;  %v12346_v33 = vunpack.c.l.bf16 %v12803_v7  ;;  %v12375_v38 = vunpack.c.h.bf16 %v12810_v26 }
 0x3fc   : > { %v10320_v46 = vsel %vm8646_vm8, %v10319_v31, %v10315_v29  ;;  %v8420_v58 = vunpack.c.l.b16 %v7703_v35  ;;  %v8421_v49 = vunpack.c.h.b16 %v7703_v35  ;;  %v7365_v51 = vmul.f32 0.0625, %v6527_v50 }
 0x3fd   : > { %v10325_v21 = vsel %vm15935_vm9, %v10324_v41, %v10320_v46  ;;  %6799 = vadd.xlane.f32.xlu1 %v6798_v47  ;;  %vm15936_vm9 = vcmask 786112   ;;  %v6612_v35 = vsel %vm5480_vm0, %v12347_v11, 0.0  ;;  %v12826_v46 = vld [vmem:[%s13701_s20 + $0x698] sm:$0xff]  }
 0x3fe   : > { %v10329_v3 = vrot.slane %v8420_v58, %v13885_v52  ;;  %v10334_v5 = vrot.slane %v8421_v49, %v13888_v56  ;;  %v7704_v59 = vpack.c.bf16 %v7366_v40, %v7365_v51  ;;  %6796 = vadd.xlane.f32.xlu0 %v6795_v48  ;;  %v6536_v63 = vpop.xlane.xlu1 %6535  ;;  %v6609_v51 = vsel %vm5480_vm0, %v12346_v33, 0.0 }
 0x3ff   : > { %v7368_v2 = vmul.f32 0.0625, %v6536_v63  ;;  %v6533_v4 = vpop.xlane.xlu0 %6532 }
 0x400   : > { %v10330_v8 = vsel %vm8660_vm10, %v10329_v3, %v10325_v21  ;;  %v8422_v34 = vunpack.c.l.b16 %v7704_v59  ;;  %v8423_v9 = vunpack.c.h.b16 %v7704_v59  ;;  %v7367_v25 = vmul.f32 0.0625, %v6533_v4 }
 0x401   : > { %v10335_v18 = vsel %vm15936_vm9, %v10334_v5, %v10330_v8  ;;  %6841 = vadd.xlane.f32.xlu1 %v6840_v57  ;;  %v12439_v59 = vunpack.c.h.bf16 %v12826_v46  ;;  %v6651_v4 = vsel %vm5480_vm0, %v12374_v45, 0.0  ;;  %vm15937_vm9 = vcmask 654912  }
 0x402   : > { %v10339_v12 = vrot.slane %v8422_v34, %v13903_v16  ;;  %v10344_v14 = vrot.slane %v8423_v9, %v13913_v37  ;;  %v7705_v22 = vpack.c.bf16 %v7368_v2, %v7367_v25  ;;  %6838 = vadd.xlane.f32.xlu0 %v6837_v15  ;;  %v6542_v17 = vpop.xlane.xlu1 %6541  ;;  %v6654_v2 = vsel %vm5480_vm0, %v12375_v38, 0.0 }
 0x403   : > { %v7370_v32 = vmul.f32 0.0625, %v6542_v17  ;;  %v6539_v27 = vpop.xlane.xlu0 %6538  ;;  %v12438_v25 = vunpack.c.l.bf16 %v12826_v46 }
 0x404   : > { %v10340_v29 = vsel %vm8674_vm12, %v10339_v12, %v10335_v18  ;;  %v8424_v30 = vunpack.c.l.b16 %v7705_v22  ;;  %v8425_v31 = vunpack.c.h.b16 %v7705_v22  ;;  %v7369_v41 = vmul.f32 0.0625, %v6539_v27  ;;  %v12850_v18 = vld [vmem:[%s13701_s20 + $0x758] sm:$0xff]  }
 0x405   : > { %6937 = vadd.xlane.f32.xlu1 %v6936_v23  ;;  %v10345_v47 = vsel %vm8681_vm13, %v10344_v14, %v10340_v29  ;;  %v6750_v22 = vsel %vm5480_vm0, %v12439_v59, 0.0  ;;  %v12866_v27 = vld [vmem:[%s13701_s20 + $0x7d8] sm:$0xff]  }
 0x406   : > { %v10349_v40 = vrot.slane %v8424_v30, %v13922_v61  ;;  %v10354_v50 = vrot.slane %v8425_v31, %v13925_v62  ;;  %v7706_v48 = vpack.c.bf16 %v7370_v32, %v7369_v41  ;;  %6934 = vadd.xlane.f32.xlu0 %v6933_v36  ;;  %v6548_v42 = vpop.xlane.xlu1 %6547  ;;  %v12535_v32 = vunpack.c.h.bf16 %v12850_v18 }
 0x407   : > { %v7372_v58 = vmul.f32 0.0625, %v6548_v42  ;;  %v6545_v49 = vpop.xlane.xlu0 %6544  ;;  %v6747_v30 = vsel %vm5480_vm0, %v12438_v25, 0.0  ;;  %v12534_v31 = vunpack.c.l.bf16 %v12850_v18  ;;  %v12835_v25 = vld [vmem:[%s13701_s20 + $0x6e0] sm:$0xff]  }
 0x408   : > { %v8426_v21 = vunpack.c.l.b16 %v7706_v48  ;;  %v8427_v57 = vunpack.c.h.b16 %v7706_v48  ;;  %v7371_v3 = vmul.f32 0.0625, %v6545_v49  ;;  %v10350_v5 = vsel %vm8688_vm14, %v10349_v40, %v10345_v47 }
 0x409   : > { %6613 = vadd.xlane.f32.xlu1 %v6612_v35  ;;  %v10355_v63 = vsel %vm8695_vm15, %v10354_v50, %v10350_v5  ;;  %v12599_v50 = vunpack.c.h.bf16 %v12866_v27 }
 0x40a   : > { %v7707_v1 = vpack.c.bf16 %v7372_v58, %v7371_v3  ;;  %6610 = vadd.xlane.f32.xlu0 %v6609_v51  ;;  %v6554_v7 = vpop.xlane.xlu1 %6553  ;;  %v15177_v15 = vsel %vm11154_vm11, %v10355_v63, %v14941_v28  ;;  %v10359_v6 = vrot.slane %v8426_v21, %v13830_v39  ;;  %v10363_v8 = vrot.slane %v8427_v57, %v13842_v53  ;;  %v12819_v3 = vld [vmem:[%s13701_s20 + $0x660] sm:$0xff]  }
 0x40b   : > { %v7374_v34 = vmul.f32 0.0625, %v6554_v7  ;;  %v6551_v9 = vpop.xlane.xlu0 %6550  ;;  %v6894_v58 = vsel %vm5480_vm0, %v12535_v32, 0.0  ;;  %v6891_v21 = vsel %vm5480_vm0, %v12534_v31, 0.0  ;;  %v12598_v57 = vunpack.c.l.bf16 %v12866_v27  ;;  %v12842_v31 = vld [vmem:[%s13701_s20 + $0x718] sm:$0xff]  }
 0x40c   : > { %v8428_v11 = vunpack.c.l.b16 %v7707_v1  ;;  %v8429_v12 = vunpack.c.h.b16 %v7707_v1  ;;  %v7373_v14 = vmul.f32 0.0625, %v6551_v9  ;;  %v10364_v36 = vsel %vm8597_vm1, %v10363_v8, %v10359_v6 }
 0x40d   : > { %6655 = vadd.xlane.f32.xlu1 %v6654_v2  ;;  %v6990_v2 = vsel %vm5480_vm0, %v12599_v50, 0.0  ;;  %v12411_v9 = vunpack.c.h.bf16 %v12819_v3  ;;  %v12475_v32 = vunpack.c.h.bf16 %v12835_v25 }
 0x40e   : > { %v10368_v17 = vrot.slane %v8428_v11, %v13835_v43  ;;  %v10373_v28 = vrot.slane %v8429_v12, %v13838_v44  ;;  %v7708_v23 = vpack.c.bf16 %v7374_v34, %v7373_v14  ;;  %6652 = vadd.xlane.f32.xlu0 %v6651_v4  ;;  %v6560_v26 = vpop.xlane.xlu1 %6559  ;;  %v6987_v12 = vsel %vm5480_vm0, %v12598_v57, 0.0 }
 0x40f   : > { %v7376_v33 = vmul.f32 0.0625, %v6560_v26  ;;  %v6557_v29 = vpop.xlane.xlu0 %6556  ;;  %v12410_v14 = vunpack.c.l.bf16 %v12819_v3  ;;  %v12502_v3 = vunpack.c.l.bf16 %v12842_v31 }
 0x410   : > { %v10369_v41 = vsel %vm8604_vm2, %v10368_v17, %v10364_v36  ;;  %v8430_v35 = vunpack.c.l.b16 %v7708_v23  ;;  %v8431_v38 = vunpack.c.h.b16 %v7708_v23  ;;  %v7375_v47 = vmul.f32 0.0625, %v6557_v29 }
 0x411   : > { %v10374_v40 = vsel %vm8611_vm3, %v10373_v28, %v10369_v41  ;;  %6751 = vadd.xlane.f32.xlu1 %v6750_v22 }
 0x412   : > { %v10378_v48 = vrot.slane %v8430_v35, %v13845_v54  ;;  %v10383_v42 = vrot.slane %v8431_v38, %v13848_v55  ;;  %v7709_v45 = vpack.c.bf16 %v7376_v33, %v7375_v47  ;;  %6748 = vadd.xlane.f32.xlu0 %v6747_v30  ;;  %v6566_v46 = vpop.xlane.xlu1 %6565  ;;  %v6708_v30 = vsel %vm5480_vm0, %v12411_v9, 0.0 }
 0x413   : > { %v7378_v49 = vmul.f32 0.0625, %v6566_v46  ;;  %v6563_v51 = vpop.xlane.xlu0 %6562  ;;  %v6705_v38 = vsel %vm5480_vm0, %v12410_v14, 0.0  ;;  %v12474_v47 = vunpack.c.l.bf16 %v12835_v25  ;;  %v6804_v46 = vsel %vm5480_vm0, %v12475_v32, 0.0 }
 0x414   : > { %v10379_v5 = vsel %vm8618_vm4, %v10378_v48, %v10374_v40  ;;  %v8432_v59 = vunpack.c.l.b16 %v7709_v45  ;;  %v8433_v63 = vunpack.c.h.b16 %v7709_v45  ;;  %v7377_v1 = vmul.f32 0.0625, %v6563_v51 }
 0x415   : > { %v10384_v7 = vsel %vm8625_vm5, %v10383_v42, %v10379_v5  ;;  %6895 = vadd.xlane.f32.xlu1 %v6894_v58  ;;  %v12503_v58 = vunpack.c.h.bf16 %v12842_v31  ;;  %v12858_v5 = vld [vmem:[%s13701_s20 + $0x798] sm:$0xff]  }
 0x416   : > { %v10388_v4 = vrot.slane %v8432_v59, %v13852_v60  ;;  %v10393_v6 = vrot.slane %v8433_v63, %v13856_v0  ;;  %v7710_v8 = vpack.c.bf16 %v7378_v49, %v7377_v1  ;;  %6892 = vadd.xlane.f32.xlu0 %v6891_v21  ;;  %v6572_v34 = vpop.xlane.xlu1 %6571  ;;  %v6801_v1 = vsel %vm5480_vm0, %v12474_v47, 0.0 }
 0x417   : > { %v7380_v18 = vmul.f32 0.0625, %v6572_v34  ;;  %v6569_v11 = vpop.xlane.xlu0 %6568  ;;  %v12567_v34 = vunpack.c.h.bf16 %v12858_v5 }
 0x418   : > { %v10389_v22 = vsel %vm8632_vm6, %v10388_v4, %v10384_v7  ;;  %v8434_v17 = vunpack.c.l.b16 %v7710_v8  ;;  %v8435_v28 = vunpack.c.h.b16 %v7710_v8  ;;  %v7379_v23 = vmul.f32 0.0625, %v6569_v11 }
 0x419   : > { %v10394_v26 = vsel %vm8639_vm7, %v10393_v6, %v10389_v22  ;;  %6991 = vadd.xlane.f32.xlu1 %v6990_v2  ;;  %v6843_v11 = vsel %vm5480_vm0, %v12502_v3, 0.0 }
 0x41a   : > { %v10398_v27 = vrot.slane %v8434_v17, %v13866_v19  ;;  %v10403_v36 = vrot.slane %v8435_v28, %v13869_v20  ;;  %v7711_v33 = vpack.c.bf16 %v7380_v18, %v7379_v23  ;;  %6988 = vadd.xlane.f32.xlu0 %v6987_v12  ;;  %v6590_v29 = vpop.xlane.xlu1 %6589  ;;  %v6846_v18 = vsel %vm5480_vm0, %v12503_v58, 0.0  ;;  %v12804_v23 = vld [vmem:[%s13701_s20 + $0x5e8] sm:$0xff]  }
 0x41b   : > { %v7386_v41 = vmul.f32 0.0625, %v6590_v29  ;;  %v6587_v35 = vpop.xlane.xlu0 %6586  ;;  %v12566_v28 = vunpack.c.l.bf16 %v12858_v5 }
 0x41c   : > { %v10399_v40 = vsel %vm8646_vm8, %v10398_v27, %v10394_v26  ;;  %v8436_v50 = vunpack.c.l.b16 %v7711_v33  ;;  %v8437_v48 = vunpack.c.h.b16 %v7711_v33  ;;  %v7385_v42 = vmul.f32 0.0625, %v6587_v35 }
 0x41d   : > { %v10404_v45 = vsel %vm15937_vm9, %v10403_v36, %v10399_v40  ;;  %6709 = vadd.xlane.f32.xlu1 %v6708_v30  ;;  %vm15938_vm9 = vcmask 786112   ;;  %v6942_v36 = vsel %vm5480_vm0, %v12567_v34, 0.0  ;;  %v6939_v40 = vsel %vm5480_vm0, %v12566_v28, 0.0 }
 0x41e   : > { %v10408_v49 = vrot.slane %v8436_v50, %v13885_v52  ;;  %v10413_v51 = vrot.slane %v8437_v48, %v13888_v56  ;;  %v7714_v21 = vpack.c.bf16 %v7386_v41, %v7385_v42  ;;  %6706 = vadd.xlane.f32.xlu0 %v6705_v38  ;;  %v6596_v57 = vpop.xlane.xlu1 %6595  ;;  %v12351_v41 = vunpack.c.h.bf16 %v12804_v23  ;;  %v12811_v48 = vld [vmem:[%s13701_s20 + $0x620] sm:$0xff]  }
 0x41f   : > { %v7388_v59 = vmul.f32 0.0625, %v6596_v57  ;;  %v6593_v63 = vpop.xlane.xlu0 %6592  ;;  %v12350_v50 = vunpack.c.l.bf16 %v12804_v23  ;;  %v12378_v57 = vunpack.c.l.bf16 %v12811_v48 }
 0x420   : > { %v10409_v7 = vsel %vm8660_vm10, %v10408_v49, %v10404_v45  ;;  %v8442_v2 = vunpack.c.l.b16 %v7714_v21  ;;  %v8443_v4 = vunpack.c.h.b16 %v7714_v21  ;;  %v7387_v6 = vmul.f32 0.0625, %v6593_v63  ;;  %v12827_v63 = vld [vmem:[%s13701_s20 + $0x6a0] sm:$0xff]  }
 0x421   : > { %v15218_v8 = vsel %vm15938_vm9, %v10413_v51, %v10409_v7  ;;  %6805 = vadd.xlane.f32.xlu1 %v6804_v46  ;;  %v6618_v51 = vsel %vm5480_vm0, %v12351_v41, 0.0  ;;  %v12379_v21 = vunpack.c.h.bf16 %v12811_v48  ;;  %v12443_v34 = vunpack.c.h.bf16 %v12827_v63 }
 0x422   : > { %v7715_v9 = vpack.c.bf16 %v7388_v59, %v7387_v6  ;;  %6802 = vadd.xlane.f32.xlu0 %v6801_v1  ;;  %v6686_v25 = vpop.xlane.xlu1 %6685  ;;  %v10438_v12 = vrot.slane %v8442_v2, %v13830_v39  ;;  %v10442_v14 = vrot.slane %v8443_v4, %v13842_v53  ;;  %v6615_v59 = vsel %vm5480_vm0, %v12350_v50, 0.0 }
 0x423   : > { %v7418_v22 = vmul.f32 0.0625, %v6686_v25  ;;  %v6683_v17 = vpop.xlane.xlu0 %6682  ;;  %v6660_v4 = vsel %vm5480_vm0, %v12379_v21, 0.0  ;;  %v6657_v6 = vsel %vm5480_vm0, %v12378_v57, 0.0  ;;  %v12820_v21 = vld [vmem:[%s13701_s20 + $0x668] sm:$0xff]  }
 0x424   : > { %v8444_v26 = vunpack.c.l.b16 %v7715_v9  ;;  %v8445_v32 = vunpack.c.h.b16 %v7715_v9  ;;  %v7417_v27 = vmul.f32 0.0625, %v6683_v17  ;;  %v10443_v35 = vsel %vm8597_vm1, %v10442_v14, %v10438_v12  ;;  %v12851_v9 = vld [vmem:[%s13701_s20 + $0x760] sm:$0xff]  }
 0x425   : > { %6847 = vadd.xlane.f32.xlu1 %v6846_v18  ;;  %v12442_v14 = vunpack.c.l.bf16 %v12827_v63  ;;  %v12539_v17 = vunpack.c.h.bf16 %v12851_v9  ;;  %v12538_v28 = vunpack.c.l.bf16 %v12851_v9 }
 0x426   : > { %v10447_v33 = vrot.slane %v8444_v26, %v13835_v43  ;;  %v10452_v29 = vrot.slane %v8445_v32, %v13838_v44  ;;  %v7730_v30 = vpack.c.bf16 %v7418_v22, %v7417_v27  ;;  %6844 = vadd.xlane.f32.xlu0 %v6843_v11  ;;  %v6782_v31 = vpop.xlane.xlu1 %6781  ;;  %v6756_v32 = vsel %vm5480_vm0, %v12443_v34, 0.0  ;;  %v12867_v27 = vld [vmem:[%s13701_s20 + $0x7e0] sm:$0xff]  }
 0x427   : > { %v7450_v38 = vmul.f32 0.0625, %v6782_v31  ;;  %v6779_v47 = vpop.xlane.xlu0 %6778  ;;  %v6753_v31 = vsel %vm5480_vm0, %v12442_v14, 0.0  ;;  %v12603_v50 = vunpack.c.h.bf16 %v12867_v27 }
 0x428   : > { %v10448_v42 = vsel %vm8604_vm2, %v10447_v33, %v10443_v35  ;;  %v7449_v45 = vmul.f32 0.0625, %v6779_v47  ;;  %v8474_v25 = vunpack.c.l.b16 %v7730_v30  ;;  %v8475_v18 = vunpack.c.h.b16 %v7730_v30 }
 0x429   : > { %v15233_v46 = vsel %vm8611_vm3, %v10452_v29, %v10448_v42  ;;  %6943 = vadd.xlane.f32.xlu1 %v6942_v36  ;;  %v6900_v47 = vsel %vm5480_vm0, %v12539_v17, 0.0  ;;  %v12836_v17 = vld [vmem:[%s13701_s20 + $0x6e8] sm:$0xff]  }
 0x42a   : > { %v15235_v58 = vpack.c.bf16 %v7450_v38, %v7449_v45  ;;  %6940 = vadd.xlane.f32.xlu0 %v6939_v40  ;;  %v6638_v49 = vpop.xlane.xlu1 %6637  ;;  %v10596_v36 = vrot.slane %v8474_v25, %v13830_v39  ;;  %v10600_v33 = vrot.slane %v8475_v18, %v13842_v53  ;;  %v6897_v40 = vsel %vm5480_vm0, %v12538_v28, 0.0 }
 0x42b   : > { %v7402_v3 = vmul.f32 0.0625, %v6638_v49  ;;  %v6635_v5 = vpop.xlane.xlu0 %6634  ;;  %v6996_v25 = vsel %vm5480_vm0, %v12603_v50, 0.0 }
 0x42c   : > { %v7401_v1 = vmul.f32 0.0625, %v6635_v5  ;;  %v10601_v57 = vsel %vm8597_vm1, %v10600_v33, %v10596_v36  ;;  %v8507_v5 = vunpack.c.h.b16 %v15235_v58 }
 0x42d   : > { %6619 = vadd.xlane.f32.xlu1 %v6618_v51  ;;  %v12602_v51 = vunpack.c.l.bf16 %v12867_v27 }
 0x42e   : > { %v15240_v7 = vpack.c.bf16 %v7402_v3, %v7401_v1  ;;  %6616 = vadd.xlane.f32.xlu0 %v6615_v59  ;;  %v6692_v2 = vpop.xlane.xlu1 %6691  ;;  %v8506_v3 = vunpack.c.l.b16 %v15235_v58 }
 0x42f   : > { %v7420_v11 = vmul.f32 0.0625, %v6692_v2  ;;  %v6689_v12 = vpop.xlane.xlu0 %6688  ;;  %v6993_v18 = vsel %vm5480_vm0, %v12602_v51, 0.0 }
 0x430   : > { %v7419_v22 = vmul.f32 0.0625, %v6689_v12  ;;  %v10754_v58 = vrot.slane %v8506_v3, %v13830_v39  ;;  %v12859_v3 = vld [vmem:[%s13701_s20 + $0x7a0] sm:$0xff]  }
 0x431   : > { %6661 = vadd.xlane.f32.xlu1 %v6660_v4 }
 0x432   : > { %v7731_v23 = vpack.c.bf16 %v7420_v11, %v7419_v22  ;;  %6658 = vadd.xlane.f32.xlu0 %v6657_v6  ;;  %v6734_v26 = vpop.xlane.xlu1 %6733  ;;  %v12415_v6 = vunpack.c.h.bf16 %v12820_v21  ;;  %v10758_v11 = vrot.slane %v8507_v5, %v13842_v53  ;;  %v12414_v22 = vunpack.c.l.bf16 %v12820_v21 }
 0x433   : > { %v7434_v29 = vmul.f32 0.0625, %v6734_v26  ;;  %v6731_v30 = vpop.xlane.xlu0 %6730 }
 0x434   : > { %v8476_v41 = vunpack.c.l.b16 %v7731_v23  ;;  %v8477_v35 = vunpack.c.h.b16 %v7731_v23  ;;  %v7433_v38 = vmul.f32 0.0625, %v6731_v30  ;;  %v12479_v30 = vunpack.c.h.bf16 %v12836_v17 }
 0x435   : > { %6757 = vadd.xlane.f32.xlu1 %v6756_v32  ;;  %v6714_v32 = vsel %vm5480_vm0, %v12415_v6, 0.0  ;;  %v12571_v6 = vunpack.c.h.bf16 %v12859_v3 }
 0x436   : > { %v10605_v48 = vrot.slane %v8476_v41, %v13835_v43  ;;  %v10610_v42 = vrot.slane %v8477_v35, %v13838_v44  ;;  %v15254_v45 = vpack.c.bf16 %v7434_v29, %v7433_v38  ;;  %6754 = vadd.xlane.f32.xlu0 %v6753_v31  ;;  %v6788_v49 = vpop.xlane.xlu1 %6787  ;;  %v10759_v31 = vsel %vm8597_vm1, %v10758_v11, %v10754_v58  ;;  %v12805_v11 = vld [vmem:[%s13701_s20 + $0x5f0] sm:$0xff]  }
 0x437   : > { %v7452_v59 = vmul.f32 0.0625, %v6788_v49  ;;  %v6785_v63 = vpop.xlane.xlu0 %6784  ;;  %v6711_v38 = vsel %vm5480_vm0, %v12414_v22, 0.0  ;;  %v6810_v21 = vsel %vm5480_vm0, %v12479_v30, 0.0 }
 0x438   : > { %v10606_v1 = vsel %vm8604_vm2, %v10605_v48, %v10601_v57  ;;  %v7451_v2 = vmul.f32 0.0625, %v6785_v63 }
 0x439   : > { %v15262_v4 = vsel %vm8611_vm3, %v10610_v42, %v10606_v1  ;;  %6901 = vadd.xlane.f32.xlu1 %v6900_v47  ;;  %v12478_v47 = vunpack.c.l.bf16 %v12836_v17 }
 0x43a   : > { %v7747_v34 = vpack.c.bf16 %v7452_v59, %v7451_v2  ;;  %6898 = vadd.xlane.f32.xlu0 %v6897_v40  ;;  %v6878_v9 = vpop.xlane.xlu1 %6877  ;;  %v12843_v40 = vld [vmem:[%s13701_s20 + $0x720] sm:$0xff]  }
 0x43b   : > { %v7482_v12 = vmul.f32 0.0625, %v6878_v9  ;;  %v6875_v14 = vpop.xlane.xlu0 %6874  ;;  %v12507_v57 = vunpack.c.h.bf16 %v12843_v40  ;;  %v6807_v63 = vsel %vm5480_vm0, %v12478_v47, 0.0  ;;  %v12506_v1 = vunpack.c.l.bf16 %v12843_v40 }
 0x43c   : > { %v8508_v28 = vunpack.c.l.b16 %v7747_v34  ;;  %v8509_v23 = vunpack.c.h.b16 %v7747_v34  ;;  %v7481_v26 = vmul.f32 0.0625, %v6875_v14  ;;  %v12570_v34 = vunpack.c.l.bf16 %v12859_v3 }
 0x43d   : > { %6997 = vadd.xlane.f32.xlu1 %v6996_v25  ;;  %v8458_v9 = vunpack.c.l.b16 %v15240_v7  ;;  %v6852_v58 = vsel %vm5480_vm0, %v12507_v57, 0.0  ;;  %v6849_v17 = vsel %vm5480_vm0, %v12506_v1, 0.0  ;;  %v8490_v40 = vunpack.c.l.b16 %v15254_v45 }
 0x43e   : > { %v10763_v27 = vrot.slane %v8508_v28, %v13835_v43  ;;  %v10768_v36 = vrot.slane %v8509_v23, %v13838_v44  ;;  %v15272_v33 = vpack.c.bf16 %v7482_v12, %v7481_v26  ;;  %6994 = vadd.xlane.f32.xlu0 %v6993_v18  ;;  %v6974_v29 = vpop.xlane.xlu1 %6973  ;;  %v8459_v12 = vunpack.c.h.b16 %v15240_v7 }
 0x43f   : > { %v7514_v41 = vmul.f32 0.0625, %v6974_v29  ;;  %v6971_v35 = vpop.xlane.xlu0 %6970  ;;  %v12354_v29 = vunpack.c.l.bf16 %v12805_v11  ;;  %v10517_v30 = vrot.slane %v8458_v9, %v13830_v39 }
 0x440   : > { %v10764_v50 = vsel %vm8604_vm2, %v10763_v27, %v10759_v31  ;;  %v7513_v48 = vmul.f32 0.0625, %v6971_v35  ;;  %v6945_v27 = vsel %vm5480_vm0, %v12570_v34, 0.0  ;;  %v10521_v47 = vrot.slane %v8459_v12, %v13842_v53 }
 0x441   : > { %v15279_v42 = vsel %vm8611_vm3, %v10768_v36, %v10764_v50  ;;  %6715 = vadd.xlane.f32.xlu1 %v6714_v32  ;;  %v6948_v32 = vsel %vm5480_vm0, %v12571_v6, 0.0  ;;  %v12355_v36 = vunpack.c.h.bf16 %v12805_v11  ;;  %v8491_v50 = vunpack.c.h.b16 %v15254_v45 }
 0x442   : > { %v15281_v49 = vpack.c.bf16 %v7514_v41, %v7513_v48  ;;  %6712 = vadd.xlane.f32.xlu0 %v6711_v38  ;;  %v6602_v51 = vpop.xlane.xlu1 %6601  ;;  %v12812_v38 = vld [vmem:[%s13701_s20 + $0x628] sm:$0xff]  }
 0x443   : > { %v7390_v5 = vmul.f32 0.0625, %v6602_v51  ;;  %v6599_v59 = vpop.xlane.xlu0 %6598  ;;  %v12383_v1 = vunpack.c.h.bf16 %v12812_v38  ;;  %v10679_v11 = vrot.slane %v8491_v50, %v13842_v53 }
 0x444   : > { %v7389_v2 = vmul.f32 0.0625, %v6599_v59 }
 0x445   : > { %6811 = vadd.xlane.f32.xlu1 %v6810_v21 }
 0x446   : > { %v7716_v25 = vpack.c.bf16 %v7390_v5, %v7389_v2  ;;  %6808 = vadd.xlane.f32.xlu0 %v6807_v63  ;;  %v6644_v18 = vpop.xlane.xlu1 %6643  ;;  %v6624_v63 = vsel %vm5480_vm0, %v12355_v36, 0.0  ;;  %v12382_v2 = vunpack.c.l.bf16 %v12812_v38 }
 0x447   : > { %v7404_v14 = vmul.f32 0.0625, %v6644_v18  ;;  %v6641_v22 = vpop.xlane.xlu0 %6640  ;;  %v10522_v18 = vsel %vm8597_vm1, %v10521_v47, %v10517_v30  ;;  %v8538_v47 = vunpack.c.l.b16 %v15272_v33 }
 0x448   : > { %v8446_v28 = vunpack.c.l.b16 %v7716_v25  ;;  %v8447_v23 = vunpack.c.h.b16 %v7716_v25  ;;  %v7403_v26 = vmul.f32 0.0625, %v6641_v22  ;;  %v12828_v25 = vld [vmem:[%s13701_s20 + $0x6a8] sm:$0xff]  }
 0x449   : > { %6853 = vadd.xlane.f32.xlu1 %v6852_v58  ;;  %v10675_v58 = vrot.slane %v8490_v40, %v13830_v39  ;;  %v12447_v36 = vunpack.c.h.bf16 %v12828_v25  ;;  %v8539_v40 = vunpack.c.h.b16 %v15272_v33 }
 0x44a   : > { %v10457_v31 = vrot.slane %v8446_v28, %v13845_v54  ;;  %v10462_v7 = vrot.slane %v8447_v23, %v13848_v55  ;;  %v7723_v41 = vpack.c.bf16 %v7404_v14, %v7403_v26  ;;  %6850 = vadd.xlane.f32.xlu0 %v6849_v17  ;;  %v6740_v35 = vpop.xlane.xlu1 %6739 }
 0x44b   : > { %v7436_v48 = vmul.f32 0.0625, %v6740_v35  ;;  %v6737_v51 = vpop.xlane.xlu0 %6736  ;;  %v12852_v35 = vld [vmem:[%s13701_s20 + $0x768] sm:$0xff]   ;;  %v10680_v38 = vsel %vm8597_vm1, %v10679_v11, %v10675_v58  ;;  %v10916_v33 = vrot.slane %v8539_v40, %v13842_v53 }
 0x44c   : > { %v10458_v21 = vsel %vm8618_vm4, %v10457_v31, %v15233_v46  ;;  %v8460_v57 = vunpack.c.l.b16 %v7723_v41  ;;  %v8461_v3 = vunpack.c.h.b16 %v7723_v41  ;;  %v7435_v5 = vmul.f32 0.0625, %v6737_v51 }
 0x44d   : > { %v15303_v59 = vsel %vm8625_vm5, %v10462_v7, %v10458_v21  ;;  %6949 = vadd.xlane.f32.xlu1 %v6948_v32  ;;  %v6621_v46 = vsel %vm5480_vm0, %v12354_v29, 0.0  ;;  %v6666_v32 = vsel %vm5480_vm0, %v12383_v1, 0.0  ;;  %v12446_v41 = vunpack.c.l.bf16 %v12828_v25 }
 0x44e   : > { %v10526_v6 = vrot.slane %v8460_v57, %v13835_v43  ;;  %v10531_v45 = vrot.slane %v8461_v3, %v13838_v44  ;;  %v7739_v34 = vpack.c.bf16 %v7436_v48, %v7435_v5  ;;  %6946 = vadd.xlane.f32.xlu0 %v6945_v27  ;;  %v6830_v9 = vpop.xlane.xlu1 %6829  ;;  %v6663_v27 = vsel %vm5480_vm0, %v12382_v2, 0.0 }
 0x44f   : > { %v7466_v12 = vmul.f32 0.0625, %v6830_v9  ;;  %v6827_v14 = vpop.xlane.xlu0 %6826  ;;  %v12543_v3 = vunpack.c.h.bf16 %v12852_v35  ;;  %v12542_v5 = vunpack.c.l.bf16 %v12852_v35  ;;  %v6762_v2 = vsel %vm5480_vm0, %v12447_v36, 0.0 }
 0x450   : > { %v10527_v22 = vsel %vm8604_vm2, %v10526_v6, %v10522_v18  ;;  %v8492_v17 = vunpack.c.l.b16 %v7739_v34  ;;  %v8493_v28 = vunpack.c.h.b16 %v7739_v34  ;;  %v7465_v23 = vmul.f32 0.0625, %v6827_v14  ;;  %v12868_v6 = vld [vmem:[%s13701_s20 + $0x7e8] sm:$0xff]  }
 0x451   : > { %v15315_v26 = vsel %vm8611_vm3, %v10531_v45, %v10527_v22  ;;  %6625 = vadd.xlane.f32.xlu1 %v6624_v63  ;;  %v10912_v45 = vrot.slane %v8538_v47, %v13830_v39  ;;  %v6906_v11 = vsel %vm5480_vm0, %v12543_v3, 0.0  ;;  %v12607_v14 = vunpack.c.h.bf16 %v12868_v6  ;;  %v12821_v3 = vld [vmem:[%s13701_s20 + $0x670] sm:$0xff]  }
 0x452   : > { %v10684_v29 = vrot.slane %v8492_v17, %v13835_v43  ;;  %v10689_v30 = vrot.slane %v8493_v28, %v13838_v44  ;;  %v15321_v31 = vpack.c.bf16 %v7466_v12, %v7465_v23  ;;  %6622 = vadd.xlane.f32.xlu0 %v6621_v46  ;;  %v6884_v7 = vpop.xlane.xlu1 %6883  ;;  %v6759_v46 = vsel %vm5480_vm0, %v12446_v41, 0.0 }
 0x453   : > { %v7484_v50 = vmul.f32 0.0625, %v6884_v7  ;;  %v6881_v48 = vpop.xlane.xlu0 %6880  ;;  %v6903_v12 = vsel %vm5480_vm0, %v12542_v5, 0.0  ;;  %v10917_v36 = vsel %vm8597_vm1, %v10916_v33, %v10912_v45 }
 0x454   : > { %v10685_v51 = vsel %vm8604_vm2, %v10684_v29, %v10680_v38  ;;  %v7483_v21 = vmul.f32 0.0625, %v6881_v48  ;;  %v8570_v29 = vunpack.c.l.b16 %v15281_v49 }
 0x455   : > { %v15329_v57 = vsel %vm8611_vm3, %v10689_v30, %v10685_v51  ;;  %6667 = vadd.xlane.f32.xlu1 %v6666_v32  ;;  %v12606_v32 = vunpack.c.l.bf16 %v12868_v6  ;;  %v8571_v30 = vunpack.c.h.b16 %v15281_v49  ;;  %v7002_v51 = vsel %vm5480_vm0, %v12607_v14, 0.0 }
 0x456   : > { %v7763_v63 = vpack.c.bf16 %v7484_v50, %v7483_v21  ;;  %6664 = vadd.xlane.f32.xlu0 %v6663_v27  ;;  %v6926_v1 = vpop.xlane.xlu1 %6925  ;;  %v12797_v27 = vld [vmem:[%s13701_s20 + $0x5b0] sm:$0xff]   ;;  %v11070_v49 = vrot.slane %v8570_v29, %v13830_v39 }
 0x457   : > { %v7498_v34 = vmul.f32 0.0625, %v6926_v1  ;;  %v6923_v9 = vpop.xlane.xlu0 %6922  ;;  %v12323_v40 = vunpack.c.h.bf16 %v12797_v27  ;;  %v12322_v21 = vunpack.c.l.bf16 %v12797_v27  ;;  %v11074_v5 = vrot.slane %v8571_v30, %v13842_v53 }
 0x458   : > { %v8540_v25 = vunpack.c.l.b16 %v7763_v63  ;;  %v8541_v18 = vunpack.c.h.b16 %v7763_v63  ;;  %v7497_v58 = vmul.f32 0.0625, %v6923_v9 }
 0x459   : > { %6763 = vadd.xlane.f32.xlu1 %v6762_v2  ;;  %v6999_v2 = vsel %vm5480_vm0, %v12606_v32, 0.0  ;;  %v6576_v9 = vsel %vm5480_vm0, %v12323_v40, 0.0  ;;  %v11075_v14 = vsel %vm8597_vm1, %v11074_v5, %v11070_v49 }
 0x45a   : > { %v10921_v22 = vrot.slane %v8540_v25, %v13835_v43  ;;  %v10926_v17 = vrot.slane %v8541_v18, %v13838_v44  ;;  %v15340_v28 = vpack.c.bf16 %v7498_v34, %v7497_v58  ;;  %6760 = vadd.xlane.f32.xlu0 %v6759_v46  ;;  %v6980_v23 = vpop.xlane.xlu1 %6979  ;;  %v12837_v34 = vld [vmem:[%s13701_s20 + $0x6f0] sm:$0xff]   ;;  %v12419_v46 = vunpack.c.h.bf16 %v12821_v3 }
 0x45b   : > { %v7516_v7 = vmul.f32 0.0625, %v6980_v23  ;;  %v6977_v41 = vpop.xlane.xlu0 %6976  ;;  %v12418_v23 = vunpack.c.l.bf16 %v12821_v3  ;;  %v12483_v32 = vunpack.c.h.bf16 %v12837_v34  ;;  %v8523_v3 = vunpack.c.h.b16 %v15321_v31 }
 0x45c   : > { %v10922_v35 = vsel %vm8604_vm2, %v10921_v22, %v10917_v36  ;;  %v7515_v38 = vmul.f32 0.0625, %v6977_v41  ;;  %v6720_v41 = vsel %vm5480_vm0, %v12419_v46, 0.0 }
 0x45d   : > { %v15348_v47 = vsel %vm8611_vm3, %v10926_v17, %v10922_v35  ;;  %6907 = vadd.xlane.f32.xlu1 %v6906_v11  ;;  %v12482_v35 = vunpack.c.l.bf16 %v12837_v34 }
 0x45e   : > { %v7779_v50 = vpack.c.bf16 %v7516_v7, %v7515_v38  ;;  %6904 = vadd.xlane.f32.xlu0 %v6903_v12  ;;  %v6698_v48 = vpop.xlane.xlu1 %6697  ;;  %v6573_v12 = vsel %vm5480_vm0, %v12322_v21, 0.0  ;;  %v8522_v38 = vunpack.c.l.b16 %v15321_v31  ;;  %v12844_v21 = vld [vmem:[%s13701_s20 + $0x728] sm:$0xff]  }
 0x45f   : > { %v7422_v63 = vmul.f32 0.0625, %v6698_v48  ;;  %v6695_v1 = vpop.xlane.xlu0 %6694  ;;  %v12511_v31 = vunpack.c.h.bf16 %v12844_v21  ;;  %v12510_v46 = vunpack.c.l.bf16 %v12844_v21  ;;  %v12806_v21 = vld [vmem:[%s13701_s20 + $0x5f8] sm:$0xff]  }
 0x460   : > { %v8572_v6 = vunpack.c.l.b16 %v7779_v50  ;;  %v8573_v45 = vunpack.c.h.b16 %v7779_v50  ;;  %v7421_v33 = vmul.f32 0.0625, %v6695_v1  ;;  %v6816_v1 = vsel %vm5480_vm0, %v12483_v32, 0.0 }
 0x461   : > { %7003 = vadd.xlane.f32.xlu1 %v7002_v51 }
 0x462   : > { %v11079_v25 = vrot.slane %v8572_v6, %v13835_v43  ;;  %v11084_v18 = vrot.slane %v8573_v45, %v13838_v44  ;;  %v7732_v58 = vpack.c.bf16 %v7422_v63, %v7421_v33  ;;  %7000 = vadd.xlane.f32.xlu0 %v6999_v2  ;;  %v6794_v11 = vpop.xlane.xlu1 %6793  ;;  %v6717_v63 = vsel %vm5480_vm0, %v12418_v23, 0.0 }
 0x463   : > { %v7454_v22 = vmul.f32 0.0625, %v6794_v11  ;;  %v6791_v17 = vpop.xlane.xlu0 %6790 }
 0x464   : > { %v11080_v27 = vsel %vm8604_vm2, %v11079_v25, %v11075_v14  ;;  %v8478_v36 = vunpack.c.l.b16 %v7732_v58  ;;  %v8479_v29 = vunpack.c.h.b16 %v7732_v58  ;;  %v7453_v30 = vmul.f32 0.0625, %v6791_v17 }
 0x465   : > { %v15363_v7 = vsel %vm8611_vm3, %v11084_v18, %v11080_v27  ;;  %6577 = vadd.xlane.f32.xlu1 %v6576_v9  ;;  %v6813_v9 = vsel %vm5480_vm0, %v12482_v35, 0.0  ;;  %v10833_v25 = vrot.slane %v8522_v38, %v13830_v39  ;;  %v10837_v14 = vrot.slane %v8523_v3, %v13842_v53 }
 0x466   : > { %v10615_v40 = vrot.slane %v8478_v36, %v13845_v54  ;;  %v10620_v50 = vrot.slane %v8479_v29, %v13848_v55  ;;  %v7748_v48 = vpack.c.bf16 %v7454_v22, %v7453_v30  ;;  %6574 = vadd.xlane.f32.xlu0 %v6573_v12  ;;  %v6836_v51 = vpop.xlane.xlu1 %6835  ;;  %v12860_v12 = vld [vmem:[%s13701_s20 + $0x7a8] sm:$0xff]   ;;  %v8554_v22 = vunpack.c.l.b16 %v15340_v28 }
 0x467   : > { %v7468_v49 = vmul.f32 0.0625, %v6836_v51  ;;  %v6833_v5 = vpop.xlane.xlu0 %6832  ;;  %v8555_v17 = vunpack.c.h.b16 %v15340_v28  ;;  %v6858_v35 = vsel %vm5480_vm0, %v12511_v31, 0.0  ;;  %v6855_v38 = vsel %vm5480_vm0, %v12510_v46, 0.0 }
 0x468   : > { %v10616_v2 = vsel %vm8618_vm4, %v10615_v40, %v15262_v4  ;;  %v8510_v6 = vunpack.c.l.b16 %v7748_v48  ;;  %v8511_v45 = vunpack.c.h.b16 %v7748_v48  ;;  %v7467_v33 = vmul.f32 0.0625, %v6833_v5 }
 0x469   : > { %v15376_v34 = vsel %vm8625_vm5, %v10620_v50, %v10616_v2  ;;  %6721 = vadd.xlane.f32.xlu1 %v6720_v41  ;;  %v12575_v40 = vunpack.c.h.bf16 %v12860_v12  ;;  %v10838_v3 = vsel %vm8597_vm1, %v10837_v14, %v10833_v25  ;;  %v10995_v5 = vrot.slane %v8555_v17, %v13842_v53 }
 0x46a   : > { %v10773_v18 = vrot.slane %v8510_v6, %v13845_v54  ;;  %v10778_v58 = vrot.slane %v8511_v45, %v13848_v55  ;;  %v7755_v11 = vpack.c.bf16 %v7468_v49, %v7467_v33  ;;  %6718 = vadd.xlane.f32.xlu0 %v6717_v63  ;;  %v6932_v4 = vpop.xlane.xlu1 %6931  ;;  %v10991_v49 = vrot.slane %v8554_v22, %v13830_v39  ;;  %v12813_v22 = vld [vmem:[%s13701_s20 + $0x630] sm:$0xff]  }
 0x46b   : > { %v7500_v23 = vmul.f32 0.0625, %v6932_v4  ;;  %v6929_v32 = vpop.xlane.xlu0 %6928  ;;  %v12358_v14 = vunpack.c.l.bf16 %v12806_v21 }
 0x46c   : > { %v10774_v27 = vsel %vm8618_vm4, %v10773_v18, %v15279_v42  ;;  %v8524_v36 = vunpack.c.l.b16 %v7755_v11  ;;  %v8525_v29 = vunpack.c.h.b16 %v7755_v11  ;;  %v7499_v30 = vmul.f32 0.0625, %v6929_v32 }
 0x46d   : > { %v15389_v41 = vsel %vm8625_vm5, %v10778_v58, %v10774_v27  ;;  %6817 = vadd.xlane.f32.xlu1 %v6816_v1  ;;  %v12574_v42 = vunpack.c.l.bf16 %v12860_v12  ;;  %v6954_v18 = vsel %vm5480_vm0, %v12575_v40, 0.0  ;;  %v10996_v58 = vsel %vm8597_vm1, %v10995_v5, %v10991_v49  ;;  %v12829_v40 = vld [vmem:[%s13701_s20 + $0x6b0] sm:$0xff]  }
 0x46e   : > { %v10842_v28 = vrot.slane %v8524_v36, %v13835_v43  ;;  %v10847_v50 = vrot.slane %v8525_v29, %v13838_v44  ;;  %v7771_v48 = vpack.c.bf16 %v7500_v23, %v7499_v30  ;;  %6814 = vadd.xlane.f32.xlu0 %v6813_v9  ;;  %v6608_v51 = vpop.xlane.xlu1 %6607  ;;  %v12359_v9 = vunpack.c.h.bf16 %v12806_v21 }
 0x46f   : > { %v7392_v63 = vmul.f32 0.0625, %v6608_v51  ;;  %v6605_v1 = vpop.xlane.xlu0 %6604  ;;  %v6951_v12 = vsel %vm5480_vm0, %v12574_v42, 0.0  ;;  %v12386_v51 = vunpack.c.l.bf16 %v12813_v22  ;;  %vm15939_vm1 = vcmask 654912  }
 0x470   : > { %v10843_v2 = vsel %vm8604_vm2, %v10842_v28, %v10838_v3  ;;  %v8556_v6 = vunpack.c.l.b16 %v7771_v48  ;;  %v8557_v45 = vunpack.c.h.b16 %v7771_v48  ;;  %v7391_v33 = vmul.f32 0.0625, %v6605_v1 }
 0x471   : > { %v15401_v31 = vsel %vm8611_vm3, %v10847_v50, %v10843_v2  ;;  %6859 = vadd.xlane.f32.xlu1 %v6858_v35  ;;  %v6630_v27 = vsel %vm5480_vm0, %v12359_v9, 0.0  ;;  %v6627_v48 = vsel %vm5480_vm0, %v12358_v14, 0.0 }
 0x472   : > { %v11000_v46 = vrot.slane %v8556_v6, %v13835_v43  ;;  %v11005_v25 = vrot.slane %v8557_v45, %v13838_v44  ;;  %v7717_v39 = vpack.c.bf16 %v7392_v63, %v7391_v33  ;;  %6856 = vadd.xlane.f32.xlu0 %v6855_v38  ;;  %v6650_v53 = vpop.xlane.xlu1 %6649  ;;  %v12387_v38 = vunpack.c.h.bf16 %v12813_v22 }
 0x473   : > { %v7406_v11 = vmul.f32 0.0625, %v6650_v53  ;;  %v6647_v4 = vpop.xlane.xlu0 %6646  ;;  %v12451_v63 = vunpack.c.h.bf16 %v12829_v40 }
 0x474   : > { %v11001_v17 = vsel %vm8604_vm2, %v11000_v46, %v10996_v58  ;;  %v8448_v23 = vunpack.c.l.b16 %v7717_v39  ;;  %v8449_v43 = vunpack.c.h.b16 %v7717_v39  ;;  %v7405_v32 = vmul.f32 0.0625, %v6647_v4  ;;  %v12853_v39 = vld [vmem:[%s13701_s20 + $0x770] sm:$0xff]   ;;  %vm15940_vm2 = vmmov %vm15939_vm1 }
 0x475   : > { %v15411_v44 = vsel %vm8611_vm3, %v11005_v25, %v11001_v17  ;;  %6955 = vadd.xlane.f32.xlu1 %v6954_v18  ;;  %v6672_v33 = vsel %vm5480_vm0, %v12387_v38, 0.0  ;;  %v6669_v46 = vsel %vm5480_vm0, %v12386_v51, 0.0  ;;  %v12450_v25 = vunpack.c.l.bf16 %v12829_v40  ;;  %vm15941_vm3 = vmmov %vm15939_vm1 }
 0x476   : > { %v10467_v36 = vrot.slane %v8448_v23, %v13852_v60  ;;  %v10472_v29 = vrot.slane %v8449_v43, %v13856_v0  ;;  %v7724_v30 = vpack.c.bf16 %v7406_v11, %v7405_v32  ;;  %6952 = vadd.xlane.f32.xlu0 %v6951_v12  ;;  %v6746_v35 = vpop.xlane.xlu1 %6745  ;;  %v6768_v12 = vsel %vm5480_vm0, %v12451_v63, 0.0  ;;  %v12869_v32 = vld [vmem:[%s13701_s20 + $0x7f0] sm:$0xff]  }
 0x477   : > { %v7438_v28 = vmul.f32 0.0625, %v6746_v35  ;;  %v6743_v50 = vpop.xlane.xlu0 %6742  ;;  %v12547_v43 = vunpack.c.h.bf16 %v12853_v39 }
 0x478   : > { %v10468_v42 = vsel %vm8632_vm6, %v10467_v36, %v15303_v59  ;;  %v8462_v21 = vunpack.c.l.b16 %v7724_v30  ;;  %v8463_v3 = vunpack.c.h.b16 %v7724_v30  ;;  %v7437_v49 = vmul.f32 0.0625, %v6743_v50 }
 0x479   : > { %v15421_v5 = vsel %vm8639_vm7, %v10472_v29, %v10468_v42  ;;  %6631 = vadd.xlane.f32.xlu1 %v6630_v27  ;;  %v6765_v36 = vsel %vm5480_vm0, %v12450_v25, 0.0  ;;  %v12546_v29 = vunpack.c.l.bf16 %v12853_v39  ;;  %v12611_v50 = vunpack.c.h.bf16 %v12869_v32 }
 0x47a   : > { %v10536_v1 = vrot.slane %v8462_v21, %v13845_v54  ;;  %v10541_v2 = vrot.slane %v8463_v3, %v13848_v55  ;;  %v7740_v6 = vpack.c.bf16 %v7438_v28, %v7437_v49  ;;  %6628 = vadd.xlane.f32.xlu0 %v6627_v48  ;;  %v6890_v45 = vpop.xlane.xlu1 %6889  ;;  %v6912_v3 = vsel %vm5480_vm0, %v12547_v43, 0.0 }
 0x47b   : > { %v7486_v9 = vmul.f32 0.0625, %v6890_v45  ;;  %v6887_v59 = vpop.xlane.xlu0 %6886  ;;  %v6909_v63 = vsel %vm5480_vm0, %v12546_v29, 0.0 }
 0x47c   : > { %v10537_v53 = vsel %vm8618_vm4, %v10536_v1, %v15315_v26  ;;  %v8494_v18 = vunpack.c.l.b16 %v7740_v6  ;;  %v8495_v58 = vunpack.c.h.b16 %v7740_v6  ;;  %v7485_v11 = vmul.f32 0.0625, %v6887_v59 }
 0x47d   : > { %v15431_v4 = vsel %vm8625_vm5, %v10541_v2, %v10537_v53  ;;  %6673 = vadd.xlane.f32.xlu1 %v6672_v33  ;;  %v12610_v1 = vunpack.c.l.bf16 %v12869_v32  ;;  %v12798_v2 = vld [vmem:[%s13701_s20 + $0x5b8] sm:$0xff]  }
 0x47e   : > { %v10694_v14 = vrot.slane %v8494_v18, %v13845_v54  ;;  %v10699_v22 = vrot.slane %v8495_v58, %v13848_v55  ;;  %v7764_v17 = vpack.c.bf16 %v7486_v9, %v7485_v11  ;;  %6670 = vadd.xlane.f32.xlu0 %v6669_v46  ;;  %v6986_v23 = vpop.xlane.xlu1 %6985  ;;  %v7008_v46 = vsel %vm5480_vm0, %v12611_v50, 0.0 }
 0x47f   : > { %v7518_v27 = vmul.f32 0.0625, %v6986_v23  ;;  %v6983_v26 = vpop.xlane.xlu0 %6982  ;;  %v12327_v58 = vunpack.c.h.bf16 %v12798_v2 }
 0x480   : > { %v10695_v30 = vsel %vm8618_vm4, %v10694_v14, %v15329_v57  ;;  %v8542_v35 = vunpack.c.l.b16 %v7764_v17  ;;  %v8543_v38 = vunpack.c.h.b16 %v7764_v17  ;;  %v7517_v40 = vmul.f32 0.0625, %v6983_v26  ;;  %v12919_v17 = vld [vmem:[%s13703_s21 + $0xe4] ss:$16 sps:$4 sm:$0xff]   ;;  %v12921_v26 = vld [vmem:[%s13703_s21 + $0xe0] ss:$16 sps:$4 sm:$0xff]  }
 0x481   : > { %v15441_v28 = vsel %vm8625_vm5, %v10699_v22, %v10695_v30  ;;  %6769 = vadd.xlane.f32.xlu1 %v6768_v12  ;;  %v7005_v14 = vsel %vm5480_vm0, %v12610_v1, 0.0  ;;  %v12326_v22 = vunpack.c.l.bf16 %v12798_v2  ;;  %11349 = vmatprep.subr.bf16.mxu0 %v12919_v17  ;;  %v12924_v2 = vld [vmem:[%s13703_s21 + $0xe8] ss:$16 sps:$4 sm:$0xff]  }
 0x482   : > { %v10931_v48 = vrot.slane %v8542_v35, %v13845_v54  ;;  %v10936_v51 = vrot.slane %v8543_v38, %v13848_v55  ;;  %v7780_v42 = vpack.c.bf16 %v7518_v27, %v7517_v40  ;;  %6766 = vadd.xlane.f32.xlu0 %v6765_v36  ;;  %v6704_v21 = vpop.xlane.xlu1 %6703  ;;  %v6582_v40 = vsel %vm5480_vm0, %v12327_v58, 0.0  ;;  %11350 = vmatpush1.bf16.xpose.msra.mxu0 %v12921_v26 }
 0x483   : > { %v7424_v49 = vmul.f32 0.0625, %v6704_v21  ;;  %v6701_v57 = vpop.xlane.xlu0 %6700  ;;  %v12838_v21 = vld [vmem:[%s13701_s20 + $0x6f8] sm:$0xff]  }
 0x484   : > { %v10932_v6 = vsel %vm8618_vm4, %v10931_v48, %v15348_v47  ;;  %v8574_v45 = vunpack.c.l.b16 %v7780_v42  ;;  %v8575_v33 = vunpack.c.h.b16 %v7780_v42  ;;  %v7423_v9 = vmul.f32 0.0625, %v6701_v57  ;;  %v12822_v47 = vld [vmem:[%s13701_s20 + $0x678] sm:$0xff]  }
 0x485   : > { %v15451_v59 = vsel %vm8625_vm5, %v10936_v51, %v10932_v6  ;;  %6913 = vadd.xlane.f32.xlu1 %v6912_v3  ;;  %v12423_v29 = vunpack.c.h.bf16 %v12822_v47  ;;  %v6579_v51 = vsel %vm5480_vm0, %v12326_v22, 0.0  ;;  %v12422_v42 = vunpack.c.l.bf16 %v12822_v47  ;;  %v12922_v3 = vld [vmem:[%s13703_s21 + $0xec] ss:$16 sps:$4 sm:$0xff]  }
 0x486   : > { %v11089_v25 = vrot.slane %v8574_v45, %v13845_v54  ;;  %v11094_v39 = vrot.slane %v8575_v33, %v13848_v55  ;;  %v7733_v53 = vpack.c.bf16 %v7424_v49, %v7423_v9  ;;  %6910 = vadd.xlane.f32.xlu0 %v6909_v63  ;;  %v6800_v18 = vpop.xlane.xlu1 %6799  ;;  %11389 = vmatprep.subr.bf16.mxu1 %v12922_v3  ;;  %v12486_v47 = vunpack.c.l.bf16 %v12838_v21 }
 0x487   : > { %v7456_v11 = vmul.f32 0.0625, %v6800_v18  ;;  %v6797_v12 = vpop.xlane.xlu0 %6796  ;;  %v6726_v45 = vsel %vm5480_vm0, %v12423_v29, 0.0  ;;  %11390 = vmatpush1.bf16.xpose.msra.mxu1 %v12924_v2  ;;  %v6723_v58 = vsel %vm5480_vm0, %v12422_v42, 0.0 }
 0x488   : > { %v11090_v23 = vsel %vm8618_vm4, %v11089_v25, %v15363_v7  ;;  %v8480_v43 = vunpack.c.l.b16 %v7733_v53  ;;  %v8481_v32 = vunpack.c.h.b16 %v7733_v53  ;;  %v7455_v27 = vmul.f32 0.0625, %v6797_v12 }
 0x489   : > { %v15463_v36 = vsel %vm8625_vm5, %v11094_v39, %v11090_v23  ;;  %7009 = vadd.xlane.f32.xlu1 %v7008_v46  ;;  %v12487_v25 = vunpack.c.h.bf16 %v12838_v21  ;;  %v12845_v39 = vld [vmem:[%s13701_s20 + $0x730] sm:$0xff]  }
 0x48a   : > { %v10625_v30 = vrot.slane %v8480_v43, %v13852_v60  ;;  %v10630_v35 = vrot.slane %v8481_v32, %v13856_v0  ;;  %v7749_v38 = vpack.c.bf16 %v7456_v11, %v7455_v27  ;;  %7006 = vadd.xlane.f32.xlu0 %v7005_v14  ;;  %v6842_v7 = vpop.xlane.xlu1 %6841  ;;  %v12925_v11 = vld [vmem:[%s13703_s21 + $0xc4] ss:$16 sps:$4 sm:$0xff]   ;;  %v12927_v23 = vld [vmem:[%s13703_s21 + $0xc0] ss:$16 sps:$4 sm:$0xff]   ;;  %v12515_v32 = vunpack.c.h.bf16 %v12845_v39 }
 0x48b   : > { %v7470_v50 = vmul.f32 0.0625, %v6842_v7  ;;  %v6839_v48 = vpop.xlane.xlu0 %6838  ;;  %11351 = vmatprep.subr.bf16.mxu0 %v12925_v11  ;;  %v6819_v7 = vsel %vm5480_vm0, %v12486_v47, 0.0 }
 0x48c   : > { %v10626_v49 = vsel %vm8632_vm6, %v10625_v30, %v15376_v34  ;;  %v8512_v57 = vunpack.c.l.b16 %v7749_v38  ;;  %v8513_v63 = vunpack.c.h.b16 %v7749_v38  ;;  %v7469_v1 = vmul.f32 0.0625, %v6839_v48  ;;  %11352 = vmatpush1.bf16.xpose.msra.mxu0 %v12927_v23  ;;  %v12928_v48 = vld [vmem:[%s13703_s21 + $0xcc] ss:$16 sps:$4 sm:$0xff]  }
 0x48d   : > { %v15475_v6 = vsel %vm8639_vm7, %v10630_v35, %v10626_v49  ;;  %6583 = vadd.xlane.f32.xlu1 %v6582_v40  ;;  %v6822_v30 = vsel %vm5480_vm0, %v12487_v25, 0.0  ;;  %v12514_v40 = vunpack.c.l.bf16 %v12845_v39  ;;  %v12930_v49 = vld [vmem:[%s13703_s21 + $0xc8] ss:$16 sps:$4 sm:$0xff]   ;;  %11391 = vmatprep.subr.bf16.mxu1 %v12928_v48 }
 0x48e   : > { %v10783_v33 = vrot.slane %v8512_v57, %v13852_v60  ;;  %v10788_v9 = vrot.slane %v8513_v63, %v13856_v0  ;;  %v7756_v46 = vpack.c.bf16 %v7470_v50, %v7469_v1  ;;  %6580 = vadd.xlane.f32.xlu0 %v6579_v51  ;;  %v6938_v34 = vpop.xlane.xlu1 %6937  ;;  %v12861_v50 = vld [vmem:[%s13701_s20 + $0x7b0] sm:$0xff]   ;;  %v6864_v63 = vsel %vm5480_vm0, %v12515_v32, 0.0 }
 0x48f   : > { %v7502_v53 = vmul.f32 0.0625, %v6938_v34  ;;  %v6935_v18 = vpop.xlane.xlu0 %6934  ;;  %11392 = vmatpush1.bf16.xpose.msra.mxu1 %v12930_v49  ;;  %v6861_v25 = vsel %vm5480_vm0, %v12514_v40, 0.0  ;;  %v12578_v39 = vunpack.c.l.bf16 %v12861_v50 }
 0x490   : > { %v10784_v12 = vsel %vm8632_vm6, %v10783_v33, %v15389_v41  ;;  %v8526_v14 = vunpack.c.l.b16 %v7756_v46  ;;  %v8527_v22 = vunpack.c.h.b16 %v7756_v46  ;;  %v7501_v17 = vmul.f32 0.0625, %v6935_v18 }
 0x491   : > { %v15487_v43 = vsel %vm8639_vm7, %v10788_v9, %v10784_v12  ;;  %6727 = vadd.xlane.f32.xlu1 %v6726_v45  ;;  %v12579_v33 = vunpack.c.h.bf16 %v12861_v50  ;;  %v12814_v9 = vld [vmem:[%s13701_s20 + $0x638] sm:$0xff]  }
 0x492   : > { %v10852_v27 = vrot.slane %v8526_v14, %v13845_v54  ;;  %v10857_v26 = vrot.slane %v8527_v22, %v13848_v55  ;;  %v7772_v29 = vpack.c.bf16 %v7502_v53, %v7501_v17  ;;  %6724 = vadd.xlane.f32.xlu0 %v6723_v58  ;;  %v6614_v41 = vpop.xlane.xlu1 %6613  ;;  %v12931_v53 = vld [vmem:[%s13703_s21 + $0xa4] ss:$16 sps:$4 sm:$0xff]   ;;  %v12391_v12 = vunpack.c.h.bf16 %v12814_v9  ;;  %v12936_v50 = vld [vmem:[%s13703_s21 + $0xa8] ss:$16 sps:$4 sm:$0xff]  }
 0x493   : > { %v7394_v35 = vmul.f32 0.0625, %v6614_v41  ;;  %v6611_v38 = vpop.xlane.xlu0 %6610  ;;  %11353 = vmatprep.subr.bf16.mxu0 %v12931_v53  ;;  %v6960_v23 = vsel %vm5480_vm0, %v12579_v33, 0.0  ;;  %v12830_v41 = vld [vmem:[%s13701_s20 + $0x6b8] sm:$0xff]   ;;  %v12937_v33 = vld [vmem:[%s13703_s21 + $0x84] ss:$16 sps:$4 sm:$0xff]  }
 0x494   : > { %v10853_v51 = vsel %vm8618_vm4, %v10852_v27, %v15401_v31  ;;  %v8558_v42 = vunpack.c.l.b16 %v7772_v29  ;;  %v8559_v21 = vunpack.c.h.b16 %v7772_v29  ;;  %v7393_v3 = vmul.f32 0.0625, %v6611_v38 }
 0x495   : > { %v15499_v57 = vsel %vm8625_vm5, %v10857_v26, %v10853_v51  ;;  %6823 = vadd.xlane.f32.xlu1 %v6822_v30  ;;  %v6957_v26 = vsel %vm5480_vm0, %v12578_v39, 0.0  ;;  %v12390_v29 = vunpack.c.l.bf16 %v12814_v9  ;;  %v12934_v30 = vld [vmem:[%s13703_s21 + $0xac] ss:$16 sps:$4 sm:$0xff]   ;;  %v6678_v51 = vsel %vm5480_vm0, %v12391_v12, 0.0  ;;  %v12939_v39 = vld [vmem:[%s13703_s21 + $0x80] ss:$16 sps:$4 sm:$0xff]  }
 0x496   : > { %v11010_v1 = vrot.slane %v8558_v42, %v13845_v54  ;;  %v11015_v2 = vrot.slane %v8559_v21, %v13848_v55  ;;  %v7718_v45 = vpack.c.bf16 %v7394_v35, %v7393_v3  ;;  %6820 = vadd.xlane.f32.xlu0 %v6819_v7  ;;  %v6656_v31 = vpop.xlane.xlu1 %6655  ;;  %v12933_v55 = vld [vmem:[%s13703_s21 + $0xa0] ss:$16 sps:$4 sm:$0xff]   ;;  %11393 = vmatprep.subr.bf16.mxu1 %v12934_v30  ;;  %v12455_v49 = vunpack.c.h.bf16 %v12830_v41 }
 0x497   : > { %v7408_v46 = vmul.f32 0.0625, %v6656_v31  ;;  %v6653_v34 = vpop.xlane.xlu0 %6652  ;;  %11354 = vmatpush1.bf16.xpose.msra.mxu0 %v12933_v55  ;;  %11394 = vmatpush1.bf16.xpose.msra.mxu1 %v12936_v50  ;;  %v12454_v31 = vunpack.c.l.bf16 %v12830_v41  ;;  %v12942_v41 = vld [vmem:[%s13703_s21 + $0x88] ss:$16 sps:$4 sm:$0xff]  }
 0x498   : > { %v11011_v18 = vsel %vm8618_vm4, %v11010_v1, %v15411_v44  ;;  %v8450_v58 = vunpack.c.l.b16 %v7718_v45  ;;  %v8451_v54 = vunpack.c.h.b16 %v7718_v45  ;;  %v7407_v47 = vmul.f32 0.0625, %v6653_v34  ;;  %11355 = vmatprep.subr.bf16.mxu0 %v12937_v33  ;;  %vm15943_vm4 = vmmov %vm15939_vm1 }
 0x499   : > { %v15511_v11 = vsel %vm8625_vm5, %v11015_v2, %v11011_v18  ;;  %6865 = vadd.xlane.f32.xlu1 %v6864_v63  ;;  %v12854_v63 = vld [vmem:[%s13701_s20 + $0x778] sm:$0xff]   ;;  %v6675_v45 = vsel %vm5480_vm0, %v12390_v29, 0.0  ;;  %v6774_v55 = vsel %vm5480_vm0, %v12455_v49, 0.0  ;;  %v12943_v49 = vld [vmem:[%s13703_s21 + $0x64] ss:$16 sps:$4 sm:$0xff]   ;;  %vm15944_vm5 = vmmov %vm15939_vm1 }
 0x49a   : > { %v10477_v14 = vrot.slane %v8450_v58, %v13866_v19  ;;  %v10482_v22 = vrot.slane %v8451_v54, %v13869_v20  ;;  %v7725_v17 = vpack.c.bf16 %v7408_v46, %v7407_v47  ;;  %6862 = vadd.xlane.f32.xlu0 %v6861_v25  ;;  %v6752_v44 = vpop.xlane.xlu1 %6751  ;;  %v12551_v18 = vunpack.c.h.bf16 %v12854_v63 }
 0x49b   : > { %v7440_v32 = vmul.f32 0.0625, %v6752_v44  ;;  %v6749_v27 = vpop.xlane.xlu0 %6748  ;;  %v12870_v44 = vld [vmem:[%s13701_s20 + $0x7f8] sm:$0xff]  }
 0x49c   : > { %v10478_v35 = vsel %vm8646_vm8, %v10477_v14, %v15421_v5  ;;  %v8464_v38 = vunpack.c.l.b16 %v7725_v17  ;;  %v8465_v7 = vunpack.c.h.b16 %v7725_v17  ;;  %v7439_v40 = vmul.f32 0.0625, %v6749_v27 }
 0x49d   : > { %v15523_v48 = vsel %vm15939_vm1, %v10482_v22, %v10478_v35  ;;  %6961 = vadd.xlane.f32.xlu1 %v6960_v23  ;;  %v6771_v22 = vsel %vm5480_vm0, %v12454_v31, 0.0  ;;  %v12550_v17 = vunpack.c.l.bf16 %v12854_v63  ;;  %v12940_v23 = vld [vmem:[%s13703_s21 + $0x8c] ss:$16 sps:$4 sm:$0xff]   ;;  %v6918_v35 = vsel %vm5480_vm0, %v12551_v18, 0.0  ;;  %v12945_v31 = vld [vmem:[%s13703_s21 + $0x60] ss:$16 sps:$4 sm:$0xff]  }
 0x49e   : > { %v10546_v42 = vrot.slane %v8464_v38, %v13852_v60  ;;  %v10551_v21 = vrot.slane %v8465_v7, %v13856_v0  ;;  %v7741_v3 = vpack.c.bf16 %v7440_v32, %v7439_v40  ;;  %6958 = vadd.xlane.f32.xlu0 %v6957_v26  ;;  %v6896_v5 = vpop.xlane.xlu1 %6895  ;;  %11395 = vmatprep.subr.bf16.mxu1 %v12940_v23  ;;  %v12615_v50 = vunpack.c.h.bf16 %v12870_v44 }
 0x49f   : > { %v7488_v1 = vmul.f32 0.0625, %v6896_v5  ;;  %v6893_v2 = vpop.xlane.xlu0 %6892  ;;  %11356 = vmatpush1.bf16.xpose.msra.mxu0 %v12939_v39  ;;  %11396 = vmatpush1.bf16.xpose.msra.mxu1 %v12942_v41  ;;  %v12614_v5 = vunpack.c.l.bf16 %v12870_v44  ;;  %v12948_v44 = vld [vmem:[%s13703_s21 + $0x68] ss:$16 sps:$4 sm:$0xff]  }
 0x4a0   : > { %v10547_v9 = vsel %vm8632_vm6, %v10546_v42, %v15431_v4  ;;  %v8496_v46 = vunpack.c.l.b16 %v7741_v3  ;;  %v8497_v34 = vunpack.c.h.b16 %v7741_v3  ;;  %v7487_v25 = vmul.f32 0.0625, %v6893_v2  ;;  %11357 = vmatprep.subr.bf16.mxu0 %v12943_v49 }
 0x4a1   : > { %v15535_v53 = vsel %vm8639_vm7, %v10551_v21, %v10547_v9  ;;  %6679 = vadd.xlane.f32.xlu1 %v6678_v51  ;;  %v12846_v51 = vld [vmem:[%s13701_s20 + $0x738] sm:$0xff]   ;;  %v6915_v3 = vsel %vm5480_vm0, %v12550_v17, 0.0  ;;  %v7014_v39 = vsel %vm5480_vm0, %v12615_v50, 0.0 }
 0x4a2   : > { %v10704_v58 = vrot.slane %v8496_v46, %v13852_v60  ;;  %v10709_v54 = vrot.slane %v8497_v34, %v13856_v0  ;;  %v7765_v47 = vpack.c.bf16 %v7488_v1, %v7487_v25  ;;  %6676 = vadd.xlane.f32.xlu0 %v6675_v45  ;;  %v6992_v4 = vpop.xlane.xlu1 %6991  ;;  %v12519_v9 = vunpack.c.h.bf16 %v12846_v51 }
 0x4a3   : > { %v7520_v12 = vmul.f32 0.0625, %v6992_v4  ;;  %v6989_v14 = vpop.xlane.xlu0 %6988  ;;  %v12862_v4 = vld [vmem:[%s13701_s20 + $0x7b8] sm:$0xff]  }
 0x4a4   : > { %v10705_v32 = vsel %vm8632_vm6, %v10704_v58, %v15441_v28  ;;  %v8544_v27 = vunpack.c.l.b16 %v7765_v47  ;;  %v8545_v26 = vunpack.c.h.b16 %v7765_v47  ;;  %v7519_v29 = vmul.f32 0.0625, %v6989_v14 }
 0x4a5   : > { %v15547_v30 = vsel %vm8639_vm7, %v10709_v54, %v10705_v32  ;;  %6775 = vadd.xlane.f32.xlu1 %v6774_v55  ;;  %v7011_v54 = vsel %vm5480_vm0, %v12614_v5, 0.0  ;;  %v12518_v47 = vunpack.c.l.bf16 %v12846_v51  ;;  %v12946_v55 = vld [vmem:[%s13703_s21 + $0x6c] ss:$16 sps:$4 sm:$0xff]   ;;  %v6870_v32 = vsel %vm5480_vm0, %v12519_v9, 0.0 }
 0x4a6   : > { %v10941_v38 = vrot.slane %v8544_v27, %v13852_v60  ;;  %v10946_v7 = vrot.slane %v8545_v26, %v13856_v0  ;;  %v7781_v40 = vpack.c.bf16 %v7520_v12, %v7519_v29  ;;  %6772 = vadd.xlane.f32.xlu0 %v6771_v22  ;;  %v6710_v28 = vpop.xlane.xlu1 %6709  ;;  %11397 = vmatprep.subr.bf16.mxu1 %v12946_v55  ;;  %v12583_v41 = vunpack.c.h.bf16 %v12862_v4 }
 0x4a7   : > { %v7426_v42 = vmul.f32 0.0625, %v6710_v28  ;;  %v6707_v21 = vpop.xlane.xlu0 %6706  ;;  %11358 = vmatpush1.bf16.xpose.msra.mxu0 %v12945_v31  ;;  %11398 = vmatpush1.bf16.xpose.msra.mxu1 %v12948_v44  ;;  %v12949_v28 = vld [vmem:[%s13703_s21 + $0x44] ss:$16 sps:$4 sm:$0xff]  }
 0x4a8   : > { %v10942_v63 = vsel %vm8632_vm6, %v10941_v38, %v15451_v59  ;;  %v8576_v1 = vunpack.c.l.b16 %v7781_v40  ;;  %v8577_v2 = vunpack.c.h.b16 %v7781_v40  ;;  %v7425_v45 = vmul.f32 0.0625, %v6707_v21  ;;  %11359 = vmatprep.subr.bf16.mxu0 %v12949_v28 }
 0x4a9   : > { %v15559_v33 = vsel %vm8639_vm7, %v10946_v7, %v10942_v63  ;;  %6919 = vadd.xlane.f32.xlu1 %v6918_v35  ;;  %v6867_v7 = vsel %vm5480_vm0, %v12518_v47, 0.0  ;;  %v12582_v40 = vunpack.c.l.bf16 %v12862_v4 }
 0x4aa   : > { %v11099_v46 = vrot.slane %v8576_v1, %v13852_v60  ;;  %v11104_v34 = vrot.slane %v8577_v2, %v13856_v0  ;;  %v7734_v25 = vpack.c.bf16 %v7426_v42, %v7425_v45  ;;  %6916 = vadd.xlane.f32.xlu0 %v6915_v3  ;;  %v6806_v59 = vpop.xlane.xlu1 %6805  ;;  %v12951_v3 = vld [vmem:[%s13703_s21 + $0x40] ss:$16 sps:$4 sm:$0xff]  }
 0x4ab   : > { %v7458_v18 = vmul.f32 0.0625, %v6806_v59  ;;  %v6803_v58 = vpop.xlane.xlu0 %6802  ;;  %v6963_v9 = vsel %vm5480_vm0, %v12582_v40, 0.0 }
 0x4ac   : > { %v11100_v12 = vsel %vm8632_vm6, %v11099_v46, %v15463_v36  ;;  %v8482_v14 = vunpack.c.l.b16 %v7734_v25  ;;  %v8483_v22 = vunpack.c.h.b16 %v7734_v25  ;;  %v7457_v17 = vmul.f32 0.0625, %v6803_v58  ;;  %v12952_v46 = vld [vmem:[%s13703_s21 + $0x4c] ss:$16 sps:$4 sm:$0xff]  }
 0x4ad   : > { %v15571_v23 = vsel %vm8639_vm7, %v11104_v34, %v11100_v12  ;;  %7015 = vadd.xlane.f32.xlu1 %v7014_v39  ;;  %11399 = vmatprep.subr.bf16.mxu1 %v12952_v46 }
 0x4ae   : > { %v10635_v27 = vrot.slane %v8482_v14, %v13866_v19  ;;  %v10640_v26 = vrot.slane %v8483_v22, %v13869_v20  ;;  %v7750_v29 = vpack.c.bf16 %v7458_v18, %v7457_v17  ;;  %7012 = vadd.xlane.f32.xlu0 %v7011_v54  ;;  %v6848_v36 = vpop.xlane.xlu1 %6847  ;;  %v12954_v18 = vld [vmem:[%s13703_s21 + $0x48] ss:$16 sps:$4 sm:$0xff]   ;;  %v12955_v14 = vld [vmem:[%s13703_s21 + $0x24] ss:$16 sps:$4 sm:$0xff]  }
 0x4af   : > { %v7472_v35 = vmul.f32 0.0625, %v6848_v36  ;;  %v6845_v38 = vpop.xlane.xlu0 %6844  ;;  %11360 = vmatpush1.bf16.xpose.msra.mxu0 %v12951_v3  ;;  %11400 = vmatpush1.bf16.xpose.msra.mxu1 %v12954_v18 }
 0x4b0   : > { %v10636_v50 = vsel %vm8646_vm8, %v10635_v27, %v15475_v6  ;;  %v8514_v51 = vunpack.c.l.b16 %v7750_v29  ;;  %v8515_v42 = vunpack.c.h.b16 %v7750_v29  ;;  %v7471_v21 = vmul.f32 0.0625, %v6845_v38  ;;  %v12957_v27 = vld [vmem:[%s13703_s21 + $0x20] ss:$16 sps:$4 sm:$0xff]   ;;  %11361 = vmatprep.subr.bf16.mxu0 %v12955_v14 }
 0x4b1   : > { %v15582_v5 = vsel %vm15940_vm2, %v10640_v26, %v10636_v50  ;;  %6871 = vadd.xlane.f32.xlu1 %v6870_v32  ;;  %v6966_v6 = vsel %vm5480_vm0, %v12583_v41, 0.0  ;;  %vm15942_vm0 = vmmov %vm15938_vm9 }
 0x4b2   : > { %v10793_v49 = vrot.slane %v8514_v51, %v13866_v19  ;;  %v10798_v63 = vrot.slane %v8515_v42, %v13869_v20  ;;  %v7757_v1 = vpack.c.bf16 %v7472_v35, %v7471_v21  ;;  %6868 = vadd.xlane.f32.xlu0 %v6867_v7  ;;  %v6944_v2 = vpop.xlane.xlu1 %6943  ;;  %v12960_v42 = vld [vmem:[%s13703_s21 + $0x28] ss:$16 sps:$4 sm:$0xff]   ;;  %vm15947_vm9 = vmmov %vm15942_vm0 }
 0x4b3   : > { %v7504_v45 = vmul.f32 0.0625, %v6944_v2  ;;  %v6941_v31 = vpop.xlane.xlu0 %6940 }
 0x4b4   : > { %v10794_v34 = vsel %vm8646_vm8, %v10793_v49, %v15487_v43  ;;  %v8528_v25 = vunpack.c.l.b16 %v7757_v1  ;;  %v8529_v59 = vunpack.c.h.b16 %v7757_v1  ;;  %v7503_v39 = vmul.f32 0.0625, %v6941_v31 }
 0x4b5   : > { %v15593_v58 = vsel %vm15941_vm3, %v10798_v63, %v10794_v34  ;;  %6967 = vadd.xlane.f32.xlu1 %v6966_v6  ;;  %vm15949_vm3 = vmmov %vm15940_vm2 }
 0x4b6   : > { %v10862_v54 = vrot.slane %v8528_v25, %v13852_v60  ;;  %v10867_v47 = vrot.slane %v8529_v59, %v13856_v0  ;;  %v7773_v4 = vpack.c.bf16 %v7504_v45, %v7503_v39  ;;  %6964 = vadd.xlane.f32.xlu0 %v6963_v9  ;;  %v6620_v55 = vpop.xlane.xlu1 %6619  ;;  %v12963_v9 = vld [vmem:[%s13703_s21] ss:$16 sps:$4 sm:$0xff]  }
 0x4b7   : > { %v7396_v43 = vmul.f32 0.0625, %v6620_v55  ;;  %v6617_v12 = vpop.xlane.xlu0 %6616  ;;  %11362 = vmatpush1.bf16.xpose.msra.mxu0 %v12957_v27 }
 0x4b8   : > { %v10863_v22 = vsel %vm8632_vm6, %v10862_v54, %v15499_v57  ;;  %v8560_v17 = vunpack.c.l.b16 %v7773_v4  ;;  %v8561_v44 = vunpack.c.h.b16 %v7773_v4  ;;  %v7395_v32 = vmul.f32 0.0625, %v6617_v12  ;;  %v12958_v57 = vld [vmem:[%s13703_s21 + $0x2c] ss:$16 sps:$4 sm:$0xff]   ;;  %v12966_v12 = vld [vmem:[%s13703_s21 + $0x8] ss:$16 sps:$4 sm:$0xff]  }
 0x4b9   : > { %v15602_v26 = vsel %vm8639_vm7, %v10867_v47, %v10863_v22  ;;  %11401 = vmatprep.subr.bf16.mxu1 %v12958_v57  ;;  %v12964_v47 = vld [vmem:[%s13703_s21 + $0xc] ss:$16 sps:$4 sm:$0xff]  }
 0x4ba   : > { %v11020_v29 = vrot.slane %v8560_v17, %v13852_v60  ;;  %v11025_v36 = vrot.slane %v8561_v44, %v13856_v0  ;;  %v7719_v41 = vpack.c.bf16 %v7396_v43, %v7395_v32  ;;  %v6662_v35 = vpop.xlane.xlu1 %6661  ;;  %11402 = vmatpush1.bf16.xpose.msra.mxu1 %v12960_v42 }
 0x4bb   : > { %v7410_v38 = vmul.f32 0.0625, %v6662_v35  ;;  %v6659_v7 = vpop.xlane.xlu0 %6658  ;;  %11403 = vmatprep.subr.bf16.mxu1 %v12964_v47 }
 0x4bc   : > { %v11021_v40 = vsel %vm8632_vm6, %v11020_v29, %v15511_v11  ;;  %v8452_v28 = vunpack.c.l.b16 %v7719_v41  ;;  %v8453_v50 = vunpack.c.h.b16 %v7719_v41  ;;  %v7409_v51 = vmul.f32 0.0625, %v6659_v7  ;;  %v12961_v11 = vld [vmem:[%s13703_s21 + $0x4] ss:$16 sps:$4 sm:$0xff]   ;;  %vm15945_vm6 = vmmov %vm15939_vm1 }
 0x4bd   : > { %v15611_v21 = vsel %vm8639_vm7, %v11025_v36, %v11021_v40  ;;  %11363 = vmatprep.subr.bf16.mxu0 %v12961_v11  ;;  %vm15946_vm7 = vmmov %vm15939_vm1 }
 0x4be   : > { %v10487_v60 = vrot.slane %v8452_v28, %v13885_v52  ;;  %v10492_v0 = vrot.slane %v8453_v50, %v13888_v56  ;;  %v7726_v3 = vpack.c.bf16 %v7410_v38, %v7409_v51  ;;  %v6758_v49 = vpop.xlane.xlu1 %6757  ;;  %vm15948_vm1 = vmmov %vm15942_vm0 }
 0x4bf   : > { %v7442_v63 = vmul.f32 0.0625, %v6758_v49  ;;  %v6755_v1 = vpop.xlane.xlu0 %6754  ;;  %11364 = vmatpush1.bf16.xpose.msra.mxu0 %v12963_v9 }
 0x4c0   : > { %v10488_v2 = vsel %vm8660_vm10, %v10487_v60, %v15523_v48  ;;  %v8466_v6 = vunpack.c.l.b16 %v7726_v3  ;;  %v8467_v45 = vunpack.c.h.b16 %v7726_v3  ;;  %v7441_v31 = vmul.f32 0.0625, %v6755_v1 }
 0x4c1   : > { %v15620_v46 = vsel %vm15942_vm0, %v10492_v0, %v10488_v2 }
 0x4c2   : > { %v10556_v34 = vrot.slane %v8466_v6, %v13866_v19  ;;  %v10561_v25 = vrot.slane %v8467_v45, %v13869_v20  ;;  %v7742_v59 = vpack.c.bf16 %v7442_v63, %v7441_v31  ;;  %v6902_v39 = vpop.xlane.xlu1 %6901  ;;  %11404 = vmatpush1.bf16.xpose.msra.mxu1 %v12966_v12 }
 0x4c3   : > { %v7490_v18 = vmul.f32 0.0625, %v6902_v39  ;;  %v6899_v54 = vpop.xlane.xlu0 %6898 }
 0x4c4   : > { %v10557_v48 = vsel %vm8646_vm8, %v10556_v34, %v15535_v53  ;;  %v8498_v4 = vunpack.c.l.b16 %v7742_v59  ;;  %v8499_v55 = vunpack.c.h.b16 %v7742_v59  ;;  %v7489_v43 = vmul.f32 0.0625, %v6899_v54 }
 0x4c5   : > { %v15629_v14 = vsel %vm15943_vm4, %v10561_v25, %v10557_v48  ;;  %vm15951_vm4 = vmmov %vm15942_vm0 }
 0x4c6   : > { %v10714_v22 = vrot.slane %v8498_v4, %v13866_v19  ;;  %v10719_v17 = vrot.slane %v8499_v55, %v13869_v20  ;;  %v7766_v44 = vpack.c.bf16 %v7490_v18, %v7489_v43  ;;  %v6998_v32 = vpop.xlane.xlu1 %6997 }
 0x4c7   : > { %v7522_v27 = vmul.f32 0.0625, %v6998_v32  ;;  %v6995_v29 = vpop.xlane.xlu0 %6994 }
 0x4c8   : > { %v10715_v53 = vsel %vm8646_vm8, %v10714_v22, %v15547_v30  ;;  %v8546_v36 = vunpack.c.l.b16 %v7766_v44  ;;  %v8547_v41 = vunpack.c.h.b16 %v7766_v44  ;;  %v7521_v35 = vmul.f32 0.0625, %v6995_v29 }
 0x4c9   : > { %v15636_v38 = vsel %vm15944_vm5, %v10719_v17, %v10715_v53  ;;  %vm15952_vm5 = vmmov %vm15942_vm0 }
 0x4ca   : > { %v10951_v7 = vrot.slane %v8546_v36, %v13866_v19  ;;  %v10956_v57 = vrot.slane %v8547_v41, %v13869_v20  ;;  %v7782_v40 = vpack.c.bf16 %v7522_v27, %v7521_v35  ;;  %v6716_v28 = vpop.xlane.xlu1 %6715 }
 0x4cb   : > { %v7428_v50 = vmul.f32 0.0625, %v6716_v28  ;;  %v6713_v51 = vpop.xlane.xlu0 %6712 }
 0x4cc   : > { %v10952_v42 = vsel %vm8646_vm8, %v10951_v7, %v15559_v33  ;;  %v8578_v60 = vunpack.c.l.b16 %v7782_v40  ;;  %v8579_v0 = vunpack.c.h.b16 %v7782_v40  ;;  %v7427_v30 = vmul.f32 0.0625, %v6713_v51 }
 0x4cd   : > { %v15643_v3 = vsel %vm15945_vm6, %v10956_v57, %v10952_v42  ;;  %vm11156_vm6 = vcmask 1046534  }
 0x4ce   : > { %v11109_v49 = vrot.slane %v8578_v60, %v13866_v19  ;;  %v11114_v63 = vrot.slane %v8579_v0, %v13869_v20  ;;  %v7735_v1 = vpack.c.bf16 %v7428_v50, %v7427_v30  ;;  %v6812_v11 = vpop.xlane.xlu1 %6811 }
 0x4cf   : > { %v7460_v2 = vmul.f32 0.0625, %v6812_v11  ;;  %v6809_v6 = vpop.xlane.xlu0 %6808 }
 0x4d0   : > { %v11110_v45 = vsel %vm8646_vm8, %v11109_v49, %v15571_v23  ;;  %v8484_v31 = vunpack.c.l.b16 %v7735_v1  ;;  %v8485_v9 = vunpack.c.h.b16 %v7735_v1  ;;  %v7459_v33 = vmul.f32 0.0625, %v6809_v6 }
 0x4d1   : > { %v15650_v34 = vsel %vm15946_vm7, %v11114_v63, %v11110_v45  ;;  %vm11158_vm7 = vcmask 1047559  }
 0x4d2   : > { %v10645_v25 = vrot.slane %v8484_v31, %v13885_v52  ;;  %v10650_v59 = vrot.slane %v8485_v9, %v13888_v56  ;;  %v7751_v39 = vpack.c.bf16 %v7460_v2, %v7459_v33  ;;  %v6854_v18 = vpop.xlane.xlu1 %6853 }
 0x4d3   : > { %v7474_v54 = vmul.f32 0.0625, %v6854_v18  ;;  %v6851_v47 = vpop.xlane.xlu0 %6850 }
 0x4d4   : > { %v10646_v48 = vsel %vm8660_vm10, %v10645_v25, %v15582_v5  ;;  %v8516_v4 = vunpack.c.l.b16 %v7751_v39  ;;  %v8517_v55 = vunpack.c.h.b16 %v7751_v39  ;;  %v7473_v23 = vmul.f32 0.0625, %v6851_v47 }
 0x4d5   : > { %v15657_v43 = vsel %vm15947_vm9, %v10650_v59, %v10646_v48 }
 0x4d6   : > { %v10803_v12 = vrot.slane %v8516_v4, %v13885_v52  ;;  %v10808_v22 = vrot.slane %v8517_v55, %v13888_v56  ;;  %v7758_v17 = vpack.c.bf16 %v7474_v54, %v7473_v23  ;;  %v6950_v44 = vpop.xlane.xlu1 %6949 }
 0x4d7   : > { %v7506_v32 = vmul.f32 0.0625, %v6950_v44  ;;  %v6947_v27 = vpop.xlane.xlu0 %6946 }
 0x4d8   : > { %v10804_v29 = vsel %vm8660_vm10, %v10803_v12, %v15593_v58  ;;  %v8530_v53 = vunpack.c.l.b16 %v7758_v17  ;;  %v8531_v36 = vunpack.c.h.b16 %v7758_v17  ;;  %v7505_v5 = vmul.f32 0.0625, %v6947_v27 }
 0x4d9   : > { %v15664_v41 = vsel %vm15948_vm1, %v10808_v22, %v10804_v29 }
 0x4da   : > { %v10872_v35 = vrot.slane %v8530_v53, %v13866_v19  ;;  %v10877_v7 = vrot.slane %v8531_v36, %v13869_v20  ;;  %v7774_v57 = vpack.c.bf16 %v7506_v32, %v7505_v5  ;;  %v6626_v40 = vpop.xlane.xlu1 %6625 }
 0x4db   : > { %v7398_v28 = vmul.f32 0.0625, %v6626_v40  ;;  %v6623_v50 = vpop.xlane.xlu0 %6622 }
 0x4dc   : > { %v10873_v51 = vsel %vm8646_vm8, %v10872_v35, %v15602_v26  ;;  %v8562_v42 = vunpack.c.l.b16 %v7774_v57  ;;  %v8563_v60 = vunpack.c.h.b16 %v7774_v57  ;;  %v7397_v58 = vmul.f32 0.0625, %v6623_v50 }
 0x4dd   : > { %v15671_v0 = vsel %vm15940_vm2, %v10877_v7, %v10873_v51 }
 0x4de   : > { %v11030_v30 = vrot.slane %v8562_v42, %v13866_v19  ;;  %v11035_v49 = vrot.slane %v8563_v60, %v13869_v20  ;;  %v7720_v63 = vpack.c.bf16 %v7398_v28, %v7397_v58  ;;  %v6668_v1 = vpop.xlane.xlu1 %6667 }
 0x4df   : > { %v7412_v11 = vmul.f32 0.0625, %v6668_v1  ;;  %v6665_v2 = vpop.xlane.xlu0 %6664 }
 0x4e0   : > { %v11031_v6 = vsel %vm8646_vm8, %v11030_v30, %v15611_v21  ;;  %v8454_v45 = vunpack.c.l.b16 %v7720_v63  ;;  %v8455_v31 = vunpack.c.h.b16 %v7720_v63  ;;  %v7411_v26 = vmul.f32 0.0625, %v6665_v2  ;;  %vm15950_vm8 = vmmov %vm15942_vm0 }
 0x4e1   : > { %v15678_v9 = vsel %vm15949_vm3, %v11035_v49, %v11031_v6 }
 0x4e2   : > { %v10497_v33 = vrot.slane %v8454_v45, %v13903_v16  ;;  %v10502_v25 = vrot.slane %v8455_v31, %v13913_v37  ;;  %v7727_v19 = vpack.c.bf16 %v7412_v11, %v7411_v26  ;;  %v6764_v59 = vpop.xlane.xlu1 %6763 }
 0x4e3   : > { %v7444_v20 = vmul.f32 0.0625, %v6764_v59  ;;  %v6761_v39 = vpop.xlane.xlu0 %6760 }
 0x4e4   : > { %v10498_v18 = vsel %vm8674_vm12, %v10497_v33, %v15620_v46  ;;  %v8468_v54 = vunpack.c.l.b16 %v7727_v19  ;;  %v8469_v47 = vunpack.c.h.b16 %v7727_v19  ;;  %v7443_v21 = vmul.f32 0.0625, %v6761_v39 }
 0x4e5   : > { %v15685_v48 = vsel %vm8681_vm13, %v10502_v25, %v10498_v18 }
 0x4e6   : > { %v10566_v4 = vrot.slane %v8468_v54, %v13885_v52  ;;  %v10571_v55 = vrot.slane %v8469_v47, %v13888_v56  ;;  %v7743_v23 = vpack.c.bf16 %v7444_v20, %v7443_v21  ;;  %v6908_v12 = vpop.xlane.xlu1 %6907 }
 0x4e7   : > { %v7492_v22 = vmul.f32 0.0625, %v6908_v12  ;;  %v6905_v17 = vpop.xlane.xlu0 %6904 }
 0x4e8   : > { %v10567_v44 = vsel %vm8660_vm10, %v10566_v4, %v15629_v14  ;;  %v8500_v32 = vunpack.c.l.b16 %v7743_v23  ;;  %v8501_v27 = vunpack.c.h.b16 %v7743_v23  ;;  %v7491_v46 = vmul.f32 0.0625, %v6905_v17 }
 0x4e9   : > { %v15692_v29 = vsel %vm15950_vm8, %v10571_v55, %v10567_v44 }
 0x4ea   : > { %v10724_v53 = vrot.slane %v8500_v32, %v13885_v52  ;;  %v10729_v36 = vrot.slane %v8501_v27, %v13888_v56  ;;  %v7767_v5 = vpack.c.bf16 %v7492_v22, %v7491_v46  ;;  %v7004_v35 = vpop.xlane.xlu1 %7003 }
 0x4eb   : > { %v7524_v7 = vmul.f32 0.0625, %v7004_v35  ;;  %v7001_v57 = vpop.xlane.xlu0 %7000 }
 0x4ec   : > { %v10725_v40 = vsel %vm8660_vm10, %v10724_v53, %v15636_v38  ;;  %v8548_v28 = vunpack.c.l.b16 %v7767_v5  ;;  %v8549_v50 = vunpack.c.h.b16 %v7767_v5  ;;  %v7523_v14 = vmul.f32 0.0625, %v7001_v57 }
 0x4ed   : > { %v15699_v51 = vsel %vm15942_vm0, %v10729_v36, %v10725_v40 }
 0x4ee   : > { %v10961_v42 = vrot.slane %v8548_v28, %v13885_v52  ;;  %v10966_v60 = vrot.slane %v8549_v50, %v13888_v56  ;;  %v7783_v58 = vpack.c.bf16 %v7524_v7, %v7523_v14  ;;  %v6578_v30 = vpop.xlane.xlu1 %6577 }
 0x4ef   : > { %v7382_v49 = vmul.f32 0.0625, %v6578_v30  ;;  %v6575_v63 = vpop.xlane.xlu0 %6574 }
 0x4f0   : > { %v10962_v1 = vsel %vm8660_vm10, %v10961_v42, %v15643_v3  ;;  %v8580_v11 = vunpack.c.l.b16 %v7783_v58  ;;  %v8581_v2 = vunpack.c.h.b16 %v7783_v58  ;;  %v7381_v38 = vmul.f32 0.0625, %v6575_v63 }
 0x4f1   : > { %v15706_v6 = vsel %vm15951_vm4, %v10966_v60, %v10962_v1 }
 0x4f2   : > { %v11119_v45 = vrot.slane %v8580_v11, %v13885_v52  ;;  %v11124_v31 = vrot.slane %v8581_v2, %v13888_v56  ;;  %v7712_v26 = vpack.c.bf16 %v7382_v49, %v7381_v38  ;;  %v6722_v33 = vpop.xlane.xlu1 %6721 }
 0x4f3   : > { %v6719_v25 = vpop.xlane.xlu0 %6718  ;;  %v7430_v50 = vmul.f32 0.0625, %v6722_v33 }
 0x4f4   : > { %v11120_v19 = vsel %vm8660_vm10, %v11119_v45, %v15650_v34  ;;  %v8438_v59 = vunpack.c.l.b16 %v7712_v26  ;;  %v8439_v20 = vunpack.c.h.b16 %v7712_v26  ;;  %v7429_v14 = vmul.f32 0.0625, %v6719_v25 }
 0x4f5   : > { %v15713_v3 = vsel %vm15952_vm5, %v11124_v31, %v11120_v19 }
 0x4f6   : > { %v10418_v39 = vrot.slane %v8438_v59, %v13903_v16  ;;  %v10423_v18 = vrot.slane %v8439_v20, %v13913_v37  ;;  %v6818_v54 = vpop.xlane.xlu1 %6817  ;;  %v7736_v30 = vpack.c.bf16 %v7430_v50, %v7429_v14 }
 0x4f7   : > { %v6815_v47 = vpop.xlane.xlu0 %6814  ;;  %v7462_v49 = vmul.f32 0.0625, %v6818_v54 }
 0x4f8   : > { %v10419_v21 = vsel %vm8674_vm12, %v10418_v39, %v15218_v8  ;;  %v7461_v63 = vmul.f32 0.0625, %v6815_v47  ;;  %v8487_v33 = vunpack.c.h.b16 %v7736_v30 }
 0x4f9   : > { %v15720_v4 = vsel %vm8681_vm13, %v10423_v18, %v10419_v21 }
 0x4fa   : > { %v6860_v55 = vpop.xlane.xlu1 %6859  ;;  %v7752_v2 = vpack.c.bf16 %v7462_v49, %v7461_v63 }
 0x4fb   : > { %v6857_v23 = vpop.xlane.xlu0 %6856  ;;  %v7476_v19 = vmul.f32 0.0625, %v6860_v55 }
 0x4fc   : > { %v7475_v39 = vmul.f32 0.0625, %v6857_v23 }
 0x4fe   : > { %v15722_v34 = vpop.xlane.xlu1 %6955 }
 0x4ff   : > { %v15724_v12 = vpop.xlane.xlu0 %6952 }
 0x502   : > { %v6632_v22 = vpop.xlane.xlu1 %6631 }
 0x503   : > { %v7400_v17 = vmul.f32 0.0625, %v6632_v22  ;;  %v6629_v44 = vpop.xlane.xlu0 %6628 }
 0x504   : > { %v7399_v32 = vmul.f32 0.0625, %v6629_v44 }
 0x506   : > { %v7721_v27 = vpack.c.bf16 %v7400_v17, %v7399_v32  ;;  %v6674_v46 = vpop.xlane.xlu1 %6673  ;;  %v10660_v32 = vrot.slane %v8487_v33, %v13913_v37 }
 0x507   : > { %v6671_v53 = vpop.xlane.xlu0 %6670  ;;  %v7414_v18 = vmul.f32 0.0625, %v6674_v46 }
 0x508   : > { %v8456_v36 = vunpack.c.l.b16 %v7721_v27  ;;  %v8457_v5 = vunpack.c.h.b16 %v7721_v27  ;;  %v7413_v54 = vmul.f32 0.0625, %v6671_v53  ;;  %v8519_v27 = vunpack.c.h.b16 %v7752_v2 }
 0x50a   : > { %v10507_v8 = vrot.slane %v8456_v36, %v13922_v61  ;;  %v10512_v35 = vrot.slane %v8457_v5, %v13925_v62  ;;  %v6770_v7 = vpop.xlane.xlu1 %6769 }
 0x50b   : > { %v6767_v57 = vpop.xlane.xlu0 %6766  ;;  %v7446_v36 = vmul.f32 0.0625, %v6770_v7 }
 0x50c   : > { %v10508_v40 = vsel %vm8688_vm14, %v10507_v8, %v15685_v48  ;;  %v8486_v48 = vunpack.c.l.b16 %v7736_v30  ;;  %v7445_v5 = vmul.f32 0.0625, %v6767_v57 }
 0x50d   : > { %v10513_v28 = vsel %vm8695_vm15, %v10512_v35, %v10508_v40  ;;  %v7759_v40 = vpack.c.bf16 %v7476_v19, %v7475_v39  ;;  %v7507_v19 = vmul.f32 0.0625, %v15724_v12 }
 0x50e   : > { %v15731_v42 = vpop.xlane.xlu1 %6913  ;;  %v15735_v60 = vsel %vm11154_vm11, %v10513_v28, %v15059_v13  ;;  %v10655_v25 = vrot.slane %v8486_v48, %v13903_v16  ;;  %v8518_v13 = vunpack.c.l.b16 %v7752_v2  ;;  %v7728_v28 = vpack.c.bf16 %v7414_v18, %v7413_v54 }
 0x50f   : > { %v15737_v58 = vpop.xlane.xlu0 %6910  ;;  %v7744_v63 = vpack.c.bf16 %v7446_v36, %v7445_v5 }
 0x510   : > { %v10656_v8 = vsel %vm8674_vm12, %v10655_v25, %v15657_v43  ;;  %v10813_v35 = vrot.slane %v8518_v13, %v13903_v16  ;;  %v10818_v43 = vrot.slane %v8519_v27, %v13913_v37  ;;  %v8532_v25 = vunpack.c.l.b16 %v7759_v40 }
 0x511   : > { %v10661_v48 = vsel %vm8681_vm13, %v10660_v32, %v10656_v8  ;;  %v7508_v13 = vmul.f32 0.0625, %v15722_v34  ;;  %v8471_v5 = vunpack.c.h.b16 %v7728_v28 }
 0x512   : > { %v15739_v1 = vpop.xlane.xlu1 %7009 }
 0x513   : > { %v15741_v11 = vpop.xlane.xlu0 %7006  ;;  %v7775_v32 = vpack.c.bf16 %v7508_v13, %v7507_v19 }
 0x516   : > { %v6584_v38 = vpop.xlane.xlu1 %6583 }
 0x517   : > { %v7384_v45 = vmul.f32 0.0625, %v6584_v38  ;;  %v6581_v31 = vpop.xlane.xlu0 %6580 }
 0x518   : > { %v7383_v26 = vmul.f32 0.0625, %v6581_v31 }
 0x51a   : > { %v7713_v59 = vpack.c.bf16 %v7384_v45, %v7383_v26  ;;  %v6728_v20 = vpop.xlane.xlu1 %6727 }
 0x51b   : > { %v7432_v47 = vmul.f32 0.0625, %v6728_v20  ;;  %v6725_v21 = vpop.xlane.xlu0 %6724  ;;  %v8470_v20 = vunpack.c.l.b16 %v7728_v28 }
 0x51c   : > { %v8440_v22 = vunpack.c.l.b16 %v7713_v59  ;;  %v8441_v17 = vunpack.c.h.b16 %v7713_v59  ;;  %v7431_v44 = vmul.f32 0.0625, %v6725_v21  ;;  %v7494_v21 = vmul.f32 0.0625, %v15731_v42 }
 0x51d   : > { %v10882_v42 = vrot.slane %v8532_v25, %v13885_v52  ;;  %v10576_v8 = vrot.slane %v8470_v20, %v13903_v16 }
 0x51e   : > { %v10428_v55 = vrot.slane %v8440_v22, %v13922_v61  ;;  %v10433_v23 = vrot.slane %v8441_v17, %v13925_v62  ;;  %v7737_v46 = vpack.c.bf16 %v7432_v47, %v7431_v44  ;;  %v6824_v53 = vpop.xlane.xlu1 %6823  ;;  %v8502_v47 = vunpack.c.l.b16 %v7744_v63 }
 0x51f   : > { %v7464_v50 = vmul.f32 0.0625, %v6824_v53  ;;  %v6821_v14 = vpop.xlane.xlu0 %6820  ;;  %v7493_v22 = vmul.f32 0.0625, %v15737_v58  ;;  %v8533_v44 = vunpack.c.h.b16 %v7759_v40 }
 0x520   : > { %v10429_v30 = vsel %vm8688_vm14, %v10428_v55, %v15720_v4  ;;  %v8488_v7 = vunpack.c.l.b16 %v7737_v46  ;;  %v8489_v57 = vunpack.c.h.b16 %v7737_v46  ;;  %v7463_v49 = vmul.f32 0.0625, %v6821_v14 }
 0x521   : > { %v10434_v2 = vsel %vm8695_vm15, %v10433_v23, %v10429_v30  ;;  %v10814_v4 = vsel %vm8674_vm12, %v10813_v35, %v15664_v41  ;;  %v8503_v55 = vunpack.c.h.b16 %v7744_v63  ;;  %v7526_v23 = vmul.f32 0.0625, %v15739_v1 }
 0x522   : > { %v10665_v38 = vrot.slane %v8488_v7, %v13922_v61  ;;  %v10670_v45 = vrot.slane %v8489_v57, %v13925_v62  ;;  %v7753_v31 = vpack.c.bf16 %v7464_v50, %v7463_v49  ;;  %v6866_v26 = vpop.xlane.xlu1 %6865  ;;  %v15759_v33 = vsel %vm11154_vm11, %v10434_v2, %v15000_v24  ;;  %vm15953_vm11 = vmmov %vm15942_vm0 }
 0x523   : > { %v6863_v59 = vpop.xlane.xlu0 %6862  ;;  %v10819_v36 = vsel %vm8681_vm13, %v10818_v43, %v10814_v4  ;;  %v7525_v46 = vmul.f32 0.0625, %v15741_v11  ;;  %v10734_v53 = vrot.slane %v8502_v47, %v13903_v16  ;;  %v7768_v35 = vpack.c.bf16 %v7494_v21, %v7493_v22 }
 0x524   : > { %v8520_v39 = vunpack.c.l.b16 %v7753_v31  ;;  %v8521_v18 = vunpack.c.h.b16 %v7753_v31  ;;  %v10666_v54 = vsel %vm8688_vm14, %v10665_v38, %v10661_v48  ;;  %v10887_v28 = vrot.slane %v8533_v44, %v13888_v56 }
 0x525   : > { %v10671_v24 = vsel %vm8695_vm15, %v10670_v45, %v10666_v54  ;;  %v8564_v14 = vunpack.c.l.b16 %v7775_v32  ;;  %v8565_v30 = vunpack.c.h.b16 %v7775_v32  ;;  %v10883_v1 = vsel %vm8660_vm10, %v10882_v42, %v15671_v0 }
 0x526   : > { %v10823_v41 = vrot.slane %v8520_v39, %v13922_v61  ;;  %v10828_v17 = vrot.slane %v8521_v18, %v13925_v62  ;;  %v6962_v34 = vpop.xlane.xlu1 %6961  ;;  %v15773_v12 = vsel %vm11156_vm6, %v10671_v24, %v15177_v15  ;;  %v10577_v11 = vsel %vm8674_vm12, %v10576_v8, %v15692_v29 }
 0x527   : > { %v6959_v27 = vpop.xlane.xlu0 %6958  ;;  %v10581_v49 = vrot.slane %v8471_v5, %v13913_v37  ;;  %v10739_v63 = vrot.slane %v8503_v55, %v13913_v37  ;;  %v7784_v48 = vpack.c.bf16 %v7526_v23, %v7525_v46  ;;  %v7477_v2 = vmul.f32 0.0625, %v6863_v59 }
 0x528   : > { %v10824_v58 = vsel %vm8688_vm14, %v10823_v41, %v10819_v36  ;;  %v10735_v38 = vsel %vm8674_vm12, %v10734_v53, %v15699_v51  ;;  %v8550_v45 = vunpack.c.l.b16 %v7768_v35  ;;  %v15797_v25 = vsel %vm15953_vm11, %v10887_v28, %v10883_v1 }
 0x529   : > { %v10829_v15 = vsel %vm8695_vm15, %v10828_v17, %v10824_v58  ;;  %v11040_v0 = vrot.slane %v8564_v14, %v13885_v52  ;;  %v15801_v29 = vrot.slane %v8565_v30, %v13888_v56  ;;  %v10582_v20 = vsel %vm8681_vm13, %v10581_v49, %v10577_v11 }
 0x52a   : > { %v6680_v40 = vpop.xlane.xlu1 %6679  ;;  %v15785_v50 = vsel %vm11156_vm6, %v10829_v15, %v15735_v60  ;;  %v7478_v60 = vmul.f32 0.0625, %v6866_v26  ;;  %v10740_v51 = vsel %vm8681_vm13, %v10739_v63, %v10735_v38  ;;  %v8551_v18 = vunpack.c.h.b16 %v7768_v35 }
 0x52b   : > { %v7416_v7 = vmul.f32 0.0625, %v6680_v40  ;;  %v6677_v57 = vpop.xlane.xlu0 %6676  ;;  %v8582_v54 = vunpack.c.l.b16 %v7784_v48  ;;  %v10971_v21 = vrot.slane %v8550_v45, %v13903_v16  ;;  %v8583_v41 = vunpack.c.h.b16 %v7784_v48 }
 0x52c   : > { %v7415_v43 = vmul.f32 0.0625, %v6677_v57  ;;  %v7760_v47 = vpack.c.bf16 %v7478_v60, %v7477_v2  ;;  %v7510_v17 = vmul.f32 0.0625, %v6962_v34  ;;  %v7509_v44 = vmul.f32 0.0625, %v6959_v27 }
 0x52d   : > { %v10976_v55 = vrot.slane %v8551_v18, %v13913_v37  ;;  %v11129_v23 = vrot.slane %v8582_v54, %v13903_v16  ;;  %v11134_v28 = vrot.slane %v8583_v41, %v13913_v37  ;;  %v10972_v57 = vsel %vm8674_vm12, %v10971_v21, %v15706_v6 }
 0x52e   : > { %v7729_v31 = vpack.c.bf16 %v7416_v7, %v7415_v43  ;;  %v6776_v4 = vpop.xlane.xlu1 %6775  ;;  %v8534_v46 = vunpack.c.l.b16 %v7760_v47  ;;  %v7776_v14 = vpack.c.bf16 %v7510_v17, %v7509_v44  ;;  %v8535_v63 = vunpack.c.h.b16 %v7760_v47 }
 0x52f   : > { %v7448_v13 = vmul.f32 0.0625, %v6776_v4  ;;  %v6773_v19 = vpop.xlane.xlu0 %6772  ;;  %v11041_v4 = vsel %vm8660_vm10, %v11040_v0, %v15678_v9  ;;  %vm15954_vm10 = vmmov %vm15942_vm0 }
 0x530   : > { %v8472_v26 = vunpack.c.l.b16 %v7729_v31  ;;  %v8473_v59 = vunpack.c.h.b16 %v7729_v31  ;;  %v7447_v39 = vmul.f32 0.0625, %v6773_v19  ;;  %v10892_v48 = vrot.slane %v8534_v46, %v13903_v16 }
 0x531   : > { %v10897_v54 = vrot.slane %v8535_v63, %v13913_v37  ;;  %v7529_v63 = vld [vmem:[#allocation2] sm:$0xff] }
 0x532   : > { %v10586_v24 = vrot.slane %v8472_v26, %v13922_v61  ;;  %v10591_v52 = vrot.slane %v8473_v59, %v13925_v62  ;;  %v7745_v56 = vpack.c.bf16 %v7448_v13, %v7447_v39  ;;  %v6920_v22 = vpop.xlane.xlu1 %6919  ;;  %v8566_v13 = vunpack.c.l.b16 %v7776_v14 }
 0x533   : > { %v7496_v32 = vmul.f32 0.0625, %v6920_v22  ;;  %v6917_v36 = vpop.xlane.xlu0 %6916  ;;  %v10977_v26 = vsel %vm8681_vm13, %v10976_v55, %v10972_v57  ;;  %v10893_v18 = vsel %vm8674_vm12, %v10892_v48, %v15797_v25 }
 0x534   : > { %v8504_v42 = vunpack.c.l.b16 %v7745_v56  ;;  %v8505_v5 = vunpack.c.h.b16 %v7745_v56  ;;  %v7495_v8 = vmul.f32 0.0625, %v6917_v36  ;;  %v10587_v58 = vsel %vm8688_vm14, %v10586_v24, %v10582_v20 }
 0x535   : > { %v10592_v15 = vsel %vm8695_vm15, %v10591_v52, %v10587_v58  ;;  %v8567_v56 = vunpack.c.h.b16 %v7776_v14  ;;  %v11050_v22 = vrot.slane %v8566_v13, %v13903_v16  ;;  %v11046_v16 = vsel %vm15954_vm10, %v15801_v29, %v11041_v4 }
 0x536   : > { %v10744_v53 = vrot.slane %v8504_v42, %v13922_v61  ;;  %v10749_v34 = vrot.slane %v8505_v5, %v13925_v62  ;;  %v7769_v27 = vpack.c.bf16 %v7496_v32, %v7495_v8  ;;  %v7016_v35 = vpop.xlane.xlu1 %7015  ;;  %v15816_v40 = vsel %vm11156_vm6, %v10592_v15, %v15118_v10 }
 0x537   : > { %v7528_v30 = vmul.f32 0.0625, %v7016_v35  ;;  %v7013_v7 = vpop.xlane.xlu0 %7012  ;;  %v11130_v10 = vsel %vm8674_vm12, %v11129_v23, %v15713_v3  ;;  %v11055_v23 = vrot.slane %v8567_v56, %v13913_v37  ;;  %v10898_v15 = vsel %vm8681_vm13, %v10897_v54, %v10893_v18 }
 0x538   : > { %v8552_v1 = vunpack.c.l.b16 %v7769_v27  ;;  %v8553_v11 = vunpack.c.h.b16 %v7769_v27  ;;  %v7527_v49 = vmul.f32 0.0625, %v7013_v7  ;;  %v10745_v43 = vsel %vm8688_vm14, %v10744_v53, %v10740_v51 }
 0x539   : > { %v10750_v60 = vsel %vm8695_vm15, %v10749_v34, %v10745_v43  ;;  %v11135_v47 = vsel %vm8681_vm13, %v11134_v28, %v11130_v10  ;;  %v11051_v53 = vsel %vm8674_vm12, %v11050_v22, %v11046_v16 }
 0x53a   : > { %v10981_v2 = vrot.slane %v8552_v1, %v13922_v61  ;;  %v10986_v38 = vrot.slane %v8553_v11, %v13925_v62  ;;  %v7785_v45 = vpack.c.bf16 %v7528_v30, %v7527_v49  ;;  %v6872_v31 = vpop.xlane.xlu1 %6871  ;;  %v11172_v6 = vsel %vm11156_vm6, %v10750_v60, %v15759_v33 }
 0x53b   : > { %v7480_v19 = vmul.f32 0.0625, %v6872_v31  ;;  %v6869_v20 = vpop.xlane.xlu0 %6868  ;;  %v11056_v30 = vsel %vm8681_vm13, %v11055_v23, %v11051_v53 }
 0x53c   : > { %v8584_v3 = vunpack.c.l.b16 %v7785_v45  ;;  %v8585_v59 = vunpack.c.h.b16 %v7785_v45  ;;  %v7479_v39 = vmul.f32 0.0625, %v6869_v20  ;;  %v10982_v51 = vsel %vm8688_vm14, %v10981_v2, %v10977_v26 }
 0x53d   : > { %v10987_v33 = vsel %vm8695_vm15, %v10986_v38, %v10982_v51 }
 0x53e   : > { %v11139_v9 = vrot.slane %v8584_v3, %v13922_v61  ;;  %v11144_v0 = vrot.slane %v8585_v59, %v13925_v62  ;;  %v7761_v21 = vpack.c.bf16 %v7480_v19, %v7479_v39  ;;  %v6968_v24 = vpop.xlane.xlu1 %6967  ;;  %v11166_v52 = vsel %vm11158_vm7, %v10987_v33, %v15773_v12 }
 0x53f   : > { %v7512_v41 = vmul.f32 0.0625, %v6968_v24  ;;  %v6965_v25 = vpop.xlane.xlu0 %6964  ;;  %v11182_v17 = vpack.c.b16 %v11166_v52, %v11166_v52 }
 0x540   : > { %v8536_v44 = vunpack.c.l.b16 %v7761_v21  ;;  %v8537_v32 = vunpack.c.h.b16 %v7761_v21  ;;  %v7511_v36 = vmul.f32 0.0625, %v6965_v25  ;;  %v11140_v42 = vsel %vm8688_vm14, %v11139_v9, %v11135_v47 }
 0x541   : > { %11381 = vmatprep.mubr.bf16.mxu0 %v11182_v17  ;;  %v11145_v5 = vsel %vm8695_vm15, %v11144_v0, %v11140_v42 }
 0x542   : > { %v10902_v8 = vrot.slane %v8536_v44, %v13922_v61  ;;  %v10907_v58 = vrot.slane %v8537_v32, %v13925_v62  ;;  %v7777_v55 = vpack.c.bf16 %v7512_v41, %v7511_v36  ;;  %v11180_v12 = vsel %vm11158_vm7, %v11145_v5, %v15785_v50 }
 0x543   : > { %v11184_v46 = vpack.c.b16 %v11180_v12, %v11180_v12 }
 0x544   : > { %v8568_v34 = vunpack.c.l.b16 %v7777_v55  ;;  %v8569_v27 = vunpack.c.h.b16 %v7777_v55  ;;  %v10903_v35 = vsel %vm8688_vm14, %v10902_v8, %v10898_v15 }
 0x545   : > { %11421 = vmatprep.mubr.bf16.mxu1 %v11184_v46  ;;  %v10908_v28 = vsel %vm8695_vm15, %v10907_v58, %v10903_v35 }
 0x546   : > { %v11060_v14 = vrot.slane %v8568_v34, %v13922_v61  ;;  %v11065_v50 = vrot.slane %v8569_v27, %v13925_v62  ;;  %v11159_v29 = vsel %vm11158_vm7, %v10908_v28, %v15816_v40 }
 0x547   : > { %v11181_v37 = vpack.c.b16 %v11159_v29, %v11159_v29 }
 0x548   : > { %v11061_v7 = vsel %vm8688_vm14, %v11060_v14, %v11056_v30 }
 0x549   : > { %11382 = vmatmul.mubr.bf16.vlgmr.msra.gmra.mxu0 %v11181_v37  ;;  %v11066_v57 = vsel %vm8695_vm15, %v11065_v50, %v11061_v7 }
 0x54a   : > { %v11173_v1 = vsel %vm11158_vm7, %v11066_v57, %v11172_v6 }
 0x54b   : > { %v11183_v11 = vpack.c.b16 %v11173_v1, %v11173_v1 }
 0x54d   : > { %11422 = vmatmul.mubr.bf16.vlgmr.msra.gmra.mxu1 %v11183_v11 }
 0x609   : > { %v11383_v49 = vpop.f32.mrf.mxu0 }
 0x60b   : > { %v11385_v43 = vpop.f32.mrf.mxu0 }
 0x60d   : > { %v11386_v61 = vpop.f32.mrf.mxu0  ;;  %v11423_v62 = vpop.f32.mrf.mxu1 }
 0x60e   : > { %v11424_v48 = vadd.f32 %v11423_v62, %v11383_v49 }
 0x60f   : > { %v11387_v10 = vpop.f32.mrf.mxu0  ;;  %v11425_v40 = vpop.f32.mrf.mxu1  ;;  %11434 = sbr.rel (%p11584_p10) target bundleno = 1565 (0x61d), region = 115 }
 0x610   : > { %v11429_v60 = vadd.f32 %v11424_v48, %v7529_v63 }
 0x611   : > { %v11426_v2 = vpop.f32.mrf.mxu1 }
 0x612   : > { %11430 = vst [vmem:[#allocation2] sm:$0xff] %v11429_v60 }
 0x613   : > { %v11427_v38 = vpop.f32.mrf.mxu1 }
 0x614   : > { %v11585_v31 = vld [vmem:[%s15903_s2] ss:$0 sm:$0xff] }
 0x619   : > { %v11435_v45 = vld [vmem:[#allocation2] sm:$0xff] }
 0x61a   : > { %v11443_v6 = vadd.f32 %v11585_v31, %v11435_v45 }
 0x61c   : > { %11444 = vst [vmem:[#allocation5] sm:$0xff] %v11443_v6 }
 0x61d PF: > { %p15871_p11 = scmp.eq.s32.totalorder %s11539_s17, 1  ;;  %s13036_s25 = smov [#allocation5]  }
 0x61e   : > { %s11454_s26 = sshll.u32 %s13036_s25, 4  ;;  %s11455_s26 = int_to_ptr.vmem [resolvable:$true] %s11454_s26 }
 0x61f   : > { %s12967_s14 = scalar_lea.vmem %s11455_s26, 128  ;;  %p12974_p1 = scmp.lt.s32.totalorder %s11455_s26, %s11455_s26 }
 0x620   : > { %p12968_p12 = scmp.ne.s32.totalorder %s11455_s26, %s12967_s14  ;;  %p12975_p2 = scmp.lt.s32.totalorder %s12967_s14, %s12967_s14 }
 0x622   : > { %p12969_p13 = pnand %p12968_p12, %p15871_p11  ;;  %p12976_p3 = por %p12975_p2, %p12974_p1 }
 0x624   : > { %p12970_p0 = pneg %p12969_p13 }
 0x626   : > { %p12977_p4 = pnand %p12976_p3, %p12970_p0 }
 0x628   : > { %12980 = shalt.err (!%p12977_p4)
}
 0x629   : > { %12872 = dma.vmem_to_hbm [thread:$0]  (%p15871_p11), %s11455_s26, 128, %s15904_s3, [#allocation6]  }
 0x62a   : > { %13012 = dma.done.wait (%p15871_p11), [#allocation6], 128  }
 0x62b   : > { %13014 = vsyncadd (%p15871_p11), [#allocation6], 4294967168 }
 0x62c PF: > { %s14_s16 = sadd.s32 1, %s13033_s16   ;;  %s15956_s12 = smov %s13021_s13 }
 0x62d   : > { %p11_p5 = scmp.ge.s32.totalorder %s14_s16, 4   ;;  %s15957_s13 = smov %s13097_s22 }
 0x62e   : > { %s15958_s14 = smov %s13029_s15  ;;  %s15959_s15 = smov %s15961_s18 }
 0x62f   :  { %13 = sbr.rel (!%p11_p5) target bundleno = 3 (0x3), region = 160 }
 0x634   :  { %11467 = vsyncpa [#allocation6], 1 }
 0x635   :  { %11469 = vsyncpa [#allocation6 + $0x1], 1 }

</bundles_post_ra>
